<compile_context>
chip_gen: v7x
topology: tpu7x:2x2x1
jax: 0.10.0
libtpu: 0.0.40
codegen_flags: <defaults>
</compile_context>

<pallas_src>
import functools
import math

import numpy as np

import jax
import jax.numpy as jnp
from jax.experimental import pallas as pl
from jax.experimental.pallas import tpu as pltpu


VMEM_LIMIT = 48 * 1024 * 1024   # under v7x's 64 MiB physical VMEM


# ------------------------------ static plan -------------------------------

def _window_perm(H, W, window, shift):
    """Perm p s.t. x_window_order = x_natural[p]; also its inverse."""
    idx = np.arange(H * W, dtype=np.int32).reshape(H, W)
    if shift > 0:
        idx = np.roll(idx, shift=(-shift, -shift), axis=(0, 1))
    idx = idx.reshape(H // window, window, W // window, window)
    idx = np.transpose(idx, (0, 2, 1, 3)).reshape(-1).astype(np.int32)
    inv = np.argsort(idx).astype(np.int32)
    return idx, inv


def _merge_gather(H, W):
    """Gather (from natural token order) producing patch-merge order
    (h2, w2, quadrant) so that reshape(B, L/4, 4C) == cat([x0,x1,x2,x3], -1)."""
    idx = np.arange(H * W, dtype=np.int32).reshape(H, W)
    g = np.stack([idx[0::2, 0::2], idx[1::2, 0::2],
                  idx[0::2, 1::2], idx[1::2, 1::2]], axis=-1)
    return g.reshape(-1).astype(np.int32)


def _shift_mask(H, W, window, shift):
    """Swin shifted-window attention mask: (num_windows, ww, ww), 0 or -100."""
    nW = (H // window) * (W // window)
    ww = window * window
    if shift == 0:
        return np.zeros((nW, ww, ww), np.float32)
    img = np.zeros((H, W), np.float32)
    cnt = 0
    for hs in (slice(0, -window), slice(-window, -shift), slice(-shift, None)):
        for ws in (slice(0, -window), slice(-window, -shift), slice(-shift, None)):
            img[hs, ws] = cnt
            cnt += 1
    mw = img.reshape(H // window, window, W // window, window)
    mw = np.transpose(mw, (0, 2, 1, 3)).reshape(nW, ww)
    diff = mw[:, None, :] - mw[:, :, None]
    return np.where(diff != 0, -100.0, 0.0).astype(np.float32)


def _rel_pos_index(window):
    """Standard Swin relative_position_index, shape (ww, ww)."""
    coords = np.stack(np.meshgrid(np.arange(window), np.arange(window),
                                  indexing="ij"))
    cf = coords.reshape(2, -1)
    rel = cf[:, :, None] - cf[:, None, :]
    rel = rel.transpose(1, 2, 0).astype(np.int64)
    rel[:, :, 0] += window - 1
    rel[:, :, 1] += window - 1
    rel[:, :, 0] *= 2 * window - 1
    return rel.sum(-1).astype(np.int32)


def _packed_bias_mask(bias, mask, group):
    """Block-diagonal packing of `group` windows per softmax tile.

    bias: (nh, ww, ww) rel-pos bias; mask: (nW, ww, ww) shift mask.
    Returns (nh, nW//group, group*ww, group*ww); off-diagonal = -1e9 so the
    extra (MXU-free) score entries vanish in the softmax.
    """
    nh, ww, _ = bias.shape
    nW = mask.shape[0]
    gww = group * ww
    ngr = nW // group
    out = np.full((nh, ngr, gww, gww), -1e9, np.float32)
    for g in range(ngr):
        for j in range(group):
            w = g * group + j
            sl = slice(j * ww, (j + 1) * ww)
            out[:, g, sl, sl] = bias + mask[w][None]
    return out


def build_layout(cfg):
    """Static per-stage / per-block layout: resolutions, windows, shifts,
    composed permutations, token tiling and window-packing plan."""
    H = W = cfg["img"] // cfg["patch"]
    tile_tokens = cfg.get("tile_tokens", 512)
    layout = []
    n_stages = len(cfg["depths"])
    for si, (depth, nh) in enumerate(zip(cfg["depths"], cfg["heads"])):
        L = H * W
        blocks = []
        prev_inv = None
        for bi in range(depth):
            if min(H, W) <= cfg["window"]:
                w_eff, shift = min(H, W), 0
            else:
                w_eff = cfg["window"]
                shift = 0 if bi % 2 == 0 else cfg["window"] // 2
            ww = w_eff * w_eff
            nW = (H // w_eff) * (W // w_eff)
            perm, inv = _window_perm(H, W, w_eff, shift)
            pre = perm if prev_inv is None else prev_inv[perm]
            if np.array_equal(pre, np.arange(L)):
                pre = None
            # token tiling (whole windows per tile) and window packing plan
            wpt = max(1, min(nW, tile_tokens // ww))
            while nW % wpt != 0:
                wpt -= 1
            group = max(1, min(wpt, 128 // ww)) if ww < 128 else 1
            while wpt % group != 0:
                group -= 1
            blocks.append(dict(
                heads=nh, window=w_eff, shift=shift, window_area=ww,
                num_windows=nW, pre_perm=pre,
                windows_per_tile=wpt, group=group,
                tile_tokens=wpt * ww, num_tiles=nW // wpt))
            prev_inv = inv
        merge = si < n_stages - 1
        merge_gather = None
        if merge:
            merge_gather = prev_inv[_merge_gather(H, W)]   # compose inv + merge
        layout.append(dict(blocks=blocks, res=(H, W), merge=merge,
                           merge_gather=merge_gather))
        if merge:
            H, W = H // 2, W // 2
    return layout


# --------------------------- in-kernel helpers -----------------------------

def _ln(x, g, b, eps=1e-5):
    """LayerNorm over last axis, statistics in f32 (torch default eps=1e-5)."""
    xf = x.astype(jnp.float32)
    mean = jnp.mean(xf, axis=-1, keepdims=True)
    xc = xf - mean
    var = jnp.mean(xc * xc, axis=-1, keepdims=True)
    return xc * jax.lax.rsqrt(var + eps) * g + b


_GELU_C = math.sqrt(2.0 / math.pi)


def _gelu(x):
    # TODO(synk): exact erf GELU; tanh approximation used (tanh lowers to EUP).
    return 0.5 * x * (1.0 + jnp.tanh(_GELU_C * (x + 0.044715 * x * x * x)))


# ------------------------------ Pallas kernels -----------------------------

def _patch_embed_kernel(x_ref, w_ref, b_ref, g_ref, bn_ref, o_ref):
    # x_ref: (n_patches, patch_dim) for one batch element.
    y = jnp.dot(x_ref[...].astype(jnp.bfloat16), w_ref[...],
                preferred_element_type=jnp.float32) + b_ref[...]
    o_ref[...] = _ln(y, g_ref[...], bn_ref[...]).astype(o_ref.dtype)


def _swin_block_kernel(x_ref, g1_ref, b1_ref, qkvw_ref, qkvb_ref, bm_ref,
                       pw_ref, pb_ref, g2_ref, b2_ref,
                       f1w_ref, f1b_ref, f2w_ref, f2b_ref, o_ref,
                       *, num_heads, window_area, group):
    """One fused Swin block for one (batch, window-aligned token tile)."""
    T, C = x_ref.shape
    dh = C // num_heads
    gww = group * window_area          # packed softmax lane width
    n_groups = T // gww

    x = x_ref[...].astype(jnp.float32)

    # ---- (shifted-)window multi-head attention ----
    h = _ln(x, g1_ref[...], b1_ref[...])
    qkv = jnp.dot(h.astype(jnp.bfloat16), qkvw_ref[...],
                  preferred_element_type=jnp.float32) + qkvb_ref[...]
    qkv = qkv.astype(jnp.bfloat16)                      # single bf16 cast
    bm = bm_ref[...].astype(jnp.float32)                # (nh, n_groups, gww, gww)

    head_outs = []
    for hd in range(num_heads):
        q = qkv[:, hd * dh:(hd + 1) * dh].reshape(n_groups, gww, dh)
        k = qkv[:, C + hd * dh:C + (hd + 1) * dh].reshape(n_groups, gww, dh)
        v = qkv[:, 2 * C + hd * dh:2 * C + (hd + 1) * dh].reshape(n_groups, gww, dh)
        s = jnp.einsum("gqd,gkd->gqk", q, k,
                       preferred_element_type=jnp.float32)   # (n_groups, gww, gww)
        s = s + bm[hd]                 # rel-pos bias + shift mask + packing mask
        s = s - jnp.max(s, axis=-1, keepdims=True)
        p = jnp.exp(s)
        p = p * pl.reciprocal(jnp.sum(p, axis=-1, keepdims=True), approx=True)
        ho = jnp.einsum("gqk,gkd->gqd", p.astype(jnp.bfloat16), v,
                        preferred_element_type=jnp.float32)  # (n_groups, gww, dh)
        head_outs.append(ho.reshape(T, dh))

    attn = jnp.concatenate(head_outs, axis=-1)               # (T, C)
    attn = jnp.dot(attn.astype(jnp.bfloat16), pw_ref[...],   # ONE K=C projection
                   preferred_element_type=jnp.float32) + pb_ref[...]
    x = x + attn

    # ---- MLP ----
    h = _ln(x, g2_ref[...], b2_ref[...])
    h = jnp.dot(h.astype(jnp.bfloat16), f1w_ref[...],
                preferred_element_type=jnp.float32) + f1b_ref[...]
    h = _gelu(h)
    h = jnp.dot(h.astype(jnp.bfloat16), f2w_ref[...],
                preferred_element_type=jnp.float32) + f2b_ref[...]
    o_ref[...] = (x + h).astype(o_ref.dtype)


def _patch_merge_kernel(x_ref, g_ref, b_ref, w_ref, o_ref):
    # LayerNorm(4C) -> Linear(4C, 2C, bias=False)
    h = _ln(x_ref[...], g_ref[...], b_ref[...])
    o_ref[...] = jnp.dot(h.astype(jnp.bfloat16), w_ref[...],
                         preferred_element_type=jnp.float32).astype(o_ref.dtype)


def _head_kernel(x_ref, g_ref, b_ref, w_ref, hb_ref, o_ref):
    # final LayerNorm -> global average pool over tokens -> Linear head.
    # (token order is irrelevant: LN is per-token and the pool is a mean.)
    h = _ln(x_ref[...], g_ref[...], b_ref[...])          # (L, C)
    pooled = jnp.mean(h, axis=0, keepdims=True)          # (1, C)
    y = jnp.dot(pooled.astype(jnp.bfloat16), w_ref[...],
                preferred_element_type=jnp.float32) + hb_ref[...]
    o_ref[...] = y.astype(o_ref.dtype)                   # (1, 128-padded classes)


# ------------------------------ kernel wrappers ----------------------------

def patch_embed(patches, params, out_dtype):
    B, n_patches, pd = patches.shape
    C0 = params["patch_w"].shape[1]

    def bc(shape):
        z = (0,) * len(shape)
        return pl.BlockSpec(shape, lambda b: z)

    return pl.pallas_call(
        _patch_embed_kernel,
        out_shape=jax.ShapeDtypeStruct((B, n_patches, C0), out_dtype),
        grid=(B,),
        in_specs=[
            pl.BlockSpec((None, n_patches, pd), lambda b: (b, 0, 0)),
            bc((pd, C0)), bc((1, C0)), bc((1, C0)), bc((1, C0)),
        ],
        out_specs=pl.BlockSpec((None, n_patches, C0), lambda b: (b, 0, 0)),
        compiler_params=pltpu.CompilerParams(
            dimension_semantics=("parallel",), vmem_limit_bytes=VMEM_LIMIT),
    )(patches, params["patch_w"], params["patch_b"],
      params["patch_ln_g"], params["patch_ln_b"])


def swin_block(x, bp, meta):
    B, L, C = x.shape
    hidden = bp["fc1_w"].shape[1]
    nh = meta["heads"]
    T = meta["tile_tokens"]
    n_tiles = meta["num_tiles"]
    nGt = meta["windows_per_tile"] // meta["group"]
    gww = meta["group"] * meta["window_area"]

    def bc(shape):
        z = (0,) * len(shape)
        return pl.BlockSpec(shape, lambda b, t: z)

    return pl.pallas_call(
        functools.partial(_swin_block_kernel, num_heads=nh,
                          window_area=meta["window_area"],
                          group=meta["group"]),
        out_shape=jax.ShapeDtypeStruct((B, L, C), x.dtype),
        grid=(B, n_tiles),
        in_specs=[
            pl.BlockSpec((None, T, C), lambda b, t: (b, t, 0)),
            bc((1, C)), bc((1, C)),
            bc((C, 3 * C)), bc((1, 3 * C)),
            pl.BlockSpec((nh, nGt, gww, gww), lambda b, t: (0, t, 0, 0)),
            bc((C, C)), bc((1, C)),
            bc((1, C)), bc((1, C)),
            bc((C, hidden)), bc((1, hidden)),
            bc((hidden, C)), bc((1, C)),
        ],
        out_specs=pl.BlockSpec((None, T, C), lambda b, t: (b, t, 0)),
        compiler_params=pltpu.CompilerParams(
            dimension_semantics=("parallel", "parallel"),
            vmem_limit_bytes=VMEM_LIMIT),
    )(x, bp["ln1_g"], bp["ln1_b"], bp["qkv_w"], bp["qkv_b"], bp["bias_mask"],
      bp["proj_w"], bp["proj_b"], bp["ln2_g"], bp["ln2_b"],
      bp["fc1_w"], bp["fc1_b"], bp["fc2_w"], bp["fc2_b"])


def patch_merge(x, mp):
    B, L, C4 = x.shape
    C2 = mp["red_w"].shape[1]

    def bc(shape):
        z = (0,) * len(shape)
        return pl.BlockSpec(shape, lambda b: z)

    return pl.pallas_call(
        _patch_merge_kernel,
        out_shape=jax.ShapeDtypeStruct((B, L, C2), x.dtype),
        grid=(B,),
        in_specs=[
            pl.BlockSpec((None, L, C4), lambda b: (b, 0, 0)),
            bc((1, C4)), bc((1, C4)), bc((C4, C2)),
        ],
        out_specs=pl.BlockSpec((None, L, C2), lambda b: (b, 0, 0)),
        compiler_params=pltpu.CompilerParams(
            dimension_semantics=("parallel",), vmem_limit_bytes=VMEM_LIMIT),
    )(x, mp["ln_g"], mp["ln_b"], mp["red_w"])


def classifier_head(x, params, num_classes):
    B, L, C = x.shape
    nc_pad = params["head_w"].shape[1]

    def bc(shape):
        z = (0,) * len(shape)
        return pl.BlockSpec(shape, lambda b: z)

    out = pl.pallas_call(
        _head_kernel,
        out_shape=jax.ShapeDtypeStruct((B, 1, nc_pad), jnp.float32),
        grid=(B,),
        in_specs=[
            pl.BlockSpec((None, L, C), lambda b: (b, 0, 0)),
            bc((1, C)), bc((1, C)),
            bc((C, nc_pad)), bc((1, nc_pad)),
        ],
        out_specs=pl.BlockSpec((None, 1, nc_pad), lambda b: (b, 0, 0)),
        compiler_params=pltpu.CompilerParams(
            dimension_semantics=("parallel",), vmem_limit_bytes=VMEM_LIMIT),
    )(x, params["norm_g"], params["norm_b"], params["head_w"], params["head_b"])
    return out.reshape(B, nc_pad)[:, :num_classes]


# ------------------------------ Swin forward -------------------------------

def swin_forward(x, params, *, cfg, layout):
    B, Cin, Himg, Wimg = x.shape
    p = cfg["patch"]
    gh, gw = Himg // p, Wimg // p
    act_dtype = jnp.bfloat16 if cfg.get("bf16_residual", True) else jnp.float32

    # Patch embedding: Conv2d(k=p, s=p) == non-overlapping patch extraction
    # (flattened in (C, ph, pw) order, matching Conv2d weight flattening)
    # followed by a fused matmul + bias + LayerNorm Pallas kernel.
    patches = x.reshape(B, Cin, gh, p, gw, p)
    patches = jnp.transpose(patches, (0, 2, 4, 1, 3, 5)).reshape(
        B, gh * gw, Cin * p * p)
    xseq = patch_embed(patches, params, act_dtype)       # (B, gh*gw, C0)

    for stage_params, stage_meta in zip(params["stages"], layout):
        for bp, meta in zip(stage_params["blocks"], stage_meta["blocks"]):
            if meta["pre_perm"] is not None:             # composed (un)shift+partition
                xseq = jnp.take(xseq, jnp.asarray(meta["pre_perm"]), axis=1)
            xseq = swin_block(xseq, bp, meta)
        if stage_meta["merge"]:
            B_, L, C = xseq.shape
            # single gather (inverse window perm composed with merge reorder),
            # then reshape groups of 4 tokens into channels == cat([x0..x3],-1)
            xseq = jnp.take(xseq, jnp.asarray(stage_meta["merge_gather"]), axis=1)
            xseq = xseq.reshape(B_, L // 4, 4 * C)
            xseq = patch_merge(xseq, stage_params["merge"])

    return classifier_head(xseq, params, cfg["num_classes"])


# ----------------------------- parameter init ------------------------------

def init_params(key, cfg, layout):
    # TODO(synk): pretrained timm weights cannot be loaded here; weights are
    # randomly initialized with the same structure.
    keys = iter(jax.random.split(key, 64))

    def nrm(shape, dtype=jnp.float32):
        return (0.02 * jax.random.normal(next(keys), shape, jnp.float32)
                ).astype(dtype)

    C = cfg["embed_dim"]
    p = cfg["patch"]
    patch_dim = cfg["in_chans"] * p * p

    params = {
        "patch_w": nrm((patch_dim, C), jnp.bfloat16),
        "patch_b": jnp.zeros((1, C), jnp.float32),
        "patch_ln_g": jnp.ones((1, C), jnp.float32),
        "patch_ln_b": jnp.zeros((1, C), jnp.float32),
        "stages": [],
    }

    for stage_meta, nh in zip(layout, cfg["heads"]):
        stage = {"blocks": [], "merge": None}
        dh = C // nh
        hidden = cfg["mlp_ratio"] * C
        H, W = stage_meta["res"]
        for meta in stage_meta["blocks"]:
            w_eff, shift = meta["window"], meta["shift"]
            ww = meta["window_area"]

            # qkv weights with the 1/sqrt(dh) attention scale folded into q.
            qkv_w = 0.02 * jax.random.normal(next(keys), (C, 3 * C), jnp.float32)
            qkv_w = qkv_w.at[:, :C].multiply(dh ** -0.5)

            # Relative-position bias table gathered with the static index,
            # combined with the shift mask and the window-packing mask.
            table = np.asarray(
                0.02 * jax.random.normal(next(keys),
                                         ((2 * w_eff - 1) ** 2, nh), jnp.float32))
            rel_idx = _rel_pos_index(w_eff)
            bias = np.transpose(
                table[rel_idx.reshape(-1)].reshape(ww, ww, nh), (2, 0, 1))
            mask = _shift_mask(H, W, w_eff, shift)
            bm = _packed_bias_mask(bias, mask, meta["group"])

            stage["blocks"].append({
                "ln1_g": jnp.ones((1, C), jnp.float32),
                "ln1_b": jnp.zeros((1, C), jnp.float32),
                "qkv_w": qkv_w.astype(jnp.bfloat16),
                "qkv_b": jnp.zeros((1, 3 * C), jnp.float32),
                "bias_mask": jnp.asarray(bm, jnp.bfloat16),
                "proj_w": nrm((C, C), jnp.bfloat16),
                "proj_b": jnp.zeros((1, C), jnp.float32),
                "ln2_g": jnp.ones((1, C), jnp.float32),
                "ln2_b": jnp.zeros((1, C), jnp.float32),
                "fc1_w": nrm((C, hidden), jnp.bfloat16),
                "fc1_b": jnp.zeros((1, hidden), jnp.float32),
                "fc2_w": nrm((hidden, C), jnp.bfloat16),
                "fc2_b": jnp.zeros((1, C), jnp.float32),
            })
        if stage_meta["merge"]:
            stage["merge"] = {
                "ln_g": jnp.ones((1, 4 * C), jnp.float32),
                "ln_b": jnp.zeros((1, 4 * C), jnp.float32),
                "red_w": nrm((4 * C, 2 * C), jnp.bfloat16),
            }
            C = 2 * C
        params["stages"].append(stage)

    nc = cfg["num_classes"]
    nc_pad = ((nc + 127) // 128) * 128          # lane-dense head output
    head_w = 0.02 * jax.random.normal(next(keys), (C, nc), jnp.float32)
    params["norm_g"] = jnp.ones((1, C), jnp.float32)
    params["norm_b"] = jnp.zeros((1, C), jnp.float32)
    params["head_w"] = jnp.pad(head_w, ((0, 0), (0, nc_pad - nc))
                               ).astype(jnp.bfloat16)
    params["head_b"] = jnp.zeros((1, nc_pad), jnp.float32)
    return params


# ---------------------------------- main ------------------------------------

if __name__ == "__main__":
    cfg = dict(img=32, patch=4, in_chans=3, embed_dim=128, depths=(2, 2),
               heads=(4, 8), window=4, mlp_ratio=4, num_classes=10,
               tile_tokens=32,          # small so the demo exercises >1 token tile
               bf16_residual=True)

    layout = build_layout(cfg)

    key = jax.random.PRNGKey(0)
    k_x, k_p = jax.random.split(key)
    x = jax.random.normal(k_x, (2, cfg["in_chans"], cfg["img"], cfg["img"]),
                          jnp.float32)
    params = init_params(k_p, cfg, layout)

    forward = jax.jit(functools.partial(swin_forward, cfg=cfg, layout=layout))
    logits = forward(x, params)
    logits = jax.block_until_ready(logits)

    assert logits.shape == (2, cfg["num_classes"])
    assert bool(jnp.all(jnp.isfinite(logits)))
    print("KERNEL_OK")
</pallas_src>

<mosaic_0001>
module attributes {stable_mosaic.version = 11 : i64} {
  func.func @_patch_embed_kernel(%arg0: i32, %arg1: memref<1x64x48xf32, #tpu.memory_space<vmem>>, %arg2: memref<48x128xbf16, #tpu.memory_space<vmem>>, %arg3: memref<1x128xf32, #tpu.memory_space<vmem>>, %arg4: memref<1x128xf32, #tpu.memory_space<vmem>>, %arg5: memref<1x128xf32, #tpu.memory_space<vmem>>, %arg6: memref<1x64x128xbf16, #tpu.memory_space<vmem>>) attributes {dimension_semantics = [#tpu.dimension_semantics<parallel>], iteration_bounds = array<i64: 2>, scalar_prefetch = 0 : i64, scratch_operands = 0 : i64, tpu.core_type = #tpu.core_type<tc>, window_params = [{transform_indices = @transform_0, window_bounds = array<i64: 1, 64, 48>}, {pipeline_mode = #tpu.pipeline_mode<synchronous>, transform_indices = @transform_1, window_bounds = array<i64: 48, 128>}, {pipeline_mode = #tpu.pipeline_mode<synchronous>, transform_indices = @transform_2, window_bounds = array<i64: 1, 128>}, {pipeline_mode = #tpu.pipeline_mode<synchronous>, transform_indices = @transform_3, window_bounds = array<i64: 1, 128>}, {pipeline_mode = #tpu.pipeline_mode<synchronous>, transform_indices = @transform_4, window_bounds = array<i64: 1, 128>}, {transform_indices = @transform_5, window_bounds = array<i64: 1, 64, 128>}]} {
    %c0 = arith.constant 0 : index
    %c0_0 = arith.constant 0 : index
    %c0_1 = arith.constant 0 : index
    %0 = vector.load %arg1[%c0, %c0_0, %c0_1] : memref<1x64x48xf32, #tpu.memory_space<vmem>>, vector<1x64x48xf32>
    %1 = vector.shape_cast %0 : vector<1x64x48xf32> to vector<64x48xf32>
    %2 = arith.truncf %1 : vector<64x48xf32> to vector<64x48xbf16>
    %c0_2 = arith.constant 0 : index
    %c0_3 = arith.constant 0 : index
    %3 = vector.load %arg2[%c0_2, %c0_3] : memref<48x128xbf16, #tpu.memory_space<vmem>>, vector<48x128xbf16>
    %cst = arith.constant dense<0.000000e+00> : vector<64x128xf32>
    %4 = tpu.matmul %2, %3, %cst {dimension_numbers = #tpu.dot_dimension_numbers<[1], [0], [0], [1], [0, 0, 1, 1], [], []>} : vector<64x48xbf16>, vector<48x128xbf16>, vector<64x128xf32> -> vector<64x128xf32>
    %c0_4 = arith.constant 0 : index
    %c0_5 = arith.constant 0 : index
    %5 = vector.load %arg3[%c0_4, %c0_5] : memref<1x128xf32, #tpu.memory_space<vmem>>, vector<1x128xf32>
    %6 = vector.broadcast %5 : vector<1x128xf32> to vector<64x128xf32>
    %7 = arith.addf %4, %6 : vector<64x128xf32>
    %c0_6 = arith.constant 0 : index
    %c0_7 = arith.constant 0 : index
    %8 = vector.load %arg4[%c0_6, %c0_7] : memref<1x128xf32, #tpu.memory_space<vmem>>, vector<1x128xf32>
    %c0_8 = arith.constant 0 : index
    %c0_9 = arith.constant 0 : index
    %9 = vector.load %arg5[%c0_8, %c0_9] : memref<1x128xf32, #tpu.memory_space<vmem>>, vector<1x128xf32>
    %cst_10 = arith.constant dense<0.000000e+00> : vector<64xf32>
    %10 = vector.multi_reduction <add>, %7, %cst_10 [1] : vector<64x128xf32> to vector<64xf32>
    %11 = vector.shape_cast %10 : vector<64xf32> to vector<64x1xf32>
    %cst_11 = arith.constant 1.280000e+02 : f32
    %12 = vector.broadcast %cst_11 : f32 to vector<64x1xf32>
    %13 = arith.divf %11, %12 : vector<64x1xf32>
    %14 = vector.broadcast %13 : vector<64x1xf32> to vector<64x128xf32>
    %15 = arith.subf %7, %14 : vector<64x128xf32>
    %16 = arith.mulf %15, %15 : vector<64x128xf32>
    %cst_12 = arith.constant dense<0.000000e+00> : vector<64xf32>
    %17 = vector.multi_reduction <add>, %16, %cst_12 [1] : vector<64x128xf32> to vector<64xf32>
    %18 = vector.shape_cast %17 : vector<64xf32> to vector<64x1xf32>
    %cst_13 = arith.constant 1.280000e+02 : f32
    %19 = vector.broadcast %cst_13 : f32 to vector<64x1xf32>
    %20 = arith.divf %18, %19 : vector<64x1xf32>
    %cst_14 = arith.constant 9.99999974E-6 : f32
    %21 = vector.broadcast %cst_14 : f32 to vector<64x1xf32>
    %22 = arith.addf %20, %21 : vector<64x1xf32>
    %23 = math.rsqrt %22 : vector<64x1xf32>
    %24 = vector.broadcast %23 : vector<64x1xf32> to vector<64x128xf32>
    %25 = arith.mulf %15, %24 : vector<64x128xf32>
    %26 = vector.broadcast %8 : vector<1x128xf32> to vector<64x128xf32>
    %27 = arith.mulf %25, %26 : vector<64x128xf32>
    %28 = vector.broadcast %9 : vector<1x128xf32> to vector<64x128xf32>
    %29 = arith.addf %27, %28 : vector<64x128xf32>
    %30 = arith.truncf %29 : vector<64x128xf32> to vector<64x128xbf16>
    %c0_15 = arith.constant 0 : index
    %c0_16 = arith.constant 0 : index
    %c0_17 = arith.constant 0 : index
    %31 = vector.load %arg6[%c0_15, %c0_16, %c0_17] : memref<1x64x128xbf16, #tpu.memory_space<vmem>>, vector<1x64x128xbf16>
    %32 = vector.shape_cast %31 : vector<1x64x128xbf16> to vector<64x128xbf16>
    %33 = vector.shape_cast %30 : vector<64x128xbf16> to vector<1x64x128xbf16>
    tpu.vector_store %arg6[%c0_15, %c0_16, %c0_17], %33 {strides = array<i32>} : memref<1x64x128xbf16, #tpu.memory_space<vmem>>, vector<1x64x128xbf16>,
    return
  }
  func.func @transform_0(%arg0: i32) -> (i32, i32, i32) {
    %c0_i32 = arith.constant 0 : i32
    %c0_i32_0 = arith.constant 0 : i32
    %c0_i32_1 = arith.constant 0 : i32
    return %arg0, %c0_i32, %c0_i32_0 : i32, i32, i32
  }
  func.func @transform_1(%arg0: i32) -> (i32, i32) {
    %c0_i32 = arith.constant 0 : i32
    %c0_i32_0 = arith.constant 0 : i32
    %c0_i32_1 = arith.constant 0 : i32
    return %c0_i32, %c0_i32_0 : i32, i32
  }
  func.func @transform_2(%arg0: i32) -> (i32, i32) {
    %c0_i32 = arith.constant 0 : i32
    %c0_i32_0 = arith.constant 0 : i32
    %c0_i32_1 = arith.constant 0 : i32
    return %c0_i32, %c0_i32_0 : i32, i32
  }
  func.func @transform_3(%arg0: i32) -> (i32, i32) {
    %c0_i32 = arith.constant 0 : i32
    %c0_i32_0 = arith.constant 0 : i32
    %c0_i32_1 = arith.constant 0 : i32
    return %c0_i32, %c0_i32_0 : i32, i32
  }
  func.func @transform_4(%arg0: i32) -> (i32, i32) {
    %c0_i32 = arith.constant 0 : i32
    %c0_i32_0 = arith.constant 0 : i32
    %c0_i32_1 = arith.constant 0 : i32
    return %c0_i32, %c0_i32_0 : i32, i32
  }
  func.func @transform_5(%arg0: i32) -> (i32, i32, i32) {
    %c0_i32 = arith.constant 0 : i32
    %c0_i32_0 = arith.constant 0 : i32
    %c0_i32_1 = arith.constant 0 : i32
    return %arg0, %c0_i32, %c0_i32_0 : i32, i32, i32
  }
}

module attributes {stable_mosaic.version = 11 : i64} {
  func.func @_swin_block_kernel(%arg0: i32, %arg1: i32, %arg2: memref<1x32x128xbf16, #tpu.memory_space<vmem>>, %arg3: memref<1x128xf32, #tpu.memory_space<vmem>>, %arg4: memref<1x128xf32, #tpu.memory_space<vmem>>, %arg5: memref<128x384xbf16, #tpu.memory_space<vmem>>, %arg6: memref<1x384xf32, #tpu.memory_space<vmem>>, %arg7: memref<4x1x32x32xbf16, #tpu.memory_space<vmem>>, %arg8: memref<128x128xbf16, #tpu.memory_space<vmem>>, %arg9: memref<1x128xf32, #tpu.memory_space<vmem>>, %arg10: memref<1x128xf32, #tpu.memory_space<vmem>>, %arg11: memref<1x128xf32, #tpu.memory_space<vmem>>, %arg12: memref<128x512xbf16, #tpu.memory_space<vmem>>, %arg13: memref<1x512xf32, #tpu.memory_space<vmem>>, %arg14: memref<512x128xbf16, #tpu.memory_space<vmem>>, %arg15: memref<1x128xf32, #tpu.memory_space<vmem>>, %arg16: memref<1x32x128xbf16, #tpu.memory_space<vmem>>) attributes {dimension_semantics = [#tpu.dimension_semantics<parallel>, #tpu.dimension_semantics<parallel>], iteration_bounds = array<i64: 2, 2>, scalar_prefetch = 0 : i64, scratch_operands = 0 : i64, tpu.core_type = #tpu.core_type<tc>, window_params = [{transform_indices = @transform_0, window_bounds = array<i64: 1, 32, 128>}, {pipeline_mode = #tpu.pipeline_mode<synchronous>, transform_indices = @transform_1, window_bounds = array<i64: 1, 128>}, {pipeline_mode = #tpu.pipeline_mode<synchronous>, transform_indices = @transform_2, window_bounds = array<i64: 1, 128>}, {pipeline_mode = #tpu.pipeline_mode<synchronous>, transform_indices = @transform_3, window_bounds = array<i64: 128, 384>}, {pipeline_mode = #tpu.pipeline_mode<synchronous>, transform_indices = @transform_4, window_bounds = array<i64: 1, 384>}, {transform_indices = @transform_5, window_bounds = array<i64: 4, 1, 32, 32>}, {pipeline_mode = #tpu.pipeline_mode<synchronous>, transform_indices = @transform_6, window_bounds = array<i64: 128, 128>}, {pipeline_mode = #tpu.pipeline_mode<synchronous>, transform_indices = @transform_7, window_bounds = array<i64: 1, 128>}, {pipeline_mode = #tpu.pipeline_mode<synchronous>, transform_indices = @transform_8, window_bounds = array<i64: 1, 128>}, {pipeline_mode = #tpu.pipeline_mode<synchronous>, transform_indices = @transform_9, window_bounds = array<i64: 1, 128>}, {pipeline_mode = #tpu.pipeline_mode<synchronous>, transform_indices = @transform_10, window_bounds = array<i64: 128, 512>}, {pipeline_mode = #tpu.pipeline_mode<synchronous>, transform_indices = @transform_11, window_bounds = array<i64: 1, 512>}, {pipeline_mode = #tpu.pipeline_mode<synchronous>, transform_indices = @transform_12, window_bounds = array<i64: 512, 128>}, {pipeline_mode = #tpu.pipeline_mode<synchronous>, transform_indices = @transform_13, window_bounds = array<i64: 1, 128>}, {transform_indices = @transform_14, window_bounds = array<i64: 1, 32, 128>}]} {
    %c0 = arith.constant 0 : index
    %c0_0 = arith.constant 0 : index
    %c0_1 = arith.constant 0 : index
    %0 = vector.load %arg2[%c0, %c0_0, %c0_1] : memref<1x32x128xbf16, #tpu.memory_space<vmem>>, vector<1x32x128xbf16>
    %1 = vector.shape_cast %0 : vector<1x32x128xbf16> to vector<32x128xbf16>
    %2 = arith.extf %1 : vector<32x128xbf16> to vector<32x128xf32>
    %c0_2 = arith.constant 0 : index
    %c0_3 = arith.constant 0 : index
    %3 = vector.load %arg3[%c0_2, %c0_3] : memref<1x128xf32, #tpu.memory_space<vmem>>, vector<1x128xf32>
    %c0_4 = arith.constant 0 : index
    %c0_5 = arith.constant 0 : index
    %4 = vector.load %arg4[%c0_4, %c0_5] : memref<1x128xf32, #tpu.memory_space<vmem>>, vector<1x128xf32>
    %cst = arith.constant dense<0.000000e+00> : vector<32xf32>
    %5 = vector.multi_reduction <add>, %2, %cst [1] : vector<32x128xf32> to vector<32xf32>
    %6 = vector.shape_cast %5 : vector<32xf32> to vector<32x1xf32>
    %cst_6 = arith.constant 1.280000e+02 : f32
    %7 = vector.broadcast %cst_6 : f32 to vector<32x1xf32>
    %8 = arith.divf %6, %7 : vector<32x1xf32>
    %9 = vector.broadcast %8 : vector<32x1xf32> to vector<32x128xf32>
    %10 = arith.subf %2, %9 : vector<32x128xf32>
    %11 = arith.mulf %10, %10 : vector<32x128xf32>
    %cst_7 = arith.constant dense<0.000000e+00> : vector<32xf32>
    %12 = vector.multi_reduction <add>, %11, %cst_7 [1] : vector<32x128xf32> to vector<32xf32>
    %13 = vector.shape_cast %12 : vector<32xf32> to vector<32x1xf32>
    %cst_8 = arith.constant 1.280000e+02 : f32
    %14 = vector.broadcast %cst_8 : f32 to vector<32x1xf32>
    %15 = arith.divf %13, %14 : vector<32x1xf32>
    %cst_9 = arith.constant 9.99999974E-6 : f32
    %16 = vector.broadcast %cst_9 : f32 to vector<32x1xf32>
    %17 = arith.addf %15, %16 : vector<32x1xf32>
    %18 = math.rsqrt %17 : vector<32x1xf32>
    %19 = vector.broadcast %18 : vector<32x1xf32> to vector<32x128xf32>
    %20 = arith.mulf %10, %19 : vector<32x128xf32>
    %21 = vector.broadcast %3 : vector<1x128xf32> to vector<32x128xf32>
    %22 = arith.mulf %20, %21 : vector<32x128xf32>
    %23 = vector.broadcast %4 : vector<1x128xf32> to vector<32x128xf32>
    %24 = arith.addf %22, %23 : vector<32x128xf32>
    %25 = arith.truncf %24 : vector<32x128xf32> to vector<32x128xbf16>
    %c0_10 = arith.constant 0 : index
    %c0_11 = arith.constant 0 : index
    %26 = vector.load %arg5[%c0_10, %c0_11] : memref<128x384xbf16, #tpu.memory_space<vmem>>, vector<128x384xbf16>
    %cst_12 = arith.constant dense<0.000000e+00> : vector<32x384xf32>
    %27 = tpu.matmul %25, %26, %cst_12 {dimension_numbers = #tpu.dot_dimension_numbers<[1], [0], [0], [1], [0, 0, 1, 1], [], []>} : vector<32x128xbf16>, vector<128x384xbf16>, vector<32x384xf32> -> vector<32x384xf32>
    %c0_13 = arith.constant 0 : index
    %c0_14 = arith.constant 0 : index
    %28 = vector.load %arg6[%c0_13, %c0_14] : memref<1x384xf32, #tpu.memory_space<vmem>>, vector<1x384xf32>
    %29 = vector.broadcast %28 : vector<1x384xf32> to vector<32x384xf32>
    %30 = arith.addf %27, %29 : vector<32x384xf32>
    %31 = arith.truncf %30 : vector<32x384xf32> to vector<32x384xbf16>
    %c0_15 = arith.constant 0 : index
    %c0_16 = arith.constant 0 : index
    %c0_17 = arith.constant 0 : index
    %c0_18 = arith.constant 0 : index
    %32 = vector.load %arg7[%c0_15, %c0_16, %c0_17, %c0_18] : memref<4x1x32x32xbf16, #tpu.memory_space<vmem>>, vector<4x1x32x32xbf16>
    %33 = arith.extf %32 : vector<4x1x32x32xbf16> to vector<4x1x32x32xf32>
    %34 = vector.extract_strided_slice %31 {offsets = [0, 0], sizes = [32, 32], strides = [1, 1]} : vector<32x384xbf16> to vector<32x32xbf16>
    %35 = vector.shape_cast %34 : vector<32x32xbf16> to vector<1x32x32xbf16>
    %36 = vector.extract_strided_slice %31 {offsets = [0, 128], sizes = [32, 32], strides = [1, 1]} : vector<32x384xbf16> to vector<32x32xbf16>
    %37 = vector.shape_cast %36 : vector<32x32xbf16> to vector<1x32x32xbf16>
    %38 = vector.extract_strided_slice %31 {offsets = [0, 256], sizes = [32, 32], strides = [1, 1]} : vector<32x384xbf16> to vector<32x32xbf16>
    %39 = vector.shape_cast %38 : vector<32x32xbf16> to vector<1x32x32xbf16>
    "tpu.trace_start"() <{level = 10 : i32, message = "gqd,gkd->gqk"}> : () -> ()
    %cst_19 = arith.constant dense<0.000000e+00> : vector<1x32x32xf32>
    %40 = tpu.matmul %35, %37, %cst_19 {dimension_numbers = #tpu.dot_dimension_numbers<[2], [2], [1], [1], [0, 0, 0, 1, 1, 1], [0], [0]>} : vector<1x32x32xbf16>, vector<1x32x32xbf16>, vector<1x32x32xf32> -> vector<1x32x32xf32>
    "tpu.trace_stop"() : () -> ()
    %41 = vector.extract_strided_slice %33 {offsets = [0, 0, 0, 0], sizes = [1, 1, 32, 32], strides = [1, 1, 1, 1]} : vector<4x1x32x32xf32> to vector<1x1x32x32xf32>
    %42 = vector.shape_cast %41 : vector<1x1x32x32xf32> to vector<1x32x32xf32>
    %43 = arith.addf %40, %42 : vector<1x32x32xf32>
    %cst_20 = arith.constant dense<0xFF800000> : vector<1x32xf32>
    %44 = vector.multi_reduction <maximumf>, %43, %cst_20 [2] : vector<1x32x32xf32> to vector<1x32xf32>
    %45 = vector.shape_cast %44 : vector<1x32xf32> to vector<1x32x1xf32>
    %46 = vector.broadcast %45 : vector<1x32x1xf32> to vector<1x32x32xf32>
    %47 = arith.subf %43, %46 : vector<1x32x32xf32>
    %48 = math.exp %47 : vector<1x32x32xf32>
    %cst_21 = arith.constant dense<0.000000e+00> : vector<1x32xf32>
    %49 = vector.multi_reduction <add>, %48, %cst_21 [2] : vector<1x32x32xf32> to vector<1x32xf32>
    %50 = vector.shape_cast %49 : vector<1x32xf32> to vector<1x32x1xf32>
    %51 = tpu.reciprocal %50 {approx = true} : vector<1x32x1xf32> -> vector<1x32x1xf32>
    %52 = vector.broadcast %51 : vector<1x32x1xf32> to vector<1x32x32xf32>
    %53 = arith.mulf %48, %52 : vector<1x32x32xf32>
    %54 = arith.truncf %53 : vector<1x32x32xf32> to vector<1x32x32xbf16>
    "tpu.trace_start"() <{level = 10 : i32, message = "gqk,gkd->gqd"}> : () -> ()
    %cst_22 = arith.constant dense<0.000000e+00> : vector<1x32x32xf32>
    %55 = tpu.matmul %54, %39, %cst_22 {dimension_numbers = #tpu.dot_dimension_numbers<[2], [1], [1], [2], [0, 0, 0, 1, 1, 2], [0], [0]>} : vector<1x32x32xbf16>, vector<1x32x32xbf16>, vector<1x32x32xf32> -> vector<1x32x32xf32>
    "tpu.trace_stop"() : () -> ()
    %56 = vector.shape_cast %55 : vector<1x32x32xf32> to vector<32x32xf32>
    %57 = vector.extract_strided_slice %31 {offsets = [0, 32], sizes = [32, 32], strides = [1, 1]} : vector<32x384xbf16> to vector<32x32xbf16>
    %58 = vector.shape_cast %57 : vector<32x32xbf16> to vector<1x32x32xbf16>
    %59 = vector.extract_strided_slice %31 {offsets = [0, 160], sizes = [32, 32], strides = [1, 1]} : vector<32x384xbf16> to vector<32x32xbf16>
    %60 = vector.shape_cast %59 : vector<32x32xbf16> to vector<1x32x32xbf16>
    %61 = vector.extract_strided_slice %31 {offsets = [0, 288], sizes = [32, 32], strides = [1, 1]} : vector<32x384xbf16> to vector<32x32xbf16>
    %62 = vector.shape_cast %61 : vector<32x32xbf16> to vector<1x32x32xbf16>
    "tpu.trace_start"() <{level = 10 : i32, message = "gqd,gkd->gqk"}> : () -> ()
    %cst_23 = arith.constant dense<0.000000e+00> : vector<1x32x32xf32>
    %63 = tpu.matmul %58, %60, %cst_23 {dimension_numbers = #tpu.dot_dimension_numbers<[2], [2], [1], [1], [0, 0, 0, 1, 1, 1], [0], [0]>} : vector<1x32x32xbf16>, vector<1x32x32xbf16>, vector<1x32x32xf32> -> vector<1x32x32xf32>
    "tpu.trace_stop"() : () -> ()
    %64 = vector.extract_strided_slice %33 {offsets = [1, 0, 0, 0], sizes = [1, 1, 32, 32], strides = [1, 1, 1, 1]} : vector<4x1x32x32xf32> to vector<1x1x32x32xf32>
    %65 = vector.shape_cast %64 : vector<1x1x32x32xf32> to vector<1x32x32xf32>
    %66 = arith.addf %63, %65 : vector<1x32x32xf32>
    %cst_24 = arith.constant dense<0xFF800000> : vector<1x32xf32>
    %67 = vector.multi_reduction <maximumf>, %66, %cst_24 [2] : vector<1x32x32xf32> to vector<1x32xf32>
    %68 = vector.shape_cast %67 : vector<1x32xf32> to vector<1x32x1xf32>
    %69 = vector.broadcast %68 : vector<1x32x1xf32> to vector<1x32x32xf32>
    %70 = arith.subf %66, %69 : vector<1x32x32xf32>
    %71 = math.exp %70 : vector<1x32x32xf32>
    %cst_25 = arith.constant dense<0.000000e+00> : vector<1x32xf32>
    %72 = vector.multi_reduction <add>, %71, %cst_25 [2] : vector<1x32x32xf32> to vector<1x32xf32>
    %73 = vector.shape_cast %72 : vector<1x32xf32> to vector<1x32x1xf32>
    %74 = tpu.reciprocal %73 {approx = true} : vector<1x32x1xf32> -> vector<1x32x1xf32>
    %75 = vector.broadcast %74 : vector<1x32x1xf32> to vector<1x32x32xf32>
    %76 = arith.mulf %71, %75 : vector<1x32x32xf32>
    %77 = arith.truncf %76 : vector<1x32x32xf32> to vector<1x32x32xbf16>
    "tpu.trace_start"() <{level = 10 : i32, message = "gqk,gkd->gqd"}> : () -> ()
    %cst_26 = arith.constant dense<0.000000e+00> : vector<1x32x32xf32>
    %78 = tpu.matmul %77, %62, %cst_26 {dimension_numbers = #tpu.dot_dimension_numbers<[2], [1], [1], [2], [0, 0, 0, 1, 1, 2], [0], [0]>} : vector<1x32x32xbf16>, vector<1x32x32xbf16>, vector<1x32x32xf32> -> vector<1x32x32xf32>
    "tpu.trace_stop"() : () -> ()
    %79 = vector.shape_cast %78 : vector<1x32x32xf32> to vector<32x32xf32>
    %80 = vector.extract_strided_slice %31 {offsets = [0, 64], sizes = [32, 32], strides = [1, 1]} : vector<32x384xbf16> to vector<32x32xbf16>
    %81 = vector.shape_cast %80 : vector<32x32xbf16> to vector<1x32x32xbf16>
    %82 = vector.extract_strided_slice %31 {offsets = [0, 192], sizes = [32, 32], strides = [1, 1]} : vector<32x384xbf16> to vector<32x32xbf16>
    %83 = vector.shape_cast %82 : vector<32x32xbf16> to vector<1x32x32xbf16>
    %84 = vector.extract_strided_slice %31 {offsets = [0, 320], sizes = [32, 32], strides = [1, 1]} : vector<32x384xbf16> to vector<32x32xbf16>
    %85 = vector.shape_cast %84 : vector<32x32xbf16> to vector<1x32x32xbf16>
    "tpu.trace_start"() <{level = 10 : i32, message = "gqd,gkd->gqk"}> : () -> ()
    %cst_27 = arith.constant dense<0.000000e+00> : vector<1x32x32xf32>
    %86 = tpu.matmul %81, %83, %cst_27 {dimension_numbers = #tpu.dot_dimension_numbers<[2], [2], [1], [1], [0, 0, 0, 1, 1, 1], [0], [0]>} : vector<1x32x32xbf16>, vector<1x32x32xbf16>, vector<1x32x32xf32> -> vector<1x32x32xf32>
    "tpu.trace_stop"() : () -> ()
    %87 = vector.extract_strided_slice %33 {offsets = [2, 0, 0, 0], sizes = [1, 1, 32, 32], strides = [1, 1, 1, 1]} : vector<4x1x32x32xf32> to vector<1x1x32x32xf32>
    %88 = vector.shape_cast %87 : vector<1x1x32x32xf32> to vector<1x32x32xf32>
    %89 = arith.addf %86, %88 : vector<1x32x32xf32>
    %cst_28 = arith.constant dense<0xFF800000> : vector<1x32xf32>
    %90 = vector.multi_reduction <maximumf>, %89, %cst_28 [2] : vector<1x32x32xf32> to vector<1x32xf32>
    %91 = vector.shape_cast %90 : vector<1x32xf32> to vector<1x32x1xf32>
    %92 = vector.broadcast %91 : vector<1x32x1xf32> to vector<1x32x32xf32>
    %93 = arith.subf %89, %92 : vector<1x32x32xf32>
    %94 = math.exp %93 : vector<1x32x32xf32>
    %cst_29 = arith.constant dense<0.000000e+00> : vector<1x32xf32>
    %95 = vector.multi_reduction <add>, %94, %cst_29 [2] : vector<1x32x32xf32> to vector<1x32xf32>
    %96 = vector.shape_cast %95 : vector<1x32xf32> to vector<1x32x1xf32>
    %97 = tpu.reciprocal %96 {approx = true} : vector<1x32x1xf32> -> vector<1x32x1xf32>
    %98 = vector.broadcast %97 : vector<1x32x1xf32> to vector<1x32x32xf32>
    %99 = arith.mulf %94, %98 : vector<1x32x32xf32>
    %100 = arith.truncf %99 : vector<1x32x32xf32> to vector<1x32x32xbf16>
    "tpu.trace_start"() <{level = 10 : i32, message = "gqk,gkd->gqd"}> : () -> ()
    %cst_30 = arith.constant dense<0.000000e+00> : vector<1x32x32xf32>
    %101 = tpu.matmul %100, %85, %cst_30 {dimension_numbers = #tpu.dot_dimension_numbers<[2], [1], [1], [2], [0, 0, 0, 1, 1, 2], [0], [0]>} : vector<1x32x32xbf16>, vector<1x32x32xbf16>, vector<1x32x32xf32> -> vector<1x32x32xf32>
    "tpu.trace_stop"() : () -> ()
    %102 = vector.shape_cast %101 : vector<1x32x32xf32> to vector<32x32xf32>
    %103 = vector.extract_strided_slice %31 {offsets = [0, 96], sizes = [32, 32], strides = [1, 1]} : vector<32x384xbf16> to vector<32x32xbf16>
    %104 = vector.shape_cast %103 : vector<32x32xbf16> to vector<1x32x32xbf16>
    %105 = vector.extract_strided_slice %31 {offsets = [0, 224], sizes = [32, 32], strides = [1, 1]} : vector<32x384xbf16> to vector<32x32xbf16>
    %106 = vector.shape_cast %105 : vector<32x32xbf16> to vector<1x32x32xbf16>
    %107 = vector.extract_strided_slice %31 {offsets = [0, 352], sizes = [32, 32], strides = [1, 1]} : vector<32x384xbf16> to vector<32x32xbf16>
    %108 = vector.shape_cast %107 : vector<32x32xbf16> to vector<1x32x32xbf16>
    "tpu.trace_start"() <{level = 10 : i32, message = "gqd,gkd->gqk"}> : () -> ()
    %cst_31 = arith.constant dense<0.000000e+00> : vector<1x32x32xf32>
    %109 = tpu.matmul %104, %106, %cst_31 {dimension_numbers = #tpu.dot_dimension_numbers<[2], [2], [1], [1], [0, 0, 0, 1, 1, 1], [0], [0]>} : vector<1x32x32xbf16>, vector<1x32x32xbf16>, vector<1x32x32xf32> -> vector<1x32x32xf32>
    "tpu.trace_stop"() : () -> ()
    %110 = vector.extract_strided_slice %33 {offsets = [3, 0, 0, 0], sizes = [1, 1, 32, 32], strides = [1, 1, 1, 1]} : vector<4x1x32x32xf32> to vector<1x1x32x32xf32>
    %111 = vector.shape_cast %110 : vector<1x1x32x32xf32> to vector<1x32x32xf32>
    %112 = arith.addf %109, %111 : vector<1x32x32xf32>
    %cst_32 = arith.constant dense<0xFF800000> : vector<1x32xf32>
    %113 = vector.multi_reduction <maximumf>, %112, %cst_32 [2] : vector<1x32x32xf32> to vector<1x32xf32>
    %114 = vector.shape_cast %113 : vector<1x32xf32> to vector<1x32x1xf32>
    %115 = vector.broadcast %114 : vector<1x32x1xf32> to vector<1x32x32xf32>
    %116 = arith.subf %112, %115 : vector<1x32x32xf32>
    %117 = math.exp %116 : vector<1x32x32xf32>
    %cst_33 = arith.constant dense<0.000000e+00> : vector<1x32xf32>
    %118 = vector.multi_reduction <add>, %117, %cst_33 [2] : vector<1x32x32xf32> to vector<1x32xf32>
    %119 = vector.shape_cast %118 : vector<1x32xf32> to vector<1x32x1xf32>
    %120 = tpu.reciprocal %119 {approx = true} : vector<1x32x1xf32> -> vector<1x32x1xf32>
    %121 = vector.broadcast %120 : vector<1x32x1xf32> to vector<1x32x32xf32>
    %122 = arith.mulf %117, %121 : vector<1x32x32xf32>
    %123 = arith.truncf %122 : vector<1x32x32xf32> to vector<1x32x32xbf16>
    "tpu.trace_start"() <{level = 10 : i32, message = "gqk,gkd->gqd"}> : () -> ()
    %cst_34 = arith.constant dense<0.000000e+00> : vector<1x32x32xf32>
    %124 = tpu.matmul %123, %108, %cst_34 {dimension_numbers = #tpu.dot_dimension_numbers<[2], [1], [1], [2], [0, 0, 0, 1, 1, 2], [0], [0]>} : vector<1x32x32xbf16>, vector<1x32x32xbf16>, vector<1x32x32xf32> -> vector<1x32x32xf32>
    "tpu.trace_stop"() : () -> ()
    %125 = vector.shape_cast %124 : vector<1x32x32xf32> to vector<32x32xf32>
    %126 = tpu.concatenate %56, %79, %102, %125 in 1 : vector<32x32xf32>, vector<32x32xf32>, vector<32x32xf32>, vector<32x32xf32> -> vector<32x128xf32>
    %127 = arith.truncf %126 : vector<32x128xf32> to vector<32x128xbf16>
    %c0_35 = arith.constant 0 : index
    %c0_36 = arith.constant 0 : index
    %128 = vector.load %arg8[%c0_35, %c0_36] : memref<128x128xbf16, #tpu.memory_space<vmem>>, vector<128x128xbf16>
    %cst_37 = arith.constant dense<0.000000e+00> : vector<32x128xf32>
    %129 = tpu.matmul %127, %128, %cst_37 {dimension_numbers = #tpu.dot_dimension_numbers<[1], [0], [0], [1], [0, 0, 1, 1], [], []>} : vector<32x128xbf16>, vector<128x128xbf16>, vector<32x128xf32> -> vector<32x128xf32>
    %c0_38 = arith.constant 0 : index
    %c0_39 = arith.constant 0 : index
    %130 = vector.load %arg9[%c0_38, %c0_39] : memref<1x128xf32, #tpu.memory_space<vmem>>, vector<1x128xf32>
    %131 = vector.broadcast %130 : vector<1x128xf32> to vector<32x128xf32>
    %132 = arith.addf %129, %131 : vector<32x128xf32>
    %133 = arith.addf %2, %132 : vector<32x128xf32>
    %c0_40 = arith.constant 0 : index
    %c0_41 = arith.constant 0 : index
    %134 = vector.load %arg10[%c0_40, %c0_41] : memref<1x128xf32, #tpu.memory_space<vmem>>, vector<1x128xf32>
    %c0_42 = arith.constant 0 : index
    %c0_43 = arith.constant 0 : index
    %135 = vector.load %arg11[%c0_42, %c0_43] : memref<1x128xf32, #tpu.memory_space<vmem>>, vector<1x128xf32>
    %cst_44 = arith.constant dense<0.000000e+00> : vector<32xf32>
    %136 = vector.multi_reduction <add>, %133, %cst_44 [1] : vector<32x128xf32> to vector<32xf32>
    %137 = vector.shape_cast %136 : vector<32xf32> to vector<32x1xf32>
    %cst_45 = arith.constant 1.280000e+02 : f32
    %138 = vector.broadcast %cst_45 : f32 to vector<32x1xf32>
    %139 = arith.divf %137, %138 : vector<32x1xf32>
    %140 = vector.broadcast %139 : vector<32x1xf32> to vector<32x128xf32>
    %141 = arith.subf %133, %140 : vector<32x128xf32>
    %142 = arith.mulf %141, %141 : vector<32x128xf32>
    %cst_46 = arith.constant dense<0.000000e+00> : vector<32xf32>
    %143 = vector.multi_reduction <add>, %142, %cst_46 [1] : vector<32x128xf32> to vector<32xf32>
    %144 = vector.shape_cast %143 : vector<32xf32> to vector<32x1xf32>
    %cst_47 = arith.constant 1.280000e+02 : f32
    %145 = vector.broadcast %cst_47 : f32 to vector<32x1xf32>
    %146 = arith.divf %144, %145 : vector<32x1xf32>
    %cst_48 = arith.constant 9.99999974E-6 : f32
    %147 = vector.broadcast %cst_48 : f32 to vector<32x1xf32>
    %148 = arith.addf %146, %147 : vector<32x1xf32>
    %149 = math.rsqrt %148 : vector<32x1xf32>
    %150 = vector.broadcast %149 : vector<32x1xf32> to vector<32x128xf32>
    %151 = arith.mulf %141, %150 : vector<32x128xf32>
    %152 = vector.broadcast %134 : vector<1x128xf32> to vector<32x128xf32>
    %153 = arith.mulf %151, %152 : vector<32x128xf32>
    %154 = vector.broadcast %135 : vector<1x128xf32> to vector<32x128xf32>
    %155 = arith.addf %153, %154 : vector<32x128xf32>
    %156 = arith.truncf %155 : vector<32x128xf32> to vector<32x128xbf16>
    %c0_49 = arith.constant 0 : index
    %c0_50 = arith.constant 0 : index
    %157 = vector.load %arg12[%c0_49, %c0_50] : memref<128x512xbf16, #tpu.memory_space<vmem>>, vector<128x512xbf16>
    %cst_51 = arith.constant dense<0.000000e+00> : vector<32x512xf32>
    %158 = tpu.matmul %156, %157, %cst_51 {dimension_numbers = #tpu.dot_dimension_numbers<[1], [0], [0], [1], [0, 0, 1, 1], [], []>} : vector<32x128xbf16>, vector<128x512xbf16>, vector<32x512xf32> -> vector<32x512xf32>
    %c0_52 = arith.constant 0 : index
    %c0_53 = arith.constant 0 : index
    %159 = vector.load %arg13[%c0_52, %c0_53] : memref<1x512xf32, #tpu.memory_space<vmem>>, vector<1x512xf32>
    %160 = vector.broadcast %159 : vector<1x512xf32> to vector<32x512xf32>
    %161 = arith.addf %158, %160 : vector<32x512xf32>
    %cst_54 = arith.constant 5.000000e-01 : f32
    %162 = vector.broadcast %cst_54 : f32 to vector<32x512xf32>
    %163 = arith.mulf %162, %161 : vector<32x512xf32>
    %cst_55 = arith.constant 4.471500e-02 : f32
    %164 = vector.broadcast %cst_55 : f32 to vector<32x512xf32>
    %165 = arith.mulf %164, %161 : vector<32x512xf32>
    %166 = arith.mulf %165, %161 : vector<32x512xf32>
    %167 = arith.mulf %166, %161 : vector<32x512xf32>
    %168 = arith.addf %161, %167 : vector<32x512xf32>
    %cst_56 = arith.constant 0.797884583 : f32
    %169 = vector.broadcast %cst_56 : f32 to vector<32x512xf32>
    %170 = arith.mulf %169, %168 : vector<32x512xf32>
    %171 = math.tanh %170 : vector<32x512xf32>
    %cst_57 = arith.constant 1.000000e+00 : f32
    %172 = vector.broadcast %cst_57 : f32 to vector<32x512xf32>
    %173 = arith.addf %172, %171 : vector<32x512xf32>
    %174 = arith.mulf %163, %173 : vector<32x512xf32>
    %175 = arith.truncf %174 : vector<32x512xf32> to vector<32x512xbf16>
    %c0_58 = arith.constant 0 : index
    %c0_59 = arith.constant 0 : index
    %176 = vector.load %arg14[%c0_58, %c0_59] : memref<512x128xbf16, #tpu.memory_space<vmem>>, vector<512x128xbf16>
    %cst_60 = arith.constant dense<0.000000e+00> : vector<32x128xf32>
    %177 = tpu.matmul %175, %176, %cst_60 {dimension_numbers = #tpu.dot_dimension_numbers<[1], [0], [0], [1], [0, 0, 1, 1], [], []>} : vector<32x512xbf16>, vector<512x128xbf16>, vector<32x128xf32> -> vector<32x128xf32>
    %c0_61 = arith.constant 0 : index
    %c0_62 = arith.constant 0 : index
    %178 = vector.load %arg15[%c0_61, %c0_62] : memref<1x128xf32, #tpu.memory_space<vmem>>, vector<1x128xf32>
    %179 = vector.broadcast %178 : vector<1x128xf32> to vector<32x128xf32>
    %180 = arith.addf %177, %179 : vector<32x128xf32>
    %181 = arith.addf %133, %180 : vector<32x128xf32>
    %182 = arith.truncf %181 : vector<32x128xf32> to vector<32x128xbf16>
    %c0_63 = arith.constant 0 : index
    %c0_64 = arith.constant 0 : index
    %c0_65 = arith.constant 0 : index
    %183 = vector.load %arg16[%c0_63, %c0_64, %c0_65] : memref<1x32x128xbf16, #tpu.memory_space<vmem>>, vector<1x32x128xbf16>
    %184 = vector.shape_cast %183 : vector<1x32x128xbf16> to vector<32x128xbf16>
    %185 = vector.shape_cast %182 : vector<32x128xbf16> to vector<1x32x128xbf16>
    tpu.vector_store %arg16[%c0_63, %c0_64, %c0_65], %185 {strides = array<i32>} : memref<1x32x128xbf16, #tpu.memory_space<vmem>>, vector<1x32x128xbf16>,
    return
  }
  func.func @transform_0(%arg0: i32, %arg1: i32) -> (i32, i32, i32) {
    %c0_i32 = arith.constant 0 : i32
    %c0_i32_0 = arith.constant 0 : i32
    return %arg0, %arg1, %c0_i32 : i32, i32, i32
  }
  func.func @transform_1(%arg0: i32, %arg1: i32) -> (i32, i32) {
    %c0_i32 = arith.constant 0 : i32
    %c0_i32_0 = arith.constant 0 : i32
    %c0_i32_1 = arith.constant 0 : i32
    return %c0_i32, %c0_i32_0 : i32, i32
  }
  func.func @transform_2(%arg0: i32, %arg1: i32) -> (i32, i32) {
    %c0_i32 = arith.constant 0 : i32
    %c0_i32_0 = arith.constant 0 : i32
    %c0_i32_1 = arith.constant 0 : i32
    return %c0_i32, %c0_i32_0 : i32, i32
  }
  func.func @transform_3(%arg0: i32, %arg1: i32) -> (i32, i32) {
    %c0_i32 = arith.constant 0 : i32
    %c0_i32_0 = arith.constant 0 : i32
    %c0_i32_1 = arith.constant 0 : i32
    return %c0_i32, %c0_i32_0 : i32, i32
  }
  func.func @transform_4(%arg0: i32, %arg1: i32) -> (i32, i32) {
    %c0_i32 = arith.constant 0 : i32
    %c0_i32_0 = arith.constant 0 : i32
    %c0_i32_1 = arith.constant 0 : i32
    return %c0_i32, %c0_i32_0 : i32, i32
  }
  func.func @transform_5(%arg0: i32, %arg1: i32) -> (i32, i32, i32, i32) {
    %c0_i32 = arith.constant 0 : i32
    %c0_i32_0 = arith.constant 0 : i32
    %c0_i32_1 = arith.constant 0 : i32
    %c0_i32_2 = arith.constant 0 : i32
    return %c0_i32, %arg1, %c0_i32_0, %c0_i32_1 : i32, i32, i32, i32
  }
  func.func @transform_6(%arg0: i32, %arg1: i32) -> (i32, i32) {
    %c0_i32 = arith.constant 0 : i32
    %c0_i32_0 = arith.constant 0 : i32
    %c0_i32_1 = arith.constant 0 : i32
    return %c0_i32, %c0_i32_0 : i32, i32
  }
  func.func @transform_7(%arg0: i32, %arg1: i32) -> (i32, i32) {
    %c0_i32 = arith.constant 0 : i32
    %c0_i32_0 = arith.constant 0 : i32
    %c0_i32_1 = arith.constant 0 : i32
    return %c0_i32, %c0_i32_0 : i32, i32
  }
  func.func @transform_8(%arg0: i32, %arg1: i32) -> (i32, i32) {
    %c0_i32 = arith.constant 0 : i32
    %c0_i32_0 = arith.constant 0 : i32
    %c0_i32_1 = arith.constant 0 : i32
    return %c0_i32, %c0_i32_0 : i32, i32
  }
  func.func @transform_9(%arg0: i32, %arg1: i32) -> (i32, i32) {
    %c0_i32 = arith.constant 0 : i32
    %c0_i32_0 = arith.constant 0 : i32
    %c0_i32_1 = arith.constant 0 : i32
    return %c0_i32, %c0_i32_0 : i32, i32
  }
  func.func @transform_10(%arg0: i32, %arg1: i32) -> (i32, i32) {
    %c0_i32 = arith.constant 0 : i32
    %c0_i32_0 = arith.constant 0 : i32
    %c0_i32_1 = arith.constant 0 : i32
    return %c0_i32, %c0_i32_0 : i32, i32
  }
  func.func @transform_11(%arg0: i32, %arg1: i32) -> (i32, i32) {
    %c0_i32 = arith.constant 0 : i32
    %c0_i32_0 = arith.constant 0 : i32
    %c0_i32_1 = arith.constant 0 : i32
    return %c0_i32, %c0_i32_0 : i32, i32
  }
  func.func @transform_12(%arg0: i32, %arg1: i32) -> (i32, i32) {
    %c0_i32 = arith.constant 0 : i32
    %c0_i32_0 = arith.constant 0 : i32
    %c0_i32_1 = arith.constant 0 : i32
    return %c0_i32, %c0_i32_0 : i32, i32
  }
  func.func @transform_13(%arg0: i32, %arg1: i32) -> (i32, i32) {
    %c0_i32 = arith.constant 0 : i32
    %c0_i32_0 = arith.constant 0 : i32
    %c0_i32_1 = arith.constant 0 : i32
    return %c0_i32, %c0_i32_0 : i32, i32
  }
  func.func @transform_14(%arg0: i32, %arg1: i32) -> (i32, i32, i32) {
    %c0_i32 = arith.constant 0 : i32
    %c0_i32_0 = arith.constant 0 : i32
    return %arg0, %arg1, %c0_i32 : i32, i32, i32
  }
}

module attributes {stable_mosaic.version = 11 : i64} {
  func.func @_swin_block_kernel(%arg0: i32, %arg1: i32, %arg2: memref<1x32x128xbf16, #tpu.memory_space<vmem>>, %arg3: memref<1x128xf32, #tpu.memory_space<vmem>>, %arg4: memref<1x128xf32, #tpu.memory_space<vmem>>, %arg5: memref<128x384xbf16, #tpu.memory_space<vmem>>, %arg6: memref<1x384xf32, #tpu.memory_space<vmem>>, %arg7: memref<4x1x32x32xbf16, #tpu.memory_space<vmem>>, %arg8: memref<128x128xbf16, #tpu.memory_space<vmem>>, %arg9: memref<1x128xf32, #tpu.memory_space<vmem>>, %arg10: memref<1x128xf32, #tpu.memory_space<vmem>>, %arg11: memref<1x128xf32, #tpu.memory_space<vmem>>, %arg12: memref<128x512xbf16, #tpu.memory_space<vmem>>, %arg13: memref<1x512xf32, #tpu.memory_space<vmem>>, %arg14: memref<512x128xbf16, #tpu.memory_space<vmem>>, %arg15: memref<1x128xf32, #tpu.memory_space<vmem>>, %arg16: memref<1x32x128xbf16, #tpu.memory_space<vmem>>) attributes {dimension_semantics = [#tpu.dimension_semantics<parallel>, #tpu.dimension_semantics<parallel>], iteration_bounds = array<i64: 2, 2>, scalar_prefetch = 0 : i64, scratch_operands = 0 : i64, tpu.core_type = #tpu.core_type<tc>, window_params = [{transform_indices = @transform_0, window_bounds = array<i64: 1, 32, 128>}, {pipeline_mode = #tpu.pipeline_mode<synchronous>, transform_indices = @transform_1, window_bounds = array<i64: 1, 128>}, {pipeline_mode = #tpu.pipeline_mode<synchronous>, transform_indices = @transform_2, window_bounds = array<i64: 1, 128>}, {pipeline_mode = #tpu.pipeline_mode<synchronous>, transform_indices = @transform_3, window_bounds = array<i64: 128, 384>}, {pipeline_mode = #tpu.pipeline_mode<synchronous>, transform_indices = @transform_4, window_bounds = array<i64: 1, 384>}, {transform_indices = @transform_5, window_bounds = array<i64: 4, 1, 32, 32>}, {pipeline_mode = #tpu.pipeline_mode<synchronous>, transform_indices = @transform_6, window_bounds = array<i64: 128, 128>}, {pipeline_mode = #tpu.pipeline_mode<synchronous>, transform_indices = @transform_7, window_bounds = array<i64: 1, 128>}, {pipeline_mode = #tpu.pipeline_mode<synchronous>, transform_indices = @transform_8, window_bounds = array<i64: 1, 128>}, {pipeline_mode = #tpu.pipeline_mode<synchronous>, transform_indices = @transform_9, window_bounds = array<i64: 1, 128>}, {pipeline_mode = #tpu.pipeline_mode<synchronous>, transform_indices = @transform_10, window_bounds = array<i64: 128, 512>}, {pipeline_mode = #tpu.pipeline_mode<synchronous>, transform_indices = @transform_11, window_bounds = array<i64: 1, 512>}, {pipeline_mode = #tpu.pipeline_mode<synchronous>, transform_indices = @transform_12, window_bounds = array<i64: 512, 128>}, {pipeline_mode = #tpu.pipeline_mode<synchronous>, transform_indices = @transform_13, window_bounds = array<i64: 1, 128>}, {transform_indices = @transform_14, window_bounds = array<i64: 1, 32, 128>}]} {
    %c0 = arith.constant 0 : index
    %c0_0 = arith.constant 0 : index
    %c0_1 = arith.constant 0 : index
    %0 = vector.load %arg2[%c0, %c0_0, %c0_1] : memref<1x32x128xbf16, #tpu.memory_space<vmem>>, vector<1x32x128xbf16>
    %1 = vector.shape_cast %0 : vector<1x32x128xbf16> to vector<32x128xbf16>
    %2 = arith.extf %1 : vector<32x128xbf16> to vector<32x128xf32>
    %c0_2 = arith.constant 0 : index
    %c0_3 = arith.constant 0 : index
    %3 = vector.load %arg3[%c0_2, %c0_3] : memref<1x128xf32, #tpu.memory_space<vmem>>, vector<1x128xf32>
    %c0_4 = arith.constant 0 : index
    %c0_5 = arith.constant 0 : index
    %4 = vector.load %arg4[%c0_4, %c0_5] : memref<1x128xf32, #tpu.memory_space<vmem>>, vector<1x128xf32>
    %cst = arith.constant dense<0.000000e+00> : vector<32xf32>
    %5 = vector.multi_reduction <add>, %2, %cst [1] : vector<32x128xf32> to vector<32xf32>
    %6 = vector.shape_cast %5 : vector<32xf32> to vector<32x1xf32>
    %cst_6 = arith.constant 1.280000e+02 : f32
    %7 = vector.broadcast %cst_6 : f32 to vector<32x1xf32>
    %8 = arith.divf %6, %7 : vector<32x1xf32>
    %9 = vector.broadcast %8 : vector<32x1xf32> to vector<32x128xf32>
    %10 = arith.subf %2, %9 : vector<32x128xf32>
    %11 = arith.mulf %10, %10 : vector<32x128xf32>
    %cst_7 = arith.constant dense<0.000000e+00> : vector<32xf32>
    %12 = vector.multi_reduction <add>, %11, %cst_7 [1] : vector<32x128xf32> to vector<32xf32>
    %13 = vector.shape_cast %12 : vector<32xf32> to vector<32x1xf32>
    %cst_8 = arith.constant 1.280000e+02 : f32
    %14 = vector.broadcast %cst_8 : f32 to vector<32x1xf32>
    %15 = arith.divf %13, %14 : vector<32x1xf32>
    %cst_9 = arith.constant 9.99999974E-6 : f32
    %16 = vector.broadcast %cst_9 : f32 to vector<32x1xf32>
    %17 = arith.addf %15, %16 : vector<32x1xf32>
    %18 = math.rsqrt %17 : vector<32x1xf32>
    %19 = vector.broadcast %18 : vector<32x1xf32> to vector<32x128xf32>
    %20 = arith.mulf %10, %19 : vector<32x128xf32>
    %21 = vector.broadcast %3 : vector<1x128xf32> to vector<32x128xf32>
    %22 = arith.mulf %20, %21 : vector<32x128xf32>
    %23 = vector.broadcast %4 : vector<1x128xf32> to vector<32x128xf32>
    %24 = arith.addf %22, %23 : vector<32x128xf32>
    %25 = arith.truncf %24 : vector<32x128xf32> to vector<32x128xbf16>
    %c0_10 = arith.constant 0 : index
    %c0_11 = arith.constant 0 : index
    %26 = vector.load %arg5[%c0_10, %c0_11] : memref<128x384xbf16, #tpu.memory_space<vmem>>, vector<128x384xbf16>
    %cst_12 = arith.constant dense<0.000000e+00> : vector<32x384xf32>
    %27 = tpu.matmul %25, %26, %cst_12 {dimension_numbers = #tpu.dot_dimension_numbers<[1], [0], [0], [1], [0, 0, 1, 1], [], []>} : vector<32x128xbf16>, vector<128x384xbf16>, vector<32x384xf32> -> vector<32x384xf32>
    %c0_13 = arith.constant 0 : index
    %c0_14 = arith.constant 0 : index
    %28 = vector.load %arg6[%c0_13, %c0_14] : memref<1x384xf32, #tpu.memory_space<vmem>>, vector<1x384xf32>
    %29 = vector.broadcast %28 : vector<1x384xf32> to vector<32x384xf32>
    %30 = arith.addf %27, %29 : vector<32x384xf32>
    %31 = arith.truncf %30 : vector<32x384xf32> to vector<32x384xbf16>
    %c0_15 = arith.constant 0 : index
    %c0_16 = arith.constant 0 : index
    %c0_17 = arith.constant 0 : index
    %c0_18 = arith.constant 0 : index
    %32 = vector.load %arg7[%c0_15, %c0_16, %c0_17, %c0_18] : memref<4x1x32x32xbf16, #tpu.memory_space<vmem>>, vector<4x1x32x32xbf16>
    %33 = arith.extf %32 : vector<4x1x32x32xbf16> to vector<4x1x32x32xf32>
    %34 = vector.extract_strided_slice %31 {offsets = [0, 0], sizes = [32, 32], strides = [1, 1]} : vector<32x384xbf16> to vector<32x32xbf16>
    %35 = vector.shape_cast %34 : vector<32x32xbf16> to vector<1x32x32xbf16>
    %36 = vector.extract_strided_slice %31 {offsets = [0, 128], sizes = [32, 32], strides = [1, 1]} : vector<32x384xbf16> to vector<32x32xbf16>
    %37 = vector.shape_cast %36 : vector<32x32xbf16> to vector<1x32x32xbf16>
    %38 = vector.extract_strided_slice %31 {offsets = [0, 256], sizes = [32, 32], strides = [1, 1]} : vector<32x384xbf16> to vector<32x32xbf16>
    %39 = vector.shape_cast %38 : vector<32x32xbf16> to vector<1x32x32xbf16>
    "tpu.trace_start"() <{level = 10 : i32, message = "gqd,gkd->gqk"}> : () -> ()
    %cst_19 = arith.constant dense<0.000000e+00> : vector<1x32x32xf32>
    %40 = tpu.matmul %35, %37, %cst_19 {dimension_numbers = #tpu.dot_dimension_numbers<[2], [2], [1], [1], [0, 0, 0, 1, 1, 1], [0], [0]>} : vector<1x32x32xbf16>, vector<1x32x32xbf16>, vector<1x32x32xf32> -> vector<1x32x32xf32>
    "tpu.trace_stop"() : () -> ()
    %41 = vector.extract_strided_slice %33 {offsets = [0, 0, 0, 0], sizes = [1, 1, 32, 32], strides = [1, 1, 1, 1]} : vector<4x1x32x32xf32> to vector<1x1x32x32xf32>
    %42 = vector.shape_cast %41 : vector<1x1x32x32xf32> to vector<1x32x32xf32>
    %43 = arith.addf %40, %42 : vector<1x32x32xf32>
    %cst_20 = arith.constant dense<0xFF800000> : vector<1x32xf32>
    %44 = vector.multi_reduction <maximumf>, %43, %cst_20 [2] : vector<1x32x32xf32> to vector<1x32xf32>
    %45 = vector.shape_cast %44 : vector<1x32xf32> to vector<1x32x1xf32>
    %46 = vector.broadcast %45 : vector<1x32x1xf32> to vector<1x32x32xf32>
    %47 = arith.subf %43, %46 : vector<1x32x32xf32>
    %48 = math.exp %47 : vector<1x32x32xf32>
    %cst_21 = arith.constant dense<0.000000e+00> : vector<1x32xf32>
    %49 = vector.multi_reduction <add>, %48, %cst_21 [2] : vector<1x32x32xf32> to vector<1x32xf32>
    %50 = vector.shape_cast %49 : vector<1x32xf32> to vector<1x32x1xf32>
    %51 = tpu.reciprocal %50 {approx = true} : vector<1x32x1xf32> -> vector<1x32x1xf32>
    %52 = vector.broadcast %51 : vector<1x32x1xf32> to vector<1x32x32xf32>
    %53 = arith.mulf %48, %52 : vector<1x32x32xf32>
    %54 = arith.truncf %53 : vector<1x32x32xf32> to vector<1x32x32xbf16>
    "tpu.trace_start"() <{level = 10 : i32, message = "gqk,gkd->gqd"}> : () -> ()
    %cst_22 = arith.constant dense<0.000000e+00> : vector<1x32x32xf32>
    %55 = tpu.matmul %54, %39, %cst_22 {dimension_numbers = #tpu.dot_dimension_numbers<[2], [1], [1], [2], [0, 0, 0, 1, 1, 2], [0], [0]>} : vector<1x32x32xbf16>, vector<1x32x32xbf16>, vector<1x32x32xf32> -> vector<1x32x32xf32>
    "tpu.trace_stop"() : () -> ()
    %56 = vector.shape_cast %55 : vector<1x32x32xf32> to vector<32x32xf32>
    %57 = vector.extract_strided_slice %31 {offsets = [0, 32], sizes = [32, 32], strides = [1, 1]} : vector<32x384xbf16> to vector<32x32xbf16>
    %58 = vector.shape_cast %57 : vector<32x32xbf16> to vector<1x32x32xbf16>
    %59 = vector.extract_strided_slice %31 {offsets = [0, 160], sizes = [32, 32], strides = [1, 1]} : vector<32x384xbf16> to vector<32x32xbf16>
    %60 = vector.shape_cast %59 : vector<32x32xbf16> to vector<1x32x32xbf16>
    %61 = vector.extract_strided_slice %31 {offsets = [0, 288], sizes = [32, 32], strides = [1, 1]} : vector<32x384xbf16> to vector<32x32xbf16>
    %62 = vector.shape_cast %61 : vector<32x32xbf16> to vector<1x32x32xbf16>
    "tpu.trace_start"() <{level = 10 : i32, message = "gqd,gkd->gqk"}> : () -> ()
    %cst_23 = arith.constant dense<0.000000e+00> : vector<1x32x32xf32>
    %63 = tpu.matmul %58, %60, %cst_23 {dimension_numbers = #tpu.dot_dimension_numbers<[2], [2], [1], [1], [0, 0, 0, 1, 1, 1], [0], [0]>} : vector<1x32x32xbf16>, vector<1x32x32xbf16>, vector<1x32x32xf32> -> vector<1x32x32xf32>
    "tpu.trace_stop"() : () -> ()
    %64 = vector.extract_strided_slice %33 {offsets = [1, 0, 0, 0], sizes = [1, 1, 32, 32], strides = [1, 1, 1, 1]} : vector<4x1x32x32xf32> to vector<1x1x32x32xf32>
    %65 = vector.shape_cast %64 : vector<1x1x32x32xf32> to vector<1x32x32xf32>
    %66 = arith.addf %63, %65 : vector<1x32x32xf32>
    %cst_24 = arith.constant dense<0xFF800000> : vector<1x32xf32>
    %67 = vector.multi_reduction <maximumf>, %66, %cst_24 [2] : vector<1x32x32xf32> to vector<1x32xf32>
    %68 = vector.shape_cast %67 : vector<1x32xf32> to vector<1x32x1xf32>
    %69 = vector.broadcast %68 : vector<1x32x1xf32> to vector<1x32x32xf32>
    %70 = arith.subf %66, %69 : vector<1x32x32xf32>
    %71 = math.exp %70 : vector<1x32x32xf32>
    %cst_25 = arith.constant dense<0.000000e+00> : vector<1x32xf32>
    %72 = vector.multi_reduction <add>, %71, %cst_25 [2] : vector<1x32x32xf32> to vector<1x32xf32>
    %73 = vector.shape_cast %72 : vector<1x32xf32> to vector<1x32x1xf32>
    %74 = tpu.reciprocal %73 {approx = true} : vector<1x32x1xf32> -> vector<1x32x1xf32>
    %75 = vector.broadcast %74 : vector<1x32x1xf32> to vector<1x32x32xf32>
    %76 = arith.mulf %71, %75 : vector<1x32x32xf32>
    %77 = arith.truncf %76 : vector<1x32x32xf32> to vector<1x32x32xbf16>
    "tpu.trace_start"() <{level = 10 : i32, message = "gqk,gkd->gqd"}> : () -> ()
    %cst_26 = arith.constant dense<0.000000e+00> : vector<1x32x32xf32>
    %78 = tpu.matmul %77, %62, %cst_26 {dimension_numbers = #tpu.dot_dimension_numbers<[2], [1], [1], [2], [0, 0, 0, 1, 1, 2], [0], [0]>} : vector<1x32x32xbf16>, vector<1x32x32xbf16>, vector<1x32x32xf32> -> vector<1x32x32xf32>
    "tpu.trace_stop"() : () -> ()
    %79 = vector.shape_cast %78 : vector<1x32x32xf32> to vector<32x32xf32>
    %80 = vector.extract_strided_slice %31 {offsets = [0, 64], sizes = [32, 32], strides = [1, 1]} : vector<32x384xbf16> to vector<32x32xbf16>
    %81 = vector.shape_cast %80 : vector<32x32xbf16> to vector<1x32x32xbf16>
    %82 = vector.extract_strided_slice %31 {offsets = [0, 192], sizes = [32, 32], strides = [1, 1]} : vector<32x384xbf16> to vector<32x32xbf16>
    %83 = vector.shape_cast %82 : vector<32x32xbf16> to vector<1x32x32xbf16>
    %84 = vector.extract_strided_slice %31 {offsets = [0, 320], sizes = [32, 32], strides = [1, 1]} : vector<32x384xbf16> to vector<32x32xbf16>
    %85 = vector.shape_cast %84 : vector<32x32xbf16> to vector<1x32x32xbf16>
    "tpu.trace_start"() <{level = 10 : i32, message = "gqd,gkd->gqk"}> : () -> ()
    %cst_27 = arith.constant dense<0.000000e+00> : vector<1x32x32xf32>
    %86 = tpu.matmul %81, %83, %cst_27 {dimension_numbers = #tpu.dot_dimension_numbers<[2], [2], [1], [1], [0, 0, 0, 1, 1, 1], [0], [0]>} : vector<1x32x32xbf16>, vector<1x32x32xbf16>, vector<1x32x32xf32> -> vector<1x32x32xf32>
    "tpu.trace_stop"() : () -> ()
    %87 = vector.extract_strided_slice %33 {offsets = [2, 0, 0, 0], sizes = [1, 1, 32, 32], strides = [1, 1, 1, 1]} : vector<4x1x32x32xf32> to vector<1x1x32x32xf32>
    %88 = vector.shape_cast %87 : vector<1x1x32x32xf32> to vector<1x32x32xf32>
    %89 = arith.addf %86, %88 : vector<1x32x32xf32>
    %cst_28 = arith.constant dense<0xFF800000> : vector<1x32xf32>
    %90 = vector.multi_reduction <maximumf>, %89, %cst_28 [2] : vector<1x32x32xf32> to vector<1x32xf32>
    %91 = vector.shape_cast %90 : vector<1x32xf32> to vector<1x32x1xf32>
    %92 = vector.broadcast %91 : vector<1x32x1xf32> to vector<1x32x32xf32>
    %93 = arith.subf %89, %92 : vector<1x32x32xf32>
    %94 = math.exp %93 : vector<1x32x32xf32>
    %cst_29 = arith.constant dense<0.000000e+00> : vector<1x32xf32>
    %95 = vector.multi_reduction <add>, %94, %cst_29 [2] : vector<1x32x32xf32> to vector<1x32xf32>
    %96 = vector.shape_cast %95 : vector<1x32xf32> to vector<1x32x1xf32>
    %97 = tpu.reciprocal %96 {approx = true} : vector<1x32x1xf32> -> vector<1x32x1xf32>
    %98 = vector.broadcast %97 : vector<1x32x1xf32> to vector<1x32x32xf32>
    %99 = arith.mulf %94, %98 : vector<1x32x32xf32>
    %100 = arith.truncf %99 : vector<1x32x32xf32> to vector<1x32x32xbf16>
    "tpu.trace_start"() <{level = 10 : i32, message = "gqk,gkd->gqd"}> : () -> ()
    %cst_30 = arith.constant dense<0.000000e+00> : vector<1x32x32xf32>
    %101 = tpu.matmul %100, %85, %cst_30 {dimension_numbers = #tpu.dot_dimension_numbers<[2], [1], [1], [2], [0, 0, 0, 1, 1, 2], [0], [0]>} : vector<1x32x32xbf16>, vector<1x32x32xbf16>, vector<1x32x32xf32> -> vector<1x32x32xf32>
    "tpu.trace_stop"() : () -> ()
    %102 = vector.shape_cast %101 : vector<1x32x32xf32> to vector<32x32xf32>
    %103 = vector.extract_strided_slice %31 {offsets = [0, 96], sizes = [32, 32], strides = [1, 1]} : vector<32x384xbf16> to vector<32x32xbf16>
    %104 = vector.shape_cast %103 : vector<32x32xbf16> to vector<1x32x32xbf16>
    %105 = vector.extract_strided_slice %31 {offsets = [0, 224], sizes = [32, 32], strides = [1, 1]} : vector<32x384xbf16> to vector<32x32xbf16>
    %106 = vector.shape_cast %105 : vector<32x32xbf16> to vector<1x32x32xbf16>
    %107 = vector.extract_strided_slice %31 {offsets = [0, 352], sizes = [32, 32], strides = [1, 1]} : vector<32x384xbf16> to vector<32x32xbf16>
    %108 = vector.shape_cast %107 : vector<32x32xbf16> to vector<1x32x32xbf16>
    "tpu.trace_start"() <{level = 10 : i32, message = "gqd,gkd->gqk"}> : () -> ()
    %cst_31 = arith.constant dense<0.000000e+00> : vector<1x32x32xf32>
    %109 = tpu.matmul %104, %106, %cst_31 {dimension_numbers = #tpu.dot_dimension_numbers<[2], [2], [1], [1], [0, 0, 0, 1, 1, 1], [0], [0]>} : vector<1x32x32xbf16>, vector<1x32x32xbf16>, vector<1x32x32xf32> -> vector<1x32x32xf32>
    "tpu.trace_stop"() : () -> ()
    %110 = vector.extract_strided_slice %33 {offsets = [3, 0, 0, 0], sizes = [1, 1, 32, 32], strides = [1, 1, 1, 1]} : vector<4x1x32x32xf32> to vector<1x1x32x32xf32>
    %111 = vector.shape_cast %110 : vector<1x1x32x32xf32> to vector<1x32x32xf32>
    %112 = arith.addf %109, %111 : vector<1x32x32xf32>
    %cst_32 = arith.constant dense<0xFF800000> : vector<1x32xf32>
    %113 = vector.multi_reduction <maximumf>, %112, %cst_32 [2] : vector<1x32x32xf32> to vector<1x32xf32>
    %114 = vector.shape_cast %113 : vector<1x32xf32> to vector<1x32x1xf32>
    %115 = vector.broadcast %114 : vector<1x32x1xf32> to vector<1x32x32xf32>
    %116 = arith.subf %112, %115 : vector<1x32x32xf32>
    %117 = math.exp %116 : vector<1x32x32xf32>
    %cst_33 = arith.constant dense<0.000000e+00> : vector<1x32xf32>
    %118 = vector.multi_reduction <add>, %117, %cst_33 [2] : vector<1x32x32xf32> to vector<1x32xf32>
    %119 = vector.shape_cast %118 : vector<1x32xf32> to vector<1x32x1xf32>
    %120 = tpu.reciprocal %119 {approx = true} : vector<1x32x1xf32> -> vector<1x32x1xf32>
    %121 = vector.broadcast %120 : vector<1x32x1xf32> to vector<1x32x32xf32>
    %122 = arith.mulf %117, %121 : vector<1x32x32xf32>
    %123 = arith.truncf %122 : vector<1x32x32xf32> to vector<1x32x32xbf16>
    "tpu.trace_start"() <{level = 10 : i32, message = "gqk,gkd->gqd"}> : () -> ()
    %cst_34 = arith.constant dense<0.000000e+00> : vector<1x32x32xf32>
    %124 = tpu.matmul %123, %108, %cst_34 {dimension_numbers = #tpu.dot_dimension_numbers<[2], [1], [1], [2], [0, 0, 0, 1, 1, 2], [0], [0]>} : vector<1x32x32xbf16>, vector<1x32x32xbf16>, vector<1x32x32xf32> -> vector<1x32x32xf32>
    "tpu.trace_stop"() : () -> ()
    %125 = vector.shape_cast %124 : vector<1x32x32xf32> to vector<32x32xf32>
    %126 = tpu.concatenate %56, %79, %102, %125 in 1 : vector<32x32xf32>, vector<32x32xf32>, vector<32x32xf32>, vector<32x32xf32> -> vector<32x128xf32>
    %127 = arith.truncf %126 : vector<32x128xf32> to vector<32x128xbf16>
    %c0_35 = arith.constant 0 : index
    %c0_36 = arith.constant 0 : index
    %128 = vector.load %arg8[%c0_35, %c0_36] : memref<128x128xbf16, #tpu.memory_space<vmem>>, vector<128x128xbf16>
    %cst_37 = arith.constant dense<0.000000e+00> : vector<32x128xf32>
    %129 = tpu.matmul %127, %128, %cst_37 {dimension_numbers = #tpu.dot_dimension_numbers<[1], [0], [0], [1], [0, 0, 1, 1], [], []>} : vector<32x128xbf16>, vector<128x128xbf16>, vector<32x128xf32> -> vector<32x128xf32>
    %c0_38 = arith.constant 0 : index
    %c0_39 = arith.constant 0 : index
    %130 = vector.load %arg9[%c0_38, %c0_39] : memref<1x128xf32, #tpu.memory_space<vmem>>, vector<1x128xf32>
    %131 = vector.broadcast %130 : vector<1x128xf32> to vector<32x128xf32>
    %132 = arith.addf %129, %131 : vector<32x128xf32>
    %133 = arith.addf %2, %132 : vector<32x128xf32>
    %c0_40 = arith.constant 0 : index
    %c0_41 = arith.constant 0 : index
    %134 = vector.load %arg10[%c0_40, %c0_41] : memref<1x128xf32, #tpu.memory_space<vmem>>, vector<1x128xf32>
    %c0_42 = arith.constant 0 : index
    %c0_43 = arith.constant 0 : index
    %135 = vector.load %arg11[%c0_42, %c0_43] : memref<1x128xf32, #tpu.memory_space<vmem>>, vector<1x128xf32>
    %cst_44 = arith.constant dense<0.000000e+00> : vector<32xf32>
    %136 = vector.multi_reduction <add>, %133, %cst_44 [1] : vector<32x128xf32> to vector<32xf32>
    %137 = vector.shape_cast %136 : vector<32xf32> to vector<32x1xf32>
    %cst_45 = arith.constant 1.280000e+02 : f32
    %138 = vector.broadcast %cst_45 : f32 to vector<32x1xf32>
    %139 = arith.divf %137, %138 : vector<32x1xf32>
    %140 = vector.broadcast %139 : vector<32x1xf32> to vector<32x128xf32>
    %141 = arith.subf %133, %140 : vector<32x128xf32>
    %142 = arith.mulf %141, %141 : vector<32x128xf32>
    %cst_46 = arith.constant dense<0.000000e+00> : vector<32xf32>
    %143 = vector.multi_reduction <add>, %142, %cst_46 [1] : vector<32x128xf32> to vector<32xf32>
    %144 = vector.shape_cast %143 : vector<32xf32> to vector<32x1xf32>
    %cst_47 = arith.constant 1.280000e+02 : f32
    %145 = vector.broadcast %cst_47 : f32 to vector<32x1xf32>
    %146 = arith.divf %144, %145 : vector<32x1xf32>
    %cst_48 = arith.constant 9.99999974E-6 : f32
    %147 = vector.broadcast %cst_48 : f32 to vector<32x1xf32>
    %148 = arith.addf %146, %147 : vector<32x1xf32>
    %149 = math.rsqrt %148 : vector<32x1xf32>
    %150 = vector.broadcast %149 : vector<32x1xf32> to vector<32x128xf32>
    %151 = arith.mulf %141, %150 : vector<32x128xf32>
    %152 = vector.broadcast %134 : vector<1x128xf32> to vector<32x128xf32>
    %153 = arith.mulf %151, %152 : vector<32x128xf32>
    %154 = vector.broadcast %135 : vector<1x128xf32> to vector<32x128xf32>
    %155 = arith.addf %153, %154 : vector<32x128xf32>
    %156 = arith.truncf %155 : vector<32x128xf32> to vector<32x128xbf16>
    %c0_49 = arith.constant 0 : index
    %c0_50 = arith.constant 0 : index
    %157 = vector.load %arg12[%c0_49, %c0_50] : memref<128x512xbf16, #tpu.memory_space<vmem>>, vector<128x512xbf16>
    %cst_51 = arith.constant dense<0.000000e+00> : vector<32x512xf32>
    %158 = tpu.matmul %156, %157, %cst_51 {dimension_numbers = #tpu.dot_dimension_numbers<[1], [0], [0], [1], [0, 0, 1, 1], [], []>} : vector<32x128xbf16>, vector<128x512xbf16>, vector<32x512xf32> -> vector<32x512xf32>
    %c0_52 = arith.constant 0 : index
    %c0_53 = arith.constant 0 : index
    %159 = vector.load %arg13[%c0_52, %c0_53] : memref<1x512xf32, #tpu.memory_space<vmem>>, vector<1x512xf32>
    %160 = vector.broadcast %159 : vector<1x512xf32> to vector<32x512xf32>
    %161 = arith.addf %158, %160 : vector<32x512xf32>
    %cst_54 = arith.constant 5.000000e-01 : f32
    %162 = vector.broadcast %cst_54 : f32 to vector<32x512xf32>
    %163 = arith.mulf %162, %161 : vector<32x512xf32>
    %cst_55 = arith.constant 4.471500e-02 : f32
    %164 = vector.broadcast %cst_55 : f32 to vector<32x512xf32>
    %165 = arith.mulf %164, %161 : vector<32x512xf32>
    %166 = arith.mulf %165, %161 : vector<32x512xf32>
    %167 = arith.mulf %166, %161 : vector<32x512xf32>
    %168 = arith.addf %161, %167 : vector<32x512xf32>
    %cst_56 = arith.constant 0.797884583 : f32
    %169 = vector.broadcast %cst_56 : f32 to vector<32x512xf32>
    %170 = arith.mulf %169, %168 : vector<32x512xf32>
    %171 = math.tanh %170 : vector<32x512xf32>
    %cst_57 = arith.constant 1.000000e+00 : f32
    %172 = vector.broadcast %cst_57 : f32 to vector<32x512xf32>
    %173 = arith.addf %172, %171 : vector<32x512xf32>
    %174 = arith.mulf %163, %173 : vector<32x512xf32>
    %175 = arith.truncf %174 : vector<32x512xf32> to vector<32x512xbf16>
    %c0_58 = arith.constant 0 : index
    %c0_59 = arith.constant 0 : index
    %176 = vector.load %arg14[%c0_58, %c0_59] : memref<512x128xbf16, #tpu.memory_space<vmem>>, vector<512x128xbf16>
    %cst_60 = arith.constant dense<0.000000e+00> : vector<32x128xf32>
    %177 = tpu.matmul %175, %176, %cst_60 {dimension_numbers = #tpu.dot_dimension_numbers<[1], [0], [0], [1], [0, 0, 1, 1], [], []>} : vector<32x512xbf16>, vector<512x128xbf16>, vector<32x128xf32> -> vector<32x128xf32>
    %c0_61 = arith.constant 0 : index
    %c0_62 = arith.constant 0 : index
    %178 = vector.load %arg15[%c0_61, %c0_62] : memref<1x128xf32, #tpu.memory_space<vmem>>, vector<1x128xf32>
    %179 = vector.broadcast %178 : vector<1x128xf32> to vector<32x128xf32>
    %180 = arith.addf %177, %179 : vector<32x128xf32>
    %181 = arith.addf %133, %180 : vector<32x128xf32>
    %182 = arith.truncf %181 : vector<32x128xf32> to vector<32x128xbf16>
    %c0_63 = arith.constant 0 : index
    %c0_64 = arith.constant 0 : index
    %c0_65 = arith.constant 0 : index
    %183 = vector.load %arg16[%c0_63, %c0_64, %c0_65] : memref<1x32x128xbf16, #tpu.memory_space<vmem>>, vector<1x32x128xbf16>
    %184 = vector.shape_cast %183 : vector<1x32x128xbf16> to vector<32x128xbf16>
    %185 = vector.shape_cast %182 : vector<32x128xbf16> to vector<1x32x128xbf16>
    tpu.vector_store %arg16[%c0_63, %c0_64, %c0_65], %185 {strides = array<i32>} : memref<1x32x128xbf16, #tpu.memory_space<vmem>>, vector<1x32x128xbf16>,
    return
  }
  func.func @transform_0(%arg0: i32, %arg1: i32) -> (i32, i32, i32) {
    %c0_i32 = arith.constant 0 : i32
    %c0_i32_0 = arith.constant 0 : i32
    return %arg0, %arg1, %c0_i32 : i32, i32, i32
  }
  func.func @transform_1(%arg0: i32, %arg1: i32) -> (i32, i32) {
    %c0_i32 = arith.constant 0 : i32
    %c0_i32_0 = arith.constant 0 : i32
    %c0_i32_1 = arith.constant 0 : i32
    return %c0_i32, %c0_i32_0 : i32, i32
  }
  func.func @transform_2(%arg0: i32, %arg1: i32) -> (i32, i32) {
    %c0_i32 = arith.constant 0 : i32
    %c0_i32_0 = arith.constant 0 : i32
    %c0_i32_1 = arith.constant 0 : i32
    return %c0_i32, %c0_i32_0 : i32, i32
  }
  func.func @transform_3(%arg0: i32, %arg1: i32) -> (i32, i32) {
    %c0_i32 = arith.constant 0 : i32
    %c0_i32_0 = arith.constant 0 : i32
    %c0_i32_1 = arith.constant 0 : i32
    return %c0_i32, %c0_i32_0 : i32, i32
  }
  func.func @transform_4(%arg0: i32, %arg1: i32) -> (i32, i32) {
    %c0_i32 = arith.constant 0 : i32
    %c0_i32_0 = arith.constant 0 : i32
    %c0_i32_1 = arith.constant 0 : i32
    return %c0_i32, %c0_i32_0 : i32, i32
  }
  func.func @transform_5(%arg0: i32, %arg1: i32) -> (i32, i32, i32, i32) {
    %c0_i32 = arith.constant 0 : i32
    %c0_i32_0 = arith.constant 0 : i32
    %c0_i32_1 = arith.constant 0 : i32
    %c0_i32_2 = arith.constant 0 : i32
    return %c0_i32, %arg1, %c0_i32_0, %c0_i32_1 : i32, i32, i32, i32
  }
  func.func @transform_6(%arg0: i32, %arg1: i32) -> (i32, i32) {
    %c0_i32 = arith.constant 0 : i32
    %c0_i32_0 = arith.constant 0 : i32
    %c0_i32_1 = arith.constant 0 : i32
    return %c0_i32, %c0_i32_0 : i32, i32
  }
  func.func @transform_7(%arg0: i32, %arg1: i32) -> (i32, i32) {
    %c0_i32 = arith.constant 0 : i32
    %c0_i32_0 = arith.constant 0 : i32
    %c0_i32_1 = arith.constant 0 : i32
    return %c0_i32, %c0_i32_0 : i32, i32
  }
  func.func @transform_8(%arg0: i32, %arg1: i32) -> (i32, i32) {
    %c0_i32 = arith.constant 0 : i32
    %c0_i32_0 = arith.constant 0 : i32
    %c0_i32_1 = arith.constant 0 : i32
    return %c0_i32, %c0_i32_0 : i32, i32
  }
  func.func @transform_9(%arg0: i32, %arg1: i32) -> (i32, i32) {
    %c0_i32 = arith.constant 0 : i32
    %c0_i32_0 = arith.constant 0 : i32
    %c0_i32_1 = arith.constant 0 : i32
    return %c0_i32, %c0_i32_0 : i32, i32
  }
  func.func @transform_10(%arg0: i32, %arg1: i32) -> (i32, i32) {
    %c0_i32 = arith.constant 0 : i32
    %c0_i32_0 = arith.constant 0 : i32
    %c0_i32_1 = arith.constant 0 : i32
    return %c0_i32, %c0_i32_0 : i32, i32
  }
  func.func @transform_11(%arg0: i32, %arg1: i32) -> (i32, i32) {
    %c0_i32 = arith.constant 0 : i32
    %c0_i32_0 = arith.constant 0 : i32
    %c0_i32_1 = arith.constant 0 : i32
    return %c0_i32, %c0_i32_0 : i32, i32
  }
  func.func @transform_12(%arg0: i32, %arg1: i32) -> (i32, i32) {
    %c0_i32 = arith.constant 0 : i32
    %c0_i32_0 = arith.constant 0 : i32
    %c0_i32_1 = arith.constant 0 : i32
    return %c0_i32, %c0_i32_0 : i32, i32
  }
  func.func @transform_13(%arg0: i32, %arg1: i32) -> (i32, i32) {
    %c0_i32 = arith.constant 0 : i32
    %c0_i32_0 = arith.constant 0 : i32
    %c0_i32_1 = arith.constant 0 : i32
    return %c0_i32, %c0_i32_0 : i32, i32
  }
  func.func @transform_14(%arg0: i32, %arg1: i32) -> (i32, i32, i32) {
    %c0_i32 = arith.constant 0 : i32
    %c0_i32_0 = arith.constant 0 : i32
    return %arg0, %arg1, %c0_i32 : i32, i32, i32
  }
}

module attributes {stable_mosaic.version = 11 : i64} {
  func.func @_patch_merge_kernel(%arg0: i32, %arg1: memref<1x16x512xbf16, #tpu.memory_space<vmem>>, %arg2: memref<1x512xf32, #tpu.memory_space<vmem>>, %arg3: memref<1x512xf32, #tpu.memory_space<vmem>>, %arg4: memref<512x256xbf16, #tpu.memory_space<vmem>>, %arg5: memref<1x16x256xbf16, #tpu.memory_space<vmem>>) attributes {dimension_semantics = [#tpu.dimension_semantics<parallel>], iteration_bounds = array<i64: 2>, scalar_prefetch = 0 : i64, scratch_operands = 0 : i64, tpu.core_type = #tpu.core_type<tc>, window_params = [{transform_indices = @transform_0, window_bounds = array<i64: 1, 16, 512>}, {pipeline_mode = #tpu.pipeline_mode<synchronous>, transform_indices = @transform_1, window_bounds = array<i64: 1, 512>}, {pipeline_mode = #tpu.pipeline_mode<synchronous>, transform_indices = @transform_2, window_bounds = array<i64: 1, 512>}, {pipeline_mode = #tpu.pipeline_mode<synchronous>, transform_indices = @transform_3, window_bounds = array<i64: 512, 256>}, {transform_indices = @transform_4, window_bounds = array<i64: 1, 16, 256>}]} {
    %c0 = arith.constant 0 : index
    %c0_0 = arith.constant 0 : index
    %c0_1 = arith.constant 0 : index
    %0 = vector.load %arg1[%c0, %c0_0, %c0_1] : memref<1x16x512xbf16, #tpu.memory_space<vmem>>, vector<1x16x512xbf16>
    %1 = vector.shape_cast %0 : vector<1x16x512xbf16> to vector<16x512xbf16>
    %c0_2 = arith.constant 0 : index
    %c0_3 = arith.constant 0 : index
    %2 = vector.load %arg2[%c0_2, %c0_3] : memref<1x512xf32, #tpu.memory_space<vmem>>, vector<1x512xf32>
    %c0_4 = arith.constant 0 : index
    %c0_5 = arith.constant 0 : index
    %3 = vector.load %arg3[%c0_4, %c0_5] : memref<1x512xf32, #tpu.memory_space<vmem>>, vector<1x512xf32>
    %4 = arith.extf %1 : vector<16x512xbf16> to vector<16x512xf32>
    %cst = arith.constant dense<0.000000e+00> : vector<16xf32>
    %5 = vector.multi_reduction <add>, %4, %cst [1] : vector<16x512xf32> to vector<16xf32>
    %6 = vector.shape_cast %5 : vector<16xf32> to vector<16x1xf32>
    %cst_6 = arith.constant 5.120000e+02 : f32
    %7 = vector.broadcast %cst_6 : f32 to vector<16x1xf32>
    %8 = arith.divf %6, %7 : vector<16x1xf32>
    %9 = vector.broadcast %8 : vector<16x1xf32> to vector<16x512xf32>
    %10 = arith.subf %4, %9 : vector<16x512xf32>
    %11 = arith.mulf %10, %10 : vector<16x512xf32>
    %cst_7 = arith.constant dense<0.000000e+00> : vector<16xf32>
    %12 = vector.multi_reduction <add>, %11, %cst_7 [1] : vector<16x512xf32> to vector<16xf32>
    %13 = vector.shape_cast %12 : vector<16xf32> to vector<16x1xf32>
    %cst_8 = arith.constant 5.120000e+02 : f32
    %14 = vector.broadcast %cst_8 : f32 to vector<16x1xf32>
    %15 = arith.divf %13, %14 : vector<16x1xf32>
    %cst_9 = arith.constant 9.99999974E-6 : f32
    %16 = vector.broadcast %cst_9 : f32 to vector<16x1xf32>
    %17 = arith.addf %15, %16 : vector<16x1xf32>
    %18 = math.rsqrt %17 : vector<16x1xf32>
    %19 = vector.broadcast %18 : vector<16x1xf32> to vector<16x512xf32>
    %20 = arith.mulf %10, %19 : vector<16x512xf32>
    %21 = vector.broadcast %2 : vector<1x512xf32> to vector<16x512xf32>
    %22 = arith.mulf %20, %21 : vector<16x512xf32>
    %23 = vector.broadcast %3 : vector<1x512xf32> to vector<16x512xf32>
    %24 = arith.addf %22, %23 : vector<16x512xf32>
    %25 = arith.truncf %24 : vector<16x512xf32> to vector<16x512xbf16>
    %c0_10 = arith.constant 0 : index
    %c0_11 = arith.constant 0 : index
    %26 = vector.load %arg4[%c0_10, %c0_11] : memref<512x256xbf16, #tpu.memory_space<vmem>>, vector<512x256xbf16>
    %cst_12 = arith.constant dense<0.000000e+00> : vector<16x256xf32>
    %27 = tpu.matmul %25, %26, %cst_12 {dimension_numbers = #tpu.dot_dimension_numbers<[1], [0], [0], [1], [0, 0, 1, 1], [], []>} : vector<16x512xbf16>, vector<512x256xbf16>, vector<16x256xf32> -> vector<16x256xf32>
    %28 = arith.truncf %27 : vector<16x256xf32> to vector<16x256xbf16>
    %c0_13 = arith.constant 0 : index
    %c0_14 = arith.constant 0 : index
    %c0_15 = arith.constant 0 : index
    %29 = vector.load %arg5[%c0_13, %c0_14, %c0_15] : memref<1x16x256xbf16, #tpu.memory_space<vmem>>, vector<1x16x256xbf16>
    %30 = vector.shape_cast %29 : vector<1x16x256xbf16> to vector<16x256xbf16>
    %31 = vector.shape_cast %28 : vector<16x256xbf16> to vector<1x16x256xbf16>
    tpu.vector_store %arg5[%c0_13, %c0_14, %c0_15], %31 {strides = array<i32>} : memref<1x16x256xbf16, #tpu.memory_space<vmem>>, vector<1x16x256xbf16>,
    return
  }
  func.func @transform_0(%arg0: i32) -> (i32, i32, i32) {
    %c0_i32 = arith.constant 0 : i32
    %c0_i32_0 = arith.constant 0 : i32
    %c0_i32_1 = arith.constant 0 : i32
    return %arg0, %c0_i32, %c0_i32_0 : i32, i32, i32
  }
  func.func @transform_1(%arg0: i32) -> (i32, i32) {
    %c0_i32 = arith.constant 0 : i32
    %c0_i32_0 = arith.constant 0 : i32
    %c0_i32_1 = arith.constant 0 : i32
    return %c0_i32, %c0_i32_0 : i32, i32
  }
  func.func @transform_2(%arg0: i32) -> (i32, i32) {
    %c0_i32 = arith.constant 0 : i32
    %c0_i32_0 = arith.constant 0 : i32
    %c0_i32_1 = arith.constant 0 : i32
    return %c0_i32, %c0_i32_0 : i32, i32
  }
  func.func @transform_3(%arg0: i32) -> (i32, i32) {
    %c0_i32 = arith.constant 0 : i32
    %c0_i32_0 = arith.constant 0 : i32
    %c0_i32_1 = arith.constant 0 : i32
    return %c0_i32, %c0_i32_0 : i32, i32
  }
  func.func @transform_4(%arg0: i32) -> (i32, i32, i32) {
    %c0_i32 = arith.constant 0 : i32
    %c0_i32_0 = arith.constant 0 : i32
    %c0_i32_1 = arith.constant 0 : i32
    return %arg0, %c0_i32, %c0_i32_0 : i32, i32, i32
  }
}

module attributes {stable_mosaic.version = 11 : i64} {
  func.func @_swin_block_kernel(%arg0: i32, %arg1: i32, %arg2: memref<1x16x256xbf16, #tpu.memory_space<vmem>>, %arg3: memref<1x256xf32, #tpu.memory_space<vmem>>, %arg4: memref<1x256xf32, #tpu.memory_space<vmem>>, %arg5: memref<256x768xbf16, #tpu.memory_space<vmem>>, %arg6: memref<1x768xf32, #tpu.memory_space<vmem>>, %arg7: memref<8x1x16x16xbf16, #tpu.memory_space<vmem>>, %arg8: memref<256x256xbf16, #tpu.memory_space<vmem>>, %arg9: memref<1x256xf32, #tpu.memory_space<vmem>>, %arg10: memref<1x256xf32, #tpu.memory_space<vmem>>, %arg11: memref<1x256xf32, #tpu.memory_space<vmem>>, %arg12: memref<256x1024xbf16, #tpu.memory_space<vmem>>, %arg13: memref<1x1024xf32, #tpu.memory_space<vmem>>, %arg14: memref<1024x256xbf16, #tpu.memory_space<vmem>>, %arg15: memref<1x256xf32, #tpu.memory_space<vmem>>, %arg16: memref<1x16x256xbf16, #tpu.memory_space<vmem>>) attributes {dimension_semantics = [#tpu.dimension_semantics<parallel>, #tpu.dimension_semantics<parallel>], iteration_bounds = array<i64: 2, 1>, scalar_prefetch = 0 : i64, scratch_operands = 0 : i64, tpu.core_type = #tpu.core_type<tc>, window_params = [{transform_indices = @transform_0, window_bounds = array<i64: 1, 16, 256>}, {pipeline_mode = #tpu.pipeline_mode<synchronous>, transform_indices = @transform_1, window_bounds = array<i64: 1, 256>}, {pipeline_mode = #tpu.pipeline_mode<synchronous>, transform_indices = @transform_2, window_bounds = array<i64: 1, 256>}, {pipeline_mode = #tpu.pipeline_mode<synchronous>, transform_indices = @transform_3, window_bounds = array<i64: 256, 768>}, {pipeline_mode = #tpu.pipeline_mode<synchronous>, transform_indices = @transform_4, window_bounds = array<i64: 1, 768>}, {transform_indices = @transform_5, window_bounds = array<i64: 8, 1, 16, 16>}, {pipeline_mode = #tpu.pipeline_mode<synchronous>, transform_indices = @transform_6, window_bounds = array<i64: 256, 256>}, {pipeline_mode = #tpu.pipeline_mode<synchronous>, transform_indices = @transform_7, window_bounds = array<i64: 1, 256>}, {pipeline_mode = #tpu.pipeline_mode<synchronous>, transform_indices = @transform_8, window_bounds = array<i64: 1, 256>}, {pipeline_mode = #tpu.pipeline_mode<synchronous>, transform_indices = @transform_9, window_bounds = array<i64: 1, 256>}, {pipeline_mode = #tpu.pipeline_mode<synchronous>, transform_indices = @transform_10, window_bounds = array<i64: 256, 1024>}, {pipeline_mode = #tpu.pipeline_mode<synchronous>, transform_indices = @transform_11, window_bounds = array<i64: 1, 1024>}, {pipeline_mode = #tpu.pipeline_mode<synchronous>, transform_indices = @transform_12, window_bounds = array<i64: 1024, 256>}, {pipeline_mode = #tpu.pipeline_mode<synchronous>, transform_indices = @transform_13, window_bounds = array<i64: 1, 256>}, {transform_indices = @transform_14, window_bounds = array<i64: 1, 16, 256>}]} {
    %c0 = arith.constant 0 : index
    %c0_0 = arith.constant 0 : index
    %c0_1 = arith.constant 0 : index
    %0 = vector.load %arg2[%c0, %c0_0, %c0_1] : memref<1x16x256xbf16, #tpu.memory_space<vmem>>, vector<1x16x256xbf16>
    %1 = vector.shape_cast %0 : vector<1x16x256xbf16> to vector<16x256xbf16>
    %2 = arith.extf %1 : vector<16x256xbf16> to vector<16x256xf32>
    %c0_2 = arith.constant 0 : index
    %c0_3 = arith.constant 0 : index
    %3 = vector.load %arg3[%c0_2, %c0_3] : memref<1x256xf32, #tpu.memory_space<vmem>>, vector<1x256xf32>
    %c0_4 = arith.constant 0 : index
    %c0_5 = arith.constant 0 : index
    %4 = vector.load %arg4[%c0_4, %c0_5] : memref<1x256xf32, #tpu.memory_space<vmem>>, vector<1x256xf32>
    %cst = arith.constant dense<0.000000e+00> : vector<16xf32>
    %5 = vector.multi_reduction <add>, %2, %cst [1] : vector<16x256xf32> to vector<16xf32>
    %6 = vector.shape_cast %5 : vector<16xf32> to vector<16x1xf32>
    %cst_6 = arith.constant 2.560000e+02 : f32
    %7 = vector.broadcast %cst_6 : f32 to vector<16x1xf32>
    %8 = arith.divf %6, %7 : vector<16x1xf32>
    %9 = vector.broadcast %8 : vector<16x1xf32> to vector<16x256xf32>
    %10 = arith.subf %2, %9 : vector<16x256xf32>
    %11 = arith.mulf %10, %10 : vector<16x256xf32>
    %cst_7 = arith.constant dense<0.000000e+00> : vector<16xf32>
    %12 = vector.multi_reduction <add>, %11, %cst_7 [1] : vector<16x256xf32> to vector<16xf32>
    %13 = vector.shape_cast %12 : vector<16xf32> to vector<16x1xf32>
    %cst_8 = arith.constant 2.560000e+02 : f32
    %14 = vector.broadcast %cst_8 : f32 to vector<16x1xf32>
    %15 = arith.divf %13, %14 : vector<16x1xf32>
    %cst_9 = arith.constant 9.99999974E-6 : f32
    %16 = vector.broadcast %cst_9 : f32 to vector<16x1xf32>
    %17 = arith.addf %15, %16 : vector<16x1xf32>
    %18 = math.rsqrt %17 : vector<16x1xf32>
    %19 = vector.broadcast %18 : vector<16x1xf32> to vector<16x256xf32>
    %20 = arith.mulf %10, %19 : vector<16x256xf32>
    %21 = vector.broadcast %3 : vector<1x256xf32> to vector<16x256xf32>
    %22 = arith.mulf %20, %21 : vector<16x256xf32>
    %23 = vector.broadcast %4 : vector<1x256xf32> to vector<16x256xf32>
    %24 = arith.addf %22, %23 : vector<16x256xf32>
    %25 = arith.truncf %24 : vector<16x256xf32> to vector<16x256xbf16>
    %c0_10 = arith.constant 0 : index
    %c0_11 = arith.constant 0 : index
    %26 = vector.load %arg5[%c0_10, %c0_11] : memref<256x768xbf16, #tpu.memory_space<vmem>>, vector<256x768xbf16>
    %cst_12 = arith.constant dense<0.000000e+00> : vector<16x768xf32>
    %27 = tpu.matmul %25, %26, %cst_12 {dimension_numbers = #tpu.dot_dimension_numbers<[1], [0], [0], [1], [0, 0, 1, 1], [], []>} : vector<16x256xbf16>, vector<256x768xbf16>, vector<16x768xf32> -> vector<16x768xf32>
    %c0_13 = arith.constant 0 : index
    %c0_14 = arith.constant 0 : index
    %28 = vector.load %arg6[%c0_13, %c0_14] : memref<1x768xf32, #tpu.memory_space<vmem>>, vector<1x768xf32>
    %29 = vector.broadcast %28 : vector<1x768xf32> to vector<16x768xf32>
    %30 = arith.addf %27, %29 : vector<16x768xf32>
    %31 = arith.truncf %30 : vector<16x768xf32> to vector<16x768xbf16>
    %c0_15 = arith.constant 0 : index
    %c0_16 = arith.constant 0 : index
    %c0_17 = arith.constant 0 : index
    %c0_18 = arith.constant 0 : index
    %32 = vector.load %arg7[%c0_15, %c0_16, %c0_17, %c0_18] : memref<8x1x16x16xbf16, #tpu.memory_space<vmem>>, vector<8x1x16x16xbf16>
    %33 = arith.extf %32 : vector<8x1x16x16xbf16> to vector<8x1x16x16xf32>
    %34 = vector.extract_strided_slice %31 {offsets = [0, 0], sizes = [16, 32], strides = [1, 1]} : vector<16x768xbf16> to vector<16x32xbf16>
    %35 = vector.shape_cast %34 : vector<16x32xbf16> to vector<1x16x32xbf16>
    %36 = vector.extract_strided_slice %31 {offsets = [0, 256], sizes = [16, 32], strides = [1, 1]} : vector<16x768xbf16> to vector<16x32xbf16>
    %37 = vector.shape_cast %36 : vector<16x32xbf16> to vector<1x16x32xbf16>
    %38 = vector.extract_strided_slice %31 {offsets = [0, 512], sizes = [16, 32], strides = [1, 1]} : vector<16x768xbf16> to vector<16x32xbf16>
    %39 = vector.shape_cast %38 : vector<16x32xbf16> to vector<1x16x32xbf16>
    "tpu.trace_start"() <{level = 10 : i32, message = "gqd,gkd->gqk"}> : () -> ()
    %cst_19 = arith.constant dense<0.000000e+00> : vector<1x16x16xf32>
    %40 = tpu.matmul %35, %37, %cst_19 {dimension_numbers = #tpu.dot_dimension_numbers<[2], [2], [1], [1], [0, 0, 0, 1, 1, 1], [0], [0]>} : vector<1x16x32xbf16>, vector<1x16x32xbf16>, vector<1x16x16xf32> -> vector<1x16x16xf32>
    "tpu.trace_stop"() : () -> ()
    %41 = vector.extract_strided_slice %33 {offsets = [0, 0, 0, 0], sizes = [1, 1, 16, 16], strides = [1, 1, 1, 1]} : vector<8x1x16x16xf32> to vector<1x1x16x16xf32>
    %42 = vector.shape_cast %41 : vector<1x1x16x16xf32> to vector<1x16x16xf32>
    %43 = arith.addf %40, %42 : vector<1x16x16xf32>
    %cst_20 = arith.constant dense<0xFF800000> : vector<1x16xf32>
    %44 = vector.multi_reduction <maximumf>, %43, %cst_20 [2] : vector<1x16x16xf32> to vector<1x16xf32>
    %45 = vector.shape_cast %44 : vector<1x16xf32> to vector<1x16x1xf32>
    %46 = vector.broadcast %45 : vector<1x16x1xf32> to vector<1x16x16xf32>
    %47 = arith.subf %43, %46 : vector<1x16x16xf32>
    %48 = math.exp %47 : vector<1x16x16xf32>
    %cst_21 = arith.constant dense<0.000000e+00> : vector<1x16xf32>
    %49 = vector.multi_reduction <add>, %48, %cst_21 [2] : vector<1x16x16xf32> to vector<1x16xf32>
    %50 = vector.shape_cast %49 : vector<1x16xf32> to vector<1x16x1xf32>
    %51 = tpu.reciprocal %50 {approx = true} : vector<1x16x1xf32> -> vector<1x16x1xf32>
    %52 = vector.broadcast %51 : vector<1x16x1xf32> to vector<1x16x16xf32>
    %53 = arith.mulf %48, %52 : vector<1x16x16xf32>
    %54 = arith.truncf %53 : vector<1x16x16xf32> to vector<1x16x16xbf16>
    "tpu.trace_start"() <{level = 10 : i32, message = "gqk,gkd->gqd"}> : () -> ()
    %cst_22 = arith.constant dense<0.000000e+00> : vector<1x16x32xf32>
    %55 = tpu.matmul %54, %39, %cst_22 {dimension_numbers = #tpu.dot_dimension_numbers<[2], [1], [1], [2], [0, 0, 0, 1, 1, 2], [0], [0]>} : vector<1x16x16xbf16>, vector<1x16x32xbf16>, vector<1x16x32xf32> -> vector<1x16x32xf32>
    "tpu.trace_stop"() : () -> ()
    %56 = vector.shape_cast %55 : vector<1x16x32xf32> to vector<16x32xf32>
    %57 = vector.extract_strided_slice %31 {offsets = [0, 32], sizes = [16, 32], strides = [1, 1]} : vector<16x768xbf16> to vector<16x32xbf16>
    %58 = vector.shape_cast %57 : vector<16x32xbf16> to vector<1x16x32xbf16>
    %59 = vector.extract_strided_slice %31 {offsets = [0, 288], sizes = [16, 32], strides = [1, 1]} : vector<16x768xbf16> to vector<16x32xbf16>
    %60 = vector.shape_cast %59 : vector<16x32xbf16> to vector<1x16x32xbf16>
    %61 = vector.extract_strided_slice %31 {offsets = [0, 544], sizes = [16, 32], strides = [1, 1]} : vector<16x768xbf16> to vector<16x32xbf16>
    %62 = vector.shape_cast %61 : vector<16x32xbf16> to vector<1x16x32xbf16>
    "tpu.trace_start"() <{level = 10 : i32, message = "gqd,gkd->gqk"}> : () -> ()
    %cst_23 = arith.constant dense<0.000000e+00> : vector<1x16x16xf32>
    %63 = tpu.matmul %58, %60, %cst_23 {dimension_numbers = #tpu.dot_dimension_numbers<[2], [2], [1], [1], [0, 0, 0, 1, 1, 1], [0], [0]>} : vector<1x16x32xbf16>, vector<1x16x32xbf16>, vector<1x16x16xf32> -> vector<1x16x16xf32>
    "tpu.trace_stop"() : () -> ()
    %64 = vector.extract_strided_slice %33 {offsets = [1, 0, 0, 0], sizes = [1, 1, 16, 16], strides = [1, 1, 1, 1]} : vector<8x1x16x16xf32> to vector<1x1x16x16xf32>
    %65 = vector.shape_cast %64 : vector<1x1x16x16xf32> to vector<1x16x16xf32>
    %66 = arith.addf %63, %65 : vector<1x16x16xf32>
    %cst_24 = arith.constant dense<0xFF800000> : vector<1x16xf32>
    %67 = vector.multi_reduction <maximumf>, %66, %cst_24 [2] : vector<1x16x16xf32> to vector<1x16xf32>
    %68 = vector.shape_cast %67 : vector<1x16xf32> to vector<1x16x1xf32>
    %69 = vector.broadcast %68 : vector<1x16x1xf32> to vector<1x16x16xf32>
    %70 = arith.subf %66, %69 : vector<1x16x16xf32>
    %71 = math.exp %70 : vector<1x16x16xf32>
    %cst_25 = arith.constant dense<0.000000e+00> : vector<1x16xf32>
    %72 = vector.multi_reduction <add>, %71, %cst_25 [2] : vector<1x16x16xf32> to vector<1x16xf32>
    %73 = vector.shape_cast %72 : vector<1x16xf32> to vector<1x16x1xf32>
    %74 = tpu.reciprocal %73 {approx = true} : vector<1x16x1xf32> -> vector<1x16x1xf32>
    %75 = vector.broadcast %74 : vector<1x16x1xf32> to vector<1x16x16xf32>
    %76 = arith.mulf %71, %75 : vector<1x16x16xf32>
    %77 = arith.truncf %76 : vector<1x16x16xf32> to vector<1x16x16xbf16>
    "tpu.trace_start"() <{level = 10 : i32, message = "gqk,gkd->gqd"}> : () -> ()
    %cst_26 = arith.constant dense<0.000000e+00> : vector<1x16x32xf32>
    %78 = tpu.matmul %77, %62, %cst_26 {dimension_numbers = #tpu.dot_dimension_numbers<[2], [1], [1], [2], [0, 0, 0, 1, 1, 2], [0], [0]>} : vector<1x16x16xbf16>, vector<1x16x32xbf16>, vector<1x16x32xf32> -> vector<1x16x32xf32>
    "tpu.trace_stop"() : () -> ()
    %79 = vector.shape_cast %78 : vector<1x16x32xf32> to vector<16x32xf32>
    %80 = vector.extract_strided_slice %31 {offsets = [0, 64], sizes = [16, 32], strides = [1, 1]} : vector<16x768xbf16> to vector<16x32xbf16>
    %81 = vector.shape_cast %80 : vector<16x32xbf16> to vector<1x16x32xbf16>
    %82 = vector.extract_strided_slice %31 {offsets = [0, 320], sizes = [16, 32], strides = [1, 1]} : vector<16x768xbf16> to vector<16x32xbf16>
    %83 = vector.shape_cast %82 : vector<16x32xbf16> to vector<1x16x32xbf16>
    %84 = vector.extract_strided_slice %31 {offsets = [0, 576], sizes = [16, 32], strides = [1, 1]} : vector<16x768xbf16> to vector<16x32xbf16>
    %85 = vector.shape_cast %84 : vector<16x32xbf16> to vector<1x16x32xbf16>
    "tpu.trace_start"() <{level = 10 : i32, message = "gqd,gkd->gqk"}> : () -> ()
    %cst_27 = arith.constant dense<0.000000e+00> : vector<1x16x16xf32>
    %86 = tpu.matmul %81, %83, %cst_27 {dimension_numbers = #tpu.dot_dimension_numbers<[2], [2], [1], [1], [0, 0, 0, 1, 1, 1], [0], [0]>} : vector<1x16x32xbf16>, vector<1x16x32xbf16>, vector<1x16x16xf32> -> vector<1x16x16xf32>
    "tpu.trace_stop"() : () -> ()
    %87 = vector.extract_strided_slice %33 {offsets = [2, 0, 0, 0], sizes = [1, 1, 16, 16], strides = [1, 1, 1, 1]} : vector<8x1x16x16xf32> to vector<1x1x16x16xf32>
    %88 = vector.shape_cast %87 : vector<1x1x16x16xf32> to vector<1x16x16xf32>
    %89 = arith.addf %86, %88 : vector<1x16x16xf32>
    %cst_28 = arith.constant dense<0xFF800000> : vector<1x16xf32>
    %90 = vector.multi_reduction <maximumf>, %89, %cst_28 [2] : vector<1x16x16xf32> to vector<1x16xf32>
    %91 = vector.shape_cast %90 : vector<1x16xf32> to vector<1x16x1xf32>
    %92 = vector.broadcast %91 : vector<1x16x1xf32> to vector<1x16x16xf32>
    %93 = arith.subf %89, %92 : vector<1x16x16xf32>
    %94 = math.exp %93 : vector<1x16x16xf32>
    %cst_29 = arith.constant dense<0.000000e+00> : vector<1x16xf32>
    %95 = vector.multi_reduction <add>, %94, %cst_29 [2] : vector<1x16x16xf32> to vector<1x16xf32>
    %96 = vector.shape_cast %95 : vector<1x16xf32> to vector<1x16x1xf32>
    %97 = tpu.reciprocal %96 {approx = true} : vector<1x16x1xf32> -> vector<1x16x1xf32>
    %98 = vector.broadcast %97 : vector<1x16x1xf32> to vector<1x16x16xf32>
    %99 = arith.mulf %94, %98 : vector<1x16x16xf32>
    %100 = arith.truncf %99 : vector<1x16x16xf32> to vector<1x16x16xbf16>
    "tpu.trace_start"() <{level = 10 : i32, message = "gqk,gkd->gqd"}> : () -> ()
    %cst_30 = arith.constant dense<0.000000e+00> : vector<1x16x32xf32>
    %101 = tpu.matmul %100, %85, %cst_30 {dimension_numbers = #tpu.dot_dimension_numbers<[2], [1], [1], [2], [0, 0, 0, 1, 1, 2], [0], [0]>} : vector<1x16x16xbf16>, vector<1x16x32xbf16>, vector<1x16x32xf32> -> vector<1x16x32xf32>
    "tpu.trace_stop"() : () -> ()
    %102 = vector.shape_cast %101 : vector<1x16x32xf32> to vector<16x32xf32>
    %103 = vector.extract_strided_slice %31 {offsets = [0, 96], sizes = [16, 32], strides = [1, 1]} : vector<16x768xbf16> to vector<16x32xbf16>
    %104 = vector.shape_cast %103 : vector<16x32xbf16> to vector<1x16x32xbf16>
    %105 = vector.extract_strided_slice %31 {offsets = [0, 352], sizes = [16, 32], strides = [1, 1]} : vector<16x768xbf16> to vector<16x32xbf16>
    %106 = vector.shape_cast %105 : vector<16x32xbf16> to vector<1x16x32xbf16>
    %107 = vector.extract_strided_slice %31 {offsets = [0, 608], sizes = [16, 32], strides = [1, 1]} : vector<16x768xbf16> to vector<16x32xbf16>
    %108 = vector.shape_cast %107 : vector<16x32xbf16> to vector<1x16x32xbf16>
    "tpu.trace_start"() <{level = 10 : i32, message = "gqd,gkd->gqk"}> : () -> ()
    %cst_31 = arith.constant dense<0.000000e+00> : vector<1x16x16xf32>
    %109 = tpu.matmul %104, %106, %cst_31 {dimension_numbers = #tpu.dot_dimension_numbers<[2], [2], [1], [1], [0, 0, 0, 1, 1, 1], [0], [0]>} : vector<1x16x32xbf16>, vector<1x16x32xbf16>, vector<1x16x16xf32> -> vector<1x16x16xf32>
    "tpu.trace_stop"() : () -> ()
    %110 = vector.extract_strided_slice %33 {offsets = [3, 0, 0, 0], sizes = [1, 1, 16, 16], strides = [1, 1, 1, 1]} : vector<8x1x16x16xf32> to vector<1x1x16x16xf32>
    %111 = vector.shape_cast %110 : vector<1x1x16x16xf32> to vector<1x16x16xf32>
    %112 = arith.addf %109, %111 : vector<1x16x16xf32>
    %cst_32 = arith.constant dense<0xFF800000> : vector<1x16xf32>
    %113 = vector.multi_reduction <maximumf>, %112, %cst_32 [2] : vector<1x16x16xf32> to vector<1x16xf32>
    %114 = vector.shape_cast %113 : vector<1x16xf32> to vector<1x16x1xf32>
    %115 = vector.broadcast %114 : vector<1x16x1xf32> to vector<1x16x16xf32>
    %116 = arith.subf %112, %115 : vector<1x16x16xf32>
    %117 = math.exp %116 : vector<1x16x16xf32>
    %cst_33 = arith.constant dense<0.000000e+00> : vector<1x16xf32>
    %118 = vector.multi_reduction <add>, %117, %cst_33 [2] : vector<1x16x16xf32> to vector<1x16xf32>
    %119 = vector.shape_cast %118 : vector<1x16xf32> to vector<1x16x1xf32>
    %120 = tpu.reciprocal %119 {approx = true} : vector<1x16x1xf32> -> vector<1x16x1xf32>
    %121 = vector.broadcast %120 : vector<1x16x1xf32> to vector<1x16x16xf32>
    %122 = arith.mulf %117, %121 : vector<1x16x16xf32>
    %123 = arith.truncf %122 : vector<1x16x16xf32> to vector<1x16x16xbf16>
    "tpu.trace_start"() <{level = 10 : i32, message = "gqk,gkd->gqd"}> : () -> ()
    %cst_34 = arith.constant dense<0.000000e+00> : vector<1x16x32xf32>
    %124 = tpu.matmul %123, %108, %cst_34 {dimension_numbers = #tpu.dot_dimension_numbers<[2], [1], [1], [2], [0, 0, 0, 1, 1, 2], [0], [0]>} : vector<1x16x16xbf16>, vector<1x16x32xbf16>, vector<1x16x32xf32> -> vector<1x16x32xf32>
    "tpu.trace_stop"() : () -> ()
    %125 = vector.shape_cast %124 : vector<1x16x32xf32> to vector<16x32xf32>
    %126 = vector.extract_strided_slice %31 {offsets = [0, 128], sizes = [16, 32], strides = [1, 1]} : vector<16x768xbf16> to vector<16x32xbf16>
    %127 = vector.shape_cast %126 : vector<16x32xbf16> to vector<1x16x32xbf16>
    %128 = vector.extract_strided_slice %31 {offsets = [0, 384], sizes = [16, 32], strides = [1, 1]} : vector<16x768xbf16> to vector<16x32xbf16>
    %129 = vector.shape_cast %128 : vector<16x32xbf16> to vector<1x16x32xbf16>
    %130 = vector.extract_strided_slice %31 {offsets = [0, 640], sizes = [16, 32], strides = [1, 1]} : vector<16x768xbf16> to vector<16x32xbf16>
    %131 = vector.shape_cast %130 : vector<16x32xbf16> to vector<1x16x32xbf16>
    "tpu.trace_start"() <{level = 10 : i32, message = "gqd,gkd->gqk"}> : () -> ()
    %cst_35 = arith.constant dense<0.000000e+00> : vector<1x16x16xf32>
    %132 = tpu.matmul %127, %129, %cst_35 {dimension_numbers = #tpu.dot_dimension_numbers<[2], [2], [1], [1], [0, 0, 0, 1, 1, 1], [0], [0]>} : vector<1x16x32xbf16>, vector<1x16x32xbf16>, vector<1x16x16xf32> -> vector<1x16x16xf32>
    "tpu.trace_stop"() : () -> ()
    %133 = vector.extract_strided_slice %33 {offsets = [4, 0, 0, 0], sizes = [1, 1, 16, 16], strides = [1, 1, 1, 1]} : vector<8x1x16x16xf32> to vector<1x1x16x16xf32>
    %134 = vector.shape_cast %133 : vector<1x1x16x16xf32> to vector<1x16x16xf32>
    %135 = arith.addf %132, %134 : vector<1x16x16xf32>
    %cst_36 = arith.constant dense<0xFF800000> : vector<1x16xf32>
    %136 = vector.multi_reduction <maximumf>, %135, %cst_36 [2] : vector<1x16x16xf32> to vector<1x16xf32>
    %137 = vector.shape_cast %136 : vector<1x16xf32> to vector<1x16x1xf32>
    %138 = vector.broadcast %137 : vector<1x16x1xf32> to vector<1x16x16xf32>
    %139 = arith.subf %135, %138 : vector<1x16x16xf32>
    %140 = math.exp %139 : vector<1x16x16xf32>
    %cst_37 = arith.constant dense<0.000000e+00> : vector<1x16xf32>
    %141 = vector.multi_reduction <add>, %140, %cst_37 [2] : vector<1x16x16xf32> to vector<1x16xf32>
    %142 = vector.shape_cast %141 : vector<1x16xf32> to vector<1x16x1xf32>
    %143 = tpu.reciprocal %142 {approx = true} : vector<1x16x1xf32> -> vector<1x16x1xf32>
    %144 = vector.broadcast %143 : vector<1x16x1xf32> to vector<1x16x16xf32>
    %145 = arith.mulf %140, %144 : vector<1x16x16xf32>
    %146 = arith.truncf %145 : vector<1x16x16xf32> to vector<1x16x16xbf16>
    "tpu.trace_start"() <{level = 10 : i32, message = "gqk,gkd->gqd"}> : () -> ()
    %cst_38 = arith.constant dense<0.000000e+00> : vector<1x16x32xf32>
    %147 = tpu.matmul %146, %131, %cst_38 {dimension_numbers = #tpu.dot_dimension_numbers<[2], [1], [1], [2], [0, 0, 0, 1, 1, 2], [0], [0]>} : vector<1x16x16xbf16>, vector<1x16x32xbf16>, vector<1x16x32xf32> -> vector<1x16x32xf32>
    "tpu.trace_stop"() : () -> ()
    %148 = vector.shape_cast %147 : vector<1x16x32xf32> to vector<16x32xf32>
    %149 = vector.extract_strided_slice %31 {offsets = [0, 160], sizes = [16, 32], strides = [1, 1]} : vector<16x768xbf16> to vector<16x32xbf16>
    %150 = vector.shape_cast %149 : vector<16x32xbf16> to vector<1x16x32xbf16>
    %151 = vector.extract_strided_slice %31 {offsets = [0, 416], sizes = [16, 32], strides = [1, 1]} : vector<16x768xbf16> to vector<16x32xbf16>
    %152 = vector.shape_cast %151 : vector<16x32xbf16> to vector<1x16x32xbf16>
    %153 = vector.extract_strided_slice %31 {offsets = [0, 672], sizes = [16, 32], strides = [1, 1]} : vector<16x768xbf16> to vector<16x32xbf16>
    %154 = vector.shape_cast %153 : vector<16x32xbf16> to vector<1x16x32xbf16>
    "tpu.trace_start"() <{level = 10 : i32, message = "gqd,gkd->gqk"}> : () -> ()
    %cst_39 = arith.constant dense<0.000000e+00> : vector<1x16x16xf32>
    %155 = tpu.matmul %150, %152, %cst_39 {dimension_numbers = #tpu.dot_dimension_numbers<[2], [2], [1], [1], [0, 0, 0, 1, 1, 1], [0], [0]>} : vector<1x16x32xbf16>, vector<1x16x32xbf16>, vector<1x16x16xf32> -> vector<1x16x16xf32>
    "tpu.trace_stop"() : () -> ()
    %156 = vector.extract_strided_slice %33 {offsets = [5, 0, 0, 0], sizes = [1, 1, 16, 16], strides = [1, 1, 1, 1]} : vector<8x1x16x16xf32> to vector<1x1x16x16xf32>
    %157 = vector.shape_cast %156 : vector<1x1x16x16xf32> to vector<1x16x16xf32>
    %158 = arith.addf %155, %157 : vector<1x16x16xf32>
    %cst_40 = arith.constant dense<0xFF800000> : vector<1x16xf32>
    %159 = vector.multi_reduction <maximumf>, %158, %cst_40 [2] : vector<1x16x16xf32> to vector<1x16xf32>
    %160 = vector.shape_cast %159 : vector<1x16xf32> to vector<1x16x1xf32>
    %161 = vector.broadcast %160 : vector<1x16x1xf32> to vector<1x16x16xf32>
    %162 = arith.subf %158, %161 : vector<1x16x16xf32>
    %163 = math.exp %162 : vector<1x16x16xf32>
    %cst_41 = arith.constant dense<0.000000e+00> : vector<1x16xf32>
    %164 = vector.multi_reduction <add>, %163, %cst_41 [2] : vector<1x16x16xf32> to vector<1x16xf32>
    %165 = vector.shape_cast %164 : vector<1x16xf32> to vector<1x16x1xf32>
    %166 = tpu.reciprocal %165 {approx = true} : vector<1x16x1xf32> -> vector<1x16x1xf32>
    %167 = vector.broadcast %166 : vector<1x16x1xf32> to vector<1x16x16xf32>
    %168 = arith.mulf %163, %167 : vector<1x16x16xf32>
    %169 = arith.truncf %168 : vector<1x16x16xf32> to vector<1x16x16xbf16>
    "tpu.trace_start"() <{level = 10 : i32, message = "gqk,gkd->gqd"}> : () -> ()
    %cst_42 = arith.constant dense<0.000000e+00> : vector<1x16x32xf32>
    %170 = tpu.matmul %169, %154, %cst_42 {dimension_numbers = #tpu.dot_dimension_numbers<[2], [1], [1], [2], [0, 0, 0, 1, 1, 2], [0], [0]>} : vector<1x16x16xbf16>, vector<1x16x32xbf16>, vector<1x16x32xf32> -> vector<1x16x32xf32>
    "tpu.trace_stop"() : () -> ()
    %171 = vector.shape_cast %170 : vector<1x16x32xf32> to vector<16x32xf32>
    %172 = vector.extract_strided_slice %31 {offsets = [0, 192], sizes = [16, 32], strides = [1, 1]} : vector<16x768xbf16> to vector<16x32xbf16>
    %173 = vector.shape_cast %172 : vector<16x32xbf16> to vector<1x16x32xbf16>
    %174 = vector.extract_strided_slice %31 {offsets = [0, 448], sizes = [16, 32], strides = [1, 1]} : vector<16x768xbf16> to vector<16x32xbf16>
    %175 = vector.shape_cast %174 : vector<16x32xbf16> to vector<1x16x32xbf16>
    %176 = vector.extract_strided_slice %31 {offsets = [0, 704], sizes = [16, 32], strides = [1, 1]} : vector<16x768xbf16> to vector<16x32xbf16>
    %177 = vector.shape_cast %176 : vector<16x32xbf16> to vector<1x16x32xbf16>
    "tpu.trace_start"() <{level = 10 : i32, message = "gqd,gkd->gqk"}> : () -> ()
    %cst_43 = arith.constant dense<0.000000e+00> : vector<1x16x16xf32>
    %178 = tpu.matmul %173, %175, %cst_43 {dimension_numbers = #tpu.dot_dimension_numbers<[2], [2], [1], [1], [0, 0, 0, 1, 1, 1], [0], [0]>} : vector<1x16x32xbf16>, vector<1x16x32xbf16>, vector<1x16x16xf32> -> vector<1x16x16xf32>
    "tpu.trace_stop"() : () -> ()
    %179 = vector.extract_strided_slice %33 {offsets = [6, 0, 0, 0], sizes = [1, 1, 16, 16], strides = [1, 1, 1, 1]} : vector<8x1x16x16xf32> to vector<1x1x16x16xf32>
    %180 = vector.shape_cast %179 : vector<1x1x16x16xf32> to vector<1x16x16xf32>
    %181 = arith.addf %178, %180 : vector<1x16x16xf32>
    %cst_44 = arith.constant dense<0xFF800000> : vector<1x16xf32>
    %182 = vector.multi_reduction <maximumf>, %181, %cst_44 [2] : vector<1x16x16xf32> to vector<1x16xf32>
    %183 = vector.shape_cast %182 : vector<1x16xf32> to vector<1x16x1xf32>
    %184 = vector.broadcast %183 : vector<1x16x1xf32> to vector<1x16x16xf32>
    %185 = arith.subf %181, %184 : vector<1x16x16xf32>
    %186 = math.exp %185 : vector<1x16x16xf32>
    %cst_45 = arith.constant dense<0.000000e+00> : vector<1x16xf32>
    %187 = vector.multi_reduction <add>, %186, %cst_45 [2] : vector<1x16x16xf32> to vector<1x16xf32>
    %188 = vector.shape_cast %187 : vector<1x16xf32> to vector<1x16x1xf32>
    %189 = tpu.reciprocal %188 {approx = true} : vector<1x16x1xf32> -> vector<1x16x1xf32>
    %190 = vector.broadcast %189 : vector<1x16x1xf32> to vector<1x16x16xf32>
    %191 = arith.mulf %186, %190 : vector<1x16x16xf32>
    %192 = arith.truncf %191 : vector<1x16x16xf32> to vector<1x16x16xbf16>
    "tpu.trace_start"() <{level = 10 : i32, message = "gqk,gkd->gqd"}> : () -> ()
    %cst_46 = arith.constant dense<0.000000e+00> : vector<1x16x32xf32>
    %193 = tpu.matmul %192, %177, %cst_46 {dimension_numbers = #tpu.dot_dimension_numbers<[2], [1], [1], [2], [0, 0, 0, 1, 1, 2], [0], [0]>} : vector<1x16x16xbf16>, vector<1x16x32xbf16>, vector<1x16x32xf32> -> vector<1x16x32xf32>
    "tpu.trace_stop"() : () -> ()
    %194 = vector.shape_cast %193 : vector<1x16x32xf32> to vector<16x32xf32>
    %195 = vector.extract_strided_slice %31 {offsets = [0, 224], sizes = [16, 32], strides = [1, 1]} : vector<16x768xbf16> to vector<16x32xbf16>
    %196 = vector.shape_cast %195 : vector<16x32xbf16> to vector<1x16x32xbf16>
    %197 = vector.extract_strided_slice %31 {offsets = [0, 480], sizes = [16, 32], strides = [1, 1]} : vector<16x768xbf16> to vector<16x32xbf16>
    %198 = vector.shape_cast %197 : vector<16x32xbf16> to vector<1x16x32xbf16>
    %199 = vector.extract_strided_slice %31 {offsets = [0, 736], sizes = [16, 32], strides = [1, 1]} : vector<16x768xbf16> to vector<16x32xbf16>
    %200 = vector.shape_cast %199 : vector<16x32xbf16> to vector<1x16x32xbf16>
    "tpu.trace_start"() <{level = 10 : i32, message = "gqd,gkd->gqk"}> : () -> ()
    %cst_47 = arith.constant dense<0.000000e+00> : vector<1x16x16xf32>
    %201 = tpu.matmul %196, %198, %cst_47 {dimension_numbers = #tpu.dot_dimension_numbers<[2], [2], [1], [1], [0, 0, 0, 1, 1, 1], [0], [0]>} : vector<1x16x32xbf16>, vector<1x16x32xbf16>, vector<1x16x16xf32> -> vector<1x16x16xf32>
    "tpu.trace_stop"() : () -> ()
    %202 = vector.extract_strided_slice %33 {offsets = [7, 0, 0, 0], sizes = [1, 1, 16, 16], strides = [1, 1, 1, 1]} : vector<8x1x16x16xf32> to vector<1x1x16x16xf32>
    %203 = vector.shape_cast %202 : vector<1x1x16x16xf32> to vector<1x16x16xf32>
    %204 = arith.addf %201, %203 : vector<1x16x16xf32>
    %cst_48 = arith.constant dense<0xFF800000> : vector<1x16xf32>
    %205 = vector.multi_reduction <maximumf>, %204, %cst_48 [2] : vector<1x16x16xf32> to vector<1x16xf32>
    %206 = vector.shape_cast %205 : vector<1x16xf32> to vector<1x16x1xf32>
    %207 = vector.broadcast %206 : vector<1x16x1xf32> to vector<1x16x16xf32>
    %208 = arith.subf %204, %207 : vector<1x16x16xf32>
    %209 = math.exp %208 : vector<1x16x16xf32>
    %cst_49 = arith.constant dense<0.000000e+00> : vector<1x16xf32>
    %210 = vector.multi_reduction <add>, %209, %cst_49 [2] : vector<1x16x16xf32> to vector<1x16xf32>
    %211 = vector.shape_cast %210 : vector<1x16xf32> to vector<1x16x1xf32>
    %212 = tpu.reciprocal %211 {approx = true} : vector<1x16x1xf32> -> vector<1x16x1xf32>
    %213 = vector.broadcast %212 : vector<1x16x1xf32> to vector<1x16x16xf32>
    %214 = arith.mulf %209, %213 : vector<1x16x16xf32>
    %215 = arith.truncf %214 : vector<1x16x16xf32> to vector<1x16x16xbf16>
    "tpu.trace_start"() <{level = 10 : i32, message = "gqk,gkd->gqd"}> : () -> ()
    %cst_50 = arith.constant dense<0.000000e+00> : vector<1x16x32xf32>
    %216 = tpu.matmul %215, %200, %cst_50 {dimension_numbers = #tpu.dot_dimension_numbers<[2], [1], [1], [2], [0, 0, 0, 1, 1, 2], [0], [0]>} : vector<1x16x16xbf16>, vector<1x16x32xbf16>, vector<1x16x32xf32> -> vector<1x16x32xf32>
    "tpu.trace_stop"() : () -> ()
    %217 = vector.shape_cast %216 : vector<1x16x32xf32> to vector<16x32xf32>
    %218 = tpu.concatenate %56, %79, %102, %125, %148, %171, %194, %217 in 1 : vector<16x32xf32>, vector<16x32xf32>, vector<16x32xf32>, vector<16x32xf32>, vector<16x32xf32>, vector<16x32xf32>, vector<16x32xf32>, vector<16x32xf32> -> vector<16x256xf32>
    %219 = arith.truncf %218 : vector<16x256xf32> to vector<16x256xbf16>
    %c0_51 = arith.constant 0 : index
    %c0_52 = arith.constant 0 : index
    %220 = vector.load %arg8[%c0_51, %c0_52] : memref<256x256xbf16, #tpu.memory_space<vmem>>, vector<256x256xbf16>
    %cst_53 = arith.constant dense<0.000000e+00> : vector<16x256xf32>
    %221 = tpu.matmul %219, %220, %cst_53 {dimension_numbers = #tpu.dot_dimension_numbers<[1], [0], [0], [1], [0, 0, 1, 1], [], []>} : vector<16x256xbf16>, vector<256x256xbf16>, vector<16x256xf32> -> vector<16x256xf32>
    %c0_54 = arith.constant 0 : index
    %c0_55 = arith.constant 0 : index
    %222 = vector.load %arg9[%c0_54, %c0_55] : memref<1x256xf32, #tpu.memory_space<vmem>>, vector<1x256xf32>
    %223 = vector.broadcast %222 : vector<1x256xf32> to vector<16x256xf32>
    %224 = arith.addf %221, %223 : vector<16x256xf32>
    %225 = arith.addf %2, %224 : vector<16x256xf32>
    %c0_56 = arith.constant 0 : index
    %c0_57 = arith.constant 0 : index
    %226 = vector.load %arg10[%c0_56, %c0_57] : memref<1x256xf32, #tpu.memory_space<vmem>>, vector<1x256xf32>
    %c0_58 = arith.constant 0 : index
    %c0_59 = arith.constant 0 : index
    %227 = vector.load %arg11[%c0_58, %c0_59] : memref<1x256xf32, #tpu.memory_space<vmem>>, vector<1x256xf32>
    %cst_60 = arith.constant dense<0.000000e+00> : vector<16xf32>
    %228 = vector.multi_reduction <add>, %225, %cst_60 [1] : vector<16x256xf32> to vector<16xf32>
    %229 = vector.shape_cast %228 : vector<16xf32> to vector<16x1xf32>
    %cst_61 = arith.constant 2.560000e+02 : f32
    %230 = vector.broadcast %cst_61 : f32 to vector<16x1xf32>
    %231 = arith.divf %229, %230 : vector<16x1xf32>
    %232 = vector.broadcast %231 : vector<16x1xf32> to vector<16x256xf32>
    %233 = arith.subf %225, %232 : vector<16x256xf32>
    %234 = arith.mulf %233, %233 : vector<16x256xf32>
    %cst_62 = arith.constant dense<0.000000e+00> : vector<16xf32>
    %235 = vector.multi_reduction <add>, %234, %cst_62 [1] : vector<16x256xf32> to vector<16xf32>
    %236 = vector.shape_cast %235 : vector<16xf32> to vector<16x1xf32>
    %cst_63 = arith.constant 2.560000e+02 : f32
    %237 = vector.broadcast %cst_63 : f32 to vector<16x1xf32>
    %238 = arith.divf %236, %237 : vector<16x1xf32>
    %cst_64 = arith.constant 9.99999974E-6 : f32
    %239 = vector.broadcast %cst_64 : f32 to vector<16x1xf32>
    %240 = arith.addf %238, %239 : vector<16x1xf32>
    %241 = math.rsqrt %240 : vector<16x1xf32>
    %242 = vector.broadcast %241 : vector<16x1xf32> to vector<16x256xf32>
    %243 = arith.mulf %233, %242 : vector<16x256xf32>
    %244 = vector.broadcast %226 : vector<1x256xf32> to vector<16x256xf32>
    %245 = arith.mulf %243, %244 : vector<16x256xf32>
    %246 = vector.broadcast %227 : vector<1x256xf32> to vector<16x256xf32>
    %247 = arith.addf %245, %246 : vector<16x256xf32>
    %248 = arith.truncf %247 : vector<16x256xf32> to vector<16x256xbf16>
    %c0_65 = arith.constant 0 : index
    %c0_66 = arith.constant 0 : index
    %249 = vector.load %arg12[%c0_65, %c0_66] : memref<256x1024xbf16, #tpu.memory_space<vmem>>, vector<256x1024xbf16>
    %cst_67 = arith.constant dense<0.000000e+00> : vector<16x1024xf32>
    %250 = tpu.matmul %248, %249, %cst_67 {dimension_numbers = #tpu.dot_dimension_numbers<[1], [0], [0], [1], [0, 0, 1, 1], [], []>} : vector<16x256xbf16>, vector<256x1024xbf16>, vector<16x1024xf32> -> vector<16x1024xf32>
    %c0_68 = arith.constant 0 : index
    %c0_69 = arith.constant 0 : index
    %251 = vector.load %arg13[%c0_68, %c0_69] : memref<1x1024xf32, #tpu.memory_space<vmem>>, vector<1x1024xf32>
    %252 = vector.broadcast %251 : vector<1x1024xf32> to vector<16x1024xf32>
    %253 = arith.addf %250, %252 : vector<16x1024xf32>
    %cst_70 = arith.constant 5.000000e-01 : f32
    %254 = vector.broadcast %cst_70 : f32 to vector<16x1024xf32>
    %255 = arith.mulf %254, %253 : vector<16x1024xf32>
    %cst_71 = arith.constant 4.471500e-02 : f32
    %256 = vector.broadcast %cst_71 : f32 to vector<16x1024xf32>
    %257 = arith.mulf %256, %253 : vector<16x1024xf32>
    %258 = arith.mulf %257, %253 : vector<16x1024xf32>
    %259 = arith.mulf %258, %253 : vector<16x1024xf32>
    %260 = arith.addf %253, %259 : vector<16x1024xf32>
    %cst_72 = arith.constant 0.797884583 : f32
    %261 = vector.broadcast %cst_72 : f32 to vector<16x1024xf32>
    %262 = arith.mulf %261, %260 : vector<16x1024xf32>
    %263 = math.tanh %262 : vector<16x1024xf32>
    %cst_73 = arith.constant 1.000000e+00 : f32
    %264 = vector.broadcast %cst_73 : f32 to vector<16x1024xf32>
    %265 = arith.addf %264, %263 : vector<16x1024xf32>
    %266 = arith.mulf %255, %265 : vector<16x1024xf32>
    %267 = arith.truncf %266 : vector<16x1024xf32> to vector<16x1024xbf16>
    %c0_74 = arith.constant 0 : index
    %c0_75 = arith.constant 0 : index
    %268 = vector.load %arg14[%c0_74, %c0_75] : memref<1024x256xbf16, #tpu.memory_space<vmem>>, vector<1024x256xbf16>
    %cst_76 = arith.constant dense<0.000000e+00> : vector<16x256xf32>
    %269 = tpu.matmul %267, %268, %cst_76 {dimension_numbers = #tpu.dot_dimension_numbers<[1], [0], [0], [1], [0, 0, 1, 1], [], []>} : vector<16x1024xbf16>, vector<1024x256xbf16>, vector<16x256xf32> -> vector<16x256xf32>
    %c0_77 = arith.constant 0 : index
    %c0_78 = arith.constant 0 : index
    %270 = vector.load %arg15[%c0_77, %c0_78] : memref<1x256xf32, #tpu.memory_space<vmem>>, vector<1x256xf32>
    %271 = vector.broadcast %270 : vector<1x256xf32> to vector<16x256xf32>
    %272 = arith.addf %269, %271 : vector<16x256xf32>
    %273 = arith.addf %225, %272 : vector<16x256xf32>
    %274 = arith.truncf %273 : vector<16x256xf32> to vector<16x256xbf16>
    %c0_79 = arith.constant 0 : index
    %c0_80 = arith.constant 0 : index
    %c0_81 = arith.constant 0 : index
    %275 = vector.load %arg16[%c0_79, %c0_80, %c0_81] : memref<1x16x256xbf16, #tpu.memory_space<vmem>>, vector<1x16x256xbf16>
    %276 = vector.shape_cast %275 : vector<1x16x256xbf16> to vector<16x256xbf16>
    %277 = vector.shape_cast %274 : vector<16x256xbf16> to vector<1x16x256xbf16>
    tpu.vector_store %arg16[%c0_79, %c0_80, %c0_81], %277 {strides = array<i32>} : memref<1x16x256xbf16, #tpu.memory_space<vmem>>, vector<1x16x256xbf16>,
    return
  }
  func.func @transform_0(%arg0: i32, %arg1: i32) -> (i32, i32, i32) {
    %c0_i32 = arith.constant 0 : i32
    %c0_i32_0 = arith.constant 0 : i32
    return %arg0, %arg1, %c0_i32 : i32, i32, i32
  }
  func.func @transform_1(%arg0: i32, %arg1: i32) -> (i32, i32) {
    %c0_i32 = arith.constant 0 : i32
    %c0_i32_0 = arith.constant 0 : i32
    %c0_i32_1 = arith.constant 0 : i32
    return %c0_i32, %c0_i32_0 : i32, i32
  }
  func.func @transform_2(%arg0: i32, %arg1: i32) -> (i32, i32) {
    %c0_i32 = arith.constant 0 : i32
    %c0_i32_0 = arith.constant 0 : i32
    %c0_i32_1 = arith.constant 0 : i32
    return %c0_i32, %c0_i32_0 : i32, i32
  }
  func.func @transform_3(%arg0: i32, %arg1: i32) -> (i32, i32) {
    %c0_i32 = arith.constant 0 : i32
    %c0_i32_0 = arith.constant 0 : i32
    %c0_i32_1 = arith.constant 0 : i32
    return %c0_i32, %c0_i32_0 : i32, i32
  }
  func.func @transform_4(%arg0: i32, %arg1: i32) -> (i32, i32) {
    %c0_i32 = arith.constant 0 : i32
    %c0_i32_0 = arith.constant 0 : i32
    %c0_i32_1 = arith.constant 0 : i32
    return %c0_i32, %c0_i32_0 : i32, i32
  }
  func.func @transform_5(%arg0: i32, %arg1: i32) -> (i32, i32, i32, i32) {
    %c0_i32 = arith.constant 0 : i32
    %c0_i32_0 = arith.constant 0 : i32
    %c0_i32_1 = arith.constant 0 : i32
    %c0_i32_2 = arith.constant 0 : i32
    return %c0_i32, %arg1, %c0_i32_0, %c0_i32_1 : i32, i32, i32, i32
  }
  func.func @transform_6(%arg0: i32, %arg1: i32) -> (i32, i32) {
    %c0_i32 = arith.constant 0 : i32
    %c0_i32_0 = arith.constant 0 : i32
    %c0_i32_1 = arith.constant 0 : i32
    return %c0_i32, %c0_i32_0 : i32, i32
  }
  func.func @transform_7(%arg0: i32, %arg1: i32) -> (i32, i32) {
    %c0_i32 = arith.constant 0 : i32
    %c0_i32_0 = arith.constant 0 : i32
    %c0_i32_1 = arith.constant 0 : i32
    return %c0_i32, %c0_i32_0 : i32, i32
  }
  func.func @transform_8(%arg0: i32, %arg1: i32) -> (i32, i32) {
    %c0_i32 = arith.constant 0 : i32
    %c0_i32_0 = arith.constant 0 : i32
    %c0_i32_1 = arith.constant 0 : i32
    return %c0_i32, %c0_i32_0 : i32, i32
  }
  func.func @transform_9(%arg0: i32, %arg1: i32) -> (i32, i32) {
    %c0_i32 = arith.constant 0 : i32
    %c0_i32_0 = arith.constant 0 : i32
    %c0_i32_1 = arith.constant 0 : i32
    return %c0_i32, %c0_i32_0 : i32, i32
  }
  func.func @transform_10(%arg0: i32, %arg1: i32) -> (i32, i32) {
    %c0_i32 = arith.constant 0 : i32
    %c0_i32_0 = arith.constant 0 : i32
    %c0_i32_1 = arith.constant 0 : i32
    return %c0_i32, %c0_i32_0 : i32, i32
  }
  func.func @transform_11(%arg0: i32, %arg1: i32) -> (i32, i32) {
    %c0_i32 = arith.constant 0 : i32
    %c0_i32_0 = arith.constant 0 : i32
    %c0_i32_1 = arith.constant 0 : i32
    return %c0_i32, %c0_i32_0 : i32, i32
  }
  func.func @transform_12(%arg0: i32, %arg1: i32) -> (i32, i32) {
    %c0_i32 = arith.constant 0 : i32
    %c0_i32_0 = arith.constant 0 : i32
    %c0_i32_1 = arith.constant 0 : i32
    return %c0_i32, %c0_i32_0 : i32, i32
  }
  func.func @transform_13(%arg0: i32, %arg1: i32) -> (i32, i32) {
    %c0_i32 = arith.constant 0 : i32
    %c0_i32_0 = arith.constant 0 : i32
    %c0_i32_1 = arith.constant 0 : i32
    return %c0_i32, %c0_i32_0 : i32, i32
  }
  func.func @transform_14(%arg0: i32, %arg1: i32) -> (i32, i32, i32) {
    %c0_i32 = arith.constant 0 : i32
    %c0_i32_0 = arith.constant 0 : i32
    return %arg0, %arg1, %c0_i32 : i32, i32, i32
  }
}

module attributes {stable_mosaic.version = 11 : i64} {
  func.func @_head_kernel(%arg0: i32, %arg1: memref<1x16x256xbf16, #tpu.memory_space<vmem>>, %arg2: memref<1x256xf32, #tpu.memory_space<vmem>>, %arg3: memref<1x256xf32, #tpu.memory_space<vmem>>, %arg4: memref<256x128xbf16, #tpu.memory_space<vmem>>, %arg5: memref<1x128xf32, #tpu.memory_space<vmem>>, %arg6: memref<1x1x128xf32, #tpu.memory_space<vmem>>) attributes {dimension_semantics = [#tpu.dimension_semantics<parallel>], iteration_bounds = array<i64: 2>, scalar_prefetch = 0 : i64, scratch_operands = 0 : i64, tpu.core_type = #tpu.core_type<tc>, window_params = [{transform_indices = @transform_0, window_bounds = array<i64: 1, 16, 256>}, {pipeline_mode = #tpu.pipeline_mode<synchronous>, transform_indices = @transform_1, window_bounds = array<i64: 1, 256>}, {pipeline_mode = #tpu.pipeline_mode<synchronous>, transform_indices = @transform_2, window_bounds = array<i64: 1, 256>}, {pipeline_mode = #tpu.pipeline_mode<synchronous>, transform_indices = @transform_3, window_bounds = array<i64: 256, 128>}, {pipeline_mode = #tpu.pipeline_mode<synchronous>, transform_indices = @transform_4, window_bounds = array<i64: 1, 128>}, {transform_indices = @transform_5, window_bounds = array<i64: 1, 1, 128>}]} {
    %c0 = arith.constant 0 : index
    %c0_0 = arith.constant 0 : index
    %c0_1 = arith.constant 0 : index
    %0 = vector.load %arg1[%c0, %c0_0, %c0_1] : memref<1x16x256xbf16, #tpu.memory_space<vmem>>, vector<1x16x256xbf16>
    %1 = vector.shape_cast %0 : vector<1x16x256xbf16> to vector<16x256xbf16>
    %c0_2 = arith.constant 0 : index
    %c0_3 = arith.constant 0 : index
    %2 = vector.load %arg2[%c0_2, %c0_3] : memref<1x256xf32, #tpu.memory_space<vmem>>, vector<1x256xf32>
    %c0_4 = arith.constant 0 : index
    %c0_5 = arith.constant 0 : index
    %3 = vector.load %arg3[%c0_4, %c0_5] : memref<1x256xf32, #tpu.memory_space<vmem>>, vector<1x256xf32>
    %4 = arith.extf %1 : vector<16x256xbf16> to vector<16x256xf32>
    %cst = arith.constant dense<0.000000e+00> : vector<16xf32>
    %5 = vector.multi_reduction <add>, %4, %cst [1] : vector<16x256xf32> to vector<16xf32>
    %6 = vector.shape_cast %5 : vector<16xf32> to vector<16x1xf32>
    %cst_6 = arith.constant 2.560000e+02 : f32
    %7 = vector.broadcast %cst_6 : f32 to vector<16x1xf32>
    %8 = arith.divf %6, %7 : vector<16x1xf32>
    %9 = vector.broadcast %8 : vector<16x1xf32> to vector<16x256xf32>
    %10 = arith.subf %4, %9 : vector<16x256xf32>
    %11 = arith.mulf %10, %10 : vector<16x256xf32>
    %cst_7 = arith.constant dense<0.000000e+00> : vector<16xf32>
    %12 = vector.multi_reduction <add>, %11, %cst_7 [1] : vector<16x256xf32> to vector<16xf32>
    %13 = vector.shape_cast %12 : vector<16xf32> to vector<16x1xf32>
    %cst_8 = arith.constant 2.560000e+02 : f32
    %14 = vector.broadcast %cst_8 : f32 to vector<16x1xf32>
    %15 = arith.divf %13, %14 : vector<16x1xf32>
    %cst_9 = arith.constant 9.99999974E-6 : f32
    %16 = vector.broadcast %cst_9 : f32 to vector<16x1xf32>
    %17 = arith.addf %15, %16 : vector<16x1xf32>
    %18 = math.rsqrt %17 : vector<16x1xf32>
    %19 = vector.broadcast %18 : vector<16x1xf32> to vector<16x256xf32>
    %20 = arith.mulf %10, %19 : vector<16x256xf32>
    %21 = vector.broadcast %2 : vector<1x256xf32> to vector<16x256xf32>
    %22 = arith.mulf %20, %21 : vector<16x256xf32>
    %23 = vector.broadcast %3 : vector<1x256xf32> to vector<16x256xf32>
    %24 = arith.addf %22, %23 : vector<16x256xf32>
    %cst_10 = arith.constant dense<0.000000e+00> : vector<256xf32>
    %25 = vector.multi_reduction <add>, %24, %cst_10 [0] : vector<16x256xf32> to vector<256xf32>
    %26 = vector.shape_cast %25 : vector<256xf32> to vector<1x256xf32>
    %cst_11 = arith.constant 1.600000e+01 : f32
    %27 = vector.broadcast %cst_11 : f32 to vector<1x256xf32>
    %28 = arith.divf %26, %27 : vector<1x256xf32>
    %29 = arith.truncf %28 : vector<1x256xf32> to vector<1x256xbf16>
    %c0_12 = arith.constant 0 : index
    %c0_13 = arith.constant 0 : index
    %30 = vector.load %arg4[%c0_12, %c0_13] : memref<256x128xbf16, #tpu.memory_space<vmem>>, vector<256x128xbf16>
    %cst_14 = arith.constant dense<0.000000e+00> : vector<1x128xf32>
    %31 = tpu.matmul %29, %30, %cst_14 {dimension_numbers = #tpu.dot_dimension_numbers<[1], [0], [0], [1], [0, 0, 1, 1], [], []>} : vector<1x256xbf16>, vector<256x128xbf16>, vector<1x128xf32> -> vector<1x128xf32>
    %c0_15 = arith.constant 0 : index
    %c0_16 = arith.constant 0 : index
    %32 = vector.load %arg5[%c0_15, %c0_16] : memref<1x128xf32, #tpu.memory_space<vmem>>, vector<1x128xf32>
    %33 = arith.addf %31, %32 : vector<1x128xf32>
    %c0_17 = arith.constant 0 : index
    %c0_18 = arith.constant 0 : index
    %c0_19 = arith.constant 0 : index
    %34 = vector.load %arg6[%c0_17, %c0_18, %c0_19] : memref<1x1x128xf32, #tpu.memory_space<vmem>>, vector<1x1x128xf32>
    %35 = vector.shape_cast %34 : vector<1x1x128xf32> to vector<1x128xf32>
    %36 = vector.shape_cast %33 : vector<1x128xf32> to vector<1x1x128xf32>
    tpu.vector_store %arg6[%c0_17, %c0_18, %c0_19], %36 {strides = array<i32>} : memref<1x1x128xf32, #tpu.memory_space<vmem>>, vector<1x1x128xf32>,
    return
  }
  func.func @transform_0(%arg0: i32) -> (i32, i32, i32) {
    %c0_i32 = arith.constant 0 : i32
    %c0_i32_0 = arith.constant 0 : i32
    %c0_i32_1 = arith.constant 0 : i32
    return %arg0, %c0_i32, %c0_i32_0 : i32, i32, i32
  }
  func.func @transform_1(%arg0: i32) -> (i32, i32) {
    %c0_i32 = arith.constant 0 : i32
    %c0_i32_0 = arith.constant 0 : i32
    %c0_i32_1 = arith.constant 0 : i32
    return %c0_i32, %c0_i32_0 : i32, i32
  }
  func.func @transform_2(%arg0: i32) -> (i32, i32) {
    %c0_i32 = arith.constant 0 : i32
    %c0_i32_0 = arith.constant 0 : i32
    %c0_i32_1 = arith.constant 0 : i32
    return %c0_i32, %c0_i32_0 : i32, i32
  }
  func.func @transform_3(%arg0: i32) -> (i32, i32) {
    %c0_i32 = arith.constant 0 : i32
    %c0_i32_0 = arith.constant 0 : i32
    %c0_i32_1 = arith.constant 0 : i32
    return %c0_i32, %c0_i32_0 : i32, i32
  }
  func.func @transform_4(%arg0: i32) -> (i32, i32) {
    %c0_i32 = arith.constant 0 : i32
    %c0_i32_0 = arith.constant 0 : i32
    %c0_i32_1 = arith.constant 0 : i32
    return %c0_i32, %c0_i32_0 : i32, i32
  }
  func.func @transform_5(%arg0: i32) -> (i32, i32, i32) {
    %c0_i32 = arith.constant 0 : i32
    %c0_i32_0 = arith.constant 0 : i32
    %c0_i32_1 = arith.constant 0 : i32
    return %arg0, %c0_i32, %c0_i32_0 : i32, i32, i32
  }
}

</mosaic_0001>

<bundles_post_ra>
// kernel: swin_forward.7
= control target key start
LH: loop header
LB: loop body
LE: loop exit
PB: predicated region body
PF: predicated region fallthrough
CT: control target
= control target key end

     0   :  { %s715_s18 = smov 0   ;;  %s793_s0 = inlined_call_operand.vmem [shape: f32[2,64,48], index: 0, kind: input, shape index: {}]   ;;  %s794_s1 = inlined_call_operand.vmem [shape: bf16[48,128], index: 1, kind: input, shape index: {}]   ;;  %s795_s2 = inlined_call_operand.vmem [shape: f32[1,128], index: 2, kind: input, shape index: {}]   ;;  %s796_s3 = inlined_call_operand.vmem [shape: f32[1,128], index: 3, kind: input, shape index: {}]   ;;  %s797_s4 = inlined_call_operand.vmem [shape: f32[1,128], index: 4, kind: input, shape index: {}]   ;;  %s798_s5 = inlined_call_operand.vmem [shape: bf16[2,64,128], index: 5, kind: output, shape index: {}]  }
   0x1 LB: > { %s561_s19 = sadd.s32 4294967295, %s683_s18   ;;  %p565_p0 = scmp.ge.s32.totalorder %s683_s18, 1  ;;  %s683_s18 = sphi %s715_s18, %s15_s18  }
   0x2   : > { %p187_p1 = scmp.lt.s32.totalorder %s683_s18, 3 }
   0x4   : > { %p188_p2 = pnand %p565_p0, %p187_p1 }
   0x5   : > { %v658_v0 = vld [vmem:[%s794_s1] sm:$0xff] (!%p188_p2)   ;;  %p215_p3 = scmp.lt.s32.totalorder (!%p188_p2), %s561_s19, 1  ;;  %v659_v1 = vld [vmem:[%s794_s1 + $0x8] sm:$0xff] (!%p188_p2)   ;;  %v660_v2 = vld [vmem:[%s794_s1 + $0x10] sm:$0xff] (!%p188_p2)   ;;  %vm269_vm0 = vcmask (!%p188_p2), 392192  }
   0x6   : > { %191 = sbr.rel (%p188_p2) target bundleno = 565 (0x235), region = 40  ;;  %630 = vmatprep.subr.bf16.mxu0 (!%p188_p2), %v658_v0  ;;  %644 = vmatprep.subr.bf16.mxu1 (!%p188_p2), %v658_v0  ;;  %v570_v15 = vld [vmem:[%s795_s2] ss:$0 sm:$0xff] (!%p188_p2) }
   0x7   : > { %631 = vmatpush3.bf16.msra.mxu0 (!%p188_p2), %v658_v0  ;;  %647 = vmatpush3.bf16.msra.mxu1 (!%p188_p2), %v658_v0 }
   0x8   : > { %632 = vmatprep.subr.bf16.mxu0 (!%p188_p2), %v659_v1  ;;  %645 = vmatprep.subr.bf16.mxu1 (!%p188_p2), %v659_v1 }
   0xb   : > { %633 = vmatpush3.bf16.msra.mxu0 (!%p188_p2), %v659_v1  ;;  %648 = vmatpush3.bf16.msra.mxu1 (!%p188_p2), %v659_v1 }
   0xc   : > { %634 = vmatprep.subr.bf16.mxu0 (!%p188_p2), %v660_v2  ;;  %646 = vmatprep.subr.bf16.mxu1 (!%p188_p2), %v660_v2 }
   0xd   : > { %s800_s19 = smov (!%p215_p3, %s561_s19), 1 }
   0xe   : > { %s590_s26 = sshll.u32 %s800_s19, 6  ;;  %s591_s11 = sshll.u32 %s800_s19, 5 }
   0xf   : > { %s219_s29 = scalar_lea.vmem %s793_s0, %s590_s26  ;;  %635 = vmatpush3.bf16.msra.mxu0 %v660_v2  ;;  %649 = vmatpush3.bf16.msra.mxu1 %v660_v2  ;;  %s224_s14 = scalar_lea.vmem %s798_s5, %s591_s11 }
  0x10   : > { %v226_v3 = vld [vmem:[%s219_s29] sm:$0xff]  ;;  %v227_v4 = vld [vmem:[%s219_s29 + $0x8] sm:$0xff]  ;;  %v228_v5 = vld [vmem:[%s219_s29 + $0x10] sm:$0xff] }
  0x11   : > { %v234_v6 = vpack.c.bf16 %v227_v4, %v226_v3  ;;  %v229_v7 = vld [vmem:[%s219_s29 + $0x18] sm:$0xff]  ;;  %v230_v8 = vld [vmem:[%s219_s29 + $0x20] sm:$0xff]  ;;  %v231_v9 = vld [vmem:[%s219_s29 + $0x28] sm:$0xff] }
  0x12   : > { %v236_v10 = vpack.c.bf16 %v231_v9, %v230_v8  ;;  %v232_v11 = vld [vmem:[%s219_s29 + $0x30] sm:$0xff]  ;;  %v233_v12 = vld [vmem:[%s219_s29 + $0x38] sm:$0xff]  ;;  %v235_v13 = vpack.c.bf16 %v229_v7, %v228_v5 }
  0x13   : > { %636 = vmatprep.mubr.msk.bf16.mxu0 %vm269_vm0, %v234_v6  ;;  %v237_v14 = vpack.c.bf16 %v233_v12, %v232_v11 }
  0x14   : > { %640 = vmatprep.mubr.msk.bf16.mxu1 %vm269_vm0, %v236_v10  ;;  %637 = vmatmul.mubr.msk.bf16.vlgmr.msra.gmra.mrb[0].mxu0 %vm269_vm0, %v235_v13 }
  0x15   : > { %641 = vmatmul.mubr.msk.bf16.vlgmr.msra.gmra.mrb[0].mxu1 %vm269_vm0, %v237_v14 }
  0xe7   : > { %v638_v16 = vpop.f32.mrb[0].mxu0 }
  0xe8   : > { %v642_v17 = vpop.f32.mrb[0].mxu1  ;;  %v325_v18 = vadd.f32 %v638_v16, %v570_v15  ;;  %v316_v19 = vpop.f32.mrb[1].mxu0 }
  0xe9   : > { %v332_v20 = vpop.f32.mrb[1].mxu1  ;;  %v317_v21 = vadd.f32 %v570_v15, %v316_v19  ;;  %v639_v22 = vpop.f32.mrb[2].mxu0  ;;  %v341_v31 = vadd.f32 %v642_v17, %v570_v15 }
  0xea   : > { %v643_v23 = vpop.f32.mrb[2].mxu1  ;;  %353 = vadd.xlane.f32.xlu1 %v325_v18  ;;  %v319_v24 = vpop.f32.mrb[3].mxu0  ;;  %v333_v26 = vadd.f32 %v570_v15, %v332_v20  ;;  %v328_v27 = vadd.f32 %v639_v22, %v570_v15 }
  0xeb   : > { %v335_v25 = vpop.f32.mrb[3].mxu1  ;;  %349 = vadd.xlane.f32.xlu0 %v317_v21  ;;  %v320_v29 = vadd.f32 %v570_v15, %v319_v24  ;;  %v344_v30 = vadd.f32 %v643_v23, %v570_v15  ;;  %v578_v23 = vld [vmem:[%s796_s3] ss:$0 sm:$0xff] }
  0xec   : > { %v336_v28 = vadd.f32 %v570_v15, %v335_v25 }
  0xee   : > { %355 = vadd.xlane.f32.xlu1 %v328_v27 }
  0xef   : > { %357 = vadd.xlane.f32.xlu0 %v333_v26 }
  0xf2   : > { %359 = vadd.xlane.f32.xlu1 %v336_v28 }
  0xf3   : > { %351 = vadd.xlane.f32.xlu0 %v320_v29 }
  0xf6   : > { %363 = vadd.xlane.f32.xlu1 %v344_v30 }
  0xf7   : > { %361 = vadd.xlane.f32.xlu0 %v341_v31 }
 0x177   : > { %v354_v32 = vpop.xlane.xlu1 %353 }
 0x178   : > { %v368_v33 = vmul.f32 0.0078125, %v354_v32  ;;  %v350_v34 = vpop.xlane.xlu0 %349 }
 0x179   : > { %v366_v35 = vmul.f32 0.0078125, %v350_v34 }
 0x17a   : > { %v376_v36 = vsub.f32 %v325_v18, %v368_v33 }
 0x17b   : > { %v356_v37 = vpop.xlane.xlu1 %355  ;;  %v745_v38 = vsub.f32 %v317_v21, %v366_v35 }
 0x17c   : > { %v369_v39 = vmul.f32 0.0078125, %v356_v37  ;;  %v358_v40 = vpop.xlane.xlu0 %357  ;;  %v384_v41 = vmul.f32 %v376_v36, %v376_v36 }
 0x17d   : > { %v370_v42 = vmul.f32 0.0078125, %v358_v40  ;;  %v382_v48 = vmul.f32 %v745_v38, %v745_v38 }
 0x17e   : > { %v747_v43 = vsub.f32 %v328_v27, %v369_v39  ;;  %394 = vadd.xlane.f32.xlu0 %v384_v41 }
 0x17f   : > { %v360_v44 = vpop.xlane.xlu1 %359  ;;  %v749_v45 = vsub.f32 %v333_v26, %v370_v42 }
 0x180   : > { %v352_v46 = vpop.xlane.xlu0 %351  ;;  %v385_v47 = vmul.f32 %v747_v43, %v747_v43  ;;  %v371_v49 = vmul.f32 0.0078125, %v360_v44 }
 0x181   : > { %v367_v50 = vmul.f32 0.0078125, %v352_v46  ;;  %v386_v54 = vmul.f32 %v749_v45, %v749_v45 }
 0x182   : > { %396 = vadd.xlane.f32.xlu1 %v385_v47  ;;  %390 = vadd.xlane.f32.xlu0 %v382_v48  ;;  %v759_v55 = vsub.f32 %v336_v28, %v371_v49 }
 0x183   : > { %v755_v51 = vsub.f32 %v320_v29, %v367_v50  ;;  %v364_v52 = vpop.xlane.xlu1 %363 }
 0x184   : > { %v362_v53 = vpop.xlane.xlu0 %361  ;;  %v373_v56 = vmul.f32 0.0078125, %v364_v52  ;;  %v387_v61 = vmul.f32 %v759_v55, %v759_v55 }
 0x185   : > { %v372_v57 = vmul.f32 0.0078125, %v362_v53  ;;  %v383_v58 = vmul.f32 %v755_v51, %v755_v51 }
 0x186   : > { %398 = vadd.xlane.f32.xlu0 %v386_v54  ;;  %v765_v60 = vsub.f32 %v344_v30, %v373_v56 }
 0x187   : > { %v763_v59 = vsub.f32 %v341_v31, %v372_v57  ;;  %392 = vadd.xlane.f32.xlu1 %v383_v58  ;;  %v579_v31 = vld [vmem:[%s797_s4] ss:$0 sm:$0xff] }
 0x188   : > { %v389_v63 = vmul.f32 %v765_v60, %v765_v60 }
 0x189   : > { %v388_v62 = vmul.f32 %v763_v59, %v763_v59 }
 0x18b   : > { %400 = vadd.xlane.f32.xlu1 %v387_v61  ;;  %402 = vadd.xlane.f32.xlu0 %v388_v62 }
 0x18f   : > { %404 = vadd.xlane.f32.xlu1 %v389_v63 }
 0x20b   : > { %v395_v0 = vpop.xlane.xlu0 %394 }
 0x20c   : > { %v408_v1 = vmul.f32 0.0078125, %v395_v0 }
 0x20e   : > { %v416_v2 = vadd.f32 1e-05, %v408_v1 }
 0x20f   : > { %v397_v3 = vpop.xlane.xlu1 %396  ;;  %v391_v4 = vpop.xlane.xlu0 %390 }
 0x210   : > { %661 = vrsqrt.f32 %v416_v2  ;;  %v409_v5 = vmul.f32 0.0078125, %v397_v3  ;;  %v406_v6 = vmul.f32 0.0078125, %v391_v4 }
 0x212   : > { %v417_v7 = vadd.f32 1e-05, %v409_v5  ;;  %v414_v8 = vadd.f32 1e-05, %v406_v6 }
 0x213   : > { %v399_v9 = vpop.xlane.xlu0 %398 }
 0x214   : > { %663 = vrsqrt.f32 %v417_v7  ;;  %v410_v10 = vmul.f32 0.0078125, %v399_v9  ;;  %v393_v11 = vpop.xlane.xlu1 %392 }
 0x215   : > { %665 = vrsqrt.f32 %v414_v8  ;;  %v407_v12 = vmul.f32 0.0078125, %v393_v11 }
 0x216   : > { %v418_v13 = vadd.f32 1e-05, %v410_v10 }
 0x217   : > { %v415_v14 = vadd.f32 1e-05, %v407_v12 }
 0x218   : > { %667 = vrsqrt.f32 %v418_v13  ;;  %v401_v15 = vpop.xlane.xlu1 %400  ;;  %v403_v16 = vpop.xlane.xlu0 %402 }
 0x219   : > { %669 = vrsqrt.f32 %v415_v14  ;;  %v411_v17 = vmul.f32 0.0078125, %v401_v15  ;;  %v412_v18 = vmul.f32 0.0078125, %v403_v16 }
 0x21a   : > { %v662_v19 = vpop.eup %661 }
 0x21b   : > { %v432_v20 = vmul.f32 %v662_v19, %v376_v36  ;;  %v419_v21 = vadd.f32 1e-05, %v411_v17  ;;  %v420_v22 = vadd.f32 1e-05, %v412_v18 }
 0x21c   : > { %v405_v24 = vpop.xlane.xlu1 %404 }
 0x21d   : > { %671 = vrsqrt.f32 %v419_v21  ;;  %v413_v25 = vmul.f32 0.0078125, %v405_v24  ;;  %v446_v28 = vmul.f32 %v578_v23, %v432_v20 }
 0x21e   : > { %v664_v26 = vpop.eup %663  ;;  %673 = vrsqrt.f32 %v420_v22 }
 0x21f   : > { %v666_v27 = vpop.eup %665  ;;  %v433_v29 = vmul.f32 %v664_v26, %v747_v43  ;;  %v421_v30 = vadd.f32 1e-05, %v413_v25  ;;  %v460_v36 = vadd.f32 %v579_v31, %v446_v28 }
 0x220   : > { %v430_v32 = vmul.f32 %v666_v27, %v745_v38 }
 0x221   : > { %v447_v33 = vmul.f32 %v578_v23, %v433_v29  ;;  %675 = vrsqrt.f32 %v421_v30 }
 0x222   : > { %v668_v34 = vpop.eup %667  ;;  %v444_v39 = vmul.f32 %v578_v23, %v430_v32 }
 0x223   : > { %v670_v35 = vpop.eup %669  ;;  %v461_v37 = vadd.f32 %v579_v31, %v447_v33  ;;  %v434_v40 = vmul.f32 %v668_v34, %v749_v45 }
 0x224   : > { %v431_v41 = vmul.f32 %v670_v35, %v755_v51  ;;  %v458_v46 = vadd.f32 %v579_v31, %v444_v39 }
 0x225   : > { %v608_v42 = vpack.c.bf16 %v461_v37, %v460_v36  ;;  %v448_v47 = vmul.f32 %v578_v23, %v434_v40 }
 0x226   : > { %v445_v43 = vmul.f32 %v578_v23, %v431_v41 }
 0x227   : > { %v672_v44 = vpop.eup %671  ;;  %620 = vst [vmem:[%s224_s14 + $0x8] sm:$0xff] %v608_v42   ;;  %v462_v56 = vadd.f32 %v579_v31, %v448_v47 }
 0x228   : > { %v674_v38 = vpop.eup %673  ;;  %v459_v48 = vadd.f32 %v579_v31, %v445_v43  ;;  %v435_v49 = vmul.f32 %v672_v44, %v759_v55 }
 0x229   : > { %v436_v50 = vmul.f32 %v674_v38, %v763_v59 }
 0x22a   : > { %v603_v52 = vpack.c.bf16 %v459_v48, %v458_v46  ;;  %v449_v53 = vmul.f32 %v578_v23, %v435_v49 }
 0x22b   : > { %v676_v54 = vpop.eup %675  ;;  %v450_v57 = vmul.f32 %v578_v23, %v436_v50 }
 0x22c   : > { %604 = vst [vmem:[%s224_s14] sm:$0xff] %v603_v52   ;;  %v463_v45 = vadd.f32 %v579_v31, %v449_v53  ;;  %v437_v51 = vmul.f32 %v676_v54, %v765_v60 }
 0x22d   : > { %v464_v62 = vadd.f32 %v579_v31, %v450_v57 }
 0x22e   : > { %v613_v58 = vpack.c.bf16 %v463_v45, %v462_v56  ;;  %v451_v61 = vmul.f32 %v578_v23, %v437_v51 }
 0x230   : > { %621 = vst [vmem:[%s224_s14 + $0x10] sm:$0xff] %v613_v58   ;;  %v465_v63 = vadd.f32 %v579_v31, %v451_v61 }
 0x232   : > { %v618_v0 = vpack.c.bf16 %v465_v63, %v464_v62 }
 0x234   : > { %622 = vst [vmem:[%s224_s14 + $0x18] sm:$0xff] %v618_v0  }
 0x235 PF: > { %s15_s18 = sadd.s32 1, %s683_s18  }
 0x236   : > { %p12_p4 = scmp.ge.s32.totalorder %s15_s18, 4  }
 0x238   :  { %14 = sbr.rel (!%p12_p4) target bundleno = 1 (0x1), region = 70 }

// kernel: swin_forward.10
= control target key start
LH: loop header
LB: loop body
LE: loop exit
PB: predicated region body
PF: predicated region fallthrough
CT: control target
= control target key end

     0   :  { %s1092_s15 = smov 0   ;;  %s1399_s0 = inlined_call_operand.vmem [shape: bf16[2,16,512], index: 0, kind: input, shape index: {}]   ;;  %s1400_s1 = inlined_call_operand.vmem [shape: f32[1,512], index: 1, kind: input, shape index: {}]   ;;  %s1401_s2 = inlined_call_operand.vmem [shape: f32[1,512], index: 2, kind: input, shape index: {}]   ;;  %s1402_s3 = inlined_call_operand.vmem [shape: bf16[512,256], index: 3, kind: input, shape index: {}]   ;;  %s1403_s4 = inlined_call_operand.vmem [shape: bf16[2,16,256], index: 4, kind: output, shape index: {}]  }
   0x1 LB: > { %s866_s16 = sadd.s32 4294967295, %s1065_s15   ;;  %p870_p0 = scmp.ge.s32.totalorder %s1065_s15, 1  ;;  %s1065_s15 = sphi %s1092_s15, %s14_s15  }
   0x2   : > { %p162_p1 = scmp.lt.s32.totalorder %s1065_s15, 3 }
   0x4   : > { %p163_p2 = pnand %p870_p0, %p162_p1 }
   0x5   : > { %p188_p3 = scmp.lt.s32.totalorder (!%p163_p2), %s866_s16, 1  ;;  %v959_v18 = vld [vmem:[%s1402_s3 + $0x4] ss:$8 sps:$4 sm:$0xff] (!%p163_p2)   ;;  %v963_v20 = vld [vmem:[%s1402_s3] ss:$8 sps:$4 sm:$0xff] (!%p163_p2)  }
   0x6   : > { %166 = sbr.rel (%p163_p2) target bundleno = 569 (0x239), region = 36  ;;  %v961_v19 = vld [vmem:[%s1402_s3 + $0x104] ss:$8 sps:$4 sm:$0xff] (!%p163_p2)   ;;  %v964_v21 = vld [vmem:[%s1402_s3 + $0x100] ss:$8 sps:$4 sm:$0xff] (!%p163_p2)   ;;  %711 = vmatprep.subr.bf16.mxu1 (!%p163_p2), %v959_v18 }
   0x7   : > { %v965_v22 = vld [vmem:[%s1402_s3 + $0x14] ss:$8 sps:$4 sm:$0xff] (!%p163_p2)   ;;  %754 = vmatprep.subr.bf16.mxu0 (!%p163_p2), %v961_v19  ;;  %712 = vmatpush1.bf16.msra.mxu1 (!%p163_p2), %v963_v20  ;;  %v969_v24 = vld [vmem:[%s1402_s3 + $0x10] ss:$8 sps:$4 sm:$0xff] (!%p163_p2)   ;;  %v971_v26 = vld [vmem:[%s1402_s3 + $0x24] ss:$8 sps:$4 sm:$0xff] (!%p163_p2)  }
   0x8   : > { %v967_v23 = vld [vmem:[%s1402_s3 + $0x114] ss:$8 sps:$4 sm:$0xff] (!%p163_p2)   ;;  %755 = vmatpush1.bf16.msra.mxu0 (!%p163_p2), %v964_v21  ;;  %v970_v25 = vld [vmem:[%s1402_s3 + $0x110] ss:$8 sps:$4 sm:$0xff] (!%p163_p2)   ;;  %713 = vmatprep.subr.bf16.mxu1 (!%p163_p2), %v965_v22  ;;  %v973_v27 = vld [vmem:[%s1402_s3 + $0x124] ss:$8 sps:$4 sm:$0xff] (!%p163_p2)  }
   0x9   : > { %756 = vmatprep.subr.bf16.mxu0 (!%p163_p2), %v967_v23  ;;  %v975_v28 = vld [vmem:[%s1402_s3 + $0x20] ss:$8 sps:$4 sm:$0xff] (!%p163_p2)   ;;  %v977_v30 = vld [vmem:[%s1402_s3 + $0x34] ss:$8 sps:$4 sm:$0xff] (!%p163_p2)   ;;  %v981_v32 = vld [vmem:[%s1402_s3 + $0x30] ss:$8 sps:$4 sm:$0xff] (!%p163_p2)  }
   0xa   : > { %v976_v29 = vld [vmem:[%s1402_s3 + $0x120] ss:$8 sps:$4 sm:$0xff] (!%p163_p2)   ;;  %v979_v31 = vld [vmem:[%s1402_s3 + $0x134] ss:$8 sps:$4 sm:$0xff] (!%p163_p2)   ;;  %v982_v33 = vld [vmem:[%s1402_s3 + $0x130] ss:$8 sps:$4 sm:$0xff] (!%p163_p2)  }
   0xb   : > { %714 = vmatpush1.bf16.msra.mxu1 (!%p163_p2), %v969_v24  ;;  %v983_v34 = vld [vmem:[%s1402_s3 + $0x44] ss:$8 sps:$4 sm:$0xff] (!%p163_p2)   ;;  %v987_v36 = vld [vmem:[%s1402_s3 + $0x40] ss:$8 sps:$4 sm:$0xff] (!%p163_p2)   ;;  %v989_v38 = vld [vmem:[%s1402_s3 + $0x54] ss:$8 sps:$4 sm:$0xff] (!%p163_p2)  }
   0xc   : > { %757 = vmatpush1.bf16.msra.mxu0 (!%p163_p2), %v970_v25  ;;  %715 = vmatprep.subr.bf16.mxu1 (!%p163_p2), %v971_v26  ;;  %v985_v35 = vld [vmem:[%s1402_s3 + $0x144] ss:$8 sps:$4 sm:$0xff] (!%p163_p2)   ;;  %v988_v37 = vld [vmem:[%s1402_s3 + $0x140] ss:$8 sps:$4 sm:$0xff] (!%p163_p2)   ;;  %v991_v39 = vld [vmem:[%s1402_s3 + $0x154] ss:$8 sps:$4 sm:$0xff] (!%p163_p2)  }
   0xd   : > { %s1405_s16 = smov (!%p188_p3, %s866_s16), 1  ;;  %758 = vmatprep.subr.bf16.mxu0 %v973_v27  ;;  %v993_v40 = vld [vmem:[%s1402_s3 + $0x50] ss:$8 sps:$4 sm:$0xff]   ;;  %v995_v42 = vld [vmem:[%s1402_s3 + $0x64] ss:$8 sps:$4 sm:$0xff]  }
   0xe   : > { %s943_s17 = sshll.u32 %s1405_s16, 5  ;;  %v994_v41 = vld [vmem:[%s1402_s3 + $0x150] ss:$8 sps:$4 sm:$0xff]   ;;  %v997_v43 = vld [vmem:[%s1402_s3 + $0x164] ss:$8 sps:$4 sm:$0xff]   ;;  %s944_s7 = sshll.u32 %s1405_s16, 4 }
   0xf   : > { %s192_s20 = scalar_lea.vmem %s1399_s0, %s943_s17  ;;  %716 = vmatpush1.bf16.msra.mxu1 %v975_v28  ;;  %v999_v44 = vld [vmem:[%s1402_s3 + $0x60] ss:$8 sps:$4 sm:$0xff]   ;;  %v1001_v46 = vld [vmem:[%s1402_s3 + $0x74] ss:$8 sps:$4 sm:$0xff]   ;;  %v1005_v48 = vld [vmem:[%s1402_s3 + $0x70] ss:$8 sps:$4 sm:$0xff]   ;;  %s197_s10 = scalar_lea.vmem %s1403_s4, %s944_s7 }
  0x10   : > { %v1106_v0 = vld [vmem:[%s192_s20] sm:$0xff]  ;;  %v1108_v1 = vld [vmem:[%s192_s20 + $0x8] sm:$0xff]  ;;  %v1110_v2 = vld [vmem:[%s192_s20 + $0x10] sm:$0xff]  ;;  %759 = vmatpush1.bf16.msra.mxu0 %v976_v29  ;;  %717 = vmatprep.subr.bf16.mxu1 %v977_v30 }
  0x11   : > { %v204_v3 = vunpack.c.l.bf16 %v1106_v0  ;;  %v205_v4 = vunpack.c.h.bf16 %v1106_v0  ;;  %v206_v5 = vunpack.c.l.bf16 %v1108_v1  ;;  %v1115_v6 = vld [vmem:[%s192_s20 + $0x18] sm:$0xff]  ;;  %v208_v7 = vunpack.c.l.bf16 %v1110_v2  ;;  %760 = vmatprep.subr.bf16.mxu0 %v979_v31  ;;  %v1000_v45 = vld [vmem:[%s1402_s3 + $0x160] ss:$8 sps:$4 sm:$0xff]   ;;  %v1007_v50 = vld [vmem:[%s1402_s3 + $0x84] ss:$8 sps:$4 sm:$0xff]  }
  0x12   : > { %v209_v8 = vunpack.c.h.bf16 %v1110_v2  ;;  %v210_v9 = vunpack.c.l.bf16 %v1115_v6  ;;  %v207_v10 = vunpack.c.h.bf16 %v1108_v1  ;;  %v211_v14 = vunpack.c.h.bf16 %v1115_v6  ;;  %v1003_v47 = vld [vmem:[%s1402_s3 + $0x174] ss:$8 sps:$4 sm:$0xff]   ;;  %v1006_v49 = vld [vmem:[%s1402_s3 + $0x170] ss:$8 sps:$4 sm:$0xff]   ;;  %v1009_v51 = vld [vmem:[%s1402_s3 + $0x184] ss:$8 sps:$4 sm:$0xff]  }
  0x13   : > { %v212_v11 = vadd.f32 %v205_v4, %v204_v3  ;;  %718 = vmatpush1.bf16.msra.mxu1 %v981_v32  ;;  %v1011_v52 = vld [vmem:[%s1402_s3 + $0x80] ss:$8 sps:$4 sm:$0xff]   ;;  %v1013_v6 = vld [vmem:[%s1402_s3 + $0x94] ss:$8 sps:$4 sm:$0xff]   ;;  %v1017_v18 = vld [vmem:[%s1402_s3 + $0x90] ss:$8 sps:$4 sm:$0xff]  }
  0x14   : > { %v217_v12 = vadd.f32 %v209_v8, %v208_v7  ;;  %761 = vmatpush1.bf16.msra.mxu0 %v982_v33  ;;  %719 = vmatprep.subr.bf16.mxu1 %v983_v34  ;;  %v1012_v53 = vld [vmem:[%s1402_s3 + $0x180] ss:$8 sps:$4 sm:$0xff]   ;;  %v1018_v19 = vld [vmem:[%s1402_s3 + $0x190] ss:$8 sps:$4 sm:$0xff]   ;;  %v1019_v20 = vld [vmem:[%s1402_s3 + $0xa4] ss:$8 sps:$4 sm:$0xff]  }
  0x15   : > { %v213_v13 = vadd.f32 %v212_v11, %v206_v5  ;;  %762 = vmatprep.subr.bf16.mxu0 %v985_v35  ;;  %v1021_v21 = vld [vmem:[%s1402_s3 + $0x1a4] ss:$8 sps:$4 sm:$0xff]   ;;  %v1023_v22 = vld [vmem:[%s1402_s3 + $0xa0] ss:$8 sps:$4 sm:$0xff]   ;;  %v1025_v24 = vld [vmem:[%s1402_s3 + $0xb4] ss:$8 sps:$4 sm:$0xff]  }
  0x16   : > { %v218_v15 = vadd.f32 %v217_v12, %v210_v9  ;;  %v1024_v23 = vld [vmem:[%s1402_s3 + $0x1a0] ss:$8 sps:$4 sm:$0xff]   ;;  %v1027_v25 = vld [vmem:[%s1402_s3 + $0x1b4] ss:$8 sps:$4 sm:$0xff]   ;;  %v1029_v26 = vld [vmem:[%s1402_s3 + $0xb0] ss:$8 sps:$4 sm:$0xff]  }
  0x17   : > { %v214_v16 = vadd.f32 %v213_v13, %v207_v10  ;;  %720 = vmatpush1.bf16.msra.mxu1 %v987_v36  ;;  %v1030_v27 = vld [vmem:[%s1402_s3 + $0x1b0] ss:$8 sps:$4 sm:$0xff]   ;;  %v1031_v28 = vld [vmem:[%s1402_s3 + $0xc4] ss:$8 sps:$4 sm:$0xff]   ;;  %v1035_v30 = vld [vmem:[%s1402_s3 + $0xc0] ss:$8 sps:$4 sm:$0xff]  }
  0x18   : > { %v219_v17 = vadd.f32 %v218_v15, %v211_v14  ;;  %763 = vmatpush1.bf16.msra.mxu0 %v988_v37  ;;  %721 = vmatprep.subr.bf16.mxu1 %v989_v38  ;;  %v1033_v29 = vld [vmem:[%s1402_s3 + $0x1c4] ss:$8 sps:$4 sm:$0xff]   ;;  %v1036_v31 = vld [vmem:[%s1402_s3 + $0x1c0] ss:$8 sps:$4 sm:$0xff]   ;;  %v1037_v32 = vld [vmem:[%s1402_s3 + $0xd4] ss:$8 sps:$4 sm:$0xff]  }
  0x19   : > { %215 = vadd.xlane.f32.xlu0 %v214_v16  ;;  %764 = vmatprep.subr.bf16.mxu0 %v991_v39  ;;  %v1039_v33 = vld [vmem:[%s1402_s3 + $0x1d4] ss:$8 sps:$4 sm:$0xff]   ;;  %v1041_v34 = vld [vmem:[%s1402_s3 + $0xd0] ss:$8 sps:$4 sm:$0xff]   ;;  %v1043_v36 = vld [vmem:[%s1402_s3 + $0xe4] ss:$8 sps:$4 sm:$0xff]  }
  0x1a   : > { %v1042_v35 = vld [vmem:[%s1402_s3 + $0x1d0] ss:$8 sps:$4 sm:$0xff]   ;;  %v1045_v37 = vld [vmem:[%s1402_s3 + $0x1e4] ss:$8 sps:$4 sm:$0xff]   ;;  %v1047_v38 = vld [vmem:[%s1402_s3 + $0xe0] ss:$8 sps:$4 sm:$0xff]  }
  0x1b   : > { %722 = vmatpush1.bf16.msra.mxu1 %v993_v40  ;;  %v1048_v39 = vld [vmem:[%s1402_s3 + $0x1e0] ss:$8 sps:$4 sm:$0xff]   ;;  %v1049_v40 = vld [vmem:[%s1402_s3 + $0xf4] ss:$8 sps:$4 sm:$0xff]  }
  0x1c   : > { %765 = vmatpush1.bf16.msra.mxu0 %v994_v41  ;;  %723 = vmatprep.subr.bf16.mxu1 %v995_v42  ;;  %v1051_v41 = vld [vmem:[%s1402_s3 + $0x1f4] ss:$8 sps:$4 sm:$0xff]   ;;  %v1053_v42 = vld [vmem:[%s1402_s3 + $0xf0] ss:$8 sps:$4 sm:$0xff]  }
  0x1d   : > { %220 = vadd.xlane.f32.xlu0 %v219_v17  ;;  %766 = vmatprep.subr.bf16.mxu0 %v997_v43  ;;  %v1054_v43 = vld [vmem:[%s1402_s3 + $0x1f0] ss:$8 sps:$4 sm:$0xff]  }
  0x1f   : > { %724 = vmatpush1.bf16.msra.mxu1 %v999_v44 }
  0x20   : > { %767 = vmatpush1.bf16.msra.mxu0 %v1000_v45  ;;  %725 = vmatprep.subr.bf16.mxu1 %v1001_v46 }
  0x21   : > { %768 = vmatprep.subr.bf16.mxu0 %v1003_v47 }
  0x23   : > { %726 = vmatpush1.bf16.msra.mxu1 %v1005_v48  ;;  %v266_v48 = vlaneseq }
  0x24   : > { %769 = vmatpush1.bf16.msra.mxu0 %v1006_v49  ;;  %727 = vmatprep.subr.bf16.mxu1 %v1007_v50 }
  0x25   : > { %770 = vmatprep.subr.bf16.mxu0 %v1009_v51  ;;  %v267_v51 = vshrl.u32 %v266_v48, 7 }
  0x27   : > { %728 = vmatpush1.bf16.msra.mxu1 %v1011_v52  ;;  %v272_v52 = vsub.s32 1, %v267_v51 }
  0x28   : > { %771 = vmatpush1.bf16.msra.mxu0 %v1012_v53  ;;  %729 = vmatprep.subr.bf16.mxu1 %v1013_v6  ;;  %v280_v53 = vsub.s32 3, %v267_v51 }
  0x2b   : > { %730 = vmatpush1.bf16.msra.mxu1 %v1017_v18 }
  0x2c   : > { %731 = vmatprep.subr.bf16.mxu1 %v1019_v20 }
  0x2f   : > { %732 = vmatpush1.bf16.msra.mxu1 %v1023_v22 }
  0x30   : > { %733 = vmatprep.subr.bf16.mxu1 %v1025_v24 }
  0x33   : > { %734 = vmatpush1.bf16.msra.mxu1 %v1029_v26 }
  0x34   : > { %735 = vmatprep.subr.bf16.mxu1 %v1031_v28 }
  0x37   : > { %736 = vmatpush1.bf16.msra.mxu1 %v1035_v30 }
  0x38   : > { %737 = vmatprep.subr.bf16.mxu1 %v1037_v32 }
  0x3b   : > { %738 = vmatpush1.bf16.msra.mxu1 %v1041_v34 }
  0x3c   : > { %739 = vmatprep.subr.bf16.mxu1 %v1043_v36 }
  0x3f   : > { %740 = vmatpush1.bf16.msra.mxu1 %v1047_v38 }
  0x40   : > { %741 = vmatprep.subr.bf16.mxu1 %v1049_v40 }
  0x43   : > { %742 = vmatpush1.bf16.msra.mxu1 %v1053_v42 }
  0xa6   : > { %v216_v54 = vpop.xlane.xlu0 %215 }
  0xa7   : > { %v223_v55 = vmul.f32 0.001953125, %v216_v54  ;;  %v202_v54 = vld [vmem:[%s1400_s1] sm:$0xf] }
  0xa9   : > { %v1248_v56 = vsub.f32 %v204_v3, %v223_v55  ;;  %v1252_v57 = vsub.f32 %v205_v4, %v223_v55  ;;  %v1256_v58 = vsub.f32 %v206_v5, %v223_v55  ;;  %v1260_v60 = vsub.f32 %v207_v10, %v223_v55 }
  0xaa   : > { %v221_v59 = vpop.xlane.xlu0 %220  ;;  %v268_v55 = vsub.s32 0, %v267_v51 }
  0xab   : > { %v224_v61 = vmul.f32 0.001953125, %v221_v59  ;;  %v233_v62 = vmul.f32 %v1248_v56, %v1248_v56  ;;  %v234_v63 = vmul.f32 %v1252_v57, %v1252_v57  ;;  %v235_v0 = vmul.f32 %v1256_v58, %v1256_v58 }
  0xac   : > { %v236_v10 = vmul.f32 %v1260_v60, %v1260_v60  ;;  %v276_v59 = vsub.s32 2, %v267_v51 }
  0xad   : > { %v1270_v3 = vsub.f32 %v208_v7, %v224_v61  ;;  %v1274_v4 = vsub.f32 %v209_v8, %v224_v61  ;;  %v241_v1 = vadd.f32 %v234_v63, %v233_v62  ;;  %v1278_v5 = vsub.f32 %v210_v9, %v224_v61  ;;  %v203_v62 = vld [vmem:[%s1401_s2] sm:$0xf] }
  0xae   : > { %v1284_v12 = vsub.f32 %v211_v14, %v224_v61  ;;  %v1015_v14 = vld [vmem:[%s1402_s3 + $0x194] ss:$8 sps:$4 sm:$0xff]  }
  0xaf   : > { %v242_v11 = vadd.f32 %v241_v1, %v235_v0  ;;  %v237_v7 = vmul.f32 %v1270_v3, %v1270_v3  ;;  %v238_v2 = vmul.f32 %v1274_v4, %v1274_v4  ;;  %v239_v13 = vmul.f32 %v1278_v5, %v1278_v5  ;;  %772 = vmatprep.subr.bf16.mxu0 %v1015_v14 }
  0xb0   : > { %v240_v15 = vmul.f32 %v1284_v12, %v1284_v12  ;;  %773 = vmatpush1.bf16.msra.mxu0 %v1018_v19  ;;  %v273_v0 = vrot.slane %v202_v54, %v272_v52 }
  0xb1   : > { %v243_v8 = vadd.f32 %v242_v11, %v236_v10  ;;  %v246_v9 = vadd.f32 %v238_v2, %v237_v7  ;;  %774 = vmatprep.subr.bf16.mxu0 %v1021_v21  ;;  %v281_v10 = vrot.slane %v202_v54, %v280_v53  ;;  %v269_v7 = vrot.slane %v202_v54, %v268_v55 }
  0xb3   : > { %244 = vadd.xlane.f32.xlu1 %v243_v8  ;;  %v247_v16 = vadd.f32 %v246_v9, %v239_v13  ;;  %v277_v8 = vrot.slane %v202_v54, %v276_v59  ;;  %v302_v9 = vrot.slane %v203_v62, %v272_v52 }
  0xb4   : > { %775 = vmatpush1.bf16.msra.mxu0 %v1024_v23 }
  0xb5   : > { %v248_v17 = vadd.f32 %v247_v16, %v240_v15  ;;  %776 = vmatprep.subr.bf16.mxu0 %v1027_v25  ;;  %v310_v15 = vrot.slane %v203_v62, %v280_v53  ;;  %v298_v16 = vrot.slane %v203_v62, %v268_v55 }
  0xb7   : > { %249 = vadd.xlane.f32.xlu1 %v248_v17  ;;  %v306_v17 = vrot.slane %v203_v62, %v276_v59 }
  0xb8   : > { %777 = vmatpush1.bf16.msra.mxu0 %v1030_v27 }
  0xb9   : > { %778 = vmatprep.subr.bf16.mxu0 %v1033_v29 }
  0xbc   : > { %779 = vmatpush1.bf16.msra.mxu0 %v1036_v31 }
  0xbd   : > { %780 = vmatprep.subr.bf16.mxu0 %v1039_v33 }
  0xc0   : > { %781 = vmatpush1.bf16.msra.mxu0 %v1042_v35 }
  0xc1   : > { %782 = vmatprep.subr.bf16.mxu0 %v1045_v37 }
  0xc4   : > { %783 = vmatpush1.bf16.msra.mxu0 %v1048_v39 }
  0xc5   : > { %784 = vmatprep.subr.bf16.mxu0 %v1051_v41 }
  0xc8   : > { %785 = vmatpush1.bf16.msra.mxu0 %v1054_v43 }
 0x140   : > { %v245_v44 = vpop.xlane.xlu1 %244 }
 0x141   : > { %v251_v45 = vmul.f32 0.001953125, %v245_v44 }
 0x143   : > { %v253_v46 = vadd.f32 1e-05, %v251_v45 }
 0x144   : > { %v250_v47 = vpop.xlane.xlu1 %249 }
 0x145   : > { %1055 = vrsqrt.f32 %v253_v46  ;;  %v252_v49 = vmul.f32 0.001953125, %v250_v47 }
 0x147   : > { %v254_v50 = vadd.f32 1e-05, %v252_v49 }
 0x149   : > { %1057 = vrsqrt.f32 %v254_v50 }
 0x14f   : > { %v1056_v61 = vpop.eup %1055 }
 0x150   : > { %v258_v63 = vmul.f32 %v1056_v61, %v1252_v57  ;;  %v260_v1 = vmul.f32 %v1056_v61, %v1260_v60  ;;  %v257_v11 = vmul.f32 %v1056_v61, %v1248_v56  ;;  %v259_v2 = vmul.f32 %v1056_v61, %v1256_v58 }
 0x152   : > { %v287_v14 = vmul.f32 %v273_v0, %v258_v63  ;;  %v289_v18 = vmul.f32 %v281_v10, %v260_v1  ;;  %v286_v19 = vmul.f32 %v269_v7, %v257_v11  ;;  %v288_v20 = vmul.f32 %v277_v8, %v259_v2 }
 0x153   : > { %v1058_v13 = vpop.eup %1057 }
 0x154   : > { %v262_v6 = vmul.f32 %v1058_v13, %v1274_v4  ;;  %v264_v57 = vmul.f32 %v1058_v13, %v1284_v12  ;;  %v261_v60 = vmul.f32 %v1058_v13, %v1270_v3  ;;  %v263_v56 = vmul.f32 %v1058_v13, %v1278_v5 }
 0x155   : > { %v316_v24 = vadd.f32 %v302_v9, %v287_v14  ;;  %v318_v26 = vadd.f32 %v310_v15, %v289_v18  ;;  %v315_v4 = vadd.f32 %v298_v16, %v286_v19  ;;  %v317_v29 = vadd.f32 %v306_v17, %v288_v20 }
 0x156   : > { %v291_v21 = vmul.f32 %v273_v0, %v262_v6  ;;  %v293_v58 = vmul.f32 %v281_v10, %v264_v57  ;;  %v290_v22 = vmul.f32 %v269_v7, %v261_v60  ;;  %v292_v23 = vmul.f32 %v277_v8, %v263_v56 }
 0x158   : > { %v320_v25 = vadd.f32 %v302_v9, %v291_v21  ;;  %v322_v27 = vadd.f32 %v310_v15, %v293_v58  ;;  %v319_v28 = vadd.f32 %v298_v16, %v290_v22  ;;  %v321_v12 = vadd.f32 %v306_v17, %v292_v23 }
 0x15a   : > { %v324_v30 = vpack.c.bf16 %v320_v25, %v316_v24  ;;  %v326_v31 = vpack.c.bf16 %v322_v27, %v318_v26  ;;  %v323_v3 = vpack.c.bf16 %v319_v28, %v315_v4  ;;  %v325_v32 = vpack.c.bf16 %v321_v12, %v317_v29 }
 0x15c   : > { %743 = vmatprep.mubr.bf16.mxu1 %v324_v30  ;;  %786 = vmatprep.mubr.bf16.mxu0 %v326_v31 }
 0x15d   : > { %744 = vmatmul.mubr.bf16.vlgmr.msra.gmra.mrb[0].mxu1 %v323_v3  ;;  %787 = vmatmul.mubr.bf16.vlgmr.msra.gmra.mrb[0].mxu0 %v325_v32 }
 0x230   : > { %v745_v5 = vpop.f32.mrb[0].mxu1  ;;  %v788_v33 = vpop.f32.mrb[0].mxu0 }
 0x231   : > { %v789_v34 = vadd.f32 %v788_v33, %v745_v5  ;;  %v747_v35 = vpop.f32.mrb[1].mxu1  ;;  %v790_v36 = vpop.f32.mrb[1].mxu0 }
 0x232   : > { %v791_v37 = vadd.f32 %v790_v36, %v747_v35  ;;  %v749_v38 = vpop.f32.mrb[2].mxu1  ;;  %v792_v39 = vpop.f32.mrb[2].mxu0 }
 0x233   : > { %v793_v40 = vadd.f32 %v792_v39, %v749_v38  ;;  %v751_v41 = vpop.f32.mrb[3].mxu1  ;;  %v794_v42 = vpop.f32.mrb[3].mxu0 }
 0x234   : > { %v945_v43 = vpack.c.bf16 %v791_v37, %v789_v34  ;;  %v795_v44 = vadd.f32 %v794_v42, %v751_v41 }
 0x236   : > { %809 = vst [vmem:[%s197_s10] sm:$0xff] %v945_v43  ;;  %v946_v45 = vpack.c.bf16 %v795_v44, %v793_v40 }
 0x238   : > { %810 = vst [vmem:[%s197_s10 + $0x8] sm:$0xff] %v946_v45 }
 0x239 PF: > { %s14_s15 = sadd.s32 1, %s1065_s15  }
 0x23a   : > { %p11_p4 = scmp.ge.s32.totalorder %s14_s15, 4  }
 0x23c   :  { %13 = sbr.rel (!%p11_p4) target bundleno = 1 (0x1), region = 66 }

// kernel: swin_forward.8
= control target key start
LH: loop header
LB: loop body
LE: loop exit
PB: predicated region body
PF: predicated region fallthrough
CT: control target
= control target key end

     0   :  { %s4668_s0 = inlined_call_operand.vmem [shape: bf16[2,64,128], index: 0, kind: input, shape index: {}]   ;;  %s4669_s1 = inlined_call_operand.vmem [shape: f32[1,128], index: 1, kind: input, shape index: {}]   ;;  %s4670_s2 = inlined_call_operand.vmem [shape: f32[1,128], index: 2, kind: input, shape index: {}]   ;;  %s4671_s3 = inlined_call_operand.vmem [shape: bf16[128,384], index: 3, kind: input, shape index: {}]   ;;  %s4672_s4 = inlined_call_operand.vmem [shape: f32[1,384], index: 4, kind: input, shape index: {}]   ;;  %s4673_s5 = inlined_call_operand.vmem [shape: bf16[4,2,32,32], index: 5, kind: input, shape index: {}]   ;;  %s4674_s6 = inlined_call_operand.vmem [shape: bf16[128,128], index: 6, kind: input, shape index: {}]   ;;  %s4675_s7 = inlined_call_operand.vmem [shape: f32[1,128], index: 7, kind: input, shape index: {}]   ;;  %s4676_s8 = inlined_call_operand.vmem [shape: f32[1,128], index: 8, kind: input, shape index: {}]   ;;  %s4677_s9 = inlined_call_operand.vmem [shape: f32[1,128], index: 9, kind: input, shape index: {}]   ;;  %s4678_s10 = inlined_call_operand.vmem [shape: bf16[128,512], index: 10, kind: input, shape index: {}]   ;;  %s4679_s11 = inlined_call_operand.vmem [shape: f32[1,512], index: 11, kind: input, shape index: {}]   ;;  %s4680_s12 = inlined_call_operand.vmem [shape: bf16[512,128], index: 12, kind: input, shape index: {}]   ;;  %s4681_s13 = inlined_call_operand.vmem [shape: f32[1,128], index: 13, kind: input, shape index: {}]   ;;  %s4682_s14 = inlined_call_operand.vmem [shape: bf16[2,64,128], index: 14, kind: output, shape index: {}]  }
   0x1   :  { %4685 = sst [smem:[#allocation4_spill]] %s4668_s0 }
   0x2   :  { %4686 = sst [smem:[#allocation5_spill]] %s4682_s14 }
   0x3   :  { %s3822_s29 = smov 0   ;;  %s3824_s30 = smov 0  }
   0x4   :  { %s3826_s15 = smov 0   ;;  %s3828_s16 = smov 0  }
   0x5   :  { %s3830_s17 = smov 0   ;;  %s3832_s18 = smov 0  }
   0x6   :  { %s3834_s19 = smov 0  }
   0x7 LB: > { %s33_s20 = sadd.s32 1, %s3733_s17  ;;  %s36_s21 = sadd.s32 1, %s3737_s18  ;;  %s3741_s19 = sphi %s3834_s19, %s24_s19   ;;  %s3737_s18 = sphi %s3832_s18, %s4697_s18   ;;  %s3733_s17 = sphi %s3830_s17, %s4696_s17   ;;  %s3729_s16 = sphi %s3828_s16, %s4695_s16   ;;  %s3725_s15 = sphi %s3826_s15, %s4694_s15   ;;  %s3721_s30 = sphi %s3824_s30, %s4693_s30   ;;  %s3717_s29 = sphi %s3822_s29, %s4692_s29  }
   0x8   : > { %p34_p0 = scmp.ge.s32.totalorder %s33_s20, 2  ;;  %s155_s22 = sadd.s32 1, %s3721_s30 }
   0x9   : > { %p162_p1 = scmp.ne.s32.totalorder %s3721_s30, %s3717_s29  ;;  %p163_p2 = scmp.eq.s32.totalorder %s3741_s19, 0 }
   0xa   : > { %s4699_s20 = smov (%p34_p0, %s33_s20), 0  ;;  %s4701_s21 = smov (!%p34_p0, %s36_s21), %s3737_s18 }
   0xb   : > { %4687 = sst [smem:[#allocation3_spill]] %s4699_s20  ;;  %s152_s23 = ssub.s32 %s3733_s17, %s4699_s20 }
   0xc   : > { %p164_p3 = por %p163_p2, %p162_p1  ;;  %p38_p4 = scmp.ge.s32.totalorder %s4701_s21, 2 }
   0xd   : > { %p153_p5 = scmp.eq.s32.totalorder %s152_s23, 0  ;;  %p2945_p6 = scmp.ge.s32.totalorder %s3741_s19, 4 }
   0xe   : > { %s4703_s21 = smov (%p38_p4, %s4701_s21), 0 }
   0xf   : > { %s3871_s24 = scalar_select %p153_p5, %s3721_s30, %s155_s22  }
  0x10   : > { %420 = sbr.rel (%p2945_p6) target bundleno = 31 (0x1f), region = 64 }
  0x17   : > { %436 = sbr.rel (!%p164_p3) target bundleno = 31 (0x1f), region = 72  ;;  %s438_s25 = sand.u32 (%p164_p3), 1, %s3721_s30  }
  0x18   : > { %s3081_s26 = sshll.u32 (%p164_p3), %s3733_s17, 4  ;;  %s2946_s27 = sshll.u32 (%p164_p3), %s438_s25, 6 }
  0x19   : > { %s443_s20 = scalar_lea.vmem (%p164_p3), %s4673_s5, %s3081_s26  ;;  %s440_s23 = scalar_lea.vmem (%p164_p3), [#allocation2], %s2946_s27 }
  0x1a   : > { %v459_v0 = vld [vmem:[%s443_s20] sm:$0xff] (%p164_p3)   ;;  %v463_v1 = vld [vmem:[%s443_s20 + $0x8] sm:$0xff] (%p164_p3)  }
  0x1b   : > { %v467_v2 = vld [vmem:[%s443_s20 + $0x20] sm:$0xff] (%p164_p3)   ;;  %460 = vst [vmem:[%s440_s23] sm:$0xff] (%p164_p3), %v459_v0   ;;  %464 = vst [vmem:[%s440_s23 + $0x8] sm:$0xff] (%p164_p3), %v463_v1   ;;  %v471_v3 = vld [vmem:[%s443_s20 + $0x28] sm:$0xff] (%p164_p3)  }
  0x1c   : > { %468 = vst [vmem:[%s440_s23 + $0x10] sm:$0xff] (%p164_p3), %v467_v2   ;;  %v475_v4 = vld [vmem:[%s443_s20 + $0x40] sm:$0xff] (%p164_p3)   ;;  %v479_v5 = vld [vmem:[%s443_s20 + $0x48] sm:$0xff] (%p164_p3)   ;;  %472 = vst [vmem:[%s440_s23 + $0x18] sm:$0xff] (%p164_p3), %v471_v3  }
  0x1d   : > { %476 = vst [vmem:[%s440_s23 + $0x20] sm:$0xff] (%p164_p3), %v475_v4   ;;  %480 = vst [vmem:[%s440_s23 + $0x28] sm:$0xff] (%p164_p3), %v479_v5   ;;  %v483_v6 = vld [vmem:[%s443_s20 + $0x60] sm:$0xff] (%p164_p3)   ;;  %v487_v7 = vld [vmem:[%s443_s20 + $0x68] sm:$0xff] (%p164_p3)  }
  0x1e   : > { %484 = vst [vmem:[%s440_s23 + $0x30] sm:$0xff] %v483_v6   ;;  %488 = vst [vmem:[%s440_s23 + $0x38] sm:$0xff] %v487_v7  }
  0x1f PF: > { %p2949_p7 = scmp.ge.s32.totalorder %s3741_s19, 1  ;;  %p544_p8 = scmp.lt.s32.totalorder %s3741_s19, 5 }
  0x21   : > { %p545_p9 = pnand %p2949_p7, %p544_p8 }
  0x22   : > { %s2951_s14 = sshll.u32 (!%p545_p9), %s3725_s15, 2  ;;  %p610_p10 = scmp.lt.s32.totalorder (!%p545_p9), %s3729_s16, 1  ;;  %v3455_v14 = vld [vmem:[%s4671_s3 + $0x4] ss:$12 sps:$4 sm:$0xff] (!%p545_p9)   ;;  %v3457_v15 = vld [vmem:[%s4671_s3] ss:$12 sps:$4 sm:$0xff] (!%p545_p9)  }
  0x23   : > { %548 = sbr.rel (%p545_p9) target bundleno = 3635 (0xe33), region = 113  ;;  %p612_p11 = scmp.lt.s32.totalorder (!%p545_p9), %s2951_s14, 7  ;;  %v3458_v16 = vld [vmem:[%s4671_s3 + $0x1c] ss:$12 sps:$4 sm:$0xff] (!%p545_p9)   ;;  %884 = vmatprep.subr.bf16.mxu0 (!%p545_p9), %v3455_v14  ;;  %v3461_v34 = vld [vmem:[%s4671_s3 + $0x18] ss:$12 sps:$4 sm:$0xff] (!%p545_p9)  }
  0x24   : > { %s4688_s0 = sld [smem:[#allocation4_spill]] (!%p545_p9)  ;;  %v3460_v17 = vld [vmem:[%s4671_s3 + $0x8] ss:$12 sps:$4 sm:$0xff] (!%p545_p9)   ;;  %885 = vmatpush1.bf16.msra.mxu0 (!%p545_p9), %v3457_v15  ;;  %v3464_v36 = vld [vmem:[%s4671_s3 + $0x20] ss:$12 sps:$4 sm:$0xff] (!%p545_p9)   ;;  %v3743_v49 = vmov (!%p545_p9), 0  }
  0x25   : > { %3253 = vmatprep.subr.bf16.mxu1 (!%p545_p9), %v3460_v17  ;;  %886 = vmatprep.subr.bf16.mxu0 (!%p545_p9), %v3458_v16  ;;  %v3462_v35 = vld [vmem:[%s4671_s3 + $0x34] ss:$12 sps:$4 sm:$0xff] (!%p545_p9)   ;;  %v3465_v37 = vld [vmem:[%s4671_s3 + $0x30] ss:$12 sps:$4 sm:$0xff] (!%p545_p9)   ;;  %v3466_v38 = vld [vmem:[%s4671_s3 + $0x4c] ss:$12 sps:$4 sm:$0xff] (!%p545_p9)  }
  0x26   : > { %3254 = vmatpush3.bf16.msra.mxu1 (!%p545_p9), %v3460_v17  ;;  %v3468_v39 = vld [vmem:[%s4671_s3 + $0x38] ss:$12 sps:$4 sm:$0xff] (!%p545_p9)   ;;  %v3469_v40 = vld [vmem:[%s4671_s3 + $0x48] ss:$12 sps:$4 sm:$0xff] (!%p545_p9)   ;;  %v3472_v42 = vld [vmem:[%s4671_s3 + $0x50] ss:$12 sps:$4 sm:$0xff] (!%p545_p9)   ;;  %916 = vmatprep.mubr.bf16.mxu0 (!%p545_p9), %v3743_v49 }
  0x27   : > { %3255 = vmatprep.subr.bf16.mxu1 (!%p545_p9), %v3464_v36  ;;  %v3470_v41 = vld [vmem:[%s4671_s3 + $0x64] ss:$12 sps:$4 sm:$0xff] (!%p545_p9)   ;;  %v3473_v43 = vld [vmem:[%s4671_s3 + $0x60] ss:$12 sps:$4 sm:$0xff] (!%p545_p9)   ;;  %v3474_v44 = vld [vmem:[%s4671_s3 + $0x7c] ss:$12 sps:$4 sm:$0xff] (!%p545_p9)  }
  0x28   : > { %887 = vmatpush1.bf16.msra.mxu0 (!%p545_p9), %v3461_v34  ;;  %v3476_v45 = vld [vmem:[%s4671_s3 + $0x68] ss:$12 sps:$4 sm:$0xff] (!%p545_p9)   ;;  %v3477_v46 = vld [vmem:[%s4671_s3 + $0x78] ss:$12 sps:$4 sm:$0xff] (!%p545_p9)   ;;  %v3480_v48 = vld [vmem:[%s4671_s3 + $0x80] ss:$12 sps:$4 sm:$0xff] (!%p545_p9)  }
  0x29   : > { %888 = vmatprep.subr.bf16.mxu0 (!%p545_p9), %v3462_v35  ;;  %v3478_v47 = vld [vmem:[%s4671_s3 + $0x94] ss:$12 sps:$4 sm:$0xff] (!%p545_p9)   ;;  %v3481_v50 = vld [vmem:[%s4671_s3 + $0x90] ss:$12 sps:$4 sm:$0xff] (!%p545_p9)   ;;  %v3482_v51 = vld [vmem:[%s4671_s3 + $0xac] ss:$12 sps:$4 sm:$0xff] (!%p545_p9)  }
  0x2a   : > { %s4705_s16 = smov (!%p610_p10, %s3729_s16), 1  ;;  %s4707_s14 = smov (!%p612_p11, %s2951_s14), 7  ;;  %3256 = vmatpush3.bf16.msra.mxu1 %v3464_v36  ;;  %v3484_v52 = vld [vmem:[%s4671_s3 + $0x98] ss:$12 sps:$4 sm:$0xff]   ;;  %v3485_v53 = vld [vmem:[%s4671_s3 + $0xa8] ss:$12 sps:$4 sm:$0xff]  }
  0x2b   : > { %s2952_s22 = sshll.u32 %s4705_s16, 3  ;;  %3257 = vmatprep.subr.bf16.mxu1 %v3468_v39  ;;  %v3486_v54 = vld [vmem:[%s4671_s3 + $0xb0] ss:$12 sps:$4 sm:$0xff]   ;;  %v2957_v5 = vld [vmem:[%s4669_s1] ss:$0 sm:$0xff]  ;;  %vm1024_vm0 = vcmask 261120  }
  0x2c   : > { %s3884_s20 = sadd.s32 %s2952_s22, %s4707_s14  ;;  %889 = vmatpush1.bf16.msra.mxu0 %v3465_v37  ;;  %v2958_v14 = vld [vmem:[%s4670_s2] ss:$0 sm:$0xff]  ;;  %s551_s27 = sand.u32 1, %s3717_s29   ;;  %vm1773_vm1 = vcmask 523264   ;;  %vm1778_vm2 = vcmask 785408  }
  0x2d   : > { %s4684_s25 = sshll.u32 %s3884_s20, 2  ;;  %890 = vmatprep.subr.bf16.mxu0 %v3466_v38  ;;  %s3744_s29 = smov 96  }
  0x2e   : > { %s617_s28 = scalar_lea.vmem %s4688_s0, %s4684_s25  ;;  %3258 = vmatpush3.bf16.msra.mxu1 %v3468_v39  ;;  %s3745_s15 = smov 64  }
  0x2f   : > { %v3087_v8 = vld [vmem:[%s617_s28] sm:$0xff]   ;;  %v3136_v9 = vld [vmem:[%s617_s28 + $0x8] sm:$0xff]   ;;  %3259 = vmatprep.subr.bf16.mxu1 %v3472_v42  ;;  %s2950_s28 = sshll.u32 %s551_s27, 6  ;;  %s3746_s0 = smov 32  }
  0x30   : > { %v3892_v10 = vunpack.c.l.bf16 %v3087_v8  ;;  %v3894_v11 = vunpack.c.l.bf16 %v3136_v9  ;;  %v3898_v12 = vunpack.c.h.bf16 %v3087_v8  ;;  %v3900_v13 = vunpack.c.h.bf16 %v3136_v9  ;;  %891 = vmatpush1.bf16.msra.mxu0 %v3469_v40  ;;  %s4051_s25 = scalar_lea.vmem [#allocation2], %s2950_s28  ;;  %s4689_s22 = sshll.u32 %s3884_s20, 2 }
  0x31   : > { %892 = vmatprep.subr.bf16.mxu0 %v3470_v41  ;;  %s4690_s28 = sld [smem:[#allocation5_spill]] }
  0x32   : > { %640 = vadd.xlane.f32.xlu0 %v3892_v10  ;;  %644 = vadd.xlane.f32.xlu1 %v3894_v11 }
  0x33   : > { %3260 = vmatpush3.bf16.msra.mxu1 %v3472_v42 }
  0x34   : > { %893 = vmatpush1.bf16.msra.mxu0 %v3473_v43  ;;  %3261 = vmatprep.subr.bf16.mxu1 %v3476_v45 }
  0x35   : > { %894 = vmatprep.subr.bf16.mxu0 %v3474_v44 }
  0x36   : > { %642 = vadd.xlane.f32.xlu0 %v3898_v12  ;;  %646 = vadd.xlane.f32.xlu1 %v3900_v13 }
  0x37   : > { %3262 = vmatpush3.bf16.msra.mxu1 %v3476_v45 }
  0x38   : > { %895 = vmatpush1.bf16.msra.mxu0 %v3477_v46  ;;  %3263 = vmatprep.subr.bf16.mxu1 %v3480_v48 }
  0x39   : > { %896 = vmatprep.subr.bf16.mxu0 %v3478_v47 }
  0x3b   : > { %3264 = vmatpush3.bf16.msra.mxu1 %v3480_v48 }
  0x3c   : > { %897 = vmatpush1.bf16.msra.mxu0 %v3481_v50  ;;  %3265 = vmatprep.subr.bf16.mxu1 %v3484_v52 }
  0x3d   : > { %898 = vmatprep.subr.bf16.mxu0 %v3482_v51 }
  0x3f   : > { %3266 = vmatpush3.bf16.msra.mxu1 %v3484_v52 }
  0x40   : > { %899 = vmatpush1.bf16.msra.mxu0 %v3485_v53  ;;  %3267 = vmatprep.subr.bf16.mxu1 %v3486_v54 }
  0x43   : > { %3268 = vmatpush3.bf16.msra.mxu1 %v3486_v54 }
  0xbf   : > { %v641_v18 = vpop.xlane.xlu0 %640  ;;  %v645_v19 = vpop.xlane.xlu1 %644 }
  0xc0   : > { %v649_v20 = vmul.f32 0.0078125, %v641_v18  ;;  %v651_v21 = vmul.f32 0.0078125, %v645_v19 }
  0xc2   : > { %v3917_v22 = vsub.f32 %v3892_v10, %v649_v20  ;;  %v3920_v23 = vsub.f32 %v3894_v11, %v651_v21 }
  0xc3   : > { %v643_v24 = vpop.xlane.xlu0 %642  ;;  %v647_v25 = vpop.xlane.xlu1 %646 }
  0xc4   : > { %v650_v26 = vmul.f32 0.0078125, %v643_v24  ;;  %v657_v27 = vmul.f32 %v3917_v22, %v3917_v22  ;;  %v652_v28 = vmul.f32 0.0078125, %v647_v25  ;;  %v659_v31 = vmul.f32 %v3920_v23, %v3920_v23 }
  0xc6   : > { %v3925_v29 = vsub.f32 %v3898_v12, %v650_v26  ;;  %661 = vadd.xlane.f32.xlu0 %v657_v27  ;;  %v3928_v30 = vsub.f32 %v3900_v13, %v652_v28  ;;  %v741_v28 = vlaneseq }
  0xc8   : > { %v658_v32 = vmul.f32 %v3925_v29, %v3925_v29  ;;  %v660_v33 = vmul.f32 %v3928_v30, %v3928_v30 }
  0xca   : > { %665 = vadd.xlane.f32.xlu0 %v659_v31  ;;  %663 = vadd.xlane.f32.xlu1 %v658_v32 }
  0xce   : > { %667 = vadd.xlane.f32.xlu1 %v660_v33 }
 0x153   : > { %v662_v55 = vpop.xlane.xlu0 %661 }
 0x154   : > { %v669_v56 = vmul.f32 0.0078125, %v662_v55 }
 0x156   : > { %v673_v57 = vadd.f32 1e-05, %v669_v56 }
 0x157   : > { %v664_v58 = vpop.xlane.xlu1 %663  ;;  %v666_v59 = vpop.xlane.xlu0 %665 }
 0x158   : > { %3575 = vrsqrt.f32 %v673_v57  ;;  %v670_v60 = vmul.f32 0.0078125, %v664_v58  ;;  %v671_v61 = vmul.f32 0.0078125, %v666_v59 }
 0x15a   : > { %v674_v62 = vadd.f32 1e-05, %v670_v60  ;;  %v675_v63 = vadd.f32 1e-05, %v671_v61 }
 0x15b   : > { %v668_v0 = vpop.xlane.xlu1 %667 }
 0x15c   : > { %3577 = vrsqrt.f32 %v674_v62  ;;  %v672_v1 = vmul.f32 0.0078125, %v668_v0 }
 0x15d   : > { %3579 = vrsqrt.f32 %v675_v63 }
 0x15e   : > { %v676_v2 = vadd.f32 1e-05, %v672_v1 }
 0x160   : > { %3581 = vrsqrt.f32 %v676_v2 }
 0x162   : > { %v3576_v3 = vpop.eup %3575 }
 0x163   : > { %v681_v4 = vmul.f32 %v3576_v3, %v3917_v22 }
 0x165   : > { %v691_v9 = vmul.f32 %v2957_v5, %v681_v4 }
 0x166   : > { %v3578_v6 = vpop.eup %3577 }
 0x167   : > { %v3580_v7 = vpop.eup %3579  ;;  %v682_v8 = vmul.f32 %v3578_v6, %v3925_v29  ;;  %v701_v18 = vadd.f32 %v2958_v14, %v691_v9  ;;  %v3137_v6 = vld [vmem:[%s4051_s25 + $0x8] sm:$0xff]  }
 0x168   : > { %v683_v15 = vmul.f32 %v3580_v7, %v3920_v23  ;;  %v4008_v23 = vshrl.u32 %v741_v28, 7 }
 0x169   : > { %v692_v16 = vmul.f32 %v2957_v5, %v682_v8  ;;  %v3100_v8 = vunpack.c.l.bf16 %v3137_v6 }
 0x16a   : > { %v3582_v17 = vpop.eup %3581  ;;  %v693_v21 = vmul.f32 %v2957_v5, %v683_v15  ;;  %v743_v29 = vsub.s32 0, %v4008_v23  ;;  %v747_v31 = vsub.s32 1, %v4008_v23  ;;  %v751_v33 = vsub.s32 2, %v4008_v23 }
 0x16b   : > { %v702_v19 = vadd.f32 %v2958_v14, %v692_v16  ;;  %v684_v20 = vmul.f32 %v3582_v17, %v3928_v30  ;;  %v739_v30 = vld [vmem:[%s4672_s4] sm:$0x7]  ;;  %v3101_v17 = vunpack.c.h.bf16 %v3137_v6 }
 0x16c   : > { %v703_v25 = vadd.f32 %v2958_v14, %v693_v21  ;;  %v744_v32 = vrot.slane %v739_v30, %v743_v29  ;;  %v748_v35 = vrot.slane %v739_v30, %v747_v31  ;;  %v752_v41 = vrot.slane %v739_v30, %v751_v33 }
 0x16d   : > { %v705_v22 = vpack.c.bf16 %v702_v19, %v701_v18  ;;  %v694_v24 = vmul.f32 %v2957_v5, %v684_v20  ;;  %v3095_v5 = vld [vmem:[%s4051_s25] sm:$0xff]  }
 0x16e   : > { %v3096_v7 = vunpack.c.l.bf16 %v3095_v5 }
 0x16f   : > { %917 = vmatmul.mubr.bf16.vlgmr.msra.gmra.mrb[0].mxu0 %v705_v22  ;;  %3269 = vmatprep.mubr.bf16.mxu1 %v705_v22  ;;  %v704_v26 = vadd.f32 %v2958_v14, %v694_v24  ;;  %v3097_v14 = vunpack.c.h.bf16 %v3095_v5 }
 0x170   : > { %926 = vmatprep.mubr.bf16.mxu0 %v3743_v49 }
 0x171   : > { %v706_v27 = vpack.c.bf16 %v704_v26, %v703_v25 }
 0x173   : > { %3270 = vmatmul.mubr.bf16.vlgmr.msra.gmra.mrb[0].mxu1 %v706_v27 }
 0x177   : > { %927 = vmatmul.mubr.bf16.gmra.mrb[4].mxu0 %v706_v27 }
 0x242   : > { %v918_v34 = vpop.f32.mrb[0].mxu0 }
 0x243   : > { %v920_v36 = vpop.f32.mrb[1].mxu0  ;;  %v919_v38 = vadd.f32 %v918_v34, %v744_v32 }
 0x244   : > { %v922_v37 = vpop.f32.mrb[2].mxu0  ;;  %v921_v42 = vadd.f32 %v920_v36, %v748_v35 }
 0x245   : > { %v923_v39 = vadd.f32 %v922_v37, %v744_v32  ;;  %v924_v40 = vpop.f32.mrb[3].mxu0 }
 0x246   : > { %v925_v43 = vadd.f32 %v924_v40, %v748_v35  ;;  %v3271_v44 = vpop.f32.mrb[0].mxu1 }
 0x247   : > { %v4022_v45 = vpack.c.bf16 %v923_v39, %v919_v38  ;;  %v971_v46 = vpop.f32.mrb[1].mxu1  ;;  %v980_v50 = vadd.f32 %v3271_v44, %v752_v41 }
 0x248   : > { %v4024_v47 = vpack.c.bf16 %v925_v43, %v921_v42  ;;  %v3272_v48 = vpop.f32.mrb[2].mxu1  ;;  %v972_v53 = vadd.f32 %v971_v46, %v752_v41 }
 0x249   : > { %v983_v51 = vadd.f32 %v3272_v48, %v752_v41  ;;  %v974_v52 = vpop.f32.mrb[3].mxu1  ;;  %3277 = vmatprep.mubr.msk.bf16.mxu0 %vm1024_vm0, %v4022_v45 }
 0x24a   : > { %v975_v54 = vadd.f32 %v974_v52, %v752_v41  ;;  %v928_v55 = vpop.f32.mrb[4].mxu0  ;;  %3357 = vmatprep.subr.msk.bf16.mxu0 %vm1024_vm0, %v4024_v47  ;;  %v1032_v56 = vsel %vm1024_vm0, %v4024_v47, 0 }
 0x24b   : > { %v4032_v57 = vpack.c.bf16 %v983_v51, %v980_v50  ;;  %v930_v58 = vpop.f32.mrb[5].mxu0  ;;  %3274 = vmatpush3.bf16.xpose.msra.mxu0 %v1032_v56  ;;  %v929_v61 = vadd.f32 %v928_v55, %v744_v32 }
 0x24c   : > { %v4034_v59 = vpack.c.bf16 %v975_v54, %v972_v53  ;;  %v932_v60 = vpop.f32.mrb[6].mxu0  ;;  %v931_v0 = vadd.f32 %v930_v58, %v748_v35 }
 0x24d   : > { %v933_v62 = vadd.f32 %v932_v60, %v744_v32  ;;  %v934_v63 = vpop.f32.mrb[7].mxu0 }
 0x24e   : > { %v935_v1 = vadd.f32 %v934_v63, %v748_v35  ;;  %3281 = vmatprep.subr.bf16.mxu1 %v4034_v59 }
 0x24f   : > { %v4037_v2 = vpack.c.bf16 %v933_v62, %v929_v61  ;;  %3282 = vmatpush3.bf16.msra.mxu1 %v4034_v59 }
 0x250   : > { %v4040_v3 = vpack.c.bf16 %v935_v1, %v931_v0  ;;  %3283 = vmatprep.subr.bf16.mxu1 %v4032_v57 }
 0x252   : > { %3358 = vmatprep.subr.msk.bf16.mxu0 %vm1024_vm0, %v4040_v3  ;;  %v1035_v4 = vsel %vm1024_vm0, %v4040_v3, 0 }
 0x253   : > { %3276 = vmatpush3.bf16.xpose.msra.mxu0 %v1035_v4  ;;  %3284 = vmatpush3.bf16.msra.mxu1 %v4032_v57 }
 0x25a   : > { %3278 = vmatmul.mubr.msk.bf16.vlgmr.msra.gmra.mrb[8].mxu0 %vm1024_vm0, %v4037_v2 }
 0x32d   : > { %v3279_v9 = vpop.f32.mrb[8].mxu0 }
 0x32e   : > { %v1071_v15 = vpop.f32.mrb[9].mxu0  ;;  %v1080_v20 = vadd.f32 %v3279_v9, %v3100_v8 }
 0x32f   : > { %v1072_v16 = vadd.f32 %v3096_v7, %v1071_v15  ;;  %v3280_v18 = vpop.f32.mrb[10].mxu0 }
 0x330   : > { %v1074_v19 = vpop.f32.mrb[11].mxu0  ;;  %v1083_v24 = vadd.f32 %v3280_v18, %v3101_v17  ;;  %v1092_v26 = vsel %vm1024_vm0, %v1080_v20, -inf }
 0x331   : > { %v1075_v21 = vadd.f32 %v3097_v14, %v1074_v19  ;;  %v1086_v22 = vsel %vm1024_vm0, %v1072_v16, -inf }
 0x332   : > { %1087 = vmax.xlane.f32.xlu0 %v1086_v22  ;;  %v1095_v27 = vsel %vm1024_vm0, %v1083_v24, -inf }
 0x333   : > { %v1089_v25 = vsel %vm1024_vm0, %v1075_v21, -inf }
 0x334   : > { %1090 = vmax.xlane.f32.xlu1 %v1089_v25 }
 0x336   : > { %1093 = vmax.xlane.f32.xlu0 %v1092_v26 }
 0x338   : > { %1096 = vmax.xlane.f32.xlu1 %v1095_v27 }
 0x3bf   : > { %v1088_v28 = vpop.xlane.xlu0 %1087 }
 0x3c0   : > { %v1098_v30 = vsub.f32 %v1072_v16, %v1088_v28 }
 0x3c1   : > { %v1091_v32 = vpop.xlane.xlu1 %1090 }
 0x3c2   : > { %v1099_v34 = vsub.f32 %v1075_v21, %v1091_v32  ;;  %v1102_v38 = vmul.f32 1.442695, %v1098_v30 }
 0x3c3   : > { %v1094_v35 = vpop.xlane.xlu0 %1093 }
 0x3c4   : > { %v1104_v36 = vmul.f32 1.442695, %v1099_v34  ;;  %v1100_v37 = vsub.f32 %v1080_v20, %v1094_v35 }
 0x3c5   : > { %v1097_v39 = vpop.xlane.xlu1 %1096 }
 0x3c6   : > { %3583 = vpow2.f32 %v1104_v36  ;;  %v1106_v40 = vmul.f32 1.442695, %v1100_v37  ;;  %v1101_v41 = vsub.f32 %v1083_v24, %v1097_v39  ;;  %v3140_v36 = vld [vmem:[%s4051_s25 + $0x20] sm:$0xff]   ;;  %v3141_v37 = vld [vmem:[%s4051_s25 + $0x28] sm:$0xff]  }
 0x3c7   : > { %v3116_v39 = vunpack.c.l.bf16 %v3141_v37 }
 0x3c8   : > { %3585 = vpow2.f32 %v1106_v40  ;;  %v1108_v42 = vmul.f32 1.442695, %v1101_v41  ;;  %v3113_v41 = vunpack.c.h.bf16 %v3140_v36 }
 0x3c9   : > { %3587 = vpow2.f32 %v1102_v38  ;;  %v3112_v38 = vunpack.c.l.bf16 %v3140_v36 }
 0x3ca   : > { %3589 = vpow2.f32 %v1108_v42 }
 0x3d0   : > { %v3584_v43 = vpop.eup %3583 }
 0x3d1   : > { %v1113_v44 = vsel %vm1024_vm0, %v3584_v43, 0.0 }
 0x3d2   : > { %v3586_v46 = vpop.eup %3585  ;;  %1114 = vadd.xlane.f32.xlu1 %v1113_v44 }
 0x3d3   : > { %v3588_v48 = vpop.eup %3587  ;;  %v1116_v50 = vsel %vm1024_vm0, %v3586_v46, 0.0 }
 0x3d4   : > { %v3590_v51 = vpop.eup %3589  ;;  %1117 = vadd.xlane.f32.xlu0 %v1116_v50  ;;  %v1110_v53 = vsel %vm1024_vm0, %v3588_v48, 0.0  ;;  %v3117_v50 = vunpack.c.h.bf16 %v3141_v37 }
 0x3d5   : > { %v1119_v52 = vsel %vm1024_vm0, %v3590_v51, 0.0 }
 0x3d6   : > { %1120 = vadd.xlane.f32.xlu1 %v1119_v52 }
 0x3d8   : > { %1111 = vadd.xlane.f32.xlu0 %v1110_v53 }
 0x3e7   : > { %1197 = vrot.lane.b32.xlu1 %v4040_v3, %s3744_s29 }
 0x3eb   : > { %1189 = vrot.lane.b32.xlu1 %v4022_v45, %s3744_s29 }
 0x3ee   : > { %1195 = vrot.lane.b32.xlu0 %v4024_v47, %s3744_s29 }
 0x3ef   : > { %1373 = vrot.lane.b32.xlu1 %v4024_v47, %s3745_s15 }
 0x3f2   : > { %1191 = vrot.lane.b32.xlu0 %v4037_v2, %s3744_s29 }
 0x3f3   : > { %1375 = vrot.lane.b32.xlu1 %v4040_v3, %s3745_s15 }
 0x3f6   : > { %1369 = vrot.lane.b32.xlu0 %v4022_v45, %s3745_s15 }
 0x3f7   : > { %1371 = vrot.lane.b32.xlu1 %v4037_v2, %s3745_s15 }
 0x45f   : > { %v1115_v54 = vpop.xlane.xlu1 %1114 }
 0x460   : > { %3591 = vrcp.f32 %v1115_v54 }
 0x461   : > { %v1118_v55 = vpop.xlane.xlu0 %1117 }
 0x463   : > { %v1121_v56 = vpop.xlane.xlu1 %1120 }
 0x464   : > { %3593 = vrcp.f32 %v1121_v56 }
 0x465   : > { %3595 = vrcp.f32 %v1118_v55  ;;  %v1112_v58 = vpop.xlane.xlu0 %1111 }
 0x466   : > { %3597 = vrcp.f32 %v1112_v58 }
 0x467   : > { %v1198_v4 = vpop.permute.xlu1 %1197 }
 0x468   : > { %v1209_v16 = vsel %vm1024_vm0, %v1198_v4, 0 }
 0x469   : > { %v1196_v60 = vpop.permute.xlu0 %1195 }
 0x46a   : > { %3359 = vmatprep.subr.msk.bf16.mxu1 %vm1024_vm0, %v1196_v60  ;;  %v3592_v61 = vpop.eup %3591  ;;  %v1206_v14 = vsel %vm1024_vm0, %v1196_v60, 0 }
 0x46b   : > { %v1127_v6 = vmul.f32 %v3592_v61, %v3584_v43  ;;  %v1190_v15 = vpop.permute.xlu1 %1189 }
 0x46d   : > { %v1192_v18 = vpop.permute.xlu0 %1191 }
 0x46e   : > { %v3594_v62 = vpop.eup %3593 }
 0x46f   : > { %v3596_v63 = vpop.eup %3595  ;;  %v1129_v1 = vmul.f32 %v3594_v62, %v3590_v51  ;;  %v1374_v17 = vpop.permute.xlu1 %1373 }
 0x470   : > { %v3598_v0 = vpop.eup %3597  ;;  %v1128_v7 = vmul.f32 %v3596_v63, %v3586_v46  ;;  %v1384_v19 = vsel %vm1024_vm0, %v1374_v17, 0 }
 0x471   : > { %v1126_v5 = vmul.f32 %v3598_v0, %v3588_v48  ;;  %v1370_v20 = vpop.permute.xlu0 %1369 }
 0x472   : > { %v1131_v9 = vpack.c.bf16 %v1129_v1, %v1128_v7 }
 0x473   : > { %v1130_v8 = vpack.c.bf16 %v1127_v6, %v1126_v5  ;;  %v1376_v21 = vpop.permute.xlu1 %1375 }
 0x474   : > { %v1387_v22 = vsel %vm1024_vm0, %v1376_v21, 0 }
 0x475   : > { %3285 = vmatprep.mubr.msk.bf16.mxu1 %vm1024_vm0, %v1130_v8 }
 0x476   : > { %3286 = vmatmul.mubr.msk.bf16.vlgmr.msra.gmra.mrb[4].mxu1 %vm1024_vm0, %v1131_v9 }
 0x477   : > { %3290 = vmatpush3.bf16.xpose.msra.mxu1 %v1206_v14  ;;  %3293 = vmatprep.mubr.msk.bf16.mxu1 %vm1024_vm0, %v1190_v15  ;;  %v1372_v24 = vpop.permute.xlu1 %1371 }
 0x478   : > { %3360 = vmatprep.subr.msk.bf16.mxu1 %vm1024_vm0, %v1198_v4 }
 0x47f   : > { %3292 = vmatpush3.bf16.xpose.msra.mxu1 %v1209_v16 }
 0x480   : > { %3361 = vmatprep.subr.msk.bf16.mxu1 %vm1024_vm0, %v1374_v17 }
 0x486   : > { %3294 = vmatmul.mubr.msk.bf16.vlgmr.msra.gmra.mrb[8].mxu1 %vm1024_vm0, %v1192_v18 }
 0x487   : > { %3306 = vmatpush3.bf16.xpose.msra.mxu1 %v1384_v19  ;;  %3309 = vmatprep.mubr.msk.bf16.mxu1 %vm1024_vm0, %v1370_v20 }
 0x488   : > { %3362 = vmatprep.subr.msk.bf16.mxu1 %vm1024_vm0, %v1376_v21  ;;  %v3138_v21 = vld [vmem:[%s4051_s25 + $0x10] sm:$0xff]  }
 0x48f   : > { %3308 = vmatpush3.bf16.xpose.msra.mxu1 %v1387_v22  ;;  %v3104_v22 = vunpack.c.l.bf16 %v3138_v21 }
 0x496   : > { %3310 = vmatmul.mubr.msk.bf16.vlgmr.msra.gmra.mrb[12].mxu1 %vm1024_vm0, %v1372_v24  ;;  %v3139_v24 = vld [vmem:[%s4051_s25 + $0x18] sm:$0xff]  }
 0x497   : > { %v3108_v36 = vunpack.c.l.bf16 %v3139_v24 }
 0x549   : > { %v4093_v25 = vpop.f32.mrb[4].mxu1 }
 0x54a   : > { %v4095_v26 = vpop.f32.mrb[5].mxu1 }
 0x54b   : > { %v4097_v27 = vpop.f32.mrb[6].mxu1 }
 0x54c   : > { %v4099_v28 = vpop.f32.mrb[7].mxu1 }
 0x559   : > { %v4101_v30 = vpop.f32.mrb[8].mxu1 }
 0x55a   : > { %v4103_v32 = vpop.f32.mrb[9].mxu1 }
 0x55b   : > { %v4105_v34 = vpop.f32.mrb[10].mxu1  ;;  %v4134_v37 = vadd.f32 %v3104_v22, %v4103_v32  ;;  %v3142_v22 = vld [vmem:[%s4051_s25 + $0x30] sm:$0xff]  }
 0x55c   : > { %v4107_v35 = vpop.f32.mrb[11].mxu1 }
 0x569   : > { %v3311_v40 = vpop.f32.mrb[12].mxu1 }
 0x56a   : > { %v1423_v42 = vpop.f32.mrb[13].mxu1  ;;  %v1432_v48 = vadd.f32 %v3311_v40, %v3116_v39  ;;  %v3105_v39 = vunpack.c.h.bf16 %v3138_v21 }
 0x56b   : > { %v1424_v43 = vadd.f32 %v3112_v38, %v1423_v42  ;;  %v3312_v44 = vpop.f32.mrb[14].mxu1  ;;  %v3109_v38 = vunpack.c.h.bf16 %v3139_v24 }
 0x56c   : > { %v1426_v46 = vpop.f32.mrb[15].mxu1  ;;  %v1435_v54 = vadd.f32 %v3312_v44, %v3117_v50  ;;  %v1444_v55 = vsel %vm1024_vm0, %v1432_v48, -inf }
 0x56d   : > { %v1427_v51 = vadd.f32 %v3113_v41, %v1426_v46  ;;  %v1438_v52 = vsel %vm1024_vm0, %v1424_v43, -inf }
 0x56e   : > { %1439 = vmax.xlane.f32.xlu0 %v1438_v52  ;;  %v1447_v56 = vsel %vm1024_vm0, %v1435_v54, -inf }
 0x56f   : > { %v1441_v53 = vsel %vm1024_vm0, %v1427_v51, -inf }
 0x570   : > { %1442 = vmax.xlane.f32.xlu1 %v1441_v53 }
 0x572   : > { %1445 = vmax.xlane.f32.xlu0 %v1444_v55 }
 0x576   : > { %1448 = vmax.xlane.f32.xlu0 %v1447_v56 }
 0x581   : > { %1486 = vrot.lane.b32.xlu1 %v4032_v57, %s3745_s15 }
 0x5fb   : > { %v1440_v58 = vpop.xlane.xlu0 %1439 }
 0x5fc   : > { %v1450_v60 = vsub.f32 %v1424_v43, %v1440_v58 }
 0x5fd   : > { %v1443_v61 = vpop.xlane.xlu1 %1442 }
 0x5fe   : > { %v1454_v0 = vmul.f32 1.442695, %v1450_v60  ;;  %v1451_v1 = vsub.f32 %v1427_v51, %v1443_v61 }
 0x5ff   : > { %v1446_v62 = vpop.xlane.xlu0 %1445 }
 0x600   : > { %v1452_v63 = vsub.f32 %v1432_v48, %v1446_v62  ;;  %v1456_v7 = vmul.f32 1.442695, %v1451_v1 }
 0x601   : > { %v1487_v41 = vpop.permute.xlu1 %1486 }
 0x602   : > { %v1458_v4 = vmul.f32 1.442695, %v1452_v63 }
 0x603   : > { %v1449_v5 = vpop.xlane.xlu0 %1448 }
 0x604   : > { %3599 = vpow2.f32 %v1458_v4  ;;  %v1453_v6 = vsub.f32 %v1435_v54, %v1449_v5 }
 0x605   : > { %3601 = vpow2.f32 %v1454_v0 }
 0x606   : > { %v1460_v8 = vmul.f32 1.442695, %v1453_v6 }
 0x608   : > { %3603 = vpow2.f32 %v1460_v8 }
 0x609   : > { %3605 = vpow2.f32 %v1456_v7 }
 0x60e   : > { %v3600_v9 = vpop.eup %3599 }
 0x60f   : > { %v1468_v14 = vsel %vm1024_vm0, %v3600_v9, 0.0  ;;  %v3602_v15 = vpop.eup %3601 }
 0x610   : > { %1469 = vadd.xlane.f32.xlu0 %v1468_v14  ;;  %v1462_v17 = vsel %vm1024_vm0, %v3602_v15, 0.0 }
 0x612   : > { %v3604_v16 = vpop.eup %3603 }
 0x613   : > { %v1471_v18 = vsel %vm1024_vm0, %v3604_v16, 0.0  ;;  %v3606_v19 = vpop.eup %3605 }
 0x614   : > { %1463 = vadd.xlane.f32.xlu0 %v1462_v17  ;;  %1472 = vadd.xlane.f32.xlu1 %v1471_v18  ;;  %v1465_v20 = vsel %vm1024_vm0, %v3606_v19, 0.0 }
 0x618   : > { %1466 = vadd.xlane.f32.xlu1 %v1465_v20 }
 0x629   : > { %1549 = vrot.lane.b32.xlu1 %v4024_v47, %s3746_s0  ;;  %v4137_v47 = vadd.f32 %v4101_v30, %v3108_v36 }
 0x62a   : > { %1484 = vrot.lane.b32.xlu0 %v4034_v59, %s3745_s15 }
 0x62b   : > { %v1266_v40 = vsel %vm1024_vm0, %v4137_v47, -inf }
 0x62d   : > { %1551 = vrot.lane.b32.xlu1 %v4040_v3, %s3746_s0  ;;  %v1260_v3 = vsel %vm1024_vm0, %v4134_v37, -inf }
 0x62e   : > { %1545 = vrot.lane.b32.xlu0 %v4022_v45, %s3746_s0  ;;  %v4142_v45 = vadd.f32 %v4105_v34, %v3109_v38  ;;  %v3143_v38 = vld [vmem:[%s4051_s25 + $0x38] sm:$0xff]   ;;  %s627_s25 = scalar_lea.vmem %s4690_s28, %s4689_s22 }
 0x630   : > { %v1269_v32 = vsel %vm1024_vm0, %v4142_v45, -inf }
 0x631   : > { %1547 = vrot.lane.b32.xlu1 %v4037_v2, %s3746_s0  ;;  %v1249_v2 = vadd.f32 %v3105_v39, %v4107_v35  ;;  %v3120_v39 = vunpack.c.l.bf16 %v3142_v22 }
 0x633   : > { %v1263_v30 = vsel %vm1024_vm0, %v1249_v2, -inf }
 0x64d   : > { %1261 = vmax.xlane.f32.xlu0 %v1260_v3 }
 0x651   : > { %1267 = vmax.xlane.f32.xlu0 %v1266_v40  ;;  %v3124_v40 = vunpack.c.l.bf16 %v3143_v38 }
 0x655   : > { %1270 = vmax.xlane.f32.xlu0 %v1269_v32  ;;  %1264 = vmax.xlane.f32.xlu1 %v1263_v30  ;;  %v3121_v30 = vunpack.c.h.bf16 %v3142_v22 }
 0x69d   : > { %v1470_v42 = vpop.xlane.xlu0 %1469 }
 0x6a1   : > { %v1473_v43 = vpop.xlane.xlu1 %1472  ;;  %v1464_v44 = vpop.xlane.xlu0 %1463 }
 0x6a2   : > { %3607 = vrcp.f32 %v1473_v43 }
 0x6a3   : > { %3609 = vrcp.f32 %v1464_v44 }
 0x6a4   : > { %3611 = vrcp.f32 %v1470_v42 }
 0x6a5   : > { %v1467_v34 = vpop.xlane.xlu1 %1466  ;;  %v1485_v35 = vpop.permute.xlu0 %1484 }
 0x6a6   : > { %3613 = vrcp.f32 %v1467_v34  ;;  %3313 = vmatprep.subr.bf16.mxu1 %v1485_v35 }
 0x6a7   : > { %3314 = vmatpush3.bf16.msra.mxu1 %v1485_v35 }
 0x6a8   : > { %3315 = vmatprep.subr.bf16.mxu1 %v1487_v41 }
 0x6a9   : > { %v1550_v46 = vpop.permute.xlu1 %1549  ;;  %v1546_v62 = vpop.permute.xlu0 %1545 }
 0x6aa   : > { %v1560_v61 = vsel %vm1024_vm0, %v1550_v46, 0 }
 0x6ab   : > { %3316 = vmatpush3.bf16.msra.mxu1 %v1487_v41 }
 0x6ac   : > { %3363 = vmatprep.subr.msk.bf16.mxu1 %vm1024_vm0, %v1550_v46  ;;  %v3608_v48 = vpop.eup %3607 }
 0x6ad   : > { %v3610_v50 = vpop.eup %3609  ;;  %v1481_v53 = vmul.f32 %v3608_v48, %v3604_v16  ;;  %v1552_v63 = vpop.permute.xlu1 %1551 }
 0x6ae   : > { %v3612_v51 = vpop.eup %3611  ;;  %v1478_v54 = vmul.f32 %v3610_v50, %v3602_v15  ;;  %v1563_v0 = vsel %vm1024_vm0, %v1552_v63, 0 }
 0x6af   : > { %v1480_v56 = vmul.f32 %v3612_v51, %v3600_v9 }
 0x6b0   : > { %v3614_v52 = vpop.eup %3613 }
 0x6b1   : > { %v1479_v55 = vmul.f32 %v3614_v52, %v3606_v19  ;;  %v1483_v60 = vpack.c.bf16 %v1481_v53, %v1480_v56  ;;  %v1548_v1 = vpop.permute.xlu1 %1547 }
 0x6b3   : > { %v1482_v58 = vpack.c.bf16 %v1479_v55, %v1478_v54 }
 0x6b5   : > { %3317 = vmatprep.mubr.msk.bf16.mxu1 %vm1024_vm0, %v1482_v58 }
 0x6b6   : > { %3318 = vmatmul.mubr.msk.bf16.vlgmr.msra.gmra.mrb[16].mxu1 %vm1024_vm0, %v1483_v60 }
 0x6b7   : > { %3322 = vmatpush3.bf16.xpose.msra.mxu1 %v1560_v61  ;;  %3325 = vmatprep.mubr.msk.bf16.mxu1 %vm1024_vm0, %v1546_v62 }
 0x6b8   : > { %3364 = vmatprep.subr.msk.bf16.mxu1 %vm1024_vm0, %v1552_v63 }
 0x6bf   : > { %3324 = vmatpush3.bf16.xpose.msra.mxu1 %v1563_v0 }
 0x6c6   : > { %3326 = vmatmul.mubr.msk.bf16.vlgmr.msra.gmra.mrb[20].mxu1 %vm1024_vm0, %v1548_v1 }
 0x6c7   : > { %2223 = vmatprep.mubr.bf16.mxu1 %v3743_v49 }
 0x6da   : > { %v1262_v4 = vpop.xlane.xlu0 %1261 }
 0x6db   : > { %v1272_v17 = vsub.f32 %v4134_v37, %v1262_v4 }
 0x6dd   : > { %v1276_v20 = vmul.f32 1.442695, %v1272_v17 }
 0x6de   : > { %v1268_v14 = vpop.xlane.xlu0 %1267 }
 0x6df   : > { %v1274_v21 = vsub.f32 %v4137_v47, %v1268_v14  ;;  %3615 = vpow2.f32 %v1276_v20 }
 0x6e1   : > { %v1280_v3 = vmul.f32 1.442695, %v1274_v21 }
 0x6e2   : > { %v1265_v16 = vpop.xlane.xlu1 %1264  ;;  %v1271_v19 = vpop.xlane.xlu0 %1270 }
 0x6e3   : > { %v1273_v18 = vsub.f32 %v1249_v2, %v1265_v16  ;;  %v1275_v36 = vsub.f32 %v4142_v45, %v1271_v19  ;;  %v3125_v2 = vunpack.c.h.bf16 %v3143_v38 }
 0x6e5   : > { %v1278_v24 = vmul.f32 1.442695, %v1273_v18  ;;  %v1282_v41 = vmul.f32 1.442695, %v1275_v36 }
 0x6e7   : > { %3617 = vpow2.f32 %v1278_v24 }
 0x6e8   : > { %3619 = vpow2.f32 %v1280_v3 }
 0x6e9   : > { %3621 = vpow2.f32 %v1282_v41  ;;  %v3616_v50 = vpop.eup %3615 }
 0x6ea   : > { %v1284_v53 = vsel %vm1024_vm0, %v3616_v50, 0.0 }
 0x6f1   : > { %v3618_v52 = vpop.eup %3617 }
 0x6f2   : > { %v4181_v54 = vpop.eup %3619  ;;  %v1287_v55 = vsel %vm1024_vm0, %v3618_v52, 0.0 }
 0x6f3   : > { %v4184_v56 = vpop.eup %3621  ;;  %v1290_v58 = vsel %vm1024_vm0, %v4181_v54, 0.0 }
 0x6f4   : > { %v1293_v60 = vsel %vm1024_vm0, %v4184_v56, 0.0 }
 0x789   : > { %v4159_v5 = vpop.f32.mrb[16].mxu1 }
 0x78a   : > { %v4161_v6 = vpop.f32.mrb[17].mxu1 }
 0x78b   : > { %v4163_v7 = vpop.f32.mrb[18].mxu1 }
 0x78c   : > { %v3440_v8 = vpack.i.bf16 %v4163_v7, %v4159_v5  ;;  %v4167_v9 = vpop.f32.mrb[19].mxu1 }
 0x78d   : > { %v3435_v15 = vpack.i.bf16 %v4167_v9, %v4161_v6 }
 0x799   : > { %v3327_v32 = vpop.f32.mrb[20].mxu1 }
 0x79a   : > { %v1599_v42 = vpop.f32.mrb[21].mxu1  ;;  %v1608_v47 = vadd.f32 %v3327_v32, %v3124_v40 }
 0x79b   : > { %v1600_v37 = vadd.f32 %v3120_v39, %v1599_v42  ;;  %v3328_v43 = vpop.f32.mrb[22].mxu1 }
 0x79c   : > { %v1602_v44 = vpop.f32.mrb[23].mxu1  ;;  %v1611_v45 = vadd.f32 %v3328_v43, %v3125_v2  ;;  %v1620_v48 = vsel %vm1024_vm0, %v1608_v47, -inf }
 0x79d   : > { %v1603_v34 = vadd.f32 %v3121_v30, %v1602_v44  ;;  %v1614_v35 = vsel %vm1024_vm0, %v1600_v37, -inf }
 0x79e   : > { %1615 = vmax.xlane.f32.xlu0 %v1614_v35  ;;  %v1623_v51 = vsel %vm1024_vm0, %v1611_v45, -inf }
 0x79f   : > { %v1617_v46 = vsel %vm1024_vm0, %v1603_v34, -inf }
 0x7a0   : > { %1618 = vmax.xlane.f32.xlu1 %v1617_v46 }
 0x7a2   : > { %1621 = vmax.xlane.f32.xlu0 %v1620_v48 }
 0x7a4   : > { %1624 = vmax.xlane.f32.xlu1 %v1623_v51 }
 0x7a6   : > { %1285 = vadd.xlane.f32.xlu0 %v1284_v53 }
 0x7a8   : > { %1288 = vadd.xlane.f32.xlu1 %v1287_v55 }
 0x7aa   : > { %1291 = vadd.xlane.f32.xlu0 %v1290_v58 }
 0x7ac   : > { %1294 = vadd.xlane.f32.xlu1 %v1293_v60 }
 0x7bd   : > { %1310 = vrot.lane.b32.xlu1 %v4032_v57, %s3744_s29 }
 0x7c1   : > { %1660 = vrot.lane.b32.xlu1 %v4034_v59, %s3746_s0 }
 0x82b   : > { %v1616_v61 = vpop.xlane.xlu0 %1615 }
 0x82c   : > { %v1626_v62 = vsub.f32 %v1600_v37, %v1616_v61 }
 0x82d   : > { %v1619_v63 = vpop.xlane.xlu1 %1618 }
 0x82e   : > { %v1630_v0 = vmul.f32 1.442695, %v1626_v62  ;;  %v1627_v4 = vsub.f32 %v1603_v34, %v1619_v63 }
 0x82f   : > { %v1622_v1 = vpop.xlane.xlu0 %1621 }
 0x830   : > { %v1628_v14 = vsub.f32 %v1608_v47, %v1622_v1  ;;  %3623 = vpow2.f32 %v1630_v0  ;;  %v1632_v20 = vmul.f32 1.442695, %v1627_v4 }
 0x831   : > { %v1625_v16 = vpop.xlane.xlu1 %1624 }
 0x832   : > { %v1634_v17 = vmul.f32 1.442695, %v1628_v14  ;;  %v1629_v18 = vsub.f32 %v1611_v45, %v1625_v16  ;;  %v3487_v16 = vld [vmem:[%s4674_s6] sm:$0xff]  }
 0x833   : > { %v1286_v19 = vpop.xlane.xlu0 %1285 }
 0x834   : > { %3625 = vpow2.f32 %v1634_v17  ;;  %v1636_v21 = vmul.f32 1.442695, %v1629_v18  ;;  %v3488_v17 = vld [vmem:[%s4674_s6 + $0x8] sm:$0xff]   ;;  %v3489_v18 = vld [vmem:[%s4674_s6 + $0x10] sm:$0xff]  }
 0x835   : > { %3627 = vrcp.f32 %v1286_v19  ;;  %v1289_v22 = vpop.xlane.xlu1 %1288  ;;  %v3490_v19 = vld [vmem:[%s4674_s6 + $0x18] sm:$0xff]  }
 0x836   : > { %3629 = vpow2.f32 %v1636_v21  ;;  %v3492_v21 = vld [vmem:[%s4674_s6 + $0x28] sm:$0xff]  }
 0x837   : > { %3631 = vrcp.f32 %v1289_v22  ;;  %v1292_v34 = vpop.xlane.xlu0 %1291  ;;  %v3493_v22 = vld [vmem:[%s4674_s6 + $0x30] sm:$0xff]  }
 0x838   : > { %3633 = vpow2.f32 %v1632_v20  ;;  %v3491_v20 = vld [vmem:[%s4674_s6 + $0x20] sm:$0xff]  }
 0x839   : > { %v1295_v44 = vpop.xlane.xlu1 %1294 }
 0x83a   : > { %v3624_v24 = vpop.eup %3623  ;;  %3635 = vrcp.f32 %v1295_v44 }
 0x83b   : > { %v1638_v37 = vsel %vm1024_vm0, %v3624_v24, 0.0  ;;  %3637 = vrcp.f32 %v1292_v34 }
 0x83d   : > { %v1311_v47 = vpop.permute.xlu1 %1310 }
 0x83e   : > { %v3626_v36 = vpop.eup %3625 }
 0x83f   : > { %v3628_v38 = vpop.eup %3627  ;;  %v1644_v39 = vsel %vm1024_vm0, %v3626_v36, 0.0 }
 0x840   : > { %v3630_v3 = vpop.eup %3629  ;;  %1645 = vadd.xlane.f32.xlu0 %v1644_v39  ;;  %v1300_v41 = vmul.f32 %v3628_v38, %v3616_v50  ;;  %v3494_v39 = vld [vmem:[%s4674_s6 + $0x38] sm:$0xff]  }
 0x841   : > { %v3632_v40 = vpop.eup %3631  ;;  %v1647_v32 = vsel %vm1024_vm0, %v3630_v3, 0.0  ;;  %v1661_v35 = vpop.permute.xlu1 %1660 }
 0x842   : > { %v3634_v30 = vpop.eup %3633  ;;  %1648 = vadd.xlane.f32.xlu1 %v1647_v32  ;;  %v1301_v42 = vmul.f32 %v3632_v40, %v3618_v52 }
 0x843   : > { %v1641_v43 = vsel %vm1024_vm0, %v3634_v30, 0.0 }
 0x844   : > { %1639 = vadd.xlane.f32.xlu0 %v1638_v37  ;;  %v1304_v2 = vpack.c.bf16 %v1301_v42, %v1300_v41  ;;  %v3636_v51 = vpop.eup %3635 }
 0x846   : > { %3301 = vmatprep.mubr.msk.bf16.mxu0 %vm1024_vm0, %v1304_v2  ;;  %1642 = vadd.xlane.f32.xlu1 %v1641_v43 }
 0x857   : > { %1662 = vrot.lane.b32.xlu1 %v4032_v57, %s3746_s0  ;;  %v3638_v57 = vpop.eup %3637 }
 0x858   : > { %v1302_v53 = vmul.f32 %v3638_v57, %v4181_v54 }
 0x85a   : > { %1308 = vrot.lane.b32.xlu0 %v4034_v59, %s3744_s29  ;;  %v1303_v59 = vmul.f32 %v3636_v51, %v4184_v56 }
 0x85c   : > { %v1305_v58 = vpack.c.bf16 %v1303_v59, %v1302_v53 }
 0x8cd   : > { %v1646_v45 = vpop.xlane.xlu0 %1645 }
 0x8cf   : > { %v1649_v46 = vpop.xlane.xlu1 %1648 }
 0x8d1   : > { %v1640_v48 = vpop.xlane.xlu0 %1639 }
 0x8d2   : > { %3639 = vrcp.f32 %v1640_v48 }
 0x8d3   : > { %3641 = vrcp.f32 %v1649_v46  ;;  %v1643_v50 = vpop.xlane.xlu1 %1642 }
 0x8d4   : > { %3643 = vrcp.f32 %v1643_v50 }
 0x8d5   : > { %3645 = vrcp.f32 %v1646_v45  ;;  %v1309_v52 = vpop.permute.xlu0 %1308 }
 0x8d6   : > { %3297 = vmatprep.subr.bf16.mxu0 %v1309_v52 }
 0x8d7   : > { %3298 = vmatpush3.bf16.msra.mxu0 %v1309_v52  ;;  %v1663_v63 = vpop.permute.xlu1 %1662 }
 0x8d8   : > { %3299 = vmatprep.subr.bf16.mxu0 %v1311_v47 }
 0x8db   : > { %3300 = vmatpush3.bf16.msra.mxu0 %v1311_v47 }
 0x8dc   : > { %v3640_v55 = vpop.eup %3639  ;;  %3329 = vmatprep.subr.bf16.mxu0 %v1661_v35 }
 0x8dd   : > { %v3642_v60 = vpop.eup %3641  ;;  %v1654_v0 = vmul.f32 %v3640_v55, %v3624_v24 }
 0x8de   : > { %v3644_v61 = vpop.eup %3643  ;;  %3302 = vmatmul.mubr.msk.bf16.vlgmr.msra.gmra.mrb[12].mxu0 %vm1024_vm0, %v1305_v58  ;;  %v1657_v4 = vmul.f32 %v3642_v60, %v3630_v3 }
 0x8df   : > { %v3646_v62 = vpop.eup %3645  ;;  %3330 = vmatpush3.bf16.msra.mxu0 %v1661_v35  ;;  %v1655_v1 = vmul.f32 %v3644_v61, %v3634_v30 }
 0x8e0   : > { %3331 = vmatprep.subr.bf16.mxu0 %v1663_v63  ;;  %v1656_v56 = vmul.f32 %v3646_v62, %v3626_v36 }
 0x8e1   : > { %v1658_v14 = vpack.c.bf16 %v1655_v1, %v1654_v0 }
 0x8e2   : > { %v1659_v54 = vpack.c.bf16 %v1657_v4, %v1656_v56 }
 0x8e3   : > { %3332 = vmatpush3.bf16.msra.mxu0 %v1663_v63  ;;  %3333 = vmatprep.mubr.msk.bf16.mxu0 %vm1024_vm0, %v1658_v14  ;;  %v2999_v14 = vld [vmem:[%s4675_s7] ss:$0 sm:$0xff] }
 0x8e4   : > { %3337 = vmatprep.subr.bf16.mxu0 %v3487_v16 }
 0x8e6   : > { %3334 = vmatmul.mubr.msk.bf16.vlgmr.msra.gmra.mrb[16].mxu0 %vm1024_vm0, %v1659_v54 }
 0x8e7   : > { %3338 = vmatpush3.bf16.msra.mxu0 %v3487_v16 }
 0x8e8   : > { %3339 = vmatprep.subr.bf16.mxu0 %v3488_v17 }
 0x8eb   : > { %3340 = vmatpush3.bf16.msra.mxu0 %v3488_v17 }
 0x8ec   : > { %3341 = vmatprep.subr.bf16.mxu0 %v3489_v18 }
 0x8ef   : > { %3342 = vmatpush3.bf16.msra.mxu0 %v3489_v18 }
 0x8f0   : > { %3343 = vmatprep.subr.bf16.mxu0 %v3490_v19 }
 0x8f3   : > { %3344 = vmatpush3.bf16.msra.mxu0 %v3490_v19 }
 0x8f4   : > { %3345 = vmatprep.subr.bf16.mxu0 %v3491_v20 }
 0x8f7   : > { %3346 = vmatpush3.bf16.msra.mxu0 %v3491_v20 }
 0x8f8   : > { %3347 = vmatprep.subr.bf16.mxu0 %v3492_v21 }
 0x8fb   : > { %3348 = vmatpush3.bf16.msra.mxu0 %v3492_v21 }
 0x8fc   : > { %3349 = vmatprep.subr.bf16.mxu0 %v3493_v22 }
 0x8ff   : > { %3350 = vmatpush3.bf16.msra.mxu0 %v3493_v22 }
 0x900   : > { %3351 = vmatprep.subr.bf16.mxu0 %v3494_v39 }
 0x903   : > { %3352 = vmatpush3.bf16.msra.mxu0 %v3494_v39  ;;  %v3500_v39 = vld [vmem:[%s4678_s10 + $0xc] ss:$16 sps:$4 sm:$0xff]  }
 0x904   : > { %2244 = vmatprep.subr.bf16.mxu0 %v3500_v39 }
 0x9b1   : > { %v3303_v24 = vpop.f32.mrb[12].mxu0 }
 0x9b2   : > { %v1354_v36 = vpop.f32.mrb[13].mxu0 }
 0x9b3   : > { %v3304_v38 = vpop.f32.mrb[14].mxu0 }
 0x9b4   : > { %v3430_v3 = vpack.i.bf16 %v3304_v38, %v3303_v24  ;;  %v1357_v40 = vpop.f32.mrb[15].mxu0 }
 0x9b5   : > { %v3425_v32 = vpack.i.bf16 %v1357_v40, %v1354_v36  ;;  %v3501_v40 = vld [vmem:[%s4678_s10 + $0x20] ss:$16 sps:$4 sm:$0xff]  }
 0x9b6   : > { %3431 = vrot.lane.b32.xlu1 %v3430_v3, %s3746_s0  ;;  %v3506_v3 = vld [vmem:[%s4678_s10 + $0x2c] ss:$16 sps:$4 sm:$0xff]  }
 0x9b7   : > { %3426 = vrot.lane.b32.xlu0 %v3425_v32, %s3746_s0  ;;  %v3504_v32 = vld [vmem:[%s4678_s10 + $0x28] ss:$16 sps:$4 sm:$0xff]  }
 0x9b9   : > { %v3335_v30 = vpop.f32.mrb[16].mxu0 }
 0x9ba   : > { %3441 = vrot.lane.b32.xlu1 %v3440_v8, %s3745_s15  ;;  %v1706_v41 = vpop.f32.mrb[17].mxu0 }
 0x9bb   : > { %3436 = vrot.lane.b32.xlu0 %v3435_v15, %s3745_s15  ;;  %v3336_v42 = vpop.f32.mrb[18].mxu0 }
 0x9bc   : > { %v3450_v37 = vpack.i.bf16 %v3336_v42, %v3335_v30  ;;  %v1709_v2 = vpop.f32.mrb[19].mxu0 }
 0x9bd   : > { %v3445_v43 = vpack.i.bf16 %v1709_v2, %v1706_v41 }
 0x9be   : > { %3451 = vrot.lane.b32.xlu1 %v3450_v37, %s3744_s29 }
 0x9bf   : > { %3446 = vrot.lane.b32.xlu0 %v3445_v43, %s3744_s29 }
 0xa28   : > { %v3432_v44 = vpop.permute.xlu1 %3431 }
 0xa29   : > { %v3427_v47 = vpop.permute.xlu0 %3426  ;;  %v3434_v34 = vunpack.i.h.bf16 %v3432_v44  ;;  %v3433_v35 = vunpack.i.l.bf16 %v3432_v44 }
 0xa2a   : > { %v3429_v7 = vunpack.i.h.bf16 %v3427_v47  ;;  %v3428_v8 = vunpack.i.l.bf16 %v3427_v47 }
 0xa2b   : > { %v1772_v15 = vsel %vm1024_vm0, %v4097_v27, %v3434_v34  ;;  %v1771_v50 = vsel %vm1024_vm0, %v4093_v25, %v3433_v35 }
 0xa2c   : > { %v3442_v5 = vpop.permute.xlu1 %3441  ;;  %v1770_v52 = vsel %vm1024_vm0, %v4099_v28, %v3429_v7  ;;  %v1769_v57 = vsel %vm1024_vm0, %v4095_v26, %v3428_v8 }
 0xa2d   : > { %v3437_v45 = vpop.permute.xlu0 %3436  ;;  %v3444_v46 = vunpack.i.h.bf16 %v3442_v5  ;;  %v3443_v48 = vunpack.i.l.bf16 %v3442_v5 }
 0xa2e   : > { %v3439_v6 = vunpack.i.h.bf16 %v3437_v45  ;;  %v3438_v9 = vunpack.i.l.bf16 %v3437_v45 }
 0xa2f   : > { %v1776_v58 = vsel %vm1773_vm1, %v1771_v50, %v3443_v48  ;;  %v1777_v60 = vsel %vm1773_vm1, %v1772_v15, %v3444_v46  ;;  %v3507_v15 = vld [vmem:[%s4678_s10 + $0x40] ss:$16 sps:$4 sm:$0xff]   ;;  %v3510_v50 = vld [vmem:[%s4678_s10 + $0x48] ss:$16 sps:$4 sm:$0xff]  }
 0xa30   : > { %v3452_v51 = vpop.permute.xlu1 %3451  ;;  %v1774_v62 = vsel %vm1773_vm1, %v1769_v57, %v3438_v9  ;;  %v1775_v25 = vsel %vm1773_vm1, %v1770_v52, %v3439_v6  ;;  %v3509_v6 = vld [vmem:[%s4678_s10 + $0x44] ss:$16 sps:$4 sm:$0xff]   ;;  %v3512_v9 = vld [vmem:[%s4678_s10 + $0x4c] ss:$16 sps:$4 sm:$0xff]   ;;  %v3513_v57 = vld [vmem:[%s4678_s10 + $0x60] ss:$16 sps:$4 sm:$0xff]  }
 0xa31   : > { %v3454_v59 = vunpack.i.h.bf16 %v3452_v51  ;;  %v3453_v53 = vunpack.i.l.bf16 %v3452_v51  ;;  %v3447_v55 = vpop.permute.xlu0 %3446  ;;  %v3515_v51 = vld [vmem:[%s4678_s10 + $0x64] ss:$16 sps:$4 sm:$0xff]   ;;  %v3518_v52 = vld [vmem:[%s4678_s10 + $0x6c] ss:$16 sps:$4 sm:$0xff]  }
 0xa32   : > { %v3449_v61 = vunpack.i.h.bf16 %v3447_v55  ;;  %v3448_v27 = vunpack.i.l.bf16 %v3447_v55  ;;  %v3524_v55 = vld [vmem:[%s4678_s10 + $0x8c] ss:$16 sps:$4 sm:$0xff]  }
 0xa33   : > { %v1782_v63 = vsel %vm1778_vm2, %v1777_v60, %v3454_v59  ;;  %v1781_v28 = vsel %vm1778_vm2, %v1776_v58, %v3453_v53  ;;  %v3516_v59 = vld [vmem:[%s4678_s10 + $0x68] ss:$16 sps:$4 sm:$0xff]   ;;  %v3521_v53 = vld [vmem:[%s4678_s10 + $0x84] ss:$16 sps:$4 sm:$0xff]   ;;  %v3519_v58 = vld [vmem:[%s4678_s10 + $0x80] ss:$16 sps:$4 sm:$0xff]  }
 0xa34   : > { %v1784_v0 = vpack.c.bf16 %v1782_v63, %v1781_v28  ;;  %v1779_v26 = vsel %vm1778_vm2, %v1774_v62, %v3448_v27  ;;  %v1780_v1 = vsel %vm1778_vm2, %v1775_v25, %v3449_v61  ;;  %v3522_v60 = vld [vmem:[%s4678_s10 + $0x88] ss:$16 sps:$4 sm:$0xff]   ;;  %v3527_v61 = vld [vmem:[%s4678_s10 + $0xa4] ss:$16 sps:$4 sm:$0xff]   ;;  %v3530_v27 = vld [vmem:[%s4678_s10 + $0xac] ss:$16 sps:$4 sm:$0xff]  }
 0xa35   : > { %v1783_v4 = vpack.c.bf16 %v1780_v1, %v1779_v26  ;;  %v3525_v62 = vld [vmem:[%s4678_s10 + $0xa0] ss:$16 sps:$4 sm:$0xff]   ;;  %v3528_v25 = vld [vmem:[%s4678_s10 + $0xa8] ss:$16 sps:$4 sm:$0xff]   ;;  %v3533_v63 = vld [vmem:[%s4678_s10 + $0xc4] ss:$16 sps:$4 sm:$0xff]  }
 0xa36   : > { %v3536_v28 = vld [vmem:[%s4678_s10 + $0xcc] ss:$16 sps:$4 sm:$0xff]   ;;  %v3534_v26 = vld [vmem:[%s4678_s10 + $0xc8] ss:$16 sps:$4 sm:$0xff]   ;;  %v3539_v1 = vld [vmem:[%s4678_s10 + $0xe4] ss:$16 sps:$4 sm:$0xff]  }
 0xa37   : > { %3353 = vmatprep.mubr.bf16.mxu0 %v1783_v4  ;;  %v3542_v4 = vld [vmem:[%s4678_s10 + $0xec] ss:$16 sps:$4 sm:$0xff]  }
 0xa38   : > { %3354 = vmatmul.mubr.bf16.vlgmr.msra.gmra.mrb[20].mxu0 %v1784_v0  ;;  %v3531_v0 = vld [vmem:[%s4678_s10 + $0xc0] ss:$16 sps:$4 sm:$0xff]  }
 0xa39   : > { %2276 = vmatprep.mubr.bf16.mxu0 %v3743_v49 }
 0xb0b   : > { %v3355_v56 = vpop.f32.mrb[20].mxu0 }
 0xb0c   : > { %v1890_v54 = vpop.f32.mrb[21].mxu0  ;;  %v1899_v19 = vadd.f32 %v3355_v56, %v2999_v14  ;;  %v3540_v56 = vld [vmem:[%s4678_s10 + $0xe8] ss:$16 sps:$4 sm:$0xff]  }
 0xb0d   : > { %v1891_v16 = vadd.f32 %v2999_v14, %v1890_v54  ;;  %v3356_v17 = vpop.f32.mrb[22].mxu0 }
 0xb0e   : > { %v1893_v18 = vpop.f32.mrb[23].mxu0  ;;  %v4272_v24 = vadd.f32 %v3894_v11, %v1899_v19  ;;  %v1902_v36 = vadd.f32 %v3356_v17, %v2999_v14  ;;  %v3498_v11 = vld [vmem:[%s4678_s10 + $0x8] ss:$16 sps:$4 sm:$0xff]  }
 0xb0f   : > { %v4265_v20 = vadd.f32 %v3892_v10, %v1891_v16  ;;  %v1894_v21 = vadd.f32 %v2999_v14, %v1893_v18  ;;  %v3495_v10 = vld [vmem:[%s4678_s10] ss:$16 sps:$4 sm:$0xff]   ;;  %2245 = vmatpush1.bf16.msra.mxu0 %v3498_v11 }
 0xb10   : > { %v4277_v38 = vadd.f32 %v3900_v13, %v1902_v36  ;;  %v3503_v13 = vld [vmem:[%s4678_s10 + $0x24] ss:$16 sps:$4 sm:$0xff]   ;;  %2246 = vmatprep.subr.bf16.mxu0 %v3506_v3  ;;  %v3537_v14 = vld [vmem:[%s4678_s10 + $0xe0] ss:$16 sps:$4 sm:$0xff]  }
 0xb11   : > { %v4268_v22 = vadd.f32 %v3898_v12, %v1894_v21  ;;  %1911 = vadd.xlane.f32.xlu0 %v4265_v20  ;;  %v3497_v12 = vld [vmem:[%s4678_s10 + $0x4] ss:$16 sps:$4 sm:$0xff]  }
 0xb12   : > { %2191 = vmatprep.subr.bf16.mxu1 %v3497_v12 }
 0xb13   : > { %1913 = vadd.xlane.f32.xlu1 %v4268_v22  ;;  %2192 = vmatpush1.bf16.msra.mxu1 %v3495_v10 }
 0xb14   : > { %2193 = vmatprep.subr.bf16.mxu1 %v3503_v13  ;;  %2247 = vmatpush1.bf16.msra.mxu0 %v3504_v32 }
 0xb15   : > { %1915 = vadd.xlane.f32.xlu0 %v4272_v24  ;;  %2248 = vmatprep.subr.bf16.mxu0 %v3512_v9 }
 0xb17   : > { %2194 = vmatpush1.bf16.msra.mxu1 %v3501_v40  ;;  %v3008_v40 = vld [vmem:[%s4676_s8] ss:$0 sm:$0xff] }
 0xb18   : > { %2195 = vmatprep.subr.bf16.mxu1 %v3509_v6  ;;  %2249 = vmatpush1.bf16.msra.mxu0 %v3510_v50  ;;  %v3545_v50 = vld [vmem:[%s4680_s12] sm:$0xff]  }
 0xb19   : > { %1917 = vadd.xlane.f32.xlu0 %v4277_v38  ;;  %2250 = vmatprep.subr.bf16.mxu0 %v3518_v52  ;;  %v3548_v52 = vld [vmem:[%s4680_s12 + $0xc8] sm:$0xff]  }
 0xb1b   : > { %2196 = vmatpush1.bf16.msra.mxu1 %v3507_v15 }
 0xb1c   : > { %2197 = vmatprep.subr.bf16.mxu1 %v3515_v51  ;;  %2251 = vmatpush1.bf16.msra.mxu0 %v3516_v59  ;;  %v3547_v51 = vld [vmem:[%s4680_s12 + $0x48] sm:$0xff]  }
 0xb1d   : > { %2252 = vmatprep.subr.bf16.mxu0 %v3524_v55  ;;  %v3550_v59 = vld [vmem:[%s4680_s12 + $0x88] sm:$0xff]   ;;  %v3552_v55 = vld [vmem:[%s4680_s12 + $0xd0] sm:$0xff]  }
 0xb1f   : > { %2198 = vmatpush1.bf16.msra.mxu1 %v3513_v57  ;;  %v3549_v57 = vld [vmem:[%s4680_s12 + $0x8] sm:$0xff]  }
 0xb20   : > { %2199 = vmatprep.subr.bf16.mxu1 %v3521_v53  ;;  %2253 = vmatpush1.bf16.msra.mxu0 %v3522_v60  ;;  %v3551_v53 = vld [vmem:[%s4680_s12 + $0x50] sm:$0xff]  }
 0xb21   : > { %2254 = vmatprep.subr.bf16.mxu0 %v3530_v27  ;;  %v3554_v60 = vld [vmem:[%s4680_s12 + $0x90] sm:$0xff]   ;;  %v3556_v27 = vld [vmem:[%s4680_s12 + $0xd8] sm:$0xff]  }
 0xb23   : > { %2200 = vmatpush1.bf16.msra.mxu1 %v3519_v58  ;;  %v3553_v58 = vld [vmem:[%s4680_s12 + $0x10] sm:$0xff]  }
 0xb24   : > { %2201 = vmatprep.subr.bf16.mxu1 %v3527_v61  ;;  %2255 = vmatpush1.bf16.msra.mxu0 %v3528_v25  ;;  %v3555_v61 = vld [vmem:[%s4680_s12 + $0x58] sm:$0xff]  }
 0xb25   : > { %2256 = vmatprep.subr.bf16.mxu0 %v3536_v28  ;;  %v3558_v25 = vld [vmem:[%s4680_s12 + $0x98] sm:$0xff]   ;;  %v3560_v28 = vld [vmem:[%s4680_s12 + $0xe0] sm:$0xff]  }
 0xb27   : > { %2202 = vmatpush1.bf16.msra.mxu1 %v3525_v62  ;;  %v3557_v62 = vld [vmem:[%s4680_s12 + $0x18] sm:$0xff]  }
 0xb28   : > { %2203 = vmatprep.subr.bf16.mxu1 %v3533_v63  ;;  %2257 = vmatpush1.bf16.msra.mxu0 %v3534_v26  ;;  %v3559_v63 = vld [vmem:[%s4680_s12 + $0x60] sm:$0xff]  }
 0xb29   : > { %2258 = vmatprep.subr.bf16.mxu0 %v3542_v4  ;;  %v3562_v26 = vld [vmem:[%s4680_s12 + $0xa0] sm:$0xff]   ;;  %v3564_v4 = vld [vmem:[%s4680_s12 + $0xe8] sm:$0xff]  }
 0xb2b   : > { %2204 = vmatpush1.bf16.msra.mxu1 %v3531_v0  ;;  %v3561_v0 = vld [vmem:[%s4680_s12 + $0x20] sm:$0xff]  }
 0xb2c   : > { %2205 = vmatprep.subr.bf16.mxu1 %v3539_v1  ;;  %2259 = vmatpush1.bf16.msra.mxu0 %v3540_v56  ;;  %v3563_v1 = vld [vmem:[%s4680_s12 + $0x68] sm:$0xff]  }
 0xb2d   : > { %v3566_v56 = vld [vmem:[%s4680_s12 + $0xa8] sm:$0xff]  }
 0xb2f   : > { %2206 = vmatpush1.bf16.msra.mxu1 %v3537_v14  ;;  %v3565_v14 = vld [vmem:[%s4680_s12 + $0x28] sm:$0xff]  }
 0xb9e   : > { %v1912_v30 = vpop.xlane.xlu0 %1911 }
 0xb9f   : > { %v1919_v41 = vmul.f32 0.0078125, %v1912_v30 }
 0xba0   : > { %v1914_v42 = vpop.xlane.xlu1 %1913 }
 0xba1   : > { %v4305_v37 = vsub.f32 %v4265_v20, %v1919_v41  ;;  %v1920_v2 = vmul.f32 0.0078125, %v1914_v42 }
 0xba2   : > { %v1916_v43 = vpop.xlane.xlu0 %1915 }
 0xba3   : > { %v4308_v44 = vsub.f32 %v4268_v22, %v1920_v2  ;;  %v1921_v47 = vmul.f32 0.0078125, %v1916_v43  ;;  %v1927_v34 = vmul.f32 %v4305_v37, %v4305_v37  ;;  %v3009_v43 = vld [vmem:[%s4677_s9] ss:$0 sm:$0xff] }
 0xba5   : > { %v4313_v35 = vsub.f32 %v4272_v24, %v1921_v47  ;;  %1931 = vadd.xlane.f32.xlu0 %v1927_v34  ;;  %v1928_v5 = vmul.f32 %v4308_v44, %v4308_v44 }
 0xba6   : > { %v1918_v7 = vpop.xlane.xlu0 %1917 }
 0xba7   : > { %v1922_v8 = vmul.f32 0.0078125, %v1918_v7  ;;  %1933 = vadd.xlane.f32.xlu1 %v1928_v5  ;;  %v1929_v45 = vmul.f32 %v4313_v35, %v4313_v35 }
 0xba9   : > { %v4320_v46 = vsub.f32 %v4277_v38, %v1922_v8  ;;  %1935 = vadd.xlane.f32.xlu0 %v1929_v45 }
 0xbab   : > { %v1930_v48 = vmul.f32 %v4320_v46, %v4320_v46 }
 0xbad   : > { %1937 = vadd.xlane.f32.xlu1 %v1930_v48 }
 0xc32   : > { %v1932_v54 = vpop.xlane.xlu0 %1931 }
 0xc33   : > { %v1939_v16 = vmul.f32 0.0078125, %v1932_v54  ;;  %v3567_v54 = vld [vmem:[%s4680_s12 + $0x70] sm:$0xff]  }
 0xc34   : > { %v1934_v17 = vpop.xlane.xlu1 %1933 }
 0xc35   : > { %v1943_v18 = vadd.f32 1e-05, %v1939_v16  ;;  %v1940_v19 = vmul.f32 0.0078125, %v1934_v17  ;;  %v3568_v16 = vld [vmem:[%s4680_s12 + $0xf0] sm:$0xff]  }
 0xc36   : > { %v1936_v21 = vpop.xlane.xlu0 %1935  ;;  %v3569_v17 = vld [vmem:[%s4680_s12 + $0x30] sm:$0xff]  }
 0xc37   : > { %3647 = vrsqrt.f32 %v1943_v18  ;;  %v1944_v36 = vadd.f32 1e-05, %v1940_v19  ;;  %v1941_v10 = vmul.f32 0.0078125, %v1936_v21  ;;  %v3570_v18 = vld [vmem:[%s4680_s12 + $0xb0] sm:$0xff]   ;;  %v3571_v19 = vld [vmem:[%s4680_s12 + $0x78] sm:$0xff]  }
 0xc38   : > { %v3572_v21 = vld [vmem:[%s4680_s12 + $0xf8] sm:$0xff]  }
 0xc39   : > { %3649 = vrsqrt.f32 %v1944_v36  ;;  %v1945_v12 = vadd.f32 1e-05, %v1941_v10  ;;  %v3573_v36 = vld [vmem:[%s4680_s12 + $0x38] sm:$0xff]  }
 0xc3a   : > { %v1938_v11 = vpop.xlane.xlu1 %1937  ;;  %v3574_v10 = vld [vmem:[%s4680_s12 + $0xb8] sm:$0xff]  }
 0xc3b   : > { %3651 = vrsqrt.f32 %v1945_v12  ;;  %v1942_v39 = vmul.f32 0.0078125, %v1938_v11  ;;  %v2009_v12 = vld [vmem:[%s4679_s11] sm:$0xf] }
 0xc3c   : > { %v4509_v11 = vrot.slane %v2009_v12, %v743_v29 }
 0xc3d   : > { %v1946_v13 = vadd.f32 1e-05, %v1942_v39  ;;  %v4513_v39 = vrot.slane %v2009_v12, %v751_v33 }
 0xc3f   : > { %3653 = vrsqrt.f32 %v1946_v13  ;;  %v2025_v13 = vsub.s32 3, %v4008_v23 }
 0xc41   : > { %v3648_v3 = vpop.eup %3647  ;;  %v4522_v29 = vrot.slane %v2009_v12, %v2025_v13 }
 0xc42   : > { %v1951_v32 = vmul.f32 %v3648_v3, %v4305_v37 }
 0xc43   : > { %v3650_v30 = vpop.eup %3649 }
 0xc44   : > { %v1952_v41 = vmul.f32 %v3650_v30, %v4308_v44  ;;  %v1961_v42 = vmul.f32 %v3008_v40, %v1951_v32  ;;  %v4518_v32 = vrot.slane %v2009_v12, %v747_v31 }
 0xc45   : > { %v3652_v2 = vpop.eup %3651 }
 0xc46   : > { %v1962_v47 = vmul.f32 %v3008_v40, %v1952_v41  ;;  %v1971_v34 = vadd.f32 %v3009_v43, %v1961_v42  ;;  %v1953_v7 = vmul.f32 %v3652_v2, %v4313_v35  ;;  %v3543_v35 = vld [vmem:[%s4680_s12 + $0x40] sm:$0xff]  }
 0xc47   : > { %3197 = vmatprep.subr.bf16.mxu1 %v3543_v35 }
 0xc48   : > { %v1972_v5 = vadd.f32 %v3009_v43, %v1962_v47  ;;  %v1963_v37 = vmul.f32 %v3008_v40, %v1953_v7 }
 0xc49   : > { %v3654_v8 = vpop.eup %3653 }
 0xc4a   : > { %v1975_v45 = vpack.c.bf16 %v1972_v5, %v1971_v34  ;;  %v1954_v48 = vmul.f32 %v3654_v8, %v4320_v46  ;;  %v1973_v9 = vadd.f32 %v3009_v43, %v1963_v37  ;;  %v3544_v46 = vld [vmem:[%s4680_s12 + $0xc0] sm:$0xff]  }
 0xc4b   : > { %3225 = vmatprep.subr.bf16.mxu0 %v3544_v46 }
 0xc4c   : > { %2224 = vmatmul.mubr.bf16.vlgmr.msra.gmra.mrb[24].mxu1 %v1975_v45  ;;  %2277 = vmatmul.mubr.bf16.vlgmr.msra.gmra.mrb[24].mxu0 %v1975_v45  ;;  %v1964_v6 = vmul.f32 %v3008_v40, %v1954_v48 }
 0xc4d   : > { %2233 = vmatprep.mubr.bf16.mxu1 %v3743_v49  ;;  %2286 = vmatprep.mubr.bf16.mxu0 %v3743_v49  ;;  %v3546_v49 = vld [vmem:[%s4680_s12 + $0x80] sm:$0xff]  }
 0xc4e   : > { %v1974_v44 = vadd.f32 %v3009_v43, %v1964_v6  ;;  %3198 = vmatpush3.bf16.msra.mxu1 %v3545_v50  ;;  %3226 = vmatpush3.bf16.msra.mxu0 %v3546_v49 }
 0xc4f   : > { %3199 = vmatprep.subr.bf16.mxu1 %v3547_v51  ;;  %3227 = vmatprep.subr.bf16.mxu0 %v3548_v52 }
 0xc50   : > { %v1976_v15 = vpack.c.bf16 %v1974_v44, %v1973_v9 }
 0xc52   : > { %3200 = vmatpush3.bf16.msra.mxu1 %v3549_v57  ;;  %3228 = vmatpush3.bf16.msra.mxu0 %v3550_v59 }
 0xc53   : > { %3201 = vmatprep.subr.bf16.mxu1 %v3551_v53  ;;  %3229 = vmatprep.subr.bf16.mxu0 %v3552_v55 }
 0xc54   : > { %2234 = vmatmul.mubr.bf16.gmra.mrb[28].mxu1 %v1976_v15  ;;  %2287 = vmatmul.mubr.bf16.gmra.mrb[28].mxu0 %v1976_v15 }
 0xc56   : > { %3202 = vmatpush3.bf16.msra.mxu1 %v3553_v58  ;;  %3230 = vmatpush3.bf16.msra.mxu0 %v3554_v60 }
 0xc57   : > { %3203 = vmatprep.subr.bf16.mxu1 %v3555_v61  ;;  %3231 = vmatprep.subr.bf16.mxu0 %v3556_v27 }
 0xc5a   : > { %3204 = vmatpush3.bf16.msra.mxu1 %v3557_v62  ;;  %3232 = vmatpush3.bf16.msra.mxu0 %v3558_v25 }
 0xc5b   : > { %3205 = vmatprep.subr.bf16.mxu1 %v3559_v63  ;;  %3233 = vmatprep.subr.bf16.mxu0 %v3560_v28 }
 0xc5e   : > { %3206 = vmatpush3.bf16.msra.mxu1 %v3561_v0  ;;  %3234 = vmatpush3.bf16.msra.mxu0 %v3562_v26 }
 0xc5f   : > { %3207 = vmatprep.subr.bf16.mxu1 %v3563_v1  ;;  %3235 = vmatprep.subr.bf16.mxu0 %v3564_v4 }
 0xc62   : > { %3208 = vmatpush3.bf16.msra.mxu1 %v3565_v14  ;;  %3236 = vmatpush3.bf16.msra.mxu0 %v3566_v56 }
 0xc63   : > { %3209 = vmatprep.subr.bf16.mxu1 %v3567_v54  ;;  %3237 = vmatprep.subr.bf16.mxu0 %v3568_v16 }
 0xc66   : > { %3210 = vmatpush3.bf16.msra.mxu1 %v3569_v17  ;;  %3238 = vmatpush3.bf16.msra.mxu0 %v3570_v18 }
 0xc67   : > { %3211 = vmatprep.subr.bf16.mxu1 %v3571_v19  ;;  %3239 = vmatprep.subr.bf16.mxu0 %v3572_v21 }
 0xc6a   : > { %3212 = vmatpush3.bf16.msra.mxu1 %v3573_v36  ;;  %3240 = vmatpush3.bf16.msra.mxu0 %v3574_v10 }
 0xd1f   : > { %v2225_v3 = vpop.f32.mrb[24].mxu1  ;;  %v2278_v40 = vpop.f32.mrb[24].mxu0 }
 0xd20   : > { %v2226_v30 = vadd.f32 %v2225_v3, %v4509_v11  ;;  %v2279_v41 = vadd.f32 %v2278_v40, %v4513_v39  ;;  %v2227_v42 = vpop.f32.mrb[25].mxu1  ;;  %v2280_v2 = vpop.f32.mrb[25].mxu0 }
 0xd21   : > { %v2229_v43 = vpop.f32.mrb[26].mxu1  ;;  %v2282_v47 = vpop.f32.mrb[26].mxu0  ;;  %v4525_v5 = vadd.f32 %v2227_v42, %v4518_v32  ;;  %v4535_v6 = vadd.f32 %v2280_v2, %v4522_v29 }
 0xd22   : > { %v2313_v33 = vmul.f32 0.044715, %v2226_v30  ;;  %v2315_v34 = vmul.f32 0.044715, %v2279_v41  ;;  %v2230_v7 = vadd.f32 %v2229_v43, %v4509_v11  ;;  %v4529_v23 = vadd.f32 %v2282_v47, %v4513_v39  ;;  %v2231_v31 = vpop.f32.mrb[27].mxu1  ;;  %v2284_v8 = vpop.f32.mrb[27].mxu0 }
 0xd23   : > { %v4532_v37 = vadd.f32 %v2231_v31, %v4518_v32  ;;  %v4538_v9 = vadd.f32 %v2284_v8, %v4522_v29  ;;  %v4540_v15 = vmul.f32 0.5, %v2226_v30  ;;  %v2314_v49 = vmul.f32 0.044715, %v4525_v5 }
 0xd24   : > { %v2329_v45 = vmul.f32 %v2313_v33, %v2226_v30  ;;  %v2331_v48 = vmul.f32 %v2315_v34, %v2279_v41  ;;  %v2317_v44 = vmul.f32 0.044715, %v2230_v7  ;;  %v2319_v50 = vmul.f32 0.044715, %v4529_v23 }
 0xd25   : > { %v2318_v52 = vmul.f32 0.044715, %v4532_v37  ;;  %v4545_v55 = vmul.f32 0.5, %v2279_v41  ;;  %v2316_v62 = vmul.f32 0.044715, %v4535_v6  ;;  %v2330_v16 = vmul.f32 %v2314_v49, %v4525_v5 }
 0xd26   : > { %v2345_v35 = vmul.f32 %v2329_v45, %v2226_v30  ;;  %v2347_v46 = vmul.f32 %v2331_v48, %v2279_v41  ;;  %v2333_v51 = vmul.f32 %v2317_v44, %v2230_v7  ;;  %v2335_v60 = vmul.f32 %v2319_v50, %v4529_v23 }
 0xd27   : > { %v2235_v57 = vpop.f32.mrb[28].mxu1  ;;  %v2288_v59 = vpop.f32.mrb[28].mxu0  ;;  %v2320_v63 = vmul.f32 0.044715, %v4538_v9  ;;  %v2334_v18 = vmul.f32 %v2318_v52, %v4532_v37  ;;  %v2332_v12 = vmul.f32 %v2316_v62, %v4535_v6  ;;  %v2346_v2 = vmul.f32 %v2330_v16, %v4525_v5 }
 0xd28   : > { %v2361_v53 = vadd.f32 %v2345_v35, %v2226_v30  ;;  %v2363_v58 = vadd.f32 %v2347_v46, %v2279_v41  ;;  %v2237_v61 = vpop.f32.mrb[29].mxu1  ;;  %v2290_v27 = vpop.f32.mrb[29].mxu0  ;;  %v2349_v25 = vmul.f32 %v2333_v51, %v2230_v7  ;;  %v4551_v28 = vadd.f32 %v2235_v57, %v4509_v11 }
 0xd29   : > { %v2239_v0 = vpop.f32.mrb[30].mxu1  ;;  %v2292_v26 = vpop.f32.mrb[30].mxu0  ;;  %v2351_v14 = vmul.f32 %v2335_v60, %v4529_v23  ;;  %v4557_v19 = vadd.f32 %v2288_v59, %v4513_v39  ;;  %v4562_v10 = vadd.f32 %v2237_v61, %v4518_v32  ;;  %v2336_v3 = vmul.f32 %v2320_v63, %v4538_v9 }
 0xd2a   : > { %v2377_v1 = vmul.f32 0.7978846, %v2361_v53  ;;  %v2379_v4 = vmul.f32 0.7978846, %v2363_v58  ;;  %v2241_v56 = vpop.f32.mrb[31].mxu1  ;;  %v2294_v54 = vpop.f32.mrb[31].mxu0  ;;  %v2365_v17 = vadd.f32 %v2349_v25, %v2230_v7  ;;  %v4568_v41 = vadd.f32 %v2290_v27, %v4522_v29 }
 0xd2b   : > { %v2367_v21 = vadd.f32 %v2351_v14, %v4529_v23  ;;  %v2321_v36 = vmul.f32 0.044715, %v4551_v28  ;;  %v2322_v30 = vmul.f32 0.044715, %v4562_v10  ;;  %v4571_v42 = vadd.f32 %v2239_v0, %v4509_v11 }
 0xd2c   : > { %3655 = vtanh.f32 %v2377_v1  ;;  %v2381_v13 = vmul.f32 0.7978846, %v2365_v17  ;;  %v2350_v43 = vmul.f32 %v2334_v18, %v4532_v37  ;;  %v4576_v47 = vadd.f32 %v2292_v26, %v4513_v39 }
 0xd2d   : > { %3657 = vtanh.f32 %v2379_v4  ;;  %v2383_v40 = vmul.f32 0.7978846, %v2367_v21  ;;  %v2337_v33 = vmul.f32 %v2321_v36, %v4551_v28  ;;  %v2323_v34 = vmul.f32 0.044715, %v4557_v19 }
 0xd2e   : > { %3659 = vtanh.f32 %v2381_v13  ;;  %v2324_v31 = vmul.f32 0.044715, %v4568_v41  ;;  %v2301_v8 = vmul.f32 0.5, %v2230_v7  ;;  %v2338_v45 = vmul.f32 %v2322_v30, %v4562_v10 }
 0xd2f   : > { %3661 = vtanh.f32 %v2383_v40  ;;  %v4583_v11 = vadd.f32 %v2241_v56, %v4518_v32  ;;  %v4586_v48 = vadd.f32 %v2294_v54, %v4522_v29  ;;  %v2348_v44 = vmul.f32 %v2332_v12, %v4535_v6 }
 0xd30   : > { %v2352_v39 = vmul.f32 %v2336_v3, %v4538_v9  ;;  %v2325_v35 = vmul.f32 0.044715, %v4571_v42  ;;  %v2327_v46 = vmul.f32 0.044715, %v4576_v47  ;;  %v2340_v50 = vmul.f32 %v2324_v31, %v4568_v41 }
 0xd31   : > { %v2326_v7 = vmul.f32 0.044715, %v4583_v11  ;;  %v2328_v49 = vmul.f32 0.044715, %v4586_v48  ;;  %v2362_v32 = vadd.f32 %v2346_v2, %v4525_v5  ;;  %v2303_v51 = vmul.f32 0.5, %v4529_v23 }
 0xd32   : > { %v2353_v29 = vmul.f32 %v2337_v33, %v4551_v28  ;;  %v2339_v52 = vmul.f32 %v2323_v34, %v4557_v19  ;;  %v2366_v57 = vadd.f32 %v2350_v43, %v4532_v37  ;;  %v2354_v59 = vmul.f32 %v2338_v45, %v4562_v10 }
 0xd33   : > { %v2342_v53 = vmul.f32 %v2326_v7, %v4583_v11  ;;  %v2344_v58 = vmul.f32 %v2328_v49, %v4586_v48  ;;  %v2378_v60 = vmul.f32 0.7978846, %v2362_v32  ;;  %v2341_v27 = vmul.f32 %v2325_v35, %v4571_v42 }
 0xd34   : > { %v2382_v62 = vmul.f32 0.7978846, %v2366_v57  ;;  %v2364_v25 = vadd.f32 %v2348_v44, %v4535_v6  ;;  %v2368_v23 = vadd.f32 %v2352_v39, %v4538_v9  ;;  %v2356_v0 = vmul.f32 %v2340_v50, %v4568_v41 }
 0xd35   : > { %v2343_v26 = vmul.f32 %v2327_v46, %v4576_v47  ;;  %v2358_v1 = vmul.f32 %v2342_v53, %v4583_v11  ;;  %3663 = vtanh.f32 %v2378_v60  ;;  %v2355_v16 = vmul.f32 %v2339_v52, %v4557_v19 }
 0xd36   : > { %v3656_v61 = vpop.eup %3655  ;;  %3665 = vtanh.f32 %v2382_v62  ;;  %v2380_v4 = vmul.f32 0.7978846, %v2364_v25  ;;  %v2384_v14 = vmul.f32 0.7978846, %v2368_v23  ;;  %v2360_v17 = vmul.f32 %v2344_v58, %v4586_v48 }
 0xd37   : > { %v3658_v63 = vpop.eup %3657  ;;  %v2409_v56 = vadd.f32 1.0, %v3656_v61  ;;  %v2370_v21 = vadd.f32 %v2354_v59, %v4562_v10  ;;  %v2357_v12 = vmul.f32 %v2341_v27, %v4571_v42  ;;  %v2374_v3 = vadd.f32 %v2358_v1, %v4583_v11 }
 0xd38   : > { %v3660_v54 = vpop.eup %3659  ;;  %v2411_v18 = vadd.f32 1.0, %v3658_v63  ;;  %3667 = vtanh.f32 %v2380_v4  ;;  %v2359_v40 = vmul.f32 %v2343_v26, %v4576_v47  ;;  %v2372_v31 = vadd.f32 %v2356_v0, %v4568_v41 }
 0xd39   : > { %v3662_v36 = vpop.eup %3661  ;;  %v2413_v13 = vadd.f32 1.0, %v3660_v54  ;;  %3669 = vtanh.f32 %v2384_v14  ;;  %v2386_v2 = vmul.f32 0.7978846, %v2370_v21  ;;  %v2425_v43 = vmul.f32 %v2409_v56, %v4540_v15 }
 0xd3a   : > { %v2415_v30 = vadd.f32 1.0, %v3662_v36  ;;  %v2390_v34 = vmul.f32 0.7978846, %v2374_v3  ;;  %v2427_v45 = vmul.f32 %v2411_v18, %v4545_v55  ;;  %v2376_v39 = vadd.f32 %v2360_v17, %v4586_v48 }
 0xd3b   : > { %v2429_v33 = vmul.f32 %v2413_v13, %v2301_v8  ;;  %3671 = vtanh.f32 %v2386_v2  ;;  %v2388_v46 = vmul.f32 0.7978846, %v2372_v31  ;;  %v2369_v49 = vadd.f32 %v2353_v29, %v4551_v28 }
 0xd3c   : > { %v2431_v44 = vmul.f32 %v2415_v30, %v2303_v51  ;;  %3673 = vtanh.f32 %v2390_v34  ;;  %v2392_v7 = vmul.f32 0.7978846, %v2376_v39  ;;  %v2373_v32 = vadd.f32 %v2357_v12, %v4571_v42 }
 0xd3d   : > { %v2441_v35 = vpack.c.bf16 %v2429_v33, %v2425_v43  ;;  %3675 = vtanh.f32 %v2388_v46  ;;  %v2371_v15 = vadd.f32 %v2355_v16, %v4557_v19  ;;  %v2385_v52 = vmul.f32 0.7978846, %v2369_v49 }
 0xd3e   : > { %v2443_v50 = vpack.c.bf16 %v2431_v44, %v2427_v45  ;;  %3677 = vtanh.f32 %v2392_v7  ;;  %v2389_v55 = vmul.f32 0.7978846, %v2373_v32  ;;  %v2375_v51 = vadd.f32 %v2359_v40, %v4576_v47 }
 0xd3f   : > { %v3664_v8 = vpop.eup %3663  ;;  %v2298_v59 = vmul.f32 0.5, %v4525_v5  ;;  %v2387_v58 = vmul.f32 0.7978846, %v2371_v15  ;;  %v2302_v60 = vmul.f32 0.5, %v4532_v37  ;;  %3679 = vtanh.f32 %v2385_v52 }
 0xd40   : > { %v3666_v57 = vpop.eup %3665  ;;  %v2410_v53 = vadd.f32 1.0, %v3664_v8  ;;  %v2391_v29 = vmul.f32 0.7978846, %v2375_v51  ;;  %3681 = vtanh.f32 %v2389_v55  ;;  %v2300_v0 = vmul.f32 0.5, %v4535_v6 }
 0xd41   : > { %v2414_v61 = vadd.f32 1.0, %v3666_v57  ;;  %3683 = vtanh.f32 %v2387_v58  ;;  %v2304_v26 = vmul.f32 0.5, %v4538_v9  ;;  %v2306_v16 = vmul.f32 0.5, %v4562_v10 }
 0xd42   : > { %v3668_v27 = vpop.eup %3667  ;;  %v2426_v25 = vmul.f32 %v2410_v53, %v2298_v59  ;;  %3685 = vtanh.f32 %v2391_v29  ;;  %v2310_v17 = vmul.f32 0.5, %v4583_v11  ;;  %v2308_v3 = vmul.f32 0.5, %v4568_v41 }
 0xd43   : > { %v3670_v62 = vpop.eup %3669  ;;  %v2430_v23 = vmul.f32 %v2414_v61, %v2302_v60  ;;  %v2412_v63 = vadd.f32 1.0, %v3668_v27  ;;  %v2312_v40 = vmul.f32 0.5, %v4586_v48  ;;  %v2305_v45 = vmul.f32 0.5, %v4551_v28 }
 0xd44   : > { %v2416_v1 = vadd.f32 1.0, %v3670_v62  ;;  %v2309_v44 = vmul.f32 0.5, %v4571_v42  ;;  %v2307_v41 = vmul.f32 0.5, %v4557_v19  ;;  %v3042_v42 = vld [vmem:[%s4681_s13] ss:$0 sm:$0xff] }
 0xd45   : > { %v3672_v5 = vpop.eup %3671  ;;  %v2442_v4 = vpack.c.bf16 %v2430_v23, %v2426_v25  ;;  %v2428_v37 = vmul.f32 %v2412_v63, %v2300_v0 }
 0xd46   : > { %v3674_v14 = vpop.eup %3673  ;;  %v2432_v56 = vmul.f32 %v2416_v1, %v2304_v26  ;;  %v2418_v54 = vadd.f32 1.0, %v3672_v5 }
 0xd47   : > { %2744 = vmatprep.mubr.bf16.mxu1 %v2442_v4  ;;  %v2422_v18 = vadd.f32 1.0, %v3674_v14  ;;  %v3676_v21 = vpop.eup %3675 }
 0xd48   : > { %v2444_v36 = vpack.c.bf16 %v2432_v56, %v2428_v37  ;;  %2745 = vmatmul.mubr.bf16.vlgmr.msra.gmra.mrb[32].mxu1 %v2441_v35  ;;  %v3678_v6 = vpop.eup %3677  ;;  %v2434_v12 = vmul.f32 %v2418_v54, %v2306_v16  ;;  %v2420_v13 = vadd.f32 1.0, %v3676_v21 }
 0xd49   : > { %v2438_v9 = vmul.f32 %v2422_v18, %v2310_v17  ;;  %v2424_v30 = vadd.f32 1.0, %v3678_v6  ;;  %v3680_v2 = vpop.eup %3679 }
 0xd4a   : > { %2793 = vmatprep.mubr.bf16.mxu0 %v2444_v36  ;;  %v3682_v10 = vpop.eup %3681  ;;  %v2436_v33 = vmul.f32 %v2420_v13, %v2308_v3  ;;  %v2417_v34 = vadd.f32 1.0, %v3680_v2 }
 0xd4b   : > { %2794 = vmatmul.mubr.bf16.vlgmr.msra.gmra.mrb[32].mxu0 %v2443_v50  ;;  %v2446_v43 = vpack.c.bf16 %v2438_v9, %v2434_v12  ;;  %v2440_v11 = vmul.f32 %v2424_v30, %v2312_v40  ;;  %v3684_v31 = vpop.eup %3683  ;;  %v2421_v39 = vadd.f32 1.0, %v3682_v10  ;;  %v2311_v50 = vmul.f32 0.5, %v4576_v47 }
 0xd4c   : > { %v3686_v35 = vpop.eup %3685  ;;  %v2419_v48 = vadd.f32 1.0, %v3684_v31  ;;  %v2433_v7 = vmul.f32 %v2417_v34, %v2305_v45 }
 0xd4d   : > { %2752 = vmatprep.mubr.bf16.mxu1 %v2446_v43  ;;  %v2448_v46 = vpack.c.bf16 %v2440_v11, %v2436_v33  ;;  %v2437_v49 = vmul.f32 %v2421_v39, %v2309_v44  ;;  %v2423_v32 = vadd.f32 1.0, %v3686_v35 }
 0xd4e   : > { %v2435_v8 = vmul.f32 %v2419_v48, %v2307_v41 }
 0xd4f   : > { %2801 = vmatprep.mubr.bf16.mxu0 %v2448_v46  ;;  %v2445_v15 = vpack.c.bf16 %v2437_v49, %v2433_v7  ;;  %v2439_v52 = vmul.f32 %v2423_v32, %v2311_v50 }
 0xd51   : > { %2753 = vmatmul.mubr.bf16.gmra.mrb[36].mxu1 %v2445_v15  ;;  %v2447_v55 = vpack.c.bf16 %v2439_v52, %v2435_v8 }
 0xd53   : > { %2802 = vmatmul.mubr.bf16.gmra.mrb[36].mxu0 %v2447_v55 }
 0xe1b   : > { %v3213_v28 = vpop.f32.mrb[32].mxu1 }
 0xe1c   : > { %v3214_v51 = vpop.f32.mrb[33].mxu1 }
 0xe1d   : > { %v3215_v19 = vadd.f32 %v3214_v51, %v3213_v28  ;;  %v3216_v57 = vpop.f32.mrb[34].mxu1 }
 0xe1e   : > { %v3241_v59 = vpop.f32.mrb[32].mxu0  ;;  %v3217_v53 = vpop.f32.mrb[35].mxu1 }
 0xe1f   : > { %v2747_v47 = vadd.f32 %v3215_v19, %v3042_v42  ;;  %v3242_v58 = vpop.f32.mrb[33].mxu0  ;;  %v3218_v60 = vadd.f32 %v3217_v53, %v3216_v57 }
 0xe20   : > { %v3243_v61 = vadd.f32 %v3242_v58, %v3241_v59  ;;  %v3244_v29 = vpop.f32.mrb[34].mxu0 }
 0xe21   : > { %v2750_v27 = vadd.f32 %v3218_v60, %v3042_v42  ;;  %v3245_v62 = vpop.f32.mrb[35].mxu0 }
 0xe22   : > { %v2796_v25 = vadd.f32 %v3243_v61, %v2747_v47  ;;  %v3246_v23 = vadd.f32 %v3245_v62, %v3244_v29 }
 0xe24   : > { %v2799_v63 = vadd.f32 %v3246_v23, %v2750_v27  ;;  %v2810_v0 = vadd.f32 %v2796_v25, %v4265_v20  ;;  %v3219_v1 = vpop.f32.mrb[36].mxu1 }
 0xe25   : > { %v3220_v5 = vpop.f32.mrb[37].mxu1 }
 0xe26   : > { %v2811_v26 = vadd.f32 %v2799_v63, %v4268_v22  ;;  %v3247_v14 = vpop.f32.mrb[36].mxu0  ;;  %v3221_v37 = vadd.f32 %v3220_v5, %v3219_v1  ;;  %v3222_v56 = vpop.f32.mrb[38].mxu1 }
 0xe27   : > { %v3248_v54 = vpop.f32.mrb[37].mxu0  ;;  %v3223_v16 = vpop.f32.mrb[39].mxu1 }
 0xe28   : > { %v3129_v4 = vpack.c.bf16 %v2811_v26, %v2810_v0  ;;  %v2755_v17 = vadd.f32 %v3221_v37, %v3042_v42  ;;  %v3249_v18 = vadd.f32 %v3248_v54, %v3247_v14  ;;  %v3250_v21 = vpop.f32.mrb[38].mxu0  ;;  %v3224_v20 = vadd.f32 %v3223_v16, %v3222_v56 }
 0xe29   : > { %v3251_v36 = vpop.f32.mrb[39].mxu0 }
 0xe2a   : > { %3130 = vst [vmem:[%s627_s25] sm:$0xff] %v3129_v4   ;;  %v2804_v22 = vadd.f32 %v3249_v18, %v2755_v17  ;;  %v2758_v6 = vadd.f32 %v3224_v20, %v3042_v42  ;;  %v3252_v12 = vadd.f32 %v3251_v36, %v3250_v21 }
 0xe2c   : > { %v2807_v9 = vadd.f32 %v3252_v12, %v2758_v6  ;;  %v2812_v13 = vadd.f32 %v2804_v22, %v4272_v24 }
 0xe2e   : > { %v2813_v3 = vadd.f32 %v2807_v9, %v4277_v38 }
 0xe30   : > { %v3134_v40 = vpack.c.bf16 %v2813_v3, %v2812_v13 }
 0xe32   : > { %3144 = vst [vmem:[%s627_s25 + $0x8] sm:$0xff] %v3134_v40  }
 0xe33 PF: > { %s24_s19 = sadd.s32 1, %s3741_s19   ;;  %s4691_s20 = sld [smem:[#allocation3_spill]] }
 0xe34   : > { %p21_p12 = scmp.ge.s32.totalorder %s24_s19, 6   ;;  %s4692_s29 = smov %s3721_s30 }
 0xe35   : > { %s4693_s30 = smov %s3871_s24  ;;  %s4694_s15 = smov %s3733_s17 }
 0xe36   : > { %s4695_s16 = smov %s3737_s18  ;;  %s4697_s18 = smov %s4703_s21 }
 0xe37   :  { %23 = sbr.rel (!%p21_p12) target bundleno = 7 (0x7), region = 155 }
 0xe39   : > { %s4696_s17 = smov %s4691_s20 }

// kernel: swin_forward.9
= control target key start
LH: loop header
LB: loop body
LE: loop exit
PB: predicated region body
PF: predicated region fallthrough
CT: control target
= control target key end

     0   :  { %s5125_s0 = inlined_call_operand.vmem [shape: bf16[2,64,128], index: 0, kind: input, shape index: {}]   ;;  %s5126_s1 = inlined_call_operand.vmem [shape: f32[1,128], index: 1, kind: input, shape index: {}]   ;;  %s5127_s2 = inlined_call_operand.hbm [shape: f32[1,128], index: 2, kind: input, shape index: {}]   ;;  %s5128_s3 = inlined_call_operand.vmem [shape: bf16[128,384], index: 3, kind: input, shape index: {}]   ;;  %s5129_s4 = inlined_call_operand.vmem [shape: f32[1,384], index: 4, kind: input, shape index: {}]   ;;  %s5130_s5 = inlined_call_operand.vmem [shape: bf16[4,2,32,32], index: 5, kind: input, shape index: {}]   ;;  %s5131_s6 = inlined_call_operand.vmem [shape: bf16[128,128], index: 6, kind: input, shape index: {}]   ;;  %s5132_s7 = inlined_call_operand.hbm [shape: f32[1,128], index: 7, kind: input, shape index: {}]   ;;  %s5133_s8 = inlined_call_operand.hbm [shape: f32[1,128], index: 8, kind: input, shape index: {}]   ;;  %s5134_s9 = inlined_call_operand.hbm [shape: f32[1,128], index: 9, kind: input, shape index: {}]   ;;  %s5135_s10 = inlined_call_operand.vmem [shape: bf16[128,512], index: 10, kind: input, shape index: {}]   ;;  %s5136_s11 = inlined_call_operand.vmem [shape: f32[1,512], index: 11, kind: input, shape index: {}]   ;;  %s5137_s12 = inlined_call_operand.vmem [shape: bf16[512,128], index: 12, kind: input, shape index: {}]   ;;  %s5138_s13 = inlined_call_operand.hbm [shape: f32[1,128], index: 13, kind: input, shape index: {}]   ;;  %s5139_s14 = inlined_call_operand.vmem [shape: bf16[2,64,128], index: 14, kind: output, shape index: {}]  }
   0x1   :  { %5148 = sst [smem:[#allocation18_spill]] %s5126_s1 }
   0x2   :  { %5149 = sst [smem:[#allocation19_spill]] %s5129_s4 }
   0x3   :  { %5150 = sst [smem:[#allocation20_spill]] %s5131_s6 }
   0x4   :  { %5151 = sst [smem:[#allocation21_spill]] %s5132_s7 }
   0x5   :  { %5152 = sst [smem:[#allocation22_spill]] %s5135_s10 }
   0x6   :  { %5153 = sst [smem:[#allocation23_spill]] %s5136_s11 }
   0x7   :  { %5154 = sst [smem:[#allocation24_spill]] %s5137_s12 }
   0x8   :  { %5155 = sst [smem:[#allocation25_spill]] %s5139_s14 }
   0x9   :  { %19 = vsyncpa [#allocation3], 0 }
   0xa   :  { %20 = vsyncpa [#allocation6], 0 }
   0xb   :  { %21 = vsyncpa [#allocation9], 0  ;;  %s4153_s29 = smov 0   ;;  %s4155_s30 = smov 0  }
   0xc   :  { %s4157_s15 = smov 0   ;;  %s4159_s16 = smov 0  }
   0xd   :  { %s4161_s17 = smov 0   ;;  %s4163_s18 = smov 0  }
   0xe   :  { %s4165_s19 = smov 0  }
   0xf LB: > { %5156 = sst [smem:[#allocation14_spill]] %s4063_s18  ;;  %s3055_s20 = sadd.s32 4294967295, %s4067_s19   ;;  %s4067_s19 = sphi %s4165_s19, %s27_s19   ;;  %s4063_s18 = sphi %s4163_s18, %s5179_s18   ;;  %s4059_s17 = sphi %s4161_s17, %s5183_s17   ;;  %s4055_s16 = sphi %s4159_s16, %s5177_s16   ;;  %s4051_s15 = sphi %s4157_s15, %s5182_s15   ;;  %s4047_s30 = sphi %s4155_s30, %s5181_s30   ;;  %s4043_s29 = sphi %s4153_s29, %s5180_s29  }
  0x10   : > { %s36_s21 = sadd.s32 1, %s4059_s17  ;;  %s39_s22 = sadd.s32 1, %s4063_s18 }
  0x11   : > { %p37_p0 = scmp.ge.s32.totalorder %s36_s21, 2  ;;  %s158_s23 = sadd.s32 1, %s4047_s30 }
  0x12   : > { %p165_p1 = scmp.ne.s32.totalorder %s4047_s30, %s4043_s29  ;;  %p166_p2 = scmp.eq.s32.totalorder %s4067_s19, 0 }
  0x13   : > { %s5185_s21 = smov (%p37_p0, %s36_s21), 0  ;;  %s5187_s22 = smov (!%p37_p0, %s39_s22), %s4063_s18 }
  0x14   : > { %5157 = sst [smem:[#allocation15_spill]] %s5185_s21  ;;  %s155_s24 = ssub.s32 %s4059_s17, %s5185_s21 }
  0x15   : > { %p41_p3 = scmp.ge.s32.totalorder %s5187_s22, 2  ;;  %p156_p4 = scmp.eq.s32.totalorder %s155_s24, 0 }
  0x16   : > { %p4200_p5 = por %p166_p2, %p165_p1  ;;  %p3057_p6 = scmp.ge.s32.totalorder %s4067_s19, 1 }
  0x17   : > { %s5189_s22 = smov (%p41_p3, %s5187_s22), 0  ;;  %p378_p7 = scmp.lt.s32.totalorder %s4067_s19, 5 }
  0x18   : > { %s5158_s25 = scalar_select %p4200_p5, 1, 0 }
  0x19   : > { %5159 = sst [smem:[#allocation16_spill]] %s5189_s22  ;;  %p4211_p8 = scmp.eq.s32.totalorder %s3055_s20, 0 }
  0x1a   : > { %s4208_s26 = scalar_select %p156_p4, %s4047_s30, %s158_s23  }
  0x1b   : > { %s5161_s27 = scalar_select %p4211_p8, 1, 0 }
  0x1c   : > { %5160 = sst [smem:[#allocation17_spill]] %s4208_s26  ;;  %p4215_p9 = pnand %p3057_p6, %p378_p7 }
  0x1d   : > { %s4069_s24 = smov [#allocation5]   ;;  %s4070_s18 = smov [#allocation8]  }
  0x1e   : > { %s5162_s28 = scalar_select %p4215_p9, 1, 0 }
  0x1f   : > { %s414_s21 = sshll.u32 %s4069_s24, 4  ;;  %p3508_p10 = pneg %p4215_p9  ;;  %s415_s21 = int_to_ptr.vmem [resolvable:$true] %s414_s21 }
  0x20   : > { %s436_s22 = sshll.u32 %s4070_s18, 4  ;;  %s5164_s7 = sld [smem:[#allocation21_spill]]  ;;  %s4221_s22 = int_to_ptr.vmem [resolvable:$true] %s436_s22 }
  0x21   : > { %p4225_p11 = pnand %p4211_p8, %p3508_p10 }
  0x23   : > { %p4237_p13 = pneg %p4225_p11 }
  0x26   : > { %s3861_s14 = scalar_lea.hbm %s5164_s7, 16 }
  0x27   : > { %p3862_p12 = scmp.ne.s32.totalorder %s5164_s7, %s3861_s14  ;;  %p3868_p2 = scmp.lt.u32.totalorder %s3861_s14, %s5164_s7 }
  0x29   : > { %p3864_p0 = pnand %p4237_p13, %p3862_p12 }
  0x2b   : > { %p3865_p1 = pneg %p3864_p0 }
  0x2d   : > { %p3870_p3 = pnand %p3868_p2, %p3865_p1 }
  0x2f   : > { %3873 = shalt.err (!%p3870_p3)
}
  0x30   : > { %s3874_s26 = scalar_lea.vmem %s415_s21, 16  ;;  %s3881_s11 = scalar_lea.vmem %s415_s21, 32 }
  0x31   : > { %p3875_p4 = scmp.ne.s32.totalorder %s415_s21, %s3874_s26  ;;  %p3882_p10 = scmp.lt.s32.totalorder %s415_s21, %s415_s21 }
  0x32   : > { %p3883_p8 = scmp.lt.s32.totalorder %s3881_s11, %s3874_s26 }
  0x33   : > { %p3877_p6 = pnand %p3875_p4, %p4237_p13 }
  0x34   : > { %p3884_p9 = por %p3883_p8, %p3882_p10 }
  0x35   : > { %p3878_p7 = pneg %p3877_p6 }
  0x37   : > { %p3885_p5 = pnand %p3884_p9, %p3878_p7 }
  0x39   : > { %3888 = shalt.err (!%p3885_p5)
}
  0x3a   : > { %3514 = dma.hbm_to_vmem [thread:$0]  (!%p4225_p11), %s5164_s7, 16, %s415_s21, [#allocation6]  }
  0x3b   : > { %s3889_s18 = scalar_lea.hbm %s5134_s9, 16 }
  0x3c   : > { %p3890_p12 = scmp.ne.s32.totalorder %s5134_s9, %s3889_s18  ;;  %p3896_p5 = scmp.lt.u32.totalorder %s3889_s18, %s5134_s9 }
  0x3e   : > { %p3892_p0 = pnand %p3890_p12, %p4237_p13 }
  0x40   : > { %p3893_p8 = pneg %p3892_p0 }
  0x42   : > { %p3898_p9 = pnand %p3896_p5, %p3893_p8 }
  0x44   : > { %3901 = shalt.err (!%p3898_p9)
}
  0x45   : > { %s3902_s21 = scalar_lea.vmem %s4221_s22, 16  ;;  %s3909_s4 = scalar_lea.vmem %s4221_s22, 32 }
  0x46   : > { %p3903_p1 = scmp.ne.s32.totalorder %s4221_s22, %s3902_s21  ;;  %p3910_p4 = scmp.lt.s32.totalorder %s4221_s22, %s4221_s22 }
  0x47   : > { %p3911_p6 = scmp.lt.s32.totalorder %s3909_s4, %s3902_s21 }
  0x48   : > { %p3905_p2 = pnand %p3903_p1, %p4237_p13 }
  0x49   : > { %p3912_p7 = por %p3911_p6, %p3910_p4 }
  0x4a   : > { %p3906_p3 = pneg %p3905_p2 }
  0x4c   : > { %p3913_p10 = pnand %p3912_p7, %p3906_p3 }
  0x4e   : > { %3916 = shalt.err (!%p3913_p10)
}
  0x4f   : > { %3520 = dma.hbm_to_vmem [thread:$0]  (!%p4225_p11), %s5134_s9, 16, %s4221_s22, [#allocation9]  }
  0x50   : > { %s4071_s23 = smov [#allocation2]   ;;  %s4072_s14 = smov [#allocation7]  }
  0x51   : > { %s394_s10 = sshll.u32 %s4071_s23, 4  ;;  %s425_s18 = sshll.u32 %s4072_s14, 4  ;;  %s395_s10 = int_to_ptr.vmem [resolvable:$true] %s394_s10  ;;  %s426_s18 = int_to_ptr.vmem [resolvable:$true] %s425_s18 }
  0x52   : > { %s3917_s21 = scalar_lea.hbm %s5127_s2, 16 }
  0x53   : > { %p3918_p12 = scmp.ne.s32.totalorder %s5127_s2, %s3917_s21  ;;  %p3924_p5 = scmp.lt.u32.totalorder %s3917_s21, %s5127_s2 }
  0x55   : > { %p3920_p0 = pnand %p3918_p12, %p4237_p13 }
  0x57   : > { %p3921_p8 = pneg %p3920_p0 }
  0x59   : > { %p3926_p9 = pnand %p3924_p5, %p3921_p8 }
  0x5b   : > { %3929 = shalt.err (!%p3926_p9)
}
  0x5c   : > { %s3930_s22 = scalar_lea.vmem %s395_s10, 16  ;;  %s3937_s12 = scalar_lea.vmem %s395_s10, 32 }
  0x5d   : > { %p3931_p1 = scmp.ne.s32.totalorder %s395_s10, %s3930_s22  ;;  %p3938_p4 = scmp.lt.s32.totalorder %s395_s10, %s395_s10 }
  0x5e   : > { %p3939_p6 = scmp.lt.s32.totalorder %s3937_s12, %s3930_s22 }
  0x5f   : > { %p3933_p2 = pnand %p3931_p1, %p4237_p13 }
  0x60   : > { %p3940_p7 = por %p3939_p6, %p3938_p4 }
  0x61   : > { %p3934_p3 = pneg %p3933_p2 }
  0x63   : > { %p3941_p10 = pnand %p3940_p7, %p3934_p3 }
  0x65   : > { %3944 = shalt.err (!%p3941_p10)
}
  0x66   : > { %3511 = dma.hbm_to_vmem [thread:$0]  (!%p4225_p11), %s5127_s2, 16, %s395_s10, [#allocation3]  }
  0x67   : > { %s3945_s26 = scalar_lea.hbm %s5133_s8, 16 }
  0x68   : > { %p3946_p12 = scmp.ne.s32.totalorder %s5133_s8, %s3945_s26  ;;  %p3952_p5 = scmp.lt.u32.totalorder %s3945_s26, %s5133_s8 }
  0x6a   : > { %p3948_p0 = pnand %p3946_p12, %p4237_p13 }
  0x6c   : > { %p3949_p8 = pneg %p3948_p0 }
  0x6e   : > { %p3954_p9 = pnand %p3952_p5, %p3949_p8 }
  0x70   : > { %3957 = shalt.err (!%p3954_p9)
}
  0x71   : > { %s3958_s22 = scalar_lea.vmem %s426_s18, 16  ;;  %s3965_s10 = scalar_lea.vmem %s426_s18, 32 }
  0x72   : > { %p3959_p1 = scmp.ne.s32.totalorder %s426_s18, %s3958_s22  ;;  %p3966_p4 = scmp.lt.s32.totalorder %s426_s18, %s426_s18 }
  0x73   : > { %p3967_p6 = scmp.lt.s32.totalorder %s3965_s10, %s3958_s22 }
  0x74   : > { %p3961_p2 = pnand %p3959_p1, %p4237_p13 }
  0x75   : > { %p3968_p7 = por %p3967_p6, %p3966_p4 }
  0x76   : > { %p3962_p3 = pneg %p3961_p2 }
  0x78   : > { %p3969_p10 = pnand %p3968_p7, %p3962_p3 }
  0x7a   : > { %3972 = shalt.err (!%p3969_p10)
}
  0x7b   : > { %3517 = dma.hbm_to_vmem [thread:$0]  (!%p4225_p11), %s5133_s8, 16, %s426_s18, [#allocation6]  }
  0x7c   : > { %s4073_s23 = smov [#allocation10]   ;;  %s3973_s11 = scalar_lea.hbm %s5138_s13, 16 }
  0x7d   : > { %s456_s1 = sshll.u32 %s4073_s23, 4  ;;  %p3974_p12 = scmp.ne.s32.totalorder %s5138_s13, %s3973_s11  ;;  %s457_s1 = int_to_ptr.vmem [resolvable:$true] %s456_s1 }
  0x7e   : > { %p3980_p5 = scmp.lt.u32.totalorder %s3973_s11, %s5138_s13 }
  0x7f   : > { %p3976_p0 = pnand %p3974_p12, %p4237_p13 }
  0x81   : > { %p3977_p8 = pneg %p3976_p0 }
  0x83   : > { %p3982_p9 = pnand %p3980_p5, %p3977_p8 }
  0x85   : > { %3985 = shalt.err (!%p3982_p9)
}
  0x86   : > { %s3986_s18 = scalar_lea.vmem %s457_s1, 16  ;;  %s3993_s10 = scalar_lea.vmem %s457_s1, 32 }
  0x87   : > { %p3987_p1 = scmp.ne.s32.totalorder %s457_s1, %s3986_s18  ;;  %p3994_p4 = scmp.lt.s32.totalorder %s457_s1, %s457_s1 }
  0x88   : > { %p3995_p6 = scmp.lt.s32.totalorder %s3993_s10, %s3986_s18 }
  0x89   : > { %p3989_p2 = pnand %p3987_p1, %p4237_p13 }
  0x8a   : > { %p3996_p7 = por %p3995_p6, %p3994_p4 }
  0x8b   : > { %p3990_p3 = pneg %p3989_p2 }
  0x8d   : > { %p3997_p10 = pnand %p3996_p7, %p3990_p3 }
  0x8f   : > { %4000 = shalt.err (!%p3997_p10)
}
  0x90   : > { %3523 = dma.hbm_to_vmem [thread:$0]  (!%p4225_p11), %s5138_s13, 16, %s457_s1, [#allocation9]  }
  0x91   : > { %p3063_p12 = scmp.ge.s32.totalorder %s4067_s19, 4 }
  0x92   : > { %p5166_p0 = scmp.ne.s32.totalorder (!%p3063_p12), %s5158_s25, 0 }
  0x93   : > { %463 = sbr.rel (%p3063_p12) target bundleno = 162 (0xa2), region = 64 }
  0x9a   : > { %479 = sbr.rel (!%p5166_p0) target bundleno = 162 (0xa2), region = 72  ;;  %s481_s24 = sand.u32 (%p5166_p0), 1, %s4047_s30  }
  0x9b   : > { %s3204_s23 = sshll.u32 (%p5166_p0), %s4059_s17, 4  ;;  %s3064_s14 = sshll.u32 (%p5166_p0), %s481_s24, 6 }
  0x9c   : > { %s486_s21 = scalar_lea.vmem (%p5166_p0), %s5130_s5, %s3204_s23  ;;  %s483_s20 = scalar_lea.vmem (%p5166_p0), [#allocation4], %s3064_s14 }
  0x9d   : > { %v502_v0 = vld [vmem:[%s486_s21] sm:$0xff] (%p5166_p0)   ;;  %v506_v1 = vld [vmem:[%s486_s21 + $0x8] sm:$0xff] (%p5166_p0)  }
  0x9e   : > { %v510_v2 = vld [vmem:[%s486_s21 + $0x20] sm:$0xff] (%p5166_p0)   ;;  %503 = vst [vmem:[%s483_s20] sm:$0xff] (%p5166_p0), %v502_v0   ;;  %507 = vst [vmem:[%s483_s20 + $0x8] sm:$0xff] (%p5166_p0), %v506_v1   ;;  %v514_v3 = vld [vmem:[%s486_s21 + $0x28] sm:$0xff] (%p5166_p0)  }
  0x9f   : > { %511 = vst [vmem:[%s483_s20 + $0x10] sm:$0xff] (%p5166_p0), %v510_v2   ;;  %v518_v4 = vld [vmem:[%s486_s21 + $0x40] sm:$0xff] (%p5166_p0)   ;;  %v522_v5 = vld [vmem:[%s486_s21 + $0x48] sm:$0xff] (%p5166_p0)   ;;  %515 = vst [vmem:[%s483_s20 + $0x18] sm:$0xff] (%p5166_p0), %v514_v3  }
  0xa0   : > { %519 = vst [vmem:[%s483_s20 + $0x20] sm:$0xff] (%p5166_p0), %v518_v4   ;;  %523 = vst [vmem:[%s483_s20 + $0x28] sm:$0xff] (%p5166_p0), %v522_v5   ;;  %v526_v6 = vld [vmem:[%s486_s21 + $0x60] sm:$0xff] (%p5166_p0)   ;;  %v530_v7 = vld [vmem:[%s486_s21 + $0x68] sm:$0xff] (%p5166_p0)  }
  0xa1   : > { %527 = vst [vmem:[%s483_s20 + $0x30] sm:$0xff] %v526_v6   ;;  %531 = vst [vmem:[%s483_s20 + $0x38] sm:$0xff] %v530_v7  }
  0xa2 PF: > { %p5167_p11 = scmp.ne.s32.totalorder %s5162_s28, 0 }
  0xa3   : > { %p5168_p13 = scmp.ne.s32.totalorder (!%p5167_p11), %s5161_s27, 0 }
  0xa4   : > { %591 = sbr.rel (%p5167_p11) target bundleno = 3773 (0xebd), region = 113 }
  0xab   : > { %4030 = dma.done.wait (%p5168_p13), [#allocation3], 16  }
  0xac   : > { %4032 = vsyncadd (%p5168_p13), [#allocation3], 4294967280  ;;  %s598_s25 = sand.u32 1, %s4043_s29  }
  0xad   : > { %s3069_s1 = sshll.u32 %s598_s25, 6 }
  0xae   : > { %s4346_s4 = scalar_lea.vmem [#allocation4], %s3069_s1 }
  0xaf   : > { %4034 = dma.done.wait (%p5168_p13), [#allocation6], 32  }
  0xb0   : > { %4036 = vsyncadd (%p5168_p13), [#allocation6], 4294967264 }
  0xb1   : > { %4038 = dma.done.wait (%p5168_p13), [#allocation9], 32  }
  0xb2   : > { %4040 = vsyncadd (%p5168_p13), [#allocation9], 4294967264  ;;  %s3074_s28 = sshll.u32 %s4051_s15, 2  ;;  %p673_p8 = scmp.lt.s32.totalorder %s4055_s16, 1  ;;  %v3629_v14 = vld [vmem:[%s5128_s3 + $0x4] ss:$12 sps:$4 sm:$0xff]  }
  0xb3   : > { %p675_p5 = scmp.lt.s32.totalorder %s3074_s28, 7  ;;  %v3631_v15 = vld [vmem:[%s5128_s3] ss:$12 sps:$4 sm:$0xff]   ;;  %v3632_v16 = vld [vmem:[%s5128_s3 + $0x1c] ss:$12 sps:$4 sm:$0xff]   ;;  %947 = vmatprep.subr.bf16.mxu0 %v3629_v14  ;;  %v4074_v49 = vmov 0  }
  0xb4   : > { %s5191_s16 = smov (!%p673_p8, %s4055_s16), 1  ;;  %v3634_v17 = vld [vmem:[%s5128_s3 + $0x8] ss:$12 sps:$4 sm:$0xff]   ;;  %948 = vmatpush1.bf16.msra.mxu0 %v3631_v15  ;;  %v3635_v34 = vld [vmem:[%s5128_s3 + $0x18] ss:$12 sps:$4 sm:$0xff]   ;;  %979 = vmatprep.mubr.bf16.mxu0 %v4074_v49  ;;  %vm1087_vm0 = vcmask 261120  }
  0xb5   : > { %s5193_s28 = smov (!%p675_p5, %s3074_s28), 7  ;;  %s3075_s29 = sshll.u32 %s5191_s16, 3  ;;  %3376 = vmatprep.subr.bf16.mxu1 %v3634_v17  ;;  %949 = vmatprep.subr.bf16.mxu0 %v3632_v16  ;;  %v3636_v35 = vld [vmem:[%s5128_s3 + $0x34] ss:$12 sps:$4 sm:$0xff]   ;;  %v3639_v37 = vld [vmem:[%s5128_s3 + $0x30] ss:$12 sps:$4 sm:$0xff]  }
  0xb6   : > { %s4359_s6 = sadd.s32 %s3075_s29, %s5193_s28  ;;  %3377 = vmatpush3.bf16.msra.mxu1 %v3634_v17  ;;  %v3638_v36 = vld [vmem:[%s5128_s3 + $0x20] ss:$12 sps:$4 sm:$0xff]   ;;  %v3642_v39 = vld [vmem:[%s5128_s3 + $0x38] ss:$12 sps:$4 sm:$0xff]   ;;  %v3643_v40 = vld [vmem:[%s5128_s3 + $0x48] ss:$12 sps:$4 sm:$0xff]  }
  0xb7   : > { %s3076_s22 = sshll.u32 %s4359_s6, 2  ;;  %3378 = vmatprep.subr.bf16.mxu1 %v3638_v36  ;;  %v3640_v38 = vld [vmem:[%s5128_s3 + $0x4c] ss:$12 sps:$4 sm:$0xff]   ;;  %v3644_v41 = vld [vmem:[%s5128_s3 + $0x64] ss:$12 sps:$4 sm:$0xff]   ;;  %s5169_s29 = sld [smem:[#allocation18_spill]] }
  0xb8   : > { %s680_s27 = scalar_lea.vmem %s5125_s0, %s3076_s22  ;;  %950 = vmatpush1.bf16.msra.mxu0 %v3635_v34  ;;  %v3646_v42 = vld [vmem:[%s5128_s3 + $0x50] ss:$12 sps:$4 sm:$0xff]   ;;  %v3647_v43 = vld [vmem:[%s5128_s3 + $0x60] ss:$12 sps:$4 sm:$0xff]   ;;  %v3650_v45 = vld [vmem:[%s5128_s3 + $0x68] ss:$12 sps:$4 sm:$0xff]  }
  0xb9   : > { %v3210_v8 = vld [vmem:[%s680_s27] sm:$0xff]   ;;  %v3259_v9 = vld [vmem:[%s680_s27 + $0x8] sm:$0xff]   ;;  %951 = vmatprep.subr.bf16.mxu0 %v3636_v35  ;;  %v3655_v50 = vld [vmem:[%s5128_s3 + $0x90] ss:$12 sps:$4 sm:$0xff]   ;;  %s5170_s27 = sld [smem:[#allocation19_spill]]  ;;  %s4075_s15 = smov 96  }
  0xba   : > { %v4367_v10 = vunpack.c.l.bf16 %v3210_v8  ;;  %v4369_v11 = vunpack.c.l.bf16 %v3259_v9  ;;  %v4373_v12 = vunpack.c.h.bf16 %v3210_v8  ;;  %v4375_v13 = vunpack.c.h.bf16 %v3259_v9  ;;  %3379 = vmatpush3.bf16.msra.mxu1 %v3638_v36  ;;  %v3648_v44 = vld [vmem:[%s5128_s3 + $0x7c] ss:$12 sps:$4 sm:$0xff]   ;;  %v3651_v46 = vld [vmem:[%s5128_s3 + $0x78] ss:$12 sps:$4 sm:$0xff]   ;;  %v3652_v47 = vld [vmem:[%s5128_s3 + $0x94] ss:$12 sps:$4 sm:$0xff]  }
  0xbb   : > { %3380 = vmatprep.subr.bf16.mxu1 %v3642_v39  ;;  %v3654_v48 = vld [vmem:[%s5128_s3 + $0x80] ss:$12 sps:$4 sm:$0xff]   ;;  %v3658_v52 = vld [vmem:[%s5128_s3 + $0x98] ss:$12 sps:$4 sm:$0xff]   ;;  %v3659_v53 = vld [vmem:[%s5128_s3 + $0xa8] ss:$12 sps:$4 sm:$0xff]  }
  0xbc   : > { %703 = vadd.xlane.f32.xlu0 %v4367_v10  ;;  %707 = vadd.xlane.f32.xlu1 %v4369_v11  ;;  %v3656_v51 = vld [vmem:[%s5128_s3 + $0xac] ss:$12 sps:$4 sm:$0xff]   ;;  %v3660_v54 = vld [vmem:[%s5128_s3 + $0xb0] ss:$12 sps:$4 sm:$0xff]   ;;  %v3081_v14 = vld [vmem:[#allocation2] ss:$0 sm:$0xff] }
  0xbd   : > { %952 = vmatpush1.bf16.msra.mxu0 %v3639_v37  ;;  %v3080_v5 = vld [vmem:[%s5169_s29] ss:$0 sm:$0xff]  ;;  %s4076_s16 = smov 64   ;;  %s4077_s12 = smov 32   ;;  %vm1836_vm1 = vcmask 523264   ;;  %vm1841_vm2 = vcmask 785408  }
  0xbe   : > { %953 = vmatprep.subr.bf16.mxu0 %v3640_v38  ;;  %3381 = vmatpush3.bf16.msra.mxu1 %v3642_v39  ;;  %s5171_s24 = sld [smem:[#allocation20_spill]]  ;;  %s5175_s7 = sld [smem:[#allocation25_spill]] }
  0xbf   : > { %3382 = vmatprep.subr.bf16.mxu1 %v3646_v42 }
  0xc0   : > { %705 = vadd.xlane.f32.xlu0 %v4373_v12  ;;  %709 = vadd.xlane.f32.xlu1 %v4375_v13 }
  0xc1   : > { %954 = vmatpush1.bf16.msra.mxu0 %v3643_v40 }
  0xc2   : > { %955 = vmatprep.subr.bf16.mxu0 %v3644_v41  ;;  %3383 = vmatpush3.bf16.msra.mxu1 %v3646_v42 }
  0xc3   : > { %3384 = vmatprep.subr.bf16.mxu1 %v3650_v45 }
  0xc4   : > { %s690_s23 = scalar_lea.vmem %s5175_s7, %s3076_s22 }
  0xc5   : > { %956 = vmatpush1.bf16.msra.mxu0 %v3647_v43 }
  0xc6   : > { %957 = vmatprep.subr.bf16.mxu0 %v3648_v44  ;;  %3385 = vmatpush3.bf16.msra.mxu1 %v3650_v45 }
  0xc7   : > { %3386 = vmatprep.subr.bf16.mxu1 %v3654_v48 }
  0xc9   : > { %958 = vmatpush1.bf16.msra.mxu0 %v3651_v46 }
  0xca   : > { %959 = vmatprep.subr.bf16.mxu0 %v3652_v47  ;;  %3387 = vmatpush3.bf16.msra.mxu1 %v3654_v48 }
  0xcb   : > { %3388 = vmatprep.subr.bf16.mxu1 %v3658_v52 }
  0xcd   : > { %960 = vmatpush1.bf16.msra.mxu0 %v3655_v50 }
  0xce   : > { %961 = vmatprep.subr.bf16.mxu0 %v3656_v51  ;;  %3389 = vmatpush3.bf16.msra.mxu1 %v3658_v52 }
  0xcf   : > { %3390 = vmatprep.subr.bf16.mxu1 %v3660_v54 }
  0xd1   : > { %962 = vmatpush1.bf16.msra.mxu0 %v3659_v53 }
  0xd2   : > { %3391 = vmatpush3.bf16.msra.mxu1 %v3660_v54 }
 0x149   : > { %v704_v18 = vpop.xlane.xlu0 %703  ;;  %v708_v19 = vpop.xlane.xlu1 %707 }
 0x14a   : > { %v712_v20 = vmul.f32 0.0078125, %v704_v18  ;;  %v714_v21 = vmul.f32 0.0078125, %v708_v19 }
 0x14c   : > { %v4392_v22 = vsub.f32 %v4367_v10, %v712_v20  ;;  %v4395_v23 = vsub.f32 %v4369_v11, %v714_v21 }
 0x14d   : > { %v706_v24 = vpop.xlane.xlu0 %705  ;;  %v710_v25 = vpop.xlane.xlu1 %709 }
 0x14e   : > { %v713_v26 = vmul.f32 0.0078125, %v706_v24  ;;  %v720_v27 = vmul.f32 %v4392_v22, %v4392_v22  ;;  %v715_v28 = vmul.f32 0.0078125, %v710_v25  ;;  %v722_v31 = vmul.f32 %v4395_v23, %v4395_v23 }
 0x150   : > { %v4400_v29 = vsub.f32 %v4373_v12, %v713_v26  ;;  %724 = vadd.xlane.f32.xlu0 %v720_v27  ;;  %v4403_v30 = vsub.f32 %v4375_v13, %v715_v28  ;;  %v804_v28 = vlaneseq }
 0x152   : > { %v721_v32 = vmul.f32 %v4400_v29, %v4400_v29  ;;  %v723_v33 = vmul.f32 %v4403_v30, %v4403_v30 }
 0x154   : > { %728 = vadd.xlane.f32.xlu0 %v722_v31  ;;  %726 = vadd.xlane.f32.xlu1 %v721_v32 }
 0x158   : > { %730 = vadd.xlane.f32.xlu1 %v723_v33 }
 0x1dd   : > { %v725_v55 = vpop.xlane.xlu0 %724 }
 0x1de   : > { %v732_v56 = vmul.f32 0.0078125, %v725_v55 }
 0x1e0   : > { %v736_v57 = vadd.f32 1e-05, %v732_v56 }
 0x1e1   : > { %v727_v58 = vpop.xlane.xlu1 %726  ;;  %v729_v59 = vpop.xlane.xlu0 %728 }
 0x1e2   : > { %3749 = vrsqrt.f32 %v736_v57  ;;  %v733_v60 = vmul.f32 0.0078125, %v727_v58  ;;  %v734_v61 = vmul.f32 0.0078125, %v729_v59 }
 0x1e4   : > { %v737_v62 = vadd.f32 1e-05, %v733_v60  ;;  %v738_v63 = vadd.f32 1e-05, %v734_v61 }
 0x1e5   : > { %v731_v0 = vpop.xlane.xlu1 %730 }
 0x1e6   : > { %3751 = vrsqrt.f32 %v737_v62  ;;  %v735_v1 = vmul.f32 0.0078125, %v731_v0 }
 0x1e7   : > { %3753 = vrsqrt.f32 %v738_v63 }
 0x1e8   : > { %v739_v2 = vadd.f32 1e-05, %v735_v1 }
 0x1ea   : > { %3755 = vrsqrt.f32 %v739_v2 }
 0x1ec   : > { %v3750_v3 = vpop.eup %3749 }
 0x1ed   : > { %v744_v4 = vmul.f32 %v3750_v3, %v4392_v22 }
 0x1ef   : > { %v754_v9 = vmul.f32 %v3080_v5, %v744_v4 }
 0x1f0   : > { %v3752_v6 = vpop.eup %3751 }
 0x1f1   : > { %v3754_v7 = vpop.eup %3753  ;;  %v745_v8 = vmul.f32 %v3752_v6, %v4400_v29  ;;  %v764_v18 = vadd.f32 %v3081_v14, %v754_v9  ;;  %v3260_v6 = vld [vmem:[%s4346_s4 + $0x8] sm:$0xff]  }
 0x1f2   : > { %v746_v15 = vmul.f32 %v3754_v7, %v4395_v23  ;;  %v4480_v23 = vshrl.u32 %v804_v28, 7 }
 0x1f3   : > { %v755_v16 = vmul.f32 %v3080_v5, %v745_v8  ;;  %v3223_v8 = vunpack.c.l.bf16 %v3260_v6 }
 0x1f4   : > { %v3756_v17 = vpop.eup %3755  ;;  %v756_v21 = vmul.f32 %v3080_v5, %v746_v15  ;;  %v806_v29 = vsub.s32 0, %v4480_v23  ;;  %v810_v31 = vsub.s32 1, %v4480_v23  ;;  %v814_v33 = vsub.s32 2, %v4480_v23 }
 0x1f5   : > { %v765_v19 = vadd.f32 %v3081_v14, %v755_v16  ;;  %v747_v20 = vmul.f32 %v3756_v17, %v4403_v30  ;;  %v802_v30 = vld [vmem:[%s5170_s27] sm:$0x7]  ;;  %v3224_v17 = vunpack.c.h.bf16 %v3260_v6  ;;  %s5173_s27 = sld [smem:[#allocation24_spill]] }
 0x1f6   : > { %v766_v25 = vadd.f32 %v3081_v14, %v756_v21  ;;  %v807_v32 = vrot.slane %v802_v30, %v806_v29  ;;  %v811_v35 = vrot.slane %v802_v30, %v810_v31  ;;  %v815_v41 = vrot.slane %v802_v30, %v814_v33 }
 0x1f7   : > { %v768_v22 = vpack.c.bf16 %v765_v19, %v764_v18  ;;  %v757_v24 = vmul.f32 %v3080_v5, %v747_v20  ;;  %v3218_v5 = vld [vmem:[%s4346_s4] sm:$0xff]  }
 0x1f8   : > { %v3219_v7 = vunpack.c.l.bf16 %v3218_v5 }
 0x1f9   : > { %980 = vmatmul.mubr.bf16.vlgmr.msra.gmra.mrb[0].mxu0 %v768_v22  ;;  %3392 = vmatprep.mubr.bf16.mxu1 %v768_v22  ;;  %v767_v26 = vadd.f32 %v3081_v14, %v757_v24  ;;  %v3220_v14 = vunpack.c.h.bf16 %v3218_v5 }
 0x1fa   : > { %989 = vmatprep.mubr.bf16.mxu0 %v4074_v49 }
 0x1fb   : > { %v769_v27 = vpack.c.bf16 %v767_v26, %v766_v25 }
 0x1fd   : > { %3393 = vmatmul.mubr.bf16.vlgmr.msra.gmra.mrb[0].mxu1 %v769_v27 }
 0x201   : > { %990 = vmatmul.mubr.bf16.gmra.mrb[4].mxu0 %v769_v27 }
 0x2cc   : > { %v981_v34 = vpop.f32.mrb[0].mxu0 }
 0x2cd   : > { %v983_v36 = vpop.f32.mrb[1].mxu0  ;;  %v982_v38 = vadd.f32 %v981_v34, %v807_v32 }
 0x2ce   : > { %v985_v37 = vpop.f32.mrb[2].mxu0  ;;  %v984_v42 = vadd.f32 %v983_v36, %v811_v35 }
 0x2cf   : > { %v986_v39 = vadd.f32 %v985_v37, %v807_v32  ;;  %v987_v40 = vpop.f32.mrb[3].mxu0 }
 0x2d0   : > { %v988_v43 = vadd.f32 %v987_v40, %v811_v35  ;;  %v3394_v44 = vpop.f32.mrb[0].mxu1 }
 0x2d1   : > { %v4494_v45 = vpack.c.bf16 %v986_v39, %v982_v38  ;;  %v1034_v46 = vpop.f32.mrb[1].mxu1  ;;  %v1043_v50 = vadd.f32 %v3394_v44, %v815_v41 }
 0x2d2   : > { %v4496_v47 = vpack.c.bf16 %v988_v43, %v984_v42  ;;  %v3395_v48 = vpop.f32.mrb[2].mxu1  ;;  %v1035_v53 = vadd.f32 %v1034_v46, %v815_v41 }
 0x2d3   : > { %v1046_v51 = vadd.f32 %v3395_v48, %v815_v41  ;;  %v1037_v52 = vpop.f32.mrb[3].mxu1  ;;  %3400 = vmatprep.mubr.msk.bf16.mxu0 %vm1087_vm0, %v4494_v45 }
 0x2d4   : > { %v1038_v54 = vadd.f32 %v1037_v52, %v815_v41  ;;  %v991_v55 = vpop.f32.mrb[4].mxu0  ;;  %3480 = vmatprep.subr.msk.bf16.mxu0 %vm1087_vm0, %v4496_v47  ;;  %v1095_v56 = vsel %vm1087_vm0, %v4496_v47, 0 }
 0x2d5   : > { %v4504_v57 = vpack.c.bf16 %v1046_v51, %v1043_v50  ;;  %v993_v58 = vpop.f32.mrb[5].mxu0  ;;  %3397 = vmatpush3.bf16.xpose.msra.mxu0 %v1095_v56  ;;  %v992_v61 = vadd.f32 %v991_v55, %v807_v32 }
 0x2d6   : > { %v4506_v59 = vpack.c.bf16 %v1038_v54, %v1035_v53  ;;  %v995_v60 = vpop.f32.mrb[6].mxu0  ;;  %v994_v0 = vadd.f32 %v993_v58, %v811_v35 }
 0x2d7   : > { %v996_v62 = vadd.f32 %v995_v60, %v807_v32  ;;  %v997_v63 = vpop.f32.mrb[7].mxu0 }
 0x2d8   : > { %v998_v1 = vadd.f32 %v997_v63, %v811_v35  ;;  %3404 = vmatprep.subr.bf16.mxu1 %v4506_v59 }
 0x2d9   : > { %v4509_v2 = vpack.c.bf16 %v996_v62, %v992_v61  ;;  %3405 = vmatpush3.bf16.msra.mxu1 %v4506_v59 }
 0x2da   : > { %v4512_v3 = vpack.c.bf16 %v998_v1, %v994_v0  ;;  %3406 = vmatprep.subr.bf16.mxu1 %v4504_v57 }
 0x2dc   : > { %3481 = vmatprep.subr.msk.bf16.mxu0 %vm1087_vm0, %v4512_v3  ;;  %v1098_v4 = vsel %vm1087_vm0, %v4512_v3, 0 }
 0x2dd   : > { %3399 = vmatpush3.bf16.xpose.msra.mxu0 %v1098_v4  ;;  %3407 = vmatpush3.bf16.msra.mxu1 %v4504_v57 }
 0x2e4   : > { %3401 = vmatmul.mubr.msk.bf16.vlgmr.msra.gmra.mrb[8].mxu0 %vm1087_vm0, %v4509_v2 }
 0x3b7   : > { %v3402_v9 = vpop.f32.mrb[8].mxu0 }
 0x3b8   : > { %v1134_v15 = vpop.f32.mrb[9].mxu0  ;;  %v1143_v20 = vadd.f32 %v3402_v9, %v3223_v8 }
 0x3b9   : > { %v1135_v16 = vadd.f32 %v3219_v7, %v1134_v15  ;;  %v3403_v18 = vpop.f32.mrb[10].mxu0 }
 0x3ba   : > { %v1137_v19 = vpop.f32.mrb[11].mxu0  ;;  %v1146_v24 = vadd.f32 %v3403_v18, %v3224_v17  ;;  %v1155_v26 = vsel %vm1087_vm0, %v1143_v20, -inf }
 0x3bb   : > { %v1138_v21 = vadd.f32 %v3220_v14, %v1137_v19  ;;  %v1149_v22 = vsel %vm1087_vm0, %v1135_v16, -inf }
 0x3bc   : > { %1150 = vmax.xlane.f32.xlu0 %v1149_v22  ;;  %v1158_v27 = vsel %vm1087_vm0, %v1146_v24, -inf }
 0x3bd   : > { %v1152_v25 = vsel %vm1087_vm0, %v1138_v21, -inf }
 0x3be   : > { %1153 = vmax.xlane.f32.xlu1 %v1152_v25 }
 0x3c0   : > { %1156 = vmax.xlane.f32.xlu0 %v1155_v26 }
 0x3c2   : > { %1159 = vmax.xlane.f32.xlu1 %v1158_v27 }
 0x449   : > { %v1151_v28 = vpop.xlane.xlu0 %1150 }
 0x44a   : > { %v1161_v30 = vsub.f32 %v1135_v16, %v1151_v28 }
 0x44b   : > { %v1154_v32 = vpop.xlane.xlu1 %1153 }
 0x44c   : > { %v1162_v34 = vsub.f32 %v1138_v21, %v1154_v32  ;;  %v1165_v38 = vmul.f32 1.442695, %v1161_v30 }
 0x44d   : > { %v1157_v35 = vpop.xlane.xlu0 %1156 }
 0x44e   : > { %v1167_v36 = vmul.f32 1.442695, %v1162_v34  ;;  %v1163_v37 = vsub.f32 %v1143_v20, %v1157_v35 }
 0x44f   : > { %v1160_v39 = vpop.xlane.xlu1 %1159 }
 0x450   : > { %3757 = vpow2.f32 %v1167_v36  ;;  %v1169_v40 = vmul.f32 1.442695, %v1163_v37  ;;  %v1164_v41 = vsub.f32 %v1146_v24, %v1160_v39  ;;  %v3263_v36 = vld [vmem:[%s4346_s4 + $0x20] sm:$0xff]   ;;  %v3264_v37 = vld [vmem:[%s4346_s4 + $0x28] sm:$0xff]  }
 0x451   : > { %v3239_v39 = vunpack.c.l.bf16 %v3264_v37 }
 0x452   : > { %3759 = vpow2.f32 %v1169_v40  ;;  %v1171_v42 = vmul.f32 1.442695, %v1164_v41  ;;  %v3236_v41 = vunpack.c.h.bf16 %v3263_v36 }
 0x453   : > { %3761 = vpow2.f32 %v1165_v38  ;;  %v3235_v38 = vunpack.c.l.bf16 %v3263_v36 }
 0x454   : > { %3763 = vpow2.f32 %v1171_v42 }
 0x45a   : > { %v3758_v43 = vpop.eup %3757 }
 0x45b   : > { %v1176_v44 = vsel %vm1087_vm0, %v3758_v43, 0.0 }
 0x45c   : > { %v3760_v46 = vpop.eup %3759  ;;  %1177 = vadd.xlane.f32.xlu1 %v1176_v44 }
 0x45d   : > { %v3762_v48 = vpop.eup %3761  ;;  %v1179_v50 = vsel %vm1087_vm0, %v3760_v46, 0.0 }
 0x45e   : > { %v3764_v51 = vpop.eup %3763  ;;  %1180 = vadd.xlane.f32.xlu0 %v1179_v50  ;;  %v1173_v53 = vsel %vm1087_vm0, %v3762_v48, 0.0  ;;  %v3240_v50 = vunpack.c.h.bf16 %v3264_v37 }
 0x45f   : > { %v1182_v52 = vsel %vm1087_vm0, %v3764_v51, 0.0 }
 0x460   : > { %1183 = vadd.xlane.f32.xlu1 %v1182_v52 }
 0x462   : > { %1174 = vadd.xlane.f32.xlu0 %v1173_v53 }
 0x471   : > { %1260 = vrot.lane.b32.xlu1 %v4512_v3, %s4075_s15 }
 0x475   : > { %1252 = vrot.lane.b32.xlu1 %v4494_v45, %s4075_s15 }
 0x478   : > { %1258 = vrot.lane.b32.xlu0 %v4496_v47, %s4075_s15 }
 0x479   : > { %1436 = vrot.lane.b32.xlu1 %v4496_v47, %s4076_s16 }
 0x47c   : > { %1254 = vrot.lane.b32.xlu0 %v4509_v2, %s4075_s15 }
 0x47d   : > { %1438 = vrot.lane.b32.xlu1 %v4512_v3, %s4076_s16 }
 0x480   : > { %1432 = vrot.lane.b32.xlu0 %v4494_v45, %s4076_s16 }
 0x481   : > { %1434 = vrot.lane.b32.xlu1 %v4509_v2, %s4076_s16 }
 0x4e9   : > { %v1178_v54 = vpop.xlane.xlu1 %1177 }
 0x4ea   : > { %3765 = vrcp.f32 %v1178_v54 }
 0x4eb   : > { %v1181_v55 = vpop.xlane.xlu0 %1180 }
 0x4ed   : > { %v1184_v56 = vpop.xlane.xlu1 %1183 }
 0x4ee   : > { %3767 = vrcp.f32 %v1184_v56 }
 0x4ef   : > { %3769 = vrcp.f32 %v1181_v55  ;;  %v1175_v58 = vpop.xlane.xlu0 %1174 }
 0x4f0   : > { %3771 = vrcp.f32 %v1175_v58 }
 0x4f1   : > { %v1261_v4 = vpop.permute.xlu1 %1260 }
 0x4f2   : > { %v1272_v16 = vsel %vm1087_vm0, %v1261_v4, 0 }
 0x4f3   : > { %v1259_v60 = vpop.permute.xlu0 %1258 }
 0x4f4   : > { %3482 = vmatprep.subr.msk.bf16.mxu1 %vm1087_vm0, %v1259_v60  ;;  %v3766_v61 = vpop.eup %3765  ;;  %v1269_v14 = vsel %vm1087_vm0, %v1259_v60, 0 }
 0x4f5   : > { %v1190_v6 = vmul.f32 %v3766_v61, %v3758_v43  ;;  %v1253_v15 = vpop.permute.xlu1 %1252 }
 0x4f7   : > { %v1255_v18 = vpop.permute.xlu0 %1254 }
 0x4f8   : > { %v3768_v62 = vpop.eup %3767 }
 0x4f9   : > { %v3770_v63 = vpop.eup %3769  ;;  %v1192_v1 = vmul.f32 %v3768_v62, %v3764_v51  ;;  %v1437_v17 = vpop.permute.xlu1 %1436 }
 0x4fa   : > { %v3772_v0 = vpop.eup %3771  ;;  %v1191_v7 = vmul.f32 %v3770_v63, %v3760_v46  ;;  %v1447_v19 = vsel %vm1087_vm0, %v1437_v17, 0 }
 0x4fb   : > { %v1189_v5 = vmul.f32 %v3772_v0, %v3762_v48  ;;  %v1433_v20 = vpop.permute.xlu0 %1432 }
 0x4fc   : > { %v1194_v9 = vpack.c.bf16 %v1192_v1, %v1191_v7 }
 0x4fd   : > { %v1193_v8 = vpack.c.bf16 %v1190_v6, %v1189_v5  ;;  %v1439_v21 = vpop.permute.xlu1 %1438 }
 0x4fe   : > { %v1450_v22 = vsel %vm1087_vm0, %v1439_v21, 0 }
 0x4ff   : > { %3408 = vmatprep.mubr.msk.bf16.mxu1 %vm1087_vm0, %v1193_v8 }
 0x500   : > { %3409 = vmatmul.mubr.msk.bf16.vlgmr.msra.gmra.mrb[4].mxu1 %vm1087_vm0, %v1194_v9 }
 0x501   : > { %3413 = vmatpush3.bf16.xpose.msra.mxu1 %v1269_v14  ;;  %3416 = vmatprep.mubr.msk.bf16.mxu1 %vm1087_vm0, %v1253_v15  ;;  %v1435_v24 = vpop.permute.xlu1 %1434 }
 0x502   : > { %3483 = vmatprep.subr.msk.bf16.mxu1 %vm1087_vm0, %v1261_v4 }
 0x509   : > { %3415 = vmatpush3.bf16.xpose.msra.mxu1 %v1272_v16 }
 0x50a   : > { %3484 = vmatprep.subr.msk.bf16.mxu1 %vm1087_vm0, %v1437_v17 }
 0x510   : > { %3417 = vmatmul.mubr.msk.bf16.vlgmr.msra.gmra.mrb[8].mxu1 %vm1087_vm0, %v1255_v18 }
 0x511   : > { %3429 = vmatpush3.bf16.xpose.msra.mxu1 %v1447_v19  ;;  %3432 = vmatprep.mubr.msk.bf16.mxu1 %vm1087_vm0, %v1433_v20 }
 0x512   : > { %3485 = vmatprep.subr.msk.bf16.mxu1 %vm1087_vm0, %v1439_v21  ;;  %v3261_v21 = vld [vmem:[%s4346_s4 + $0x10] sm:$0xff]  }
 0x519   : > { %3431 = vmatpush3.bf16.xpose.msra.mxu1 %v1450_v22  ;;  %v3227_v22 = vunpack.c.l.bf16 %v3261_v21 }
 0x520   : > { %3433 = vmatmul.mubr.msk.bf16.vlgmr.msra.gmra.mrb[12].mxu1 %vm1087_vm0, %v1435_v24  ;;  %v3262_v24 = vld [vmem:[%s4346_s4 + $0x18] sm:$0xff]  }
 0x521   : > { %v3231_v36 = vunpack.c.l.bf16 %v3262_v24 }
 0x5d3   : > { %v4562_v25 = vpop.f32.mrb[4].mxu1 }
 0x5d4   : > { %v4564_v26 = vpop.f32.mrb[5].mxu1 }
 0x5d5   : > { %v4566_v27 = vpop.f32.mrb[6].mxu1 }
 0x5d6   : > { %v4568_v28 = vpop.f32.mrb[7].mxu1 }
 0x5e3   : > { %v4570_v30 = vpop.f32.mrb[8].mxu1 }
 0x5e4   : > { %v4572_v32 = vpop.f32.mrb[9].mxu1 }
 0x5e5   : > { %v4574_v34 = vpop.f32.mrb[10].mxu1  ;;  %v4603_v37 = vadd.f32 %v3227_v22, %v4572_v32  ;;  %v3265_v22 = vld [vmem:[%s4346_s4 + $0x30] sm:$0xff]  }
 0x5e6   : > { %v4576_v35 = vpop.f32.mrb[11].mxu1 }
 0x5f3   : > { %v3434_v40 = vpop.f32.mrb[12].mxu1 }
 0x5f4   : > { %v1486_v42 = vpop.f32.mrb[13].mxu1  ;;  %v1495_v48 = vadd.f32 %v3434_v40, %v3239_v39  ;;  %v3228_v39 = vunpack.c.h.bf16 %v3261_v21 }
 0x5f5   : > { %v1487_v43 = vadd.f32 %v3235_v38, %v1486_v42  ;;  %v3435_v44 = vpop.f32.mrb[14].mxu1  ;;  %v3232_v38 = vunpack.c.h.bf16 %v3262_v24 }
 0x5f6   : > { %v1489_v46 = vpop.f32.mrb[15].mxu1  ;;  %v1498_v54 = vadd.f32 %v3435_v44, %v3240_v50  ;;  %v1507_v55 = vsel %vm1087_vm0, %v1495_v48, -inf }
 0x5f7   : > { %v1490_v51 = vadd.f32 %v3236_v41, %v1489_v46  ;;  %v1501_v52 = vsel %vm1087_vm0, %v1487_v43, -inf }
 0x5f8   : > { %1502 = vmax.xlane.f32.xlu0 %v1501_v52  ;;  %v1510_v56 = vsel %vm1087_vm0, %v1498_v54, -inf }
 0x5f9   : > { %v1504_v53 = vsel %vm1087_vm0, %v1490_v51, -inf }
 0x5fa   : > { %1505 = vmax.xlane.f32.xlu1 %v1504_v53 }
 0x5fc   : > { %1508 = vmax.xlane.f32.xlu0 %v1507_v55 }
 0x600   : > { %1511 = vmax.xlane.f32.xlu0 %v1510_v56 }
 0x60b   : > { %1549 = vrot.lane.b32.xlu1 %v4504_v57, %s4076_s16 }
 0x685   : > { %v1503_v58 = vpop.xlane.xlu0 %1502 }
 0x686   : > { %v1513_v60 = vsub.f32 %v1487_v43, %v1503_v58 }
 0x687   : > { %v1506_v61 = vpop.xlane.xlu1 %1505 }
 0x688   : > { %v1517_v0 = vmul.f32 1.442695, %v1513_v60  ;;  %v1514_v1 = vsub.f32 %v1490_v51, %v1506_v61 }
 0x689   : > { %v1509_v62 = vpop.xlane.xlu0 %1508 }
 0x68a   : > { %v1515_v63 = vsub.f32 %v1495_v48, %v1509_v62  ;;  %v1519_v7 = vmul.f32 1.442695, %v1514_v1 }
 0x68b   : > { %v1550_v41 = vpop.permute.xlu1 %1549 }
 0x68c   : > { %v1521_v4 = vmul.f32 1.442695, %v1515_v63 }
 0x68d   : > { %v1512_v5 = vpop.xlane.xlu0 %1511 }
 0x68e   : > { %3773 = vpow2.f32 %v1521_v4  ;;  %v1516_v6 = vsub.f32 %v1498_v54, %v1512_v5 }
 0x68f   : > { %3775 = vpow2.f32 %v1517_v0 }
 0x690   : > { %v1523_v8 = vmul.f32 1.442695, %v1516_v6 }
 0x692   : > { %3777 = vpow2.f32 %v1523_v8 }
 0x693   : > { %3779 = vpow2.f32 %v1519_v7 }
 0x698   : > { %v3774_v9 = vpop.eup %3773 }
 0x699   : > { %v1531_v14 = vsel %vm1087_vm0, %v3774_v9, 0.0  ;;  %v3776_v15 = vpop.eup %3775 }
 0x69a   : > { %1532 = vadd.xlane.f32.xlu0 %v1531_v14  ;;  %v1525_v17 = vsel %vm1087_vm0, %v3776_v15, 0.0 }
 0x69c   : > { %v3778_v16 = vpop.eup %3777 }
 0x69d   : > { %v1534_v18 = vsel %vm1087_vm0, %v3778_v16, 0.0  ;;  %v3780_v19 = vpop.eup %3779 }
 0x69e   : > { %1526 = vadd.xlane.f32.xlu0 %v1525_v17  ;;  %1535 = vadd.xlane.f32.xlu1 %v1534_v18  ;;  %v1528_v20 = vsel %vm1087_vm0, %v3780_v19, 0.0 }
 0x6a2   : > { %1529 = vadd.xlane.f32.xlu1 %v1528_v20 }
 0x6b3   : > { %1612 = vrot.lane.b32.xlu1 %v4496_v47, %s4077_s12  ;;  %v4606_v47 = vadd.f32 %v4570_v30, %v3231_v36 }
 0x6b4   : > { %1547 = vrot.lane.b32.xlu0 %v4506_v59, %s4076_s16 }
 0x6b5   : > { %v1329_v40 = vsel %vm1087_vm0, %v4606_v47, -inf }
 0x6b7   : > { %1614 = vrot.lane.b32.xlu1 %v4512_v3, %s4077_s12  ;;  %v1323_v3 = vsel %vm1087_vm0, %v4603_v37, -inf }
 0x6b8   : > { %1608 = vrot.lane.b32.xlu0 %v4494_v45, %s4077_s12  ;;  %v4611_v45 = vadd.f32 %v4574_v34, %v3232_v38  ;;  %v3266_v38 = vld [vmem:[%s4346_s4 + $0x38] sm:$0xff]   ;;  %s5174_s4 = sld [smem:[#allocation23_spill]] }
 0x6ba   : > { %v1332_v32 = vsel %vm1087_vm0, %v4611_v45, -inf }
 0x6bb   : > { %1610 = vrot.lane.b32.xlu1 %v4509_v2, %s4077_s12  ;;  %v1312_v2 = vadd.f32 %v3228_v39, %v4576_v35  ;;  %v3243_v39 = vunpack.c.l.bf16 %v3265_v22 }
 0x6bd   : > { %v1326_v30 = vsel %vm1087_vm0, %v1312_v2, -inf }
 0x6d7   : > { %1324 = vmax.xlane.f32.xlu0 %v1323_v3 }
 0x6db   : > { %1330 = vmax.xlane.f32.xlu0 %v1329_v40  ;;  %v3247_v40 = vunpack.c.l.bf16 %v3266_v38 }
 0x6df   : > { %1333 = vmax.xlane.f32.xlu0 %v1332_v32  ;;  %1327 = vmax.xlane.f32.xlu1 %v1326_v30  ;;  %v3244_v30 = vunpack.c.h.bf16 %v3265_v22 }
 0x727   : > { %v1533_v42 = vpop.xlane.xlu0 %1532 }
 0x72b   : > { %v1536_v43 = vpop.xlane.xlu1 %1535  ;;  %v1527_v44 = vpop.xlane.xlu0 %1526 }
 0x72c   : > { %3781 = vrcp.f32 %v1536_v43 }
 0x72d   : > { %3783 = vrcp.f32 %v1527_v44 }
 0x72e   : > { %3785 = vrcp.f32 %v1533_v42 }
 0x72f   : > { %v1530_v34 = vpop.xlane.xlu1 %1529  ;;  %v1548_v35 = vpop.permute.xlu0 %1547 }
 0x730   : > { %3787 = vrcp.f32 %v1530_v34  ;;  %3436 = vmatprep.subr.bf16.mxu1 %v1548_v35 }
 0x731   : > { %3437 = vmatpush3.bf16.msra.mxu1 %v1548_v35 }
 0x732   : > { %3438 = vmatprep.subr.bf16.mxu1 %v1550_v41 }
 0x733   : > { %v1613_v46 = vpop.permute.xlu1 %1612  ;;  %v1609_v62 = vpop.permute.xlu0 %1608 }
 0x734   : > { %v1623_v61 = vsel %vm1087_vm0, %v1613_v46, 0 }
 0x735   : > { %3439 = vmatpush3.bf16.msra.mxu1 %v1550_v41 }
 0x736   : > { %3486 = vmatprep.subr.msk.bf16.mxu1 %vm1087_vm0, %v1613_v46  ;;  %v3782_v48 = vpop.eup %3781 }
 0x737   : > { %v3784_v50 = vpop.eup %3783  ;;  %v1544_v53 = vmul.f32 %v3782_v48, %v3778_v16  ;;  %v1615_v63 = vpop.permute.xlu1 %1614 }
 0x738   : > { %v3786_v51 = vpop.eup %3785  ;;  %v1541_v54 = vmul.f32 %v3784_v50, %v3776_v15  ;;  %v1626_v0 = vsel %vm1087_vm0, %v1615_v63, 0 }
 0x739   : > { %v1543_v56 = vmul.f32 %v3786_v51, %v3774_v9 }
 0x73a   : > { %v3788_v52 = vpop.eup %3787 }
 0x73b   : > { %v1542_v55 = vmul.f32 %v3788_v52, %v3780_v19  ;;  %v1546_v60 = vpack.c.bf16 %v1544_v53, %v1543_v56  ;;  %v1611_v1 = vpop.permute.xlu1 %1610 }
 0x73d   : > { %v1545_v58 = vpack.c.bf16 %v1542_v55, %v1541_v54 }
 0x73f   : > { %3440 = vmatprep.mubr.msk.bf16.mxu1 %vm1087_vm0, %v1545_v58 }
 0x740   : > { %3441 = vmatmul.mubr.msk.bf16.vlgmr.msra.gmra.mrb[16].mxu1 %vm1087_vm0, %v1546_v60 }
 0x741   : > { %3445 = vmatpush3.bf16.xpose.msra.mxu1 %v1623_v61  ;;  %3448 = vmatprep.mubr.msk.bf16.mxu1 %vm1087_vm0, %v1609_v62 }
 0x742   : > { %3487 = vmatprep.subr.msk.bf16.mxu1 %vm1087_vm0, %v1615_v63 }
 0x749   : > { %3447 = vmatpush3.bf16.xpose.msra.mxu1 %v1626_v0 }
 0x750   : > { %3449 = vmatmul.mubr.msk.bf16.vlgmr.msra.gmra.mrb[20].mxu1 %vm1087_vm0, %v1611_v1 }
 0x751   : > { %2286 = vmatprep.mubr.bf16.mxu1 %v4074_v49 }
 0x764   : > { %v1325_v4 = vpop.xlane.xlu0 %1324 }
 0x765   : > { %v1335_v17 = vsub.f32 %v4603_v37, %v1325_v4 }
 0x767   : > { %v1339_v20 = vmul.f32 1.442695, %v1335_v17 }
 0x768   : > { %v1331_v14 = vpop.xlane.xlu0 %1330 }
 0x769   : > { %v1337_v21 = vsub.f32 %v4606_v47, %v1331_v14  ;;  %3789 = vpow2.f32 %v1339_v20 }
 0x76b   : > { %v1343_v3 = vmul.f32 1.442695, %v1337_v21 }
 0x76c   : > { %v1328_v16 = vpop.xlane.xlu1 %1327  ;;  %v1334_v19 = vpop.xlane.xlu0 %1333 }
 0x76d   : > { %v1336_v18 = vsub.f32 %v1312_v2, %v1328_v16  ;;  %v1338_v36 = vsub.f32 %v4611_v45, %v1334_v19  ;;  %v3248_v2 = vunpack.c.h.bf16 %v3266_v38 }
 0x76f   : > { %v1341_v24 = vmul.f32 1.442695, %v1336_v18  ;;  %v1345_v41 = vmul.f32 1.442695, %v1338_v36 }
 0x771   : > { %3791 = vpow2.f32 %v1341_v24 }
 0x772   : > { %3793 = vpow2.f32 %v1343_v3 }
 0x773   : > { %3795 = vpow2.f32 %v1345_v41  ;;  %v3790_v50 = vpop.eup %3789 }
 0x774   : > { %v1347_v53 = vsel %vm1087_vm0, %v3790_v50, 0.0 }
 0x77b   : > { %v3792_v52 = vpop.eup %3791 }
 0x77c   : > { %v4650_v54 = vpop.eup %3793  ;;  %v1350_v55 = vsel %vm1087_vm0, %v3792_v52, 0.0 }
 0x77d   : > { %v4653_v56 = vpop.eup %3795  ;;  %v1353_v58 = vsel %vm1087_vm0, %v4650_v54, 0.0 }
 0x77e   : > { %v1356_v60 = vsel %vm1087_vm0, %v4653_v56, 0.0 }
 0x813   : > { %v4628_v5 = vpop.f32.mrb[16].mxu1 }
 0x814   : > { %v4630_v6 = vpop.f32.mrb[17].mxu1 }
 0x815   : > { %v4632_v7 = vpop.f32.mrb[18].mxu1 }
 0x816   : > { %v3614_v8 = vpack.i.bf16 %v4632_v7, %v4628_v5  ;;  %v4636_v9 = vpop.f32.mrb[19].mxu1 }
 0x817   : > { %v3609_v15 = vpack.i.bf16 %v4636_v9, %v4630_v6 }
 0x823   : > { %v3450_v32 = vpop.f32.mrb[20].mxu1 }
 0x824   : > { %v1662_v42 = vpop.f32.mrb[21].mxu1  ;;  %v1671_v47 = vadd.f32 %v3450_v32, %v3247_v40 }
 0x825   : > { %v1663_v37 = vadd.f32 %v3243_v39, %v1662_v42  ;;  %v3451_v43 = vpop.f32.mrb[22].mxu1 }
 0x826   : > { %v1665_v44 = vpop.f32.mrb[23].mxu1  ;;  %v1674_v45 = vadd.f32 %v3451_v43, %v3248_v2  ;;  %v1683_v48 = vsel %vm1087_vm0, %v1671_v47, -inf }
 0x827   : > { %v1666_v34 = vadd.f32 %v3244_v30, %v1665_v44  ;;  %v1677_v35 = vsel %vm1087_vm0, %v1663_v37, -inf }
 0x828   : > { %1678 = vmax.xlane.f32.xlu0 %v1677_v35  ;;  %v1686_v51 = vsel %vm1087_vm0, %v1674_v45, -inf }
 0x829   : > { %v1680_v46 = vsel %vm1087_vm0, %v1666_v34, -inf }
 0x82a   : > { %1681 = vmax.xlane.f32.xlu1 %v1680_v46 }
 0x82c   : > { %1684 = vmax.xlane.f32.xlu0 %v1683_v48 }
 0x82e   : > { %1687 = vmax.xlane.f32.xlu1 %v1686_v51 }
 0x830   : > { %1348 = vadd.xlane.f32.xlu0 %v1347_v53 }
 0x832   : > { %1351 = vadd.xlane.f32.xlu1 %v1350_v55 }
 0x834   : > { %1354 = vadd.xlane.f32.xlu0 %v1353_v58 }
 0x836   : > { %1357 = vadd.xlane.f32.xlu1 %v1356_v60 }
 0x847   : > { %1373 = vrot.lane.b32.xlu1 %v4504_v57, %s4075_s15 }
 0x84b   : > { %1723 = vrot.lane.b32.xlu1 %v4506_v59, %s4077_s12 }
 0x8b5   : > { %v1679_v61 = vpop.xlane.xlu0 %1678 }
 0x8b6   : > { %v1689_v62 = vsub.f32 %v1663_v37, %v1679_v61 }
 0x8b7   : > { %v1682_v63 = vpop.xlane.xlu1 %1681 }
 0x8b8   : > { %v1693_v0 = vmul.f32 1.442695, %v1689_v62  ;;  %v1690_v4 = vsub.f32 %v1666_v34, %v1682_v63 }
 0x8b9   : > { %v1685_v1 = vpop.xlane.xlu0 %1684 }
 0x8ba   : > { %v1691_v14 = vsub.f32 %v1671_v47, %v1685_v1  ;;  %3797 = vpow2.f32 %v1693_v0  ;;  %v1695_v20 = vmul.f32 1.442695, %v1690_v4 }
 0x8bb   : > { %v1688_v16 = vpop.xlane.xlu1 %1687 }
 0x8bc   : > { %v1697_v17 = vmul.f32 1.442695, %v1691_v14  ;;  %v1692_v18 = vsub.f32 %v1674_v45, %v1688_v16  ;;  %v3661_v16 = vld [vmem:[%s5171_s24] sm:$0xff]  }
 0x8bd   : > { %v1349_v19 = vpop.xlane.xlu0 %1348 }
 0x8be   : > { %3799 = vpow2.f32 %v1697_v17  ;;  %v1699_v21 = vmul.f32 1.442695, %v1692_v18  ;;  %v3662_v17 = vld [vmem:[%s5171_s24 + $0x8] sm:$0xff]   ;;  %v3663_v18 = vld [vmem:[%s5171_s24 + $0x10] sm:$0xff]  }
 0x8bf   : > { %3801 = vrcp.f32 %v1349_v19  ;;  %v1352_v22 = vpop.xlane.xlu1 %1351  ;;  %v3664_v19 = vld [vmem:[%s5171_s24 + $0x18] sm:$0xff]  }
 0x8c0   : > { %3803 = vpow2.f32 %v1699_v21  ;;  %v3666_v21 = vld [vmem:[%s5171_s24 + $0x28] sm:$0xff]  }
 0x8c1   : > { %3805 = vrcp.f32 %v1352_v22  ;;  %v1355_v34 = vpop.xlane.xlu0 %1354  ;;  %v3667_v22 = vld [vmem:[%s5171_s24 + $0x30] sm:$0xff]  }
 0x8c2   : > { %3807 = vpow2.f32 %v1695_v20  ;;  %v3665_v20 = vld [vmem:[%s5171_s24 + $0x20] sm:$0xff]  }
 0x8c3   : > { %v1358_v44 = vpop.xlane.xlu1 %1357 }
 0x8c4   : > { %v3798_v24 = vpop.eup %3797  ;;  %3809 = vrcp.f32 %v1358_v44 }
 0x8c5   : > { %v1701_v37 = vsel %vm1087_vm0, %v3798_v24, 0.0  ;;  %3811 = vrcp.f32 %v1355_v34 }
 0x8c7   : > { %v1374_v47 = vpop.permute.xlu1 %1373 }
 0x8c8   : > { %v3800_v36 = vpop.eup %3799 }
 0x8c9   : > { %v3802_v38 = vpop.eup %3801  ;;  %v1707_v39 = vsel %vm1087_vm0, %v3800_v36, 0.0 }
 0x8ca   : > { %v3804_v3 = vpop.eup %3803  ;;  %1708 = vadd.xlane.f32.xlu0 %v1707_v39  ;;  %v1363_v41 = vmul.f32 %v3802_v38, %v3790_v50  ;;  %v3668_v39 = vld [vmem:[%s5171_s24 + $0x38] sm:$0xff]  }
 0x8cb   : > { %v3806_v40 = vpop.eup %3805  ;;  %v1710_v32 = vsel %vm1087_vm0, %v3804_v3, 0.0  ;;  %v1724_v35 = vpop.permute.xlu1 %1723 }
 0x8cc   : > { %v3808_v30 = vpop.eup %3807  ;;  %1711 = vadd.xlane.f32.xlu1 %v1710_v32  ;;  %v1364_v42 = vmul.f32 %v3806_v40, %v3792_v52 }
 0x8cd   : > { %v1704_v43 = vsel %vm1087_vm0, %v3808_v30, 0.0 }
 0x8ce   : > { %1702 = vadd.xlane.f32.xlu0 %v1701_v37  ;;  %v1367_v2 = vpack.c.bf16 %v1364_v42, %v1363_v41  ;;  %v3810_v51 = vpop.eup %3809 }
 0x8d0   : > { %3424 = vmatprep.mubr.msk.bf16.mxu0 %vm1087_vm0, %v1367_v2  ;;  %1705 = vadd.xlane.f32.xlu1 %v1704_v43 }
 0x8e1   : > { %1725 = vrot.lane.b32.xlu1 %v4504_v57, %s4077_s12  ;;  %v3812_v57 = vpop.eup %3811 }
 0x8e2   : > { %v1365_v53 = vmul.f32 %v3812_v57, %v4650_v54 }
 0x8e4   : > { %1371 = vrot.lane.b32.xlu0 %v4506_v59, %s4075_s15  ;;  %v1366_v59 = vmul.f32 %v3810_v51, %v4653_v56 }
 0x8e6   : > { %v1368_v58 = vpack.c.bf16 %v1366_v59, %v1365_v53 }
 0x957   : > { %v1709_v45 = vpop.xlane.xlu0 %1708 }
 0x959   : > { %v1712_v46 = vpop.xlane.xlu1 %1711 }
 0x95b   : > { %v1703_v48 = vpop.xlane.xlu0 %1702 }
 0x95c   : > { %3813 = vrcp.f32 %v1703_v48 }
 0x95d   : > { %3815 = vrcp.f32 %v1712_v46  ;;  %v1706_v50 = vpop.xlane.xlu1 %1705 }
 0x95e   : > { %3817 = vrcp.f32 %v1706_v50 }
 0x95f   : > { %3819 = vrcp.f32 %v1709_v45  ;;  %v1372_v52 = vpop.permute.xlu0 %1371 }
 0x960   : > { %3420 = vmatprep.subr.bf16.mxu0 %v1372_v52 }
 0x961   : > { %3421 = vmatpush3.bf16.msra.mxu0 %v1372_v52  ;;  %v1726_v63 = vpop.permute.xlu1 %1725 }
 0x962   : > { %3422 = vmatprep.subr.bf16.mxu0 %v1374_v47 }
 0x965   : > { %3423 = vmatpush3.bf16.msra.mxu0 %v1374_v47 }
 0x966   : > { %v3814_v55 = vpop.eup %3813  ;;  %3452 = vmatprep.subr.bf16.mxu0 %v1724_v35 }
 0x967   : > { %v3816_v60 = vpop.eup %3815  ;;  %v1717_v0 = vmul.f32 %v3814_v55, %v3798_v24 }
 0x968   : > { %v3818_v61 = vpop.eup %3817  ;;  %3425 = vmatmul.mubr.msk.bf16.vlgmr.msra.gmra.mrb[12].mxu0 %vm1087_vm0, %v1368_v58  ;;  %v1720_v4 = vmul.f32 %v3816_v60, %v3804_v3 }
 0x969   : > { %v3820_v62 = vpop.eup %3819  ;;  %3453 = vmatpush3.bf16.msra.mxu0 %v1724_v35  ;;  %v1718_v1 = vmul.f32 %v3818_v61, %v3808_v30 }
 0x96a   : > { %3454 = vmatprep.subr.bf16.mxu0 %v1726_v63  ;;  %v1719_v56 = vmul.f32 %v3820_v62, %v3800_v36 }
 0x96b   : > { %v1721_v14 = vpack.c.bf16 %v1718_v1, %v1717_v0 }
 0x96c   : > { %v1722_v54 = vpack.c.bf16 %v1720_v4, %v1719_v56 }
 0x96d   : > { %3455 = vmatpush3.bf16.msra.mxu0 %v1726_v63  ;;  %3456 = vmatprep.mubr.msk.bf16.mxu0 %vm1087_vm0, %v1721_v14  ;;  %v3122_v14 = vld [vmem:[#allocation5] ss:$0 sm:$0xff] }
 0x96e   : > { %3460 = vmatprep.subr.bf16.mxu0 %v3661_v16 }
 0x970   : > { %3457 = vmatmul.mubr.msk.bf16.vlgmr.msra.gmra.mrb[16].mxu0 %vm1087_vm0, %v1722_v54 }
 0x971   : > { %3461 = vmatpush3.bf16.msra.mxu0 %v3661_v16 }
 0x972   : > { %3462 = vmatprep.subr.bf16.mxu0 %v3662_v17 }
 0x975   : > { %3463 = vmatpush3.bf16.msra.mxu0 %v3662_v17 }
 0x976   : > { %3464 = vmatprep.subr.bf16.mxu0 %v3663_v18 }
 0x979   : > { %3465 = vmatpush3.bf16.msra.mxu0 %v3663_v18 }
 0x97a   : > { %3466 = vmatprep.subr.bf16.mxu0 %v3664_v19 }
 0x97d   : > { %3467 = vmatpush3.bf16.msra.mxu0 %v3664_v19 }
 0x97e   : > { %3468 = vmatprep.subr.bf16.mxu0 %v3665_v20 }
 0x981   : > { %3469 = vmatpush3.bf16.msra.mxu0 %v3665_v20 }
 0x982   : > { %3470 = vmatprep.subr.bf16.mxu0 %v3666_v21 }
 0x985   : > { %3471 = vmatpush3.bf16.msra.mxu0 %v3666_v21 }
 0x986   : > { %3472 = vmatprep.subr.bf16.mxu0 %v3667_v22 }
 0x989   : > { %3473 = vmatpush3.bf16.msra.mxu0 %v3667_v22 }
 0x98a   : > { %3474 = vmatprep.subr.bf16.mxu0 %v3668_v39 }
 0x98d   : > { %3475 = vmatpush3.bf16.msra.mxu0 %v3668_v39 }
 0xa3b   : > { %v3426_v24 = vpop.f32.mrb[12].mxu0 }
 0xa3c   : > { %v1417_v36 = vpop.f32.mrb[13].mxu0 }
 0xa3d   : > { %v3427_v38 = vpop.f32.mrb[14].mxu0 }
 0xa3e   : > { %v3604_v3 = vpack.i.bf16 %v3427_v38, %v3426_v24  ;;  %v1420_v40 = vpop.f32.mrb[15].mxu0 }
 0xa3f   : > { %v3599_v32 = vpack.i.bf16 %v1420_v40, %v1417_v36 }
 0xa40   : > { %3605 = vrot.lane.b32.xlu1 %v3604_v3, %s4077_s12 }
 0xa41   : > { %3600 = vrot.lane.b32.xlu0 %v3599_v32, %s4077_s12  ;;  %s5172_s12 = sld [smem:[#allocation22_spill]] }
 0xa43   : > { %v3458_v30 = vpop.f32.mrb[16].mxu0 }
 0xa44   : > { %3615 = vrot.lane.b32.xlu1 %v3614_v8, %s4076_s16  ;;  %v1769_v41 = vpop.f32.mrb[17].mxu0 }
 0xa45   : > { %3610 = vrot.lane.b32.xlu0 %v3609_v15, %s4076_s16  ;;  %v3459_v42 = vpop.f32.mrb[18].mxu0 }
 0xa46   : > { %v3624_v37 = vpack.i.bf16 %v3459_v42, %v3458_v30  ;;  %v1772_v2 = vpop.f32.mrb[19].mxu0 }
 0xa47   : > { %v3619_v43 = vpack.i.bf16 %v1772_v2, %v1769_v41  ;;  %v3674_v39 = vld [vmem:[%s5172_s12 + $0xc] ss:$16 sps:$4 sm:$0xff]   ;;  %v3675_v40 = vld [vmem:[%s5172_s12 + $0x20] ss:$16 sps:$4 sm:$0xff]   ;;  %v3678_v32 = vld [vmem:[%s5172_s12 + $0x28] ss:$16 sps:$4 sm:$0xff]  }
 0xa48   : > { %3625 = vrot.lane.b32.xlu1 %v3624_v37, %s4075_s15  ;;  %v3680_v3 = vld [vmem:[%s5172_s12 + $0x2c] ss:$16 sps:$4 sm:$0xff]   ;;  %2307 = vmatprep.subr.bf16.mxu0 %v3674_v39 }
 0xa49   : > { %3620 = vrot.lane.b32.xlu0 %v3619_v43, %s4075_s15 }
 0xab2   : > { %v3606_v44 = vpop.permute.xlu1 %3605 }
 0xab3   : > { %v3601_v47 = vpop.permute.xlu0 %3600  ;;  %v3608_v34 = vunpack.i.h.bf16 %v3606_v44  ;;  %v3607_v35 = vunpack.i.l.bf16 %v3606_v44 }
 0xab4   : > { %v3603_v7 = vunpack.i.h.bf16 %v3601_v47  ;;  %v3602_v8 = vunpack.i.l.bf16 %v3601_v47 }
 0xab5   : > { %v1835_v15 = vsel %vm1087_vm0, %v4566_v27, %v3608_v34  ;;  %v1834_v50 = vsel %vm1087_vm0, %v4562_v25, %v3607_v35 }
 0xab6   : > { %v3616_v5 = vpop.permute.xlu1 %3615  ;;  %v1833_v52 = vsel %vm1087_vm0, %v4568_v28, %v3603_v7  ;;  %v1832_v57 = vsel %vm1087_vm0, %v4564_v26, %v3602_v8 }
 0xab7   : > { %v3611_v45 = vpop.permute.xlu0 %3610  ;;  %v3618_v46 = vunpack.i.h.bf16 %v3616_v5  ;;  %v3617_v48 = vunpack.i.l.bf16 %v3616_v5 }
 0xab8   : > { %v3613_v6 = vunpack.i.h.bf16 %v3611_v45  ;;  %v3612_v9 = vunpack.i.l.bf16 %v3611_v45 }
 0xab9   : > { %v1839_v58 = vsel %vm1836_vm1, %v1834_v50, %v3617_v48  ;;  %v1840_v60 = vsel %vm1836_vm1, %v1835_v15, %v3618_v46  ;;  %v3681_v15 = vld [vmem:[%s5172_s12 + $0x40] ss:$16 sps:$4 sm:$0xff]   ;;  %v3684_v50 = vld [vmem:[%s5172_s12 + $0x48] ss:$16 sps:$4 sm:$0xff]  }
 0xaba   : > { %v3626_v51 = vpop.permute.xlu1 %3625  ;;  %v1837_v62 = vsel %vm1836_vm1, %v1832_v57, %v3612_v9  ;;  %v1838_v25 = vsel %vm1836_vm1, %v1833_v52, %v3613_v6  ;;  %v3683_v6 = vld [vmem:[%s5172_s12 + $0x44] ss:$16 sps:$4 sm:$0xff]   ;;  %v3686_v9 = vld [vmem:[%s5172_s12 + $0x4c] ss:$16 sps:$4 sm:$0xff]   ;;  %v3687_v57 = vld [vmem:[%s5172_s12 + $0x60] ss:$16 sps:$4 sm:$0xff]  }
 0xabb   : > { %v3628_v59 = vunpack.i.h.bf16 %v3626_v51  ;;  %v3627_v53 = vunpack.i.l.bf16 %v3626_v51  ;;  %v3621_v55 = vpop.permute.xlu0 %3620  ;;  %v3689_v51 = vld [vmem:[%s5172_s12 + $0x64] ss:$16 sps:$4 sm:$0xff]   ;;  %v3692_v52 = vld [vmem:[%s5172_s12 + $0x6c] ss:$16 sps:$4 sm:$0xff]  }
 0xabc   : > { %v3623_v61 = vunpack.i.h.bf16 %v3621_v55  ;;  %v3622_v27 = vunpack.i.l.bf16 %v3621_v55  ;;  %v3698_v55 = vld [vmem:[%s5172_s12 + $0x8c] ss:$16 sps:$4 sm:$0xff]  }
 0xabd   : > { %v1845_v63 = vsel %vm1841_vm2, %v1840_v60, %v3628_v59  ;;  %v1844_v28 = vsel %vm1841_vm2, %v1839_v58, %v3627_v53  ;;  %v3690_v59 = vld [vmem:[%s5172_s12 + $0x68] ss:$16 sps:$4 sm:$0xff]   ;;  %v3695_v53 = vld [vmem:[%s5172_s12 + $0x84] ss:$16 sps:$4 sm:$0xff]   ;;  %v3693_v58 = vld [vmem:[%s5172_s12 + $0x80] ss:$16 sps:$4 sm:$0xff]  }
 0xabe   : > { %v1847_v0 = vpack.c.bf16 %v1845_v63, %v1844_v28  ;;  %v1842_v26 = vsel %vm1841_vm2, %v1837_v62, %v3622_v27  ;;  %v1843_v1 = vsel %vm1841_vm2, %v1838_v25, %v3623_v61  ;;  %v3696_v60 = vld [vmem:[%s5172_s12 + $0x88] ss:$16 sps:$4 sm:$0xff]   ;;  %v3701_v61 = vld [vmem:[%s5172_s12 + $0xa4] ss:$16 sps:$4 sm:$0xff]   ;;  %v3704_v27 = vld [vmem:[%s5172_s12 + $0xac] ss:$16 sps:$4 sm:$0xff]  }
 0xabf   : > { %v1846_v4 = vpack.c.bf16 %v1843_v1, %v1842_v26  ;;  %v3699_v62 = vld [vmem:[%s5172_s12 + $0xa0] ss:$16 sps:$4 sm:$0xff]   ;;  %v3702_v25 = vld [vmem:[%s5172_s12 + $0xa8] ss:$16 sps:$4 sm:$0xff]   ;;  %v3707_v63 = vld [vmem:[%s5172_s12 + $0xc4] ss:$16 sps:$4 sm:$0xff]  }
 0xac0   : > { %v3710_v28 = vld [vmem:[%s5172_s12 + $0xcc] ss:$16 sps:$4 sm:$0xff]   ;;  %v3708_v26 = vld [vmem:[%s5172_s12 + $0xc8] ss:$16 sps:$4 sm:$0xff]   ;;  %v3713_v1 = vld [vmem:[%s5172_s12 + $0xe4] ss:$16 sps:$4 sm:$0xff]  }
 0xac1   : > { %3476 = vmatprep.mubr.bf16.mxu0 %v1846_v4  ;;  %v3716_v4 = vld [vmem:[%s5172_s12 + $0xec] ss:$16 sps:$4 sm:$0xff]  }
 0xac2   : > { %3477 = vmatmul.mubr.bf16.vlgmr.msra.gmra.mrb[20].mxu0 %v1847_v0  ;;  %v3705_v0 = vld [vmem:[%s5172_s12 + $0xc0] ss:$16 sps:$4 sm:$0xff]  }
 0xac3   : > { %2339 = vmatprep.mubr.bf16.mxu0 %v4074_v49 }
 0xb95   : > { %v3478_v56 = vpop.f32.mrb[20].mxu0 }
 0xb96   : > { %v1953_v54 = vpop.f32.mrb[21].mxu0  ;;  %v1962_v19 = vadd.f32 %v3478_v56, %v3122_v14  ;;  %v3714_v56 = vld [vmem:[%s5172_s12 + $0xe8] ss:$16 sps:$4 sm:$0xff]  }
 0xb97   : > { %v1954_v16 = vadd.f32 %v3122_v14, %v1953_v54  ;;  %v3479_v17 = vpop.f32.mrb[22].mxu0 }
 0xb98   : > { %v1956_v18 = vpop.f32.mrb[23].mxu0  ;;  %v4738_v24 = vadd.f32 %v4369_v11, %v1962_v19  ;;  %v1965_v36 = vadd.f32 %v3479_v17, %v3122_v14  ;;  %v3672_v11 = vld [vmem:[%s5172_s12 + $0x8] ss:$16 sps:$4 sm:$0xff]  }
 0xb99   : > { %v4731_v20 = vadd.f32 %v4367_v10, %v1954_v16  ;;  %v1957_v21 = vadd.f32 %v3122_v14, %v1956_v18  ;;  %v3669_v10 = vld [vmem:[%s5172_s12] ss:$16 sps:$4 sm:$0xff]   ;;  %2308 = vmatpush1.bf16.msra.mxu0 %v3672_v11 }
 0xb9a   : > { %v4743_v38 = vadd.f32 %v4375_v13, %v1965_v36  ;;  %v3677_v13 = vld [vmem:[%s5172_s12 + $0x24] ss:$16 sps:$4 sm:$0xff]   ;;  %2309 = vmatprep.subr.bf16.mxu0 %v3680_v3  ;;  %v3711_v14 = vld [vmem:[%s5172_s12 + $0xe0] ss:$16 sps:$4 sm:$0xff]  }
 0xb9b   : > { %v4734_v22 = vadd.f32 %v4373_v12, %v1957_v21  ;;  %1974 = vadd.xlane.f32.xlu0 %v4731_v20  ;;  %v3671_v12 = vld [vmem:[%s5172_s12 + $0x4] ss:$16 sps:$4 sm:$0xff]  }
 0xb9c   : > { %2254 = vmatprep.subr.bf16.mxu1 %v3671_v12 }
 0xb9d   : > { %1976 = vadd.xlane.f32.xlu1 %v4734_v22  ;;  %2255 = vmatpush1.bf16.msra.mxu1 %v3669_v10 }
 0xb9e   : > { %2256 = vmatprep.subr.bf16.mxu1 %v3677_v13  ;;  %2310 = vmatpush1.bf16.msra.mxu0 %v3678_v32 }
 0xb9f   : > { %1978 = vadd.xlane.f32.xlu0 %v4738_v24  ;;  %2311 = vmatprep.subr.bf16.mxu0 %v3686_v9 }
 0xba1   : > { %2257 = vmatpush1.bf16.msra.mxu1 %v3675_v40  ;;  %v3131_v40 = vld [vmem:[#allocation7] ss:$0 sm:$0xff] }
 0xba2   : > { %2258 = vmatprep.subr.bf16.mxu1 %v3683_v6  ;;  %2312 = vmatpush1.bf16.msra.mxu0 %v3684_v50  ;;  %v3719_v50 = vld [vmem:[%s5173_s27] sm:$0xff]  }
 0xba3   : > { %1980 = vadd.xlane.f32.xlu0 %v4743_v38  ;;  %2313 = vmatprep.subr.bf16.mxu0 %v3692_v52  ;;  %v3722_v52 = vld [vmem:[%s5173_s27 + $0xc8] sm:$0xff]  }
 0xba5   : > { %2259 = vmatpush1.bf16.msra.mxu1 %v3681_v15 }
 0xba6   : > { %2260 = vmatprep.subr.bf16.mxu1 %v3689_v51  ;;  %2314 = vmatpush1.bf16.msra.mxu0 %v3690_v59  ;;  %v3721_v51 = vld [vmem:[%s5173_s27 + $0x48] sm:$0xff]  }
 0xba7   : > { %2315 = vmatprep.subr.bf16.mxu0 %v3698_v55  ;;  %v3724_v59 = vld [vmem:[%s5173_s27 + $0x88] sm:$0xff]   ;;  %v3726_v55 = vld [vmem:[%s5173_s27 + $0xd0] sm:$0xff]  }
 0xba9   : > { %2261 = vmatpush1.bf16.msra.mxu1 %v3687_v57  ;;  %v3723_v57 = vld [vmem:[%s5173_s27 + $0x8] sm:$0xff]  }
 0xbaa   : > { %2262 = vmatprep.subr.bf16.mxu1 %v3695_v53  ;;  %2316 = vmatpush1.bf16.msra.mxu0 %v3696_v60  ;;  %v3725_v53 = vld [vmem:[%s5173_s27 + $0x50] sm:$0xff]  }
 0xbab   : > { %2317 = vmatprep.subr.bf16.mxu0 %v3704_v27  ;;  %v3728_v60 = vld [vmem:[%s5173_s27 + $0x90] sm:$0xff]   ;;  %v3730_v27 = vld [vmem:[%s5173_s27 + $0xd8] sm:$0xff]  }
 0xbad   : > { %2263 = vmatpush1.bf16.msra.mxu1 %v3693_v58  ;;  %v3727_v58 = vld [vmem:[%s5173_s27 + $0x10] sm:$0xff]  }
 0xbae   : > { %2264 = vmatprep.subr.bf16.mxu1 %v3701_v61  ;;  %2318 = vmatpush1.bf16.msra.mxu0 %v3702_v25  ;;  %v3729_v61 = vld [vmem:[%s5173_s27 + $0x58] sm:$0xff]  }
 0xbaf   : > { %2319 = vmatprep.subr.bf16.mxu0 %v3710_v28  ;;  %v3732_v25 = vld [vmem:[%s5173_s27 + $0x98] sm:$0xff]   ;;  %v3734_v28 = vld [vmem:[%s5173_s27 + $0xe0] sm:$0xff]  }
 0xbb1   : > { %2265 = vmatpush1.bf16.msra.mxu1 %v3699_v62  ;;  %v3731_v62 = vld [vmem:[%s5173_s27 + $0x18] sm:$0xff]  }
 0xbb2   : > { %2266 = vmatprep.subr.bf16.mxu1 %v3707_v63  ;;  %2320 = vmatpush1.bf16.msra.mxu0 %v3708_v26  ;;  %v3733_v63 = vld [vmem:[%s5173_s27 + $0x60] sm:$0xff]  }
 0xbb3   : > { %2321 = vmatprep.subr.bf16.mxu0 %v3716_v4  ;;  %v3736_v26 = vld [vmem:[%s5173_s27 + $0xa0] sm:$0xff]   ;;  %v3738_v4 = vld [vmem:[%s5173_s27 + $0xe8] sm:$0xff]  }
 0xbb5   : > { %2267 = vmatpush1.bf16.msra.mxu1 %v3705_v0  ;;  %v3735_v0 = vld [vmem:[%s5173_s27 + $0x20] sm:$0xff]  }
 0xbb6   : > { %2268 = vmatprep.subr.bf16.mxu1 %v3713_v1  ;;  %2322 = vmatpush1.bf16.msra.mxu0 %v3714_v56  ;;  %v3737_v1 = vld [vmem:[%s5173_s27 + $0x68] sm:$0xff]  }
 0xbb7   : > { %v3740_v56 = vld [vmem:[%s5173_s27 + $0xa8] sm:$0xff]  }
 0xbb9   : > { %2269 = vmatpush1.bf16.msra.mxu1 %v3711_v14  ;;  %v3739_v14 = vld [vmem:[%s5173_s27 + $0x28] sm:$0xff]  }
 0xc28   : > { %v1975_v30 = vpop.xlane.xlu0 %1974 }
 0xc29   : > { %v1982_v41 = vmul.f32 0.0078125, %v1975_v30 }
 0xc2a   : > { %v1977_v42 = vpop.xlane.xlu1 %1976 }
 0xc2b   : > { %v4771_v37 = vsub.f32 %v4731_v20, %v1982_v41  ;;  %v1983_v2 = vmul.f32 0.0078125, %v1977_v42 }
 0xc2c   : > { %v1979_v43 = vpop.xlane.xlu0 %1978 }
 0xc2d   : > { %v4774_v44 = vsub.f32 %v4734_v22, %v1983_v2  ;;  %v1984_v47 = vmul.f32 0.0078125, %v1979_v43  ;;  %v1990_v34 = vmul.f32 %v4771_v37, %v4771_v37  ;;  %v3132_v43 = vld [vmem:[#allocation8] ss:$0 sm:$0xff] }
 0xc2f   : > { %v4779_v35 = vsub.f32 %v4738_v24, %v1984_v47  ;;  %1994 = vadd.xlane.f32.xlu0 %v1990_v34  ;;  %v1991_v5 = vmul.f32 %v4774_v44, %v4774_v44 }
 0xc30   : > { %v1981_v7 = vpop.xlane.xlu0 %1980 }
 0xc31   : > { %v1985_v8 = vmul.f32 0.0078125, %v1981_v7  ;;  %1996 = vadd.xlane.f32.xlu1 %v1991_v5  ;;  %v1992_v45 = vmul.f32 %v4779_v35, %v4779_v35 }
 0xc33   : > { %v4786_v46 = vsub.f32 %v4743_v38, %v1985_v8  ;;  %1998 = vadd.xlane.f32.xlu0 %v1992_v45 }
 0xc35   : > { %v1993_v48 = vmul.f32 %v4786_v46, %v4786_v46 }
 0xc37   : > { %2000 = vadd.xlane.f32.xlu1 %v1993_v48 }
 0xcbc   : > { %v1995_v54 = vpop.xlane.xlu0 %1994 }
 0xcbd   : > { %v2002_v16 = vmul.f32 0.0078125, %v1995_v54  ;;  %v3741_v54 = vld [vmem:[%s5173_s27 + $0x70] sm:$0xff]  }
 0xcbe   : > { %v1997_v17 = vpop.xlane.xlu1 %1996 }
 0xcbf   : > { %v2006_v18 = vadd.f32 1e-05, %v2002_v16  ;;  %v2003_v19 = vmul.f32 0.0078125, %v1997_v17  ;;  %v3742_v16 = vld [vmem:[%s5173_s27 + $0xf0] sm:$0xff]  }
 0xcc0   : > { %v1999_v21 = vpop.xlane.xlu0 %1998  ;;  %v3743_v17 = vld [vmem:[%s5173_s27 + $0x30] sm:$0xff]  }
 0xcc1   : > { %3821 = vrsqrt.f32 %v2006_v18  ;;  %v2007_v36 = vadd.f32 1e-05, %v2003_v19  ;;  %v2004_v10 = vmul.f32 0.0078125, %v1999_v21  ;;  %v3744_v18 = vld [vmem:[%s5173_s27 + $0xb0] sm:$0xff]   ;;  %v3745_v19 = vld [vmem:[%s5173_s27 + $0x78] sm:$0xff]  }
 0xcc2   : > { %v3746_v21 = vld [vmem:[%s5173_s27 + $0xf8] sm:$0xff]  }
 0xcc3   : > { %3823 = vrsqrt.f32 %v2007_v36  ;;  %v2008_v12 = vadd.f32 1e-05, %v2004_v10  ;;  %v3747_v36 = vld [vmem:[%s5173_s27 + $0x38] sm:$0xff]  }
 0xcc4   : > { %v2001_v11 = vpop.xlane.xlu1 %2000  ;;  %v3748_v10 = vld [vmem:[%s5173_s27 + $0xb8] sm:$0xff]  }
 0xcc5   : > { %3825 = vrsqrt.f32 %v2008_v12  ;;  %v2005_v39 = vmul.f32 0.0078125, %v2001_v11  ;;  %v2072_v12 = vld [vmem:[%s5174_s4] sm:$0xf] }
 0xcc6   : > { %v4969_v11 = vrot.slane %v2072_v12, %v806_v29 }
 0xcc7   : > { %v2009_v13 = vadd.f32 1e-05, %v2005_v39  ;;  %v4973_v39 = vrot.slane %v2072_v12, %v814_v33 }
 0xcc9   : > { %3827 = vrsqrt.f32 %v2009_v13  ;;  %v2088_v13 = vsub.s32 3, %v4480_v23 }
 0xccb   : > { %v3822_v3 = vpop.eup %3821  ;;  %v4982_v29 = vrot.slane %v2072_v12, %v2088_v13 }
 0xccc   : > { %v2014_v32 = vmul.f32 %v3822_v3, %v4771_v37 }
 0xccd   : > { %v3824_v30 = vpop.eup %3823 }
 0xcce   : > { %v2015_v41 = vmul.f32 %v3824_v30, %v4774_v44  ;;  %v2024_v42 = vmul.f32 %v3131_v40, %v2014_v32  ;;  %v4978_v32 = vrot.slane %v2072_v12, %v810_v31 }
 0xccf   : > { %v3826_v2 = vpop.eup %3825 }
 0xcd0   : > { %v2025_v47 = vmul.f32 %v3131_v40, %v2015_v41  ;;  %v2034_v34 = vadd.f32 %v3132_v43, %v2024_v42  ;;  %v2016_v7 = vmul.f32 %v3826_v2, %v4779_v35  ;;  %v3717_v35 = vld [vmem:[%s5173_s27 + $0x40] sm:$0xff]  }
 0xcd1   : > { %3320 = vmatprep.subr.bf16.mxu1 %v3717_v35 }
 0xcd2   : > { %v2035_v5 = vadd.f32 %v3132_v43, %v2025_v47  ;;  %v2026_v6 = vmul.f32 %v3131_v40, %v2016_v7 }
 0xcd3   : > { %v3828_v8 = vpop.eup %3827 }
 0xcd4   : > { %v2038_v45 = vpack.c.bf16 %v2035_v5, %v2034_v34  ;;  %v2017_v48 = vmul.f32 %v3828_v8, %v4786_v46  ;;  %v2036_v44 = vadd.f32 %v3132_v43, %v2026_v6  ;;  %v3718_v46 = vld [vmem:[%s5173_s27 + $0xc0] sm:$0xff]  }
 0xcd5   : > { %3348 = vmatprep.subr.bf16.mxu0 %v3718_v46 }
 0xcd6   : > { %2287 = vmatmul.mubr.bf16.vlgmr.msra.gmra.mrb[24].mxu1 %v2038_v45  ;;  %2340 = vmatmul.mubr.bf16.vlgmr.msra.gmra.mrb[24].mxu0 %v2038_v45  ;;  %v2027_v9 = vmul.f32 %v3131_v40, %v2017_v48 }
 0xcd7   : > { %2296 = vmatprep.mubr.bf16.mxu1 %v4074_v49  ;;  %2349 = vmatprep.mubr.bf16.mxu0 %v4074_v49  ;;  %v3720_v49 = vld [vmem:[%s5173_s27 + $0x80] sm:$0xff]  }
 0xcd8   : > { %v2037_v37 = vadd.f32 %v3132_v43, %v2027_v9  ;;  %3321 = vmatpush3.bf16.msra.mxu1 %v3719_v50  ;;  %3349 = vmatpush3.bf16.msra.mxu0 %v3720_v49 }
 0xcd9   : > { %3322 = vmatprep.subr.bf16.mxu1 %v3721_v51  ;;  %3350 = vmatprep.subr.bf16.mxu0 %v3722_v52 }
 0xcda   : > { %v2039_v15 = vpack.c.bf16 %v2037_v37, %v2036_v44 }
 0xcdc   : > { %3323 = vmatpush3.bf16.msra.mxu1 %v3723_v57  ;;  %3351 = vmatpush3.bf16.msra.mxu0 %v3724_v59 }
 0xcdd   : > { %3324 = vmatprep.subr.bf16.mxu1 %v3725_v53  ;;  %3352 = vmatprep.subr.bf16.mxu0 %v3726_v55 }
 0xcde   : > { %2297 = vmatmul.mubr.bf16.gmra.mrb[28].mxu1 %v2039_v15  ;;  %2350 = vmatmul.mubr.bf16.gmra.mrb[28].mxu0 %v2039_v15 }
 0xce0   : > { %3325 = vmatpush3.bf16.msra.mxu1 %v3727_v58  ;;  %3353 = vmatpush3.bf16.msra.mxu0 %v3728_v60 }
 0xce1   : > { %3326 = vmatprep.subr.bf16.mxu1 %v3729_v61  ;;  %3354 = vmatprep.subr.bf16.mxu0 %v3730_v27 }
 0xce4   : > { %3327 = vmatpush3.bf16.msra.mxu1 %v3731_v62  ;;  %3355 = vmatpush3.bf16.msra.mxu0 %v3732_v25 }
 0xce5   : > { %3328 = vmatprep.subr.bf16.mxu1 %v3733_v63  ;;  %3356 = vmatprep.subr.bf16.mxu0 %v3734_v28 }
 0xce8   : > { %3329 = vmatpush3.bf16.msra.mxu1 %v3735_v0  ;;  %3357 = vmatpush3.bf16.msra.mxu0 %v3736_v26 }
 0xce9   : > { %3330 = vmatprep.subr.bf16.mxu1 %v3737_v1  ;;  %3358 = vmatprep.subr.bf16.mxu0 %v3738_v4 }
 0xcec   : > { %3331 = vmatpush3.bf16.msra.mxu1 %v3739_v14  ;;  %3359 = vmatpush3.bf16.msra.mxu0 %v3740_v56 }
 0xced   : > { %3332 = vmatprep.subr.bf16.mxu1 %v3741_v54  ;;  %3360 = vmatprep.subr.bf16.mxu0 %v3742_v16 }
 0xcf0   : > { %3333 = vmatpush3.bf16.msra.mxu1 %v3743_v17  ;;  %3361 = vmatpush3.bf16.msra.mxu0 %v3744_v18 }
 0xcf1   : > { %3334 = vmatprep.subr.bf16.mxu1 %v3745_v19  ;;  %3362 = vmatprep.subr.bf16.mxu0 %v3746_v21 }
 0xcf4   : > { %3335 = vmatpush3.bf16.msra.mxu1 %v3747_v36  ;;  %3363 = vmatpush3.bf16.msra.mxu0 %v3748_v10 }
 0xda9   : > { %v2288_v3 = vpop.f32.mrb[24].mxu1  ;;  %v2341_v40 = vpop.f32.mrb[24].mxu0 }
 0xdaa   : > { %v2289_v30 = vadd.f32 %v2288_v3, %v4969_v11  ;;  %v2342_v41 = vadd.f32 %v2341_v40, %v4973_v39  ;;  %v2290_v42 = vpop.f32.mrb[25].mxu1  ;;  %v2343_v2 = vpop.f32.mrb[25].mxu0 }
 0xdab   : > { %v2292_v43 = vpop.f32.mrb[26].mxu1  ;;  %v2345_v47 = vpop.f32.mrb[26].mxu0  ;;  %v4985_v5 = vadd.f32 %v2290_v42, %v4978_v32  ;;  %v4995_v9 = vadd.f32 %v2343_v2, %v4982_v29 }
 0xdac   : > { %v2376_v33 = vmul.f32 0.044715, %v2289_v30  ;;  %v2378_v34 = vmul.f32 0.044715, %v2342_v41  ;;  %v2293_v7 = vadd.f32 %v2292_v43, %v4969_v11  ;;  %v4989_v23 = vadd.f32 %v2345_v47, %v4973_v39  ;;  %v2294_v31 = vpop.f32.mrb[27].mxu1  ;;  %v2347_v8 = vpop.f32.mrb[27].mxu0 }
 0xdad   : > { %v4992_v6 = vadd.f32 %v2294_v31, %v4978_v32  ;;  %v4998_v44 = vadd.f32 %v2347_v8, %v4982_v29  ;;  %v5000_v15 = vmul.f32 0.5, %v2289_v30  ;;  %v2377_v49 = vmul.f32 0.044715, %v4985_v5 }
 0xdae   : > { %v2392_v45 = vmul.f32 %v2376_v33, %v2289_v30  ;;  %v2394_v48 = vmul.f32 %v2378_v34, %v2342_v41  ;;  %v2380_v37 = vmul.f32 0.044715, %v2293_v7  ;;  %v2382_v50 = vmul.f32 0.044715, %v4989_v23 }
 0xdaf   : > { %v2381_v52 = vmul.f32 0.044715, %v4992_v6  ;;  %v5005_v55 = vmul.f32 0.5, %v2342_v41  ;;  %v2379_v62 = vmul.f32 0.044715, %v4995_v9  ;;  %v2393_v16 = vmul.f32 %v2377_v49, %v4985_v5 }
 0xdb0   : > { %v2408_v35 = vmul.f32 %v2392_v45, %v2289_v30  ;;  %v2410_v46 = vmul.f32 %v2394_v48, %v2342_v41  ;;  %v2396_v51 = vmul.f32 %v2380_v37, %v2293_v7  ;;  %v2398_v60 = vmul.f32 %v2382_v50, %v4989_v23 }
 0xdb1   : > { %v2298_v57 = vpop.f32.mrb[28].mxu1  ;;  %v2351_v59 = vpop.f32.mrb[28].mxu0  ;;  %v2383_v63 = vmul.f32 0.044715, %v4998_v44  ;;  %v2397_v18 = vmul.f32 %v2381_v52, %v4992_v6  ;;  %v2395_v12 = vmul.f32 %v2379_v62, %v4995_v9  ;;  %v2409_v2 = vmul.f32 %v2393_v16, %v4985_v5 }
 0xdb2   : > { %v2424_v53 = vadd.f32 %v2408_v35, %v2289_v30  ;;  %v2426_v58 = vadd.f32 %v2410_v46, %v2342_v41  ;;  %v2300_v61 = vpop.f32.mrb[29].mxu1  ;;  %v2353_v27 = vpop.f32.mrb[29].mxu0  ;;  %v2412_v25 = vmul.f32 %v2396_v51, %v2293_v7  ;;  %v5011_v28 = vadd.f32 %v2298_v57, %v4969_v11 }
 0xdb3   : > { %v2302_v0 = vpop.f32.mrb[30].mxu1  ;;  %v2355_v26 = vpop.f32.mrb[30].mxu0  ;;  %v2414_v14 = vmul.f32 %v2398_v60, %v4989_v23  ;;  %v5017_v19 = vadd.f32 %v2351_v59, %v4973_v39  ;;  %v5022_v10 = vadd.f32 %v2300_v61, %v4978_v32  ;;  %v2399_v3 = vmul.f32 %v2383_v63, %v4998_v44 }
 0xdb4   : > { %v2440_v1 = vmul.f32 0.7978846, %v2424_v53  ;;  %v2442_v4 = vmul.f32 0.7978846, %v2426_v58  ;;  %v2304_v56 = vpop.f32.mrb[31].mxu1  ;;  %v2357_v54 = vpop.f32.mrb[31].mxu0  ;;  %v2428_v17 = vadd.f32 %v2412_v25, %v2293_v7  ;;  %v5028_v41 = vadd.f32 %v2353_v27, %v4982_v29 }
 0xdb5   : > { %v2430_v21 = vadd.f32 %v2414_v14, %v4989_v23  ;;  %v2384_v36 = vmul.f32 0.044715, %v5011_v28  ;;  %v2385_v30 = vmul.f32 0.044715, %v5022_v10  ;;  %v5031_v42 = vadd.f32 %v2302_v0, %v4969_v11 }
 0xdb6   : > { %3829 = vtanh.f32 %v2440_v1  ;;  %v2444_v13 = vmul.f32 0.7978846, %v2428_v17  ;;  %v2413_v43 = vmul.f32 %v2397_v18, %v4992_v6  ;;  %v5036_v47 = vadd.f32 %v2355_v26, %v4973_v39 }
 0xdb7   : > { %3831 = vtanh.f32 %v2442_v4  ;;  %v2446_v40 = vmul.f32 0.7978846, %v2430_v21  ;;  %v2400_v33 = vmul.f32 %v2384_v36, %v5011_v28  ;;  %v2386_v34 = vmul.f32 0.044715, %v5017_v19 }
 0xdb8   : > { %3833 = vtanh.f32 %v2444_v13  ;;  %v2387_v31 = vmul.f32 0.044715, %v5028_v41  ;;  %v2364_v8 = vmul.f32 0.5, %v2293_v7  ;;  %v2401_v45 = vmul.f32 %v2385_v30, %v5022_v10 }
 0xdb9   : > { %3835 = vtanh.f32 %v2446_v40  ;;  %v5043_v11 = vadd.f32 %v2304_v56, %v4978_v32  ;;  %v5046_v48 = vadd.f32 %v2357_v54, %v4982_v29  ;;  %v2411_v37 = vmul.f32 %v2395_v12, %v4995_v9 }
 0xdba   : > { %v2415_v39 = vmul.f32 %v2399_v3, %v4998_v44  ;;  %v2388_v35 = vmul.f32 0.044715, %v5031_v42  ;;  %v2390_v46 = vmul.f32 0.044715, %v5036_v47  ;;  %v2403_v50 = vmul.f32 %v2387_v31, %v5028_v41 }
 0xdbb   : > { %v2389_v7 = vmul.f32 0.044715, %v5043_v11  ;;  %v2391_v49 = vmul.f32 0.044715, %v5046_v48  ;;  %v2425_v32 = vadd.f32 %v2409_v2, %v4985_v5  ;;  %v2366_v51 = vmul.f32 0.5, %v4989_v23 }
 0xdbc   : > { %v2416_v29 = vmul.f32 %v2400_v33, %v5011_v28  ;;  %v2402_v52 = vmul.f32 %v2386_v34, %v5017_v19  ;;  %v2429_v57 = vadd.f32 %v2413_v43, %v4992_v6  ;;  %v2417_v59 = vmul.f32 %v2401_v45, %v5022_v10 }
 0xdbd   : > { %v2405_v53 = vmul.f32 %v2389_v7, %v5043_v11  ;;  %v2407_v58 = vmul.f32 %v2391_v49, %v5046_v48  ;;  %v2441_v60 = vmul.f32 0.7978846, %v2425_v32  ;;  %v2404_v27 = vmul.f32 %v2388_v35, %v5031_v42 }
 0xdbe   : > { %v2445_v62 = vmul.f32 0.7978846, %v2429_v57  ;;  %v2427_v25 = vadd.f32 %v2411_v37, %v4995_v9  ;;  %v2431_v23 = vadd.f32 %v2415_v39, %v4998_v44  ;;  %v2419_v0 = vmul.f32 %v2403_v50, %v5028_v41 }
 0xdbf   : > { %v2406_v26 = vmul.f32 %v2390_v46, %v5036_v47  ;;  %v2421_v1 = vmul.f32 %v2405_v53, %v5043_v11  ;;  %3837 = vtanh.f32 %v2441_v60  ;;  %v2418_v16 = vmul.f32 %v2402_v52, %v5017_v19 }
 0xdc0   : > { %v3830_v61 = vpop.eup %3829  ;;  %3839 = vtanh.f32 %v2445_v62  ;;  %v2443_v4 = vmul.f32 0.7978846, %v2427_v25  ;;  %v2447_v14 = vmul.f32 0.7978846, %v2431_v23  ;;  %v2423_v17 = vmul.f32 %v2407_v58, %v5046_v48 }
 0xdc1   : > { %v3832_v63 = vpop.eup %3831  ;;  %v2472_v56 = vadd.f32 1.0, %v3830_v61  ;;  %v2433_v21 = vadd.f32 %v2417_v59, %v5022_v10  ;;  %v2420_v12 = vmul.f32 %v2404_v27, %v5031_v42  ;;  %v2437_v3 = vadd.f32 %v2421_v1, %v5043_v11 }
 0xdc2   : > { %v3834_v54 = vpop.eup %3833  ;;  %v2474_v18 = vadd.f32 1.0, %v3832_v63  ;;  %3841 = vtanh.f32 %v2443_v4  ;;  %v2422_v40 = vmul.f32 %v2406_v26, %v5036_v47  ;;  %v2435_v31 = vadd.f32 %v2419_v0, %v5028_v41 }
 0xdc3   : > { %v3836_v36 = vpop.eup %3835  ;;  %v2476_v13 = vadd.f32 1.0, %v3834_v54  ;;  %3843 = vtanh.f32 %v2447_v14  ;;  %v2449_v2 = vmul.f32 0.7978846, %v2433_v21  ;;  %v2488_v43 = vmul.f32 %v2472_v56, %v5000_v15 }
 0xdc4   : > { %v2478_v30 = vadd.f32 1.0, %v3836_v36  ;;  %v2453_v34 = vmul.f32 0.7978846, %v2437_v3  ;;  %v2490_v45 = vmul.f32 %v2474_v18, %v5005_v55  ;;  %v2439_v39 = vadd.f32 %v2423_v17, %v5046_v48 }
 0xdc5   : > { %v2492_v33 = vmul.f32 %v2476_v13, %v2364_v8  ;;  %3845 = vtanh.f32 %v2449_v2  ;;  %v2451_v46 = vmul.f32 0.7978846, %v2435_v31  ;;  %v2432_v49 = vadd.f32 %v2416_v29, %v5011_v28 }
 0xdc6   : > { %v2494_v37 = vmul.f32 %v2478_v30, %v2366_v51  ;;  %3847 = vtanh.f32 %v2453_v34  ;;  %v2455_v7 = vmul.f32 0.7978846, %v2439_v39  ;;  %v2436_v32 = vadd.f32 %v2420_v12, %v5031_v42 }
 0xdc7   : > { %v2504_v35 = vpack.c.bf16 %v2492_v33, %v2488_v43  ;;  %3849 = vtanh.f32 %v2451_v46  ;;  %v2434_v15 = vadd.f32 %v2418_v16, %v5017_v19  ;;  %v2448_v52 = vmul.f32 0.7978846, %v2432_v49 }
 0xdc8   : > { %v2506_v50 = vpack.c.bf16 %v2494_v37, %v2490_v45  ;;  %3851 = vtanh.f32 %v2455_v7  ;;  %v2452_v55 = vmul.f32 0.7978846, %v2436_v32  ;;  %v2438_v51 = vadd.f32 %v2422_v40, %v5036_v47 }
 0xdc9   : > { %v3838_v8 = vpop.eup %3837  ;;  %v2361_v59 = vmul.f32 0.5, %v4985_v5  ;;  %v2450_v58 = vmul.f32 0.7978846, %v2434_v15  ;;  %v2365_v60 = vmul.f32 0.5, %v4992_v6  ;;  %3853 = vtanh.f32 %v2448_v52 }
 0xdca   : > { %v3840_v57 = vpop.eup %3839  ;;  %v2473_v53 = vadd.f32 1.0, %v3838_v8  ;;  %v2454_v29 = vmul.f32 0.7978846, %v2438_v51  ;;  %3855 = vtanh.f32 %v2452_v55  ;;  %v2363_v0 = vmul.f32 0.5, %v4995_v9 }
 0xdcb   : > { %v2477_v61 = vadd.f32 1.0, %v3840_v57  ;;  %3857 = vtanh.f32 %v2450_v58  ;;  %v2367_v26 = vmul.f32 0.5, %v4998_v44  ;;  %v2369_v16 = vmul.f32 0.5, %v5022_v10 }
 0xdcc   : > { %v3842_v27 = vpop.eup %3841  ;;  %v2489_v25 = vmul.f32 %v2473_v53, %v2361_v59  ;;  %3859 = vtanh.f32 %v2454_v29  ;;  %v2373_v17 = vmul.f32 0.5, %v5043_v11  ;;  %v2371_v3 = vmul.f32 0.5, %v5028_v41 }
 0xdcd   : > { %v3844_v62 = vpop.eup %3843  ;;  %v2493_v23 = vmul.f32 %v2477_v61, %v2365_v60  ;;  %v2475_v63 = vadd.f32 1.0, %v3842_v27  ;;  %v2375_v40 = vmul.f32 0.5, %v5046_v48  ;;  %v2368_v45 = vmul.f32 0.5, %v5011_v28 }
 0xdce   : > { %v2479_v1 = vadd.f32 1.0, %v3844_v62  ;;  %v2372_v37 = vmul.f32 0.5, %v5031_v42  ;;  %v2370_v41 = vmul.f32 0.5, %v5017_v19  ;;  %v3165_v42 = vld [vmem:[#allocation10] ss:$0 sm:$0xff] }
 0xdcf   : > { %v3846_v5 = vpop.eup %3845  ;;  %v2505_v4 = vpack.c.bf16 %v2493_v23, %v2489_v25  ;;  %v2491_v6 = vmul.f32 %v2475_v63, %v2363_v0 }
 0xdd0   : > { %v3848_v14 = vpop.eup %3847  ;;  %v2495_v56 = vmul.f32 %v2479_v1, %v2367_v26  ;;  %v2481_v54 = vadd.f32 1.0, %v3846_v5 }
 0xdd1   : > { %2807 = vmatprep.mubr.bf16.mxu1 %v2505_v4  ;;  %v2485_v18 = vadd.f32 1.0, %v3848_v14  ;;  %v3850_v21 = vpop.eup %3849 }
 0xdd2   : > { %v2507_v36 = vpack.c.bf16 %v2495_v56, %v2491_v6  ;;  %2808 = vmatmul.mubr.bf16.vlgmr.msra.gmra.mrb[32].mxu1 %v2504_v35  ;;  %v3852_v9 = vpop.eup %3851  ;;  %v2497_v12 = vmul.f32 %v2481_v54, %v2369_v16  ;;  %v2483_v13 = vadd.f32 1.0, %v3850_v21 }
 0xdd3   : > { %v2501_v44 = vmul.f32 %v2485_v18, %v2373_v17  ;;  %v2487_v30 = vadd.f32 1.0, %v3852_v9  ;;  %v3854_v2 = vpop.eup %3853 }
 0xdd4   : > { %2856 = vmatprep.mubr.bf16.mxu0 %v2507_v36  ;;  %v3856_v10 = vpop.eup %3855  ;;  %v2499_v33 = vmul.f32 %v2483_v13, %v2371_v3  ;;  %v2480_v34 = vadd.f32 1.0, %v3854_v2 }
 0xdd5   : > { %2857 = vmatmul.mubr.bf16.vlgmr.msra.gmra.mrb[32].mxu0 %v2506_v50  ;;  %v2509_v43 = vpack.c.bf16 %v2501_v44, %v2497_v12  ;;  %v2503_v11 = vmul.f32 %v2487_v30, %v2375_v40  ;;  %v3858_v31 = vpop.eup %3857  ;;  %v2484_v39 = vadd.f32 1.0, %v3856_v10  ;;  %v2374_v50 = vmul.f32 0.5, %v5036_v47 }
 0xdd6   : > { %v3860_v35 = vpop.eup %3859  ;;  %v2482_v48 = vadd.f32 1.0, %v3858_v31  ;;  %v2496_v7 = vmul.f32 %v2480_v34, %v2368_v45 }
 0xdd7   : > { %2815 = vmatprep.mubr.bf16.mxu1 %v2509_v43  ;;  %v2511_v46 = vpack.c.bf16 %v2503_v11, %v2499_v33  ;;  %v2500_v49 = vmul.f32 %v2484_v39, %v2372_v37  ;;  %v2486_v32 = vadd.f32 1.0, %v3860_v35 }
 0xdd8   : > { %v2498_v8 = vmul.f32 %v2482_v48, %v2370_v41 }
 0xdd9   : > { %2864 = vmatprep.mubr.bf16.mxu0 %v2511_v46  ;;  %v2508_v15 = vpack.c.bf16 %v2500_v49, %v2496_v7  ;;  %v2502_v52 = vmul.f32 %v2486_v32, %v2374_v50 }
 0xddb   : > { %2816 = vmatmul.mubr.bf16.gmra.mrb[36].mxu1 %v2508_v15  ;;  %v2510_v55 = vpack.c.bf16 %v2502_v52, %v2498_v8 }
 0xddd   : > { %2865 = vmatmul.mubr.bf16.gmra.mrb[36].mxu0 %v2510_v55 }
 0xea5   : > { %v3336_v28 = vpop.f32.mrb[32].mxu1 }
 0xea6   : > { %v3337_v51 = vpop.f32.mrb[33].mxu1 }
 0xea7   : > { %v3338_v57 = vadd.f32 %v3337_v51, %v3336_v28  ;;  %v3339_v59 = vpop.f32.mrb[34].mxu1 }
 0xea8   : > { %v3364_v19 = vpop.f32.mrb[32].mxu0  ;;  %v3340_v53 = vpop.f32.mrb[35].mxu1 }
 0xea9   : > { %v2810_v58 = vadd.f32 %v3338_v57, %v3165_v42  ;;  %v3365_v60 = vpop.f32.mrb[33].mxu0  ;;  %v3341_v61 = vadd.f32 %v3340_v53, %v3339_v59 }
 0xeaa   : > { %v3366_v47 = vadd.f32 %v3365_v60, %v3364_v19  ;;  %v3367_v29 = vpop.f32.mrb[34].mxu0 }
 0xeab   : > { %v2813_v27 = vadd.f32 %v3341_v61, %v3165_v42  ;;  %v3368_v62 = vpop.f32.mrb[35].mxu0 }
 0xeac   : > { %v2859_v25 = vadd.f32 %v3366_v47, %v2810_v58  ;;  %v3369_v23 = vadd.f32 %v3368_v62, %v3367_v29 }
 0xeae   : > { %v2862_v63 = vadd.f32 %v3369_v23, %v2813_v27  ;;  %v2873_v0 = vadd.f32 %v2859_v25, %v4731_v20  ;;  %v3342_v1 = vpop.f32.mrb[36].mxu1 }
 0xeaf   : > { %v3343_v5 = vpop.f32.mrb[37].mxu1 }
 0xeb0   : > { %v2874_v26 = vadd.f32 %v2862_v63, %v4734_v22  ;;  %v3370_v14 = vpop.f32.mrb[36].mxu0  ;;  %v3344_v6 = vadd.f32 %v3343_v5, %v3342_v1  ;;  %v3345_v56 = vpop.f32.mrb[38].mxu1 }
 0xeb1   : > { %v3371_v54 = vpop.f32.mrb[37].mxu0  ;;  %v3346_v16 = vpop.f32.mrb[39].mxu1 }
 0xeb2   : > { %v3252_v4 = vpack.c.bf16 %v2874_v26, %v2873_v0  ;;  %v2818_v17 = vadd.f32 %v3344_v6, %v3165_v42  ;;  %v3372_v18 = vadd.f32 %v3371_v54, %v3370_v14  ;;  %v3373_v21 = vpop.f32.mrb[38].mxu0  ;;  %v3347_v20 = vadd.f32 %v3346_v16, %v3345_v56 }
 0xeb3   : > { %v3374_v36 = vpop.f32.mrb[39].mxu0 }
 0xeb4   : > { %3253 = vst [vmem:[%s690_s23] sm:$0xff] %v3252_v4   ;;  %v2867_v22 = vadd.f32 %v3372_v18, %v2818_v17  ;;  %v2821_v9 = vadd.f32 %v3347_v20, %v3165_v42  ;;  %v3375_v12 = vadd.f32 %v3374_v36, %v3373_v21 }
 0xeb6   : > { %v2870_v44 = vadd.f32 %v3375_v12, %v2821_v9  ;;  %v2875_v13 = vadd.f32 %v2867_v22, %v4738_v24 }
 0xeb8   : > { %v2876_v3 = vadd.f32 %v2870_v44, %v4743_v38 }
 0xeba   : > { %v3257_v40 = vpack.c.bf16 %v2876_v3, %v2875_v13 }
 0xebc   : > { %3267 = vst [vmem:[%s690_s23 + $0x8] sm:$0xff] %v3257_v40  }
 0xebd PF: > { %s27_s19 = sadd.s32 1, %s4067_s19   ;;  %s5176_s6 = sld [smem:[#allocation17_spill]] }
 0xebe   : > { %p24_p9 = scmp.ge.s32.totalorder %s27_s19, 6   ;;  %s5177_s16 = sld [smem:[#allocation14_spill]] }
 0xebf   : > { %s5178_s22 = sld [smem:[#allocation15_spill]]  ;;  %s5179_s18 = sld [smem:[#allocation16_spill]] }
 0xec0   : > { %s5180_s29 = smov %s4047_s30  ;;  %s5182_s15 = smov %s4059_s17 }
 0xec1   :  { %26 = sbr.rel (!%p24_p9) target bundleno = 15 (0xf), region = 176 }
 0xec3   : > { %s5181_s30 = smov %s5176_s6 }
 0xec5   : > { %s5183_s17 = smov %s5178_s22 }
 0xec8   :  { %2927 = vsyncpa [#allocation3], 1 }
 0xec9   :  { %2929 = vsyncpa [#allocation3 + $0x1], 1 }
 0xeca   :  { %2930 = vsyncpa [#allocation6], 1 }
 0xecb   :  { %2931 = vsyncpa [#allocation9], 1 }

// kernel: swin_forward.13
= control target key start
LH: loop header
LB: loop body
LE: loop exit
PB: predicated region body
PF: predicated region fallthrough
CT: control target
= control target key end

     0   :  { %10 = vsyncpa [#allocation3], 0  ;;  %s910_s0 = inlined_call_operand.vmem [shape: bf16[2,16,256], index: 0, kind: input, shape index: {}]   ;;  %s911_s1 = inlined_call_operand.vmem [shape: f32[1,256], index: 1, kind: input, shape index: {}]   ;;  %s912_s2 = inlined_call_operand.vmem [shape: f32[1,256], index: 2, kind: input, shape index: {}]   ;;  %s913_s3 = inlined_call_operand.vmem [shape: bf16[256,128], index: 3, kind: input, shape index: {}]   ;;  %s914_s4 = inlined_call_operand.vmem [shape: f32[1,128], index: 4, kind: input, shape index: {}]   ;;  %s915_s5 = inlined_call_operand.hbm [shape: f32[2,1,128], index: 5, kind: output, shape index: {}]  }
   0x1   :  { %12 = vsyncpa [#allocation3 + $0x1], 0  ;;  %s753_s18 = smov 0   ;;  %s755_s19 = smov 0  }
   0x2   :  { %s757_s20 = smov 0   ;;  %s759_s21 = smov 0  }
   0x3 LB: > { %s774_s22 = sadd.s32 4294967295, %s720_s21   ;;  %s551_s23 = sadd.s32 4294967294, %s720_s21   ;;  %s720_s21 = sphi %s759_s21, %s921_s21   ;;  %s716_s20 = sphi %s757_s20, %s920_s20   ;;  %s712_s19 = sphi %s755_s19, %s919_s19   ;;  %s708_s18 = sphi %s753_s18, %s918_s18  }
   0x4   : > { %s778_s24 = sadd.s32 1, %s720_s21   ;;  %s135_s25 = sadd.s32 1, %s716_s20 }
   0x5   : > { %s132_s26 = ssub.s32 %s720_s21, %s778_s24  ;;  %p145_p0 = scmp.ne.s32.totalorder %s716_s20, %s712_s19 }
   0x6   : > { %p133_p1 = scmp.eq.s32.totalorder %s132_s26, 0  ;;  %p146_p2 = scmp.eq.s32.totalorder %s774_s22, 1 }
   0x7   : > { %p151_p3 = scmp.ne.s32.totalorder %s712_s19, %s708_s18  ;;  %p152_p4 = scmp.eq.s32.totalorder %s551_s23, 1 }
   0x8   : > { %s789_s27 = scalar_select %p133_p1, %s716_s20, %s135_s25  }
   0x9   : > { %p791_p5 = por %p146_p2, %p145_p0  ;;  %p795_p6 = por %p152_p4, %p151_p3 }
   0xa   : > { %p554_p7 = scmp.ge.s32.totalorder %s720_s21, 1  ;;  %p190_p8 = scmp.lt.s32.totalorder %s720_s21, 3 }
   0xc   : > { %p191_p9 = pnand %p554_p7, %p190_p8 }
   0xd   : > { %p217_p10 = scmp.lt.s32.totalorder (!%p191_p9), %s774_s22, 1  ;;  %v638_v22 = vld [vmem:[%s913_s3 + $0x40] sm:$0xff] (!%p191_p9)   ;;  %v640_v24 = vld [vmem:[%s913_s3 + $0x48] sm:$0xff] (!%p191_p9)   ;;  %v642_v26 = vld [vmem:[%s913_s3 + $0x50] sm:$0xff] (!%p191_p9)   ;;  %v265_v41 = vlaneseq (!%p191_p9)  ;;  %s215_s14 = sand.u32 (!%p191_p9), 1, %s712_s19  }
   0xe   : > { %194 = sbr.rel (%p191_p9) target bundleno = 597 (0x255), region = 40  ;;  %v639_v23 = vld [vmem:[%s913_s3] sm:$0xff] (!%p191_p9)   ;;  %577 = vmatprep.subr.bf16.mxu0 (!%p191_p9), %v638_v22  ;;  %v641_v25 = vld [vmem:[%s913_s3 + $0x8] sm:$0xff] (!%p191_p9)   ;;  %v643_v27 = vld [vmem:[%s913_s3 + $0x10] sm:$0xff] (!%p191_p9)   ;;  %s573_s17 = sshll.u32 (!%p191_p9), %s774_s22, 4 }
   0xf   : > { %578 = vmatpush3.bf16.msra.mxu0 (!%p191_p9), %v639_v23  ;;  %v644_v28 = vld [vmem:[%s913_s3 + $0x58] sm:$0xff] (!%p191_p9)   ;;  %v646_v30 = vld [vmem:[%s913_s3 + $0x60] sm:$0xff] (!%p191_p9)   ;;  %v648_v32 = vld [vmem:[%s913_s3 + $0x68] sm:$0xff] (!%p191_p9)   ;;  %v266_v45 = vshrl.u32 (!%p191_p9), %v265_v41, 7  ;;  %s216_s23 = scalar_lea.vmem (!%p191_p9), [#allocation2], %s215_s14  ;;  %s484_s7 = scalar_lea.sflag (!%p191_p9), [#allocation3], %s215_s14 }
  0x10   : > { %579 = vmatprep.subr.bf16.mxu0 (!%p191_p9), %v640_v24  ;;  %v645_v29 = vld [vmem:[%s913_s3 + $0x18] sm:$0xff] (!%p191_p9)   ;;  %v647_v31 = vld [vmem:[%s913_s3 + $0x20] sm:$0xff] (!%p191_p9)   ;;  %v649_v33 = vld [vmem:[%s913_s3 + $0x28] sm:$0xff] (!%p191_p9)   ;;  %s496_s25 = sshll.u32 (!%p191_p9), %s216_s23, 4  ;;  %s870_s25 = int_to_ptr.vmem [resolvable:$true] %s496_s25 }
  0x11   : > { %v650_v34 = vld [vmem:[%s913_s3 + $0x70] sm:$0xff] (!%p191_p9)   ;;  %v652_v36 = vld [vmem:[%s913_s3 + $0x78] sm:$0xff] (!%p191_p9)   ;;  %v267_v46 = vsub.s32 (!%p191_p9), 0, %v266_v45  ;;  %v271_v47 = vsub.s32 (!%p191_p9), 1, %v266_v45  ;;  %v225_v48 = vld [vmem:[%s911_s1] sm:$0x3] (!%p191_p9) }
  0x12   : > { %v651_v35 = vld [vmem:[%s913_s3 + $0x30] sm:$0xff] (!%p191_p9)   ;;  %v653_v37 = vld [vmem:[%s913_s3 + $0x38] sm:$0xff] (!%p191_p9)   ;;  %v226_v53 = vld [vmem:[%s912_s2] sm:$0x3] (!%p191_p9)  ;;  %s658_s8 = scalar_lea.vmem (!%p191_p9), %s870_s25, 16 }
  0x13   : > { %580 = vmatpush3.bf16.msra.mxu0 (!%p191_p9), %v641_v25  ;;  %v268_v52 = vrot.slane (!%p191_p9), %v225_v48, %v267_v46  ;;  %v272_v54 = vrot.slane (!%p191_p9), %v225_v48, %v271_v47  ;;  %v283_v56 = vrot.slane (!%p191_p9), %v226_v53, %v267_v46  ;;  %v287_v57 = vrot.slane (!%p191_p9), %v226_v53, %v271_v47  ;;  %v345_v23 = vld [vmem:[%s914_s4] sm:$0x1] (!%p191_p9)  ;;  %p659_p11 = scmp.ne.s32.totalorder (!%p191_p9), %s870_s25, %s658_s8 }
  0x14   : > { %581 = vmatprep.subr.bf16.mxu0 (!%p191_p9), %v642_v26 }
  0x15   : > { %s218_s30 = scalar_select %p217_p10, %s774_s22, 1 }
  0x16   : > { %p660_p12 = pnand %p659_p11, %p791_p5  ;;  %s722_s22 = smov [#allocation2]  }
  0x17   : > { %s576_s6 = sshll.u32 %s218_s30, 4  ;;  %582 = vmatpush3.bf16.msra.mxu0 %v643_v27 }
  0x18   : > { %s221_s9 = scalar_lea.vmem %s910_s0, %s576_s6  ;;  %583 = vmatprep.subr.bf16.mxu0 %v644_v28  ;;  %s868_s6 = scalar_lea.hbm %s915_s5, %s573_s17 }
  0x19   : > { %v223_v0 = vld [vmem:[%s221_s9] sm:$0xff]  ;;  %v224_v1 = vld [vmem:[%s221_s9 + $0x8] sm:$0xff]  ;;  %p661_p13 = pneg %p660_p12  ;;  %s662_s9 = sshll.u32 %s722_s22, 4  ;;  %s663_s9 = int_to_ptr.vmem [resolvable:$false] %s662_s9 }
  0x1a   : > { %v227_v2 = vunpack.c.l.bf16 %v223_v0  ;;  %v228_v3 = vunpack.c.h.bf16 %v223_v0  ;;  %v229_v4 = vunpack.c.l.bf16 %v224_v1  ;;  %v230_v5 = vunpack.c.h.bf16 %v224_v1  ;;  %s664_s10 = scalar_lea.vmem %s663_s9, 32  ;;  %p665_p0 = scmp.lt.s32.totalorder %s870_s25, %s663_s9 }
  0x1b   : > { %584 = vmatpush3.bf16.msra.mxu0 %v645_v29  ;;  %p666_p1 = scmp.lt.s32.totalorder %s664_s10, %s658_s8 }
  0x1c   : > { %v231_v6 = vadd.f32 %v228_v3, %v227_v2  ;;  %v234_v7 = vadd.f32 %v230_v5, %v229_v4  ;;  %585 = vmatprep.subr.bf16.mxu0 %v646_v30 }
  0x1d   : > { %p667_p2 = por %p666_p1, %p665_p0 }
  0x1e   : > { %232 = vadd.xlane.f32.xlu0 %v231_v6 }
  0x1f   : > { %586 = vmatpush3.bf16.msra.mxu0 %v647_v31  ;;  %p668_p3 = pnand %p667_p2, %p661_p13 }
  0x20   : > { %587 = vmatprep.subr.bf16.mxu0 %v648_v32 }
  0x22   : > { %235 = vadd.xlane.f32.xlu0 %v234_v7 }
  0x23   : > { %588 = vmatpush3.bf16.msra.mxu0 %v649_v33 }
  0x24   : > { %589 = vmatprep.subr.bf16.mxu0 %v650_v34 }
  0x27   : > { %590 = vmatpush3.bf16.msra.mxu0 %v651_v35 }
  0x28   : > { %591 = vmatprep.subr.bf16.mxu0 %v652_v36 }
  0x2b   : > { %592 = vmatpush3.bf16.msra.mxu0 %v653_v37 }
  0xab   : > { %v233_v8 = vpop.xlane.xlu0 %232 }
  0xac   : > { %v238_v9 = vmul.f32 0.00390625, %v233_v8 }
  0xae   : > { %v240_v10 = vsub.f32 %v227_v2, %v238_v9  ;;  %v241_v11 = vsub.f32 %v228_v3, %v238_v9 }
  0xaf   : > { %v236_v12 = vpop.xlane.xlu0 %235 }
  0xb0   : > { %v239_v13 = vmul.f32 0.00390625, %v236_v12  ;;  %v244_v14 = vmul.f32 %v240_v10, %v240_v10  ;;  %v245_v15 = vmul.f32 %v241_v11, %v241_v11 }
  0xb2   : > { %v242_v16 = vsub.f32 %v229_v4, %v239_v13  ;;  %v243_v17 = vsub.f32 %v230_v5, %v239_v13  ;;  %v248_v18 = vadd.f32 %v245_v15, %v244_v14 }
  0xb4   : > { %249 = vadd.xlane.f32.xlu1 %v248_v18  ;;  %v246_v19 = vmul.f32 %v242_v16, %v242_v16  ;;  %v247_v20 = vmul.f32 %v243_v17, %v243_v17 }
  0xb6   : > { %v251_v21 = vadd.f32 %v247_v20, %v246_v19 }
  0xb8   : > { %252 = vadd.xlane.f32.xlu1 %v251_v21 }
 0x141   : > { %v250_v38 = vpop.xlane.xlu1 %249 }
 0x142   : > { %v254_v39 = vmul.f32 0.00390625, %v250_v38 }
 0x144   : > { %v256_v40 = vadd.f32 1e-05, %v254_v39 }
 0x145   : > { %v253_v42 = vpop.xlane.xlu1 %252 }
 0x146   : > { %654 = vrsqrt.f32 %v256_v40  ;;  %v255_v43 = vmul.f32 0.00390625, %v253_v42 }
 0x148   : > { %v257_v44 = vadd.f32 1e-05, %v255_v43 }
 0x14a   : > { %656 = vrsqrt.f32 %v257_v44 }
 0x150   : > { %v655_v49 = vpop.eup %654 }
 0x151   : > { %v260_v50 = vmul.f32 %v655_v49, %v240_v10  ;;  %v261_v51 = vmul.f32 %v655_v49, %v241_v11 }
 0x153   : > { %v276_v60 = vmul.f32 %v272_v54, %v261_v51  ;;  %v275_v61 = vmul.f32 %v268_v52, %v260_v50 }
 0x154   : > { %v657_v55 = vpop.eup %656 }
 0x155   : > { %v262_v58 = vmul.f32 %v657_v55, %v242_v16  ;;  %v263_v59 = vmul.f32 %v657_v55, %v243_v17  ;;  %v291_v0 = vadd.f32 %v287_v57, %v276_v60  ;;  %v290_v2 = vadd.f32 %v283_v56, %v275_v61 }
 0x157   : > { %v277_v62 = vmul.f32 %v268_v52, %v262_v58  ;;  %v278_v63 = vmul.f32 %v272_v54, %v263_v59 }
 0x159   : > { %v293_v1 = vadd.f32 %v287_v57, %v278_v63  ;;  %v292_v3 = vadd.f32 %v283_v56, %v277_v62 }
 0x15b   : > { %v301_v4 = vadd.f32 %v293_v1, %v291_v0  ;;  %v294_v5 = vadd.f32 %v292_v3, %v290_v2 }
 0x15d   : > { %v302_v6 = vrot.slane %v301_v4, 4  ;;  %v295_v7 = vrot.slane %v294_v5, 4 }
 0x15f   : > { %v303_v8 = vadd.f32 %v302_v6, %v301_v4  ;;  %v296_v9 = vadd.f32 %v295_v7, %v294_v5 }
 0x161   : > { %v304_v10 = vrot.slane %v303_v8, 2  ;;  %v297_v11 = vrot.slane %v296_v9, 2 }
 0x163   : > { %v305_v12 = vadd.f32 %v304_v10, %v303_v8  ;;  %v298_v13 = vadd.f32 %v297_v11, %v296_v9 }
 0x165   : > { %v306_v14 = vrot.slane %v305_v12, 1  ;;  %v299_v15 = vrot.slane %v298_v13, 1 }
 0x167   : > { %v307_v16 = vadd.f32 %v306_v14, %v305_v12  ;;  %v300_v17 = vadd.f32 %v299_v15, %v298_v13 }
 0x169   : > { %v310_v18 = vmul.f32 0.0625, %v307_v16  ;;  %v309_v19 = vmul.f32 0.0625, %v300_v17 }
 0x16b   : > { %v312_v20 = vpack.c.bf16 %v310_v18, %v310_v18  ;;  %v311_v21 = vpack.c.bf16 %v309_v19, %v309_v19 }
 0x16d   : > { %474 = vmatprep.mubr.bf16.mxu0 %v312_v20 }
 0x16e   : > { %475 = vmatmul.mubr.bf16.vlgmr.msra.gmra.mrb[0].mxu0 %v311_v21 }
 0x241   : > { %v593_v22 = vpop.f32.mrb[0].mxu0 }
 0x242   : > { %v594_v24 = vpop.f32.mrb[1].mxu0 }
 0x243   : > { %v595_v25 = vadd.f32 %v594_v24, %v593_v22  ;;  %v596_v26 = vpop.f32.mrb[2].mxu0 }
 0x244   : > { %v597_v27 = vpop.f32.mrb[3].mxu0 }
 0x245   : > { %v477_v28 = vadd.f32 %v595_v25, %v345_v23 }
 0x247   : > { %482 = vst [vmem:[%s216_s23] sm:$0x1] %v477_v28 }
 0x248   : > { %671 = shalt.err (!%p668_p3)
}
 0x249   : > { %s672_s11 = scalar_lea.hbm %s868_s6, 16  ;;  %s676_s14 = scalar_lea.hbm %s915_s5, 32 }
 0x24a   : > { %p673_p4 = scmp.ne.s32.totalorder %s868_s6, %s672_s11  ;;  %p677_p9 = scmp.lt.u32.totalorder %s868_s6, %s915_s5 }
 0x24b   : > { %p678_p10 = scmp.lt.u32.totalorder %s676_s14, %s672_s11  ;;  %p680_p12 = scmp.lt.u32.totalorder %s672_s11, %s868_s6 }
 0x24c   : > { %p674_p7 = pnand %p673_p4, %p791_p5 }
 0x24d   : > { %p679_p11 = por %p678_p10, %p677_p9 }
 0x24e   : > { %p675_p8 = pneg %p674_p7 }
 0x24f   : > { %p681_p13 = por %p680_p12, %p679_p11 }
 0x251   : > { %p682_p0 = pnand %p681_p13, %p675_p8 }
 0x253   : > { %685 = shalt.err (!%p682_p0)
}
 0x254   : > { %599 = dma.vmem_to_hbm [thread:$0]  (%p791_p5), %s870_s25, 16, %s868_s6, %s484_s7  }
 0x255 PF: > { %p605_p1 = scmp.ge.s32.totalorder %s720_s21, 2  ;;  %s508_s17 = sand.u32 1, %s708_s18  }
 0x256   : > { %s509_s23 = scalar_lea.sflag [#allocation3], %s508_s17 }
 0x257   : > { %p602_p2 = pnand %p605_p1, %p795_p6 }
 0x259   : > { %703 = dma.done.wait (!%p602_p2), %s509_s23, 16  }
 0x25a   : > { %705 = vsyncadd (!%p602_p2), %s509_s23, 4294967280  ;;  %p15_p3 = scmp.ge.s32.totalorder %s778_s24, 4   ;;  %s918_s18 = smov %s712_s19 }
 0x25b   : > { %s919_s19 = smov %s716_s20  ;;  %s920_s20 = smov %s789_s27 }
 0x25c   : > { %s921_s21 = smov %s778_s24  ;;  %17 = sbr.rel (!%p15_p3) target bundleno = 3 (0x3), region = 75 }
 0x263   :  { %513 = vsyncpa [#allocation3], 1 }
 0x264   :  { %515 = vsyncpa [#allocation3 + $0x1], 1 }

// kernel: swin_forward.11
= control target key start
LH: loop header
LB: loop body
LE: loop exit
PB: predicated region body
PF: predicated region fallthrough
CT: control target
= control target key end

     0   :  { %s6191_s29 = smov 0   ;;  %s6193_s30 = smov 0   ;;  %s7955_s0 = inlined_call_operand.vmem [shape: bf16[2,16,256], index: 0, kind: input, shape index: {}]   ;;  %s7956_s1 = inlined_call_operand.vmem [shape: f32[1,256], index: 1, kind: input, shape index: {}]   ;;  %s7957_s2 = inlined_call_operand.vmem [shape: f32[1,256], index: 2, kind: input, shape index: {}]   ;;  %s7958_s3 = inlined_call_operand.vmem [shape: bf16[256,768], index: 3, kind: input, shape index: {}]   ;;  %s7959_s4 = inlined_call_operand.vmem [shape: f32[1,768], index: 4, kind: input, shape index: {}]   ;;  %s7960_s5 = inlined_call_operand.vmem [shape: bf16[8,1,16,16], index: 5, kind: input, shape index: {}]   ;;  %s7961_s6 = inlined_call_operand.vmem [shape: bf16[256,256], index: 6, kind: input, shape index: {}]   ;;  %s7962_s7 = inlined_call_operand.vmem [shape: f32[1,256], index: 7, kind: input, shape index: {}]   ;;  %s7963_s8 = inlined_call_operand.vmem [shape: f32[1,256], index: 8, kind: input, shape index: {}]   ;;  %s7964_s9 = inlined_call_operand.vmem [shape: f32[1,256], index: 9, kind: input, shape index: {}]   ;;  %s7965_s10 = inlined_call_operand.vmem [shape: bf16[256,1024], index: 10, kind: input, shape index: {}]   ;;  %s7966_s11 = inlined_call_operand.vmem [shape: f32[1,1024], index: 11, kind: input, shape index: {}]   ;;  %s7967_s12 = inlined_call_operand.vmem [shape: bf16[1024,256], index: 12, kind: input, shape index: {}]   ;;  %s7968_s13 = inlined_call_operand.vmem [shape: f32[1,256], index: 13, kind: input, shape index: {}]   ;;  %s7969_s14 = inlined_call_operand.vmem [shape: bf16[2,16,256], index: 14, kind: output, shape index: {}]  }
   0x1   :  { %s6195_s15 = smov 0  }
   0x2 LB: > { %s36_s16 = sadd.s32 1, %s6105_s30  ;;  %p4944_p0 = scmp.ge.s32.totalorder %s6109_s15, 1  ;;  %s6109_s15 = sphi %s6195_s15, %s24_s15   ;;  %s6105_s30 = sphi %s6193_s30, %s7975_s30   ;;  %s6101_s29 = sphi %s6191_s29, %s7974_s29  }
   0x3   : > { %p38_p1 = scmp.ge.s32.totalorder %s36_s16, 2  ;;  %p444_p2 = scmp.lt.s32.totalorder %s6109_s15, 3 }
   0x5   : > { %s7977_s16 = smov (%p38_p1, %s36_s16), 0  ;;  %p445_p3 = pnand %p4944_p0, %p444_p2 }
   0x6   : > { %p506_p4 = scmp.lt.s32.totalorder (!%p445_p3), %s6101_s29, 1  ;;  %v5599_v8 = vld [vmem:[%s7958_s3 + $0x4] ss:$24 sps:$4 sm:$0xff] (!%p445_p3)   ;;  %v5601_v9 = vld [vmem:[%s7958_s3] ss:$24 sps:$4 sm:$0xff] (!%p445_p3)   ;;  %v575_v59 = vlaneseq (!%p445_p3)  ;;  %vm6112_vm0 = vmmov (!%p445_p3), 0  }
   0x7   : > { %448 = sbr.rel (%p445_p3) target bundleno = 3892 (0xf34), region = 76  ;;  %v5602_v10 = vld [vmem:[%s7958_s3 + $0x34] ss:$24 sps:$4 sm:$0xff] (!%p445_p3)   ;;  %1214 = vmatprep.subr.bf16.mxu0 (!%p445_p3), %v5599_v8  ;;  %v5604_v11 = vld [vmem:[%s7958_s3 + $0x30] ss:$24 sps:$4 sm:$0xff] (!%p445_p3)   ;;  %vm1381_vm1 = vcmask (!%p445_p3), 261120  }
   0x8   : > { %1215 = vmatpush1.bf16.msra.mxu0 (!%p445_p3), %v5601_v9  ;;  %v5605_v12 = vld [vmem:[%s7958_s3 + $0x64] ss:$24 sps:$4 sm:$0xff] (!%p445_p3)   ;;  %v5607_v13 = vld [vmem:[%s7958_s3 + $0x60] ss:$24 sps:$4 sm:$0xff] (!%p445_p3)   ;;  %v5608_v14 = vld [vmem:[%s7958_s3 + $0x94] ss:$24 sps:$4 sm:$0xff] (!%p445_p3)  }
   0x9   : > { %1216 = vmatprep.subr.bf16.mxu0 (!%p445_p3), %v5602_v10  ;;  %v5610_v15 = vld [vmem:[%s7958_s3 + $0x90] ss:$24 sps:$4 sm:$0xff] (!%p445_p3)   ;;  %v5611_v16 = vld [vmem:[%s7958_s3 + $0xc4] ss:$24 sps:$4 sm:$0xff] (!%p445_p3)   ;;  %v5613_v17 = vld [vmem:[%s7958_s3 + $0xc0] ss:$24 sps:$4 sm:$0xff] (!%p445_p3)  }
   0xa   : > { %v5614_v18 = vld [vmem:[%s7958_s3 + $0xf4] ss:$24 sps:$4 sm:$0xff] (!%p445_p3)   ;;  %v5616_v19 = vld [vmem:[%s7958_s3 + $0xf0] ss:$24 sps:$4 sm:$0xff] (!%p445_p3)   ;;  %v5617_v20 = vld [vmem:[%s7958_s3 + $0x124] ss:$24 sps:$4 sm:$0xff] (!%p445_p3)  }
   0xb   : > { %v5619_v21 = vld [vmem:[%s7958_s3 + $0x120] ss:$24 sps:$4 sm:$0xff] (!%p445_p3)   ;;  %v5620_v22 = vld [vmem:[%s7958_s3 + $0x154] ss:$24 sps:$4 sm:$0xff] (!%p445_p3)   ;;  %v5622_v23 = vld [vmem:[%s7958_s3 + $0x150] ss:$24 sps:$4 sm:$0xff] (!%p445_p3)  }
   0xc   : > { %1217 = vmatpush1.bf16.msra.mxu0 (!%p445_p3), %v5604_v11  ;;  %v5623_v24 = vld [vmem:[%s7958_s3 + $0x184] ss:$24 sps:$4 sm:$0xff] (!%p445_p3)   ;;  %v5625_v25 = vld [vmem:[%s7958_s3 + $0x180] ss:$24 sps:$4 sm:$0xff] (!%p445_p3)   ;;  %v5626_v26 = vld [vmem:[%s7958_s3 + $0x1b4] ss:$24 sps:$4 sm:$0xff] (!%p445_p3)  }
   0xd   : > { %1218 = vmatprep.subr.bf16.mxu0 (!%p445_p3), %v5605_v12  ;;  %v5628_v41 = vld [vmem:[%s7958_s3 + $0x1b0] ss:$24 sps:$4 sm:$0xff] (!%p445_p3)   ;;  %v5629_v42 = vld [vmem:[%s7958_s3 + $0x1e4] ss:$24 sps:$4 sm:$0xff] (!%p445_p3)   ;;  %v5631_v43 = vld [vmem:[%s7958_s3 + $0x1e0] ss:$24 sps:$4 sm:$0xff] (!%p445_p3)  }
   0xe   : > { %s7979_s29 = smov (!%p506_p4, %s6101_s29), 1  ;;  %v5632_v44 = vld [vmem:[%s7958_s3 + $0x214] ss:$24 sps:$4 sm:$0xff]   ;;  %v5634_v45 = vld [vmem:[%s7958_s3 + $0x210] ss:$24 sps:$4 sm:$0xff]   ;;  %v6332_v62 = vshrl.u32 %v575_v59, 7 }
   0xf   : > { %s7970_s17 = sshll.u32 %s7979_s29, 4  ;;  %v5635_v46 = vld [vmem:[%s7958_s3 + $0x244] ss:$24 sps:$4 sm:$0xff]   ;;  %v5637_v47 = vld [vmem:[%s7958_s3 + $0x240] ss:$24 sps:$4 sm:$0xff]   ;;  %vm1429_vm2 = vcmask 130048  }
  0x10   : > { %s514_s20 = scalar_lea.vmem %s7955_s0, %s7970_s17  ;;  %1219 = vmatpush1.bf16.msra.mxu0 %v5607_v13  ;;  %v5638_v48 = vld [vmem:[%s7958_s3 + $0x274] ss:$24 sps:$4 sm:$0xff]   ;;  %v5640_v49 = vld [vmem:[%s7958_s3 + $0x270] ss:$24 sps:$4 sm:$0xff]   ;;  %v5641_v50 = vld [vmem:[%s7958_s3 + $0x2a4] ss:$24 sps:$4 sm:$0xff]  }
  0x11   : > { %v533_v0 = vld [vmem:[%s514_s20] sm:$0xff]  ;;  %v534_v1 = vld [vmem:[%s514_s20 + $0x8] sm:$0xff]  ;;  %1220 = vmatprep.subr.bf16.mxu0 %v5608_v14  ;;  %v6335_v63 = vsub.s32 1, %v6332_v62  ;;  %s6113_s23 = smov 96   ;;  %s7971_s24 = smov 64   ;;  %vm2393_vm3 = vcmask 523264  }
  0x12   : > { %v6217_v2 = vunpack.c.l.bf16 %v533_v0  ;;  %v6219_v3 = vunpack.c.h.bf16 %v533_v0  ;;  %v6221_v4 = vunpack.c.l.bf16 %v534_v1  ;;  %v6223_v5 = vunpack.c.h.bf16 %v534_v1  ;;  %v5643_v51 = vld [vmem:[%s7958_s3 + $0x2a0] ss:$24 sps:$4 sm:$0xff]   ;;  %v5644_v52 = vld [vmem:[%s7958_s3 + $0x2d4] ss:$24 sps:$4 sm:$0xff]   ;;  %v5646_v53 = vld [vmem:[%s7958_s3 + $0x2d0] ss:$24 sps:$4 sm:$0xff]  }
  0x13   : > { %v5649_v54 = vld [vmem:[%s7958_s3 + $0xc] ss:$24 sps:$4 sm:$0xff]   ;;  %v6338_v0 = vsub.s32 0, %v6332_v62  ;;  %v539_v1 = vld [vmem:[%s7956_s1] sm:$0x3]  ;;  %s6115_s18 = smov 32  }
  0x14   : > { %v541_v6 = vadd.f32 %v6219_v3, %v6217_v2  ;;  %v544_v7 = vadd.f32 %v6223_v5, %v6221_v4  ;;  %1221 = vmatpush1.bf16.msra.mxu0 %v5610_v15  ;;  %v582_v9 = vrot.slane %v539_v1, %v6335_v63  ;;  %v5695_v59 = vld [vmem:[%s7958_s3 + $0x10] ss:$24 sps:$4 sm:$0xff]   ;;  %s7972_s17 = smov 64   ;;  %vm2396_vm4 = vcmask 785408   ;;  %s7973_s20 = sshll.u32 %s7979_s29, 4 }
  0x15   : > { %1222 = vmatprep.subr.bf16.mxu0 %v5611_v16  ;;  %v578_v11 = vrot.slane %v539_v1, %v6338_v0  ;;  %v5703_v1 = vld [vmem:[%s7958_s3 + $0x74] ss:$24 sps:$4 sm:$0xff]   ;;  %s530_s25 = scalar_lea.vmem %s7969_s14, %s7973_s20 }
  0x16   : > { %542 = vadd.xlane.f32.xlu0 %v541_v6 }
  0x18   : > { %1223 = vmatpush1.bf16.msra.mxu0 %v5613_v17 }
  0x19   : > { %1224 = vmatprep.subr.bf16.mxu0 %v5614_v18 }
  0x1a   : > { %545 = vadd.xlane.f32.xlu0 %v544_v7  ;;  %v540_v7 = vld [vmem:[%s7957_s2] sm:$0x3] }
  0x1b   : > { %v597_v13 = vrot.slane %v540_v7, %v6335_v63  ;;  %v593_v14 = vrot.slane %v540_v7, %v6338_v0  ;;  %v5706_v7 = vld [vmem:[%s7958_s3 + $0xa4] ss:$24 sps:$4 sm:$0xff]  }
  0x1c   : > { %1225 = vmatpush1.bf16.msra.mxu0 %v5616_v19 }
  0x1d   : > { %1226 = vmatprep.subr.bf16.mxu0 %v5617_v20 }
  0x20   : > { %1227 = vmatpush1.bf16.msra.mxu0 %v5619_v21 }
  0x21   : > { %1228 = vmatprep.subr.bf16.mxu0 %v5620_v22 }
  0x24   : > { %1229 = vmatpush1.bf16.msra.mxu0 %v5622_v23 }
  0x25   : > { %1230 = vmatprep.subr.bf16.mxu0 %v5623_v24 }
  0x28   : > { %1231 = vmatpush1.bf16.msra.mxu0 %v5625_v25 }
  0x29   : > { %1232 = vmatprep.subr.bf16.mxu0 %v5626_v26  ;;  %v5647_v26 = vld [vmem:[%s7958_s3 + $0x8] ss:$24 sps:$4 sm:$0xff]  }
  0x2c   : > { %1233 = vmatpush1.bf16.msra.mxu0 %v5628_v41  ;;  %v5668_v41 = vld [vmem:[%s7958_s3 + $0x158] ss:$24 sps:$4 sm:$0xff]  }
  0x2d   : > { %1234 = vmatprep.subr.bf16.mxu0 %v5629_v42  ;;  %v5673_v42 = vld [vmem:[%s7958_s3 + $0x18c] ss:$24 sps:$4 sm:$0xff]  }
  0x30   : > { %1235 = vmatpush1.bf16.msra.mxu0 %v5631_v43  ;;  %v5671_v43 = vld [vmem:[%s7958_s3 + $0x188] ss:$24 sps:$4 sm:$0xff]  }
  0x31   : > { %1236 = vmatprep.subr.bf16.mxu0 %v5632_v44  ;;  %v5676_v44 = vld [vmem:[%s7958_s3 + $0x1bc] ss:$24 sps:$4 sm:$0xff]  }
  0x34   : > { %1237 = vmatpush1.bf16.msra.mxu0 %v5634_v45  ;;  %v5674_v45 = vld [vmem:[%s7958_s3 + $0x1b8] ss:$24 sps:$4 sm:$0xff]  }
  0x35   : > { %1238 = vmatprep.subr.bf16.mxu0 %v5635_v46  ;;  %v5679_v46 = vld [vmem:[%s7958_s3 + $0x1ec] ss:$24 sps:$4 sm:$0xff]  }
  0x38   : > { %1239 = vmatpush1.bf16.msra.mxu0 %v5637_v47  ;;  %v5677_v47 = vld [vmem:[%s7958_s3 + $0x1e8] ss:$24 sps:$4 sm:$0xff]  }
  0x39   : > { %1240 = vmatprep.subr.bf16.mxu0 %v5638_v48  ;;  %v5682_v48 = vld [vmem:[%s7958_s3 + $0x21c] ss:$24 sps:$4 sm:$0xff]  }
  0x3c   : > { %1241 = vmatpush1.bf16.msra.mxu0 %v5640_v49  ;;  %v5680_v49 = vld [vmem:[%s7958_s3 + $0x218] ss:$24 sps:$4 sm:$0xff]  }
  0x3d   : > { %1242 = vmatprep.subr.bf16.mxu0 %v5641_v50  ;;  %v5685_v50 = vld [vmem:[%s7958_s3 + $0x24c] ss:$24 sps:$4 sm:$0xff]  }
  0x40   : > { %1243 = vmatpush1.bf16.msra.mxu0 %v5643_v51  ;;  %v5683_v51 = vld [vmem:[%s7958_s3 + $0x248] ss:$24 sps:$4 sm:$0xff]  }
  0x41   : > { %1244 = vmatprep.subr.bf16.mxu0 %v5644_v52  ;;  %v5688_v52 = vld [vmem:[%s7958_s3 + $0x27c] ss:$24 sps:$4 sm:$0xff]  }
  0x44   : > { %1245 = vmatpush1.bf16.msra.mxu0 %v5646_v53  ;;  %v5686_v53 = vld [vmem:[%s7958_s3 + $0x278] ss:$24 sps:$4 sm:$0xff]  }
  0x45   : > { %1257 = vmatprep.subr.bf16.mxu0 %v5649_v54  ;;  %v5691_v54 = vld [vmem:[%s7958_s3 + $0x2ac] ss:$24 sps:$4 sm:$0xff]  }
  0xa3   : > { %v543_v27 = vpop.xlane.xlu0 %542 }
  0xa4   : > { %v548_v28 = vmul.f32 0.00390625, %v543_v27 }
  0xa6   : > { %v550_v29 = vsub.f32 %v6217_v2, %v548_v28  ;;  %v551_v30 = vsub.f32 %v6219_v3, %v548_v28  ;;  %v5652_v28 = vld [vmem:[%s7958_s3 + $0x3c] ss:$24 sps:$4 sm:$0xff]  }
  0xa7   : > { %v546_v31 = vpop.xlane.xlu0 %545 }
  0xa8   : > { %v549_v32 = vmul.f32 0.00390625, %v546_v31  ;;  %v554_v33 = vmul.f32 %v550_v29, %v550_v29  ;;  %v555_v34 = vmul.f32 %v551_v30, %v551_v30  ;;  %v5653_v31 = vld [vmem:[%s7958_s3 + $0x68] ss:$24 sps:$4 sm:$0xff]  }
  0xaa   : > { %v552_v35 = vsub.f32 %v6221_v4, %v549_v32  ;;  %v553_v36 = vsub.f32 %v6223_v5, %v549_v32  ;;  %v558_v37 = vadd.f32 %v555_v34, %v554_v33  ;;  %v5658_v32 = vld [vmem:[%s7958_s3 + $0x9c] ss:$24 sps:$4 sm:$0xff]   ;;  %v5656_v33 = vld [vmem:[%s7958_s3 + $0x98] ss:$24 sps:$4 sm:$0xff]   ;;  %v5661_v34 = vld [vmem:[%s7958_s3 + $0xcc] ss:$24 sps:$4 sm:$0xff]  }
  0xac   : > { %559 = vadd.xlane.f32.xlu1 %v558_v37  ;;  %v556_v38 = vmul.f32 %v552_v35, %v552_v35  ;;  %v557_v39 = vmul.f32 %v553_v36, %v553_v36  ;;  %v5662_v37 = vld [vmem:[%s7958_s3 + $0xf8] ss:$24 sps:$4 sm:$0xff]  }
  0xae   : > { %v561_v40 = vadd.f32 %v557_v39, %v556_v38  ;;  %v5667_v38 = vld [vmem:[%s7958_s3 + $0x12c] ss:$24 sps:$4 sm:$0xff]   ;;  %v5665_v39 = vld [vmem:[%s7958_s3 + $0x128] ss:$24 sps:$4 sm:$0xff]  }
  0xb0   : > { %562 = vadd.xlane.f32.xlu1 %v561_v40  ;;  %v5670_v40 = vld [vmem:[%s7958_s3 + $0x15c] ss:$24 sps:$4 sm:$0xff]  }
 0x139   : > { %v560_v55 = vpop.xlane.xlu1 %559 }
 0x13a   : > { %v564_v56 = vmul.f32 0.00390625, %v560_v55  ;;  %v5689_v55 = vld [vmem:[%s7958_s3 + $0x2a8] ss:$24 sps:$4 sm:$0xff]  }
 0x13c   : > { %v566_v57 = vadd.f32 1e-05, %v564_v56  ;;  %v5694_v56 = vld [vmem:[%s7958_s3 + $0x2dc] ss:$24 sps:$4 sm:$0xff]  }
 0x13d   : > { %v563_v58 = vpop.xlane.xlu1 %562 }
 0x13e   : > { %5983 = vrsqrt.f32 %v566_v57  ;;  %v565_v60 = vmul.f32 0.00390625, %v563_v58  ;;  %v5692_v57 = vld [vmem:[%s7958_s3 + $0x2d8] ss:$24 sps:$4 sm:$0xff]   ;;  %v5697_v58 = vld [vmem:[%s7958_s3 + $0x14] ss:$24 sps:$4 sm:$0xff]  }
 0x140   : > { %v567_v61 = vadd.f32 1e-05, %v565_v60  ;;  %v5700_v60 = vld [vmem:[%s7958_s3 + $0x44] ss:$24 sps:$4 sm:$0xff]  }
 0x142   : > { %5985 = vrsqrt.f32 %v567_v61  ;;  %v5698_v61 = vld [vmem:[%s7958_s3 + $0x40] ss:$24 sps:$4 sm:$0xff]  }
 0x148   : > { %v5984_v6 = vpop.eup %5983 }
 0x149   : > { %v571_v8 = vmul.f32 %v5984_v6, %v551_v30  ;;  %v570_v10 = vmul.f32 %v5984_v6, %v550_v29  ;;  %v5650_v29 = vld [vmem:[%s7958_s3 + $0x38] ss:$24 sps:$4 sm:$0xff]   ;;  %v5655_v30 = vld [vmem:[%s7958_s3 + $0x6c] ss:$24 sps:$4 sm:$0xff]  }
 0x14a   : > { %v5701_v6 = vld [vmem:[%s7958_s3 + $0x70] ss:$24 sps:$4 sm:$0xff]  }
 0x14b   : > { %v586_v16 = vmul.f32 %v582_v9, %v571_v8  ;;  %v585_v18 = vmul.f32 %v578_v11, %v570_v10  ;;  %v5704_v8 = vld [vmem:[%s7958_s3 + $0xa0] ss:$24 sps:$4 sm:$0xff]   ;;  %v5707_v10 = vld [vmem:[%s7958_s3 + $0xd0] ss:$24 sps:$4 sm:$0xff]  }
 0x14c   : > { %v5986_v12 = vpop.eup %5985 }
 0x14d   : > { %v573_v15 = vmul.f32 %v5986_v12, %v553_v36  ;;  %v572_v17 = vmul.f32 %v5986_v12, %v552_v35  ;;  %v601_v21 = vadd.f32 %v597_v13, %v586_v16  ;;  %v600_v23 = vadd.f32 %v593_v14, %v585_v18  ;;  %v5659_v35 = vld [vmem:[%s7958_s3 + $0xc8] ss:$24 sps:$4 sm:$0xff]   ;;  %v5664_v36 = vld [vmem:[%s7958_s3 + $0xfc] ss:$24 sps:$4 sm:$0xff]  }
 0x14e   : > { %v5710_v12 = vld [vmem:[%s7958_s3 + $0x100] ss:$24 sps:$4 sm:$0xff]   ;;  %v5719_v18 = vld [vmem:[%s7958_s3 + $0x190] ss:$24 sps:$4 sm:$0xff]  }
 0x14f   : > { %v588_v19 = vmul.f32 %v582_v9, %v573_v15  ;;  %v587_v20 = vmul.f32 %v578_v11, %v572_v17  ;;  %v5709_v9 = vld [vmem:[%s7958_s3 + $0xd4] ss:$24 sps:$4 sm:$0xff]   ;;  %v5712_v11 = vld [vmem:[%s7958_s3 + $0x104] ss:$24 sps:$4 sm:$0xff]   ;;  %v5716_v16 = vld [vmem:[%s7958_s3 + $0x160] ss:$24 sps:$4 sm:$0xff]  }
 0x150   : > { %v5718_v15 = vld [vmem:[%s7958_s3 + $0x164] ss:$24 sps:$4 sm:$0xff]   ;;  %v5721_v17 = vld [vmem:[%s7958_s3 + $0x194] ss:$24 sps:$4 sm:$0xff]  }
 0x151   : > { %v603_v22 = vadd.f32 %v597_v13, %v588_v19  ;;  %v602_v24 = vadd.f32 %v593_v14, %v587_v20  ;;  %v5715_v13 = vld [vmem:[%s7958_s3 + $0x134] ss:$24 sps:$4 sm:$0xff]   ;;  %v5713_v14 = vld [vmem:[%s7958_s3 + $0x130] ss:$24 sps:$4 sm:$0xff]   ;;  %v5724_v19 = vld [vmem:[%s7958_s3 + $0x1c4] ss:$24 sps:$4 sm:$0xff]  }
 0x152   : > { %v5722_v20 = vld [vmem:[%s7958_s3 + $0x1c0] ss:$24 sps:$4 sm:$0xff]  }
 0x153   : > { %v6350_v25 = vpack.c.bf16 %v603_v22, %v601_v21  ;;  %v6355_v27 = vpack.c.bf16 %v602_v24, %v600_v23  ;;  %v5727_v21 = vld [vmem:[%s7958_s3 + $0x1f4] ss:$24 sps:$4 sm:$0xff]   ;;  %v5725_v22 = vld [vmem:[%s7958_s3 + $0x1f0] ss:$24 sps:$4 sm:$0xff]   ;;  %v5730_v23 = vld [vmem:[%s7958_s3 + $0x224] ss:$24 sps:$4 sm:$0xff]  }
 0x154   : > { %v5728_v24 = vld [vmem:[%s7958_s3 + $0x220] ss:$24 sps:$4 sm:$0xff]  }
 0x155   : > { %1246 = vmatprep.mubr.bf16.mxu0 %v6350_v25 }
 0x156   : > { %1247 = vmatmul.mubr.bf16.vlgmr.msra.gmra.mrb[0].mxu0 %v6355_v27 }
 0x157   : > { %1258 = vmatpush1.bf16.msra.mxu0 %v5647_v26  ;;  %1289 = vmatprep.mubr.bf16.mxu0 %v6350_v25  ;;  %v5731_v26 = vld [vmem:[%s7958_s3 + $0x250] ss:$24 sps:$4 sm:$0xff]  }
 0x158   : > { %1259 = vmatprep.subr.bf16.mxu0 %v5652_v28  ;;  %v5736_v28 = vld [vmem:[%s7958_s3 + $0x284] ss:$24 sps:$4 sm:$0xff]  }
 0x15b   : > { %1260 = vmatpush1.bf16.msra.mxu0 %v5650_v29  ;;  %v5734_v29 = vld [vmem:[%s7958_s3 + $0x280] ss:$24 sps:$4 sm:$0xff]  }
 0x15c   : > { %1261 = vmatprep.subr.bf16.mxu0 %v5655_v30  ;;  %v5739_v30 = vld [vmem:[%s7958_s3 + $0x2b4] ss:$24 sps:$4 sm:$0xff]  }
 0x15f   : > { %1262 = vmatpush1.bf16.msra.mxu0 %v5653_v31  ;;  %v5737_v31 = vld [vmem:[%s7958_s3 + $0x2b0] ss:$24 sps:$4 sm:$0xff]  }
 0x160   : > { %1263 = vmatprep.subr.bf16.mxu0 %v5658_v32  ;;  %v5742_v32 = vld [vmem:[%s7958_s3 + $0x2e4] ss:$24 sps:$4 sm:$0xff]  }
 0x163   : > { %1264 = vmatpush1.bf16.msra.mxu0 %v5656_v33  ;;  %v5740_v33 = vld [vmem:[%s7958_s3 + $0x2e0] ss:$24 sps:$4 sm:$0xff]  }
 0x164   : > { %1265 = vmatprep.subr.bf16.mxu0 %v5661_v34  ;;  %v6111_v34 = vmov 0.0  }
 0x165   : > { %5452 = vmatprep.subr.bf16.mxu1 %v6111_v34  ;;  %5454 = vmatprep.mubr.msk.bf16.mxu1 %vm6112_vm0, %v6111_v34 }
 0x167   : > { %1266 = vmatpush1.bf16.msra.mxu0 %v5659_v35  ;;  %v702_v35 = vld [vmem:[%s7959_s4] sm:$0x3f] }
 0x168   : > { %1267 = vmatprep.subr.bf16.mxu0 %v5664_v36  ;;  %v707_v36 = vrot.slane %v702_v35, %v6338_v0 }
 0x16b   : > { %1268 = vmatpush1.bf16.msra.mxu0 %v5662_v37 }
 0x16c   : > { %1269 = vmatprep.subr.bf16.mxu0 %v5667_v38 }
 0x16f   : > { %1270 = vmatpush1.bf16.msra.mxu0 %v5665_v39 }
 0x170   : > { %1271 = vmatprep.subr.bf16.mxu0 %v5670_v40 }
 0x173   : > { %1272 = vmatpush1.bf16.msra.mxu0 %v5668_v41 }
 0x174   : > { %1273 = vmatprep.subr.bf16.mxu0 %v5673_v42 }
 0x177   : > { %1274 = vmatpush1.bf16.msra.mxu0 %v5671_v43 }
 0x178   : > { %1275 = vmatprep.subr.bf16.mxu0 %v5676_v44 }
 0x17b   : > { %1276 = vmatpush1.bf16.msra.mxu0 %v5674_v45 }
 0x17c   : > { %1277 = vmatprep.subr.bf16.mxu0 %v5679_v46 }
 0x17f   : > { %1278 = vmatpush1.bf16.msra.mxu0 %v5677_v47  ;;  %v714_v47 = vsub.s32 2, %v6332_v62 }
 0x180   : > { %1279 = vmatprep.subr.bf16.mxu0 %v5682_v48  ;;  %v718_v48 = vsub.s32 3, %v6332_v62 }
 0x183   : > { %1280 = vmatpush1.bf16.msra.mxu0 %v5680_v49  ;;  %v715_v49 = vrot.slane %v702_v35, %v714_v47 }
 0x184   : > { %1281 = vmatprep.subr.bf16.mxu0 %v5685_v50 }
 0x187   : > { %1282 = vmatpush1.bf16.msra.mxu0 %v5683_v51  ;;  %v719_v51 = vrot.slane %v702_v35, %v718_v48 }
 0x188   : > { %1283 = vmatprep.subr.bf16.mxu0 %v5688_v52 }
 0x18b   : > { %1284 = vmatpush1.bf16.msra.mxu0 %v5686_v53 }
 0x18c   : > { %1285 = vmatprep.subr.bf16.mxu0 %v5691_v54 }
 0x18f   : > { %1286 = vmatpush1.bf16.msra.mxu0 %v5689_v55 }
 0x190   : > { %1287 = vmatprep.subr.bf16.mxu0 %v5694_v56 }
 0x193   : > { %1288 = vmatpush1.bf16.msra.mxu0 %v5692_v57 }
 0x194   : > { %1300 = vmatprep.subr.bf16.mxu0 %v5697_v58 }
 0x196   : > { %1290 = vmatmul.mubr.bf16.vlgmr.msra.gmra.mrb[4].mxu0 %v6355_v27 }
 0x197   : > { %1301 = vmatpush1.bf16.msra.mxu0 %v5695_v59  ;;  %1332 = vmatprep.mubr.bf16.mxu0 %v6350_v25  ;;  %v5733_v25 = vld [vmem:[%s7958_s3 + $0x254] ss:$24 sps:$4 sm:$0xff]  }
 0x198   : > { %1302 = vmatprep.subr.bf16.mxu0 %v5700_v60 }
 0x19b   : > { %1303 = vmatpush1.bf16.msra.mxu0 %v5698_v61 }
 0x19c   : > { %1304 = vmatprep.subr.bf16.mxu0 %v5703_v1  ;;  %v722_v1 = vsub.s32 4, %v6332_v62 }
 0x19f   : > { %1305 = vmatpush1.bf16.msra.mxu0 %v5701_v6  ;;  %v726_v6 = vsub.s32 5, %v6332_v62 }
 0x1a0   : > { %1306 = vmatprep.subr.bf16.mxu0 %v5706_v7  ;;  %v723_v7 = vrot.slane %v702_v35, %v722_v1 }
 0x1a3   : > { %1307 = vmatpush1.bf16.msra.mxu0 %v5704_v8 }
 0x1a4   : > { %1308 = vmatprep.subr.bf16.mxu0 %v5709_v9  ;;  %v727_v9 = vrot.slane %v702_v35, %v726_v6 }
 0x1a7   : > { %1309 = vmatpush1.bf16.msra.mxu0 %v5707_v10 }
 0x1a8   : > { %1310 = vmatprep.subr.bf16.mxu0 %v5712_v11 }
 0x1ab   : > { %1311 = vmatpush1.bf16.msra.mxu0 %v5710_v12 }
 0x1ac   : > { %1312 = vmatprep.subr.bf16.mxu0 %v5715_v13 }
 0x1af   : > { %1313 = vmatpush1.bf16.msra.mxu0 %v5713_v14 }
 0x1b0   : > { %1314 = vmatprep.subr.bf16.mxu0 %v5718_v15 }
 0x1b3   : > { %1315 = vmatpush1.bf16.msra.mxu0 %v5716_v16 }
 0x1b4   : > { %1316 = vmatprep.subr.bf16.mxu0 %v5721_v17 }
 0x1b7   : > { %1317 = vmatpush1.bf16.msra.mxu0 %v5719_v18 }
 0x1b8   : > { %1318 = vmatprep.subr.bf16.mxu0 %v5724_v19  ;;  %v5358_v19 = vld [vmem:[%s7960_s5] sm:$0xff]  }
 0x1bb   : > { %1319 = vmatpush1.bf16.msra.mxu0 %v5722_v20  ;;  %v5359_v20 = vunpack.c.l.bf16 %v5358_v19 }
 0x1bc   : > { %1320 = vmatprep.subr.bf16.mxu0 %v5727_v21  ;;  %v5360_v21 = vunpack.c.h.bf16 %v5358_v19 }
 0x1bf   : > { %1321 = vmatpush1.bf16.msra.mxu0 %v5725_v22 }
 0x1c0   : > { %1322 = vmatprep.subr.bf16.mxu0 %v5730_v23 }
 0x1c3   : > { %1323 = vmatpush1.bf16.msra.mxu0 %v5728_v24 }
 0x1c4   : > { %1324 = vmatprep.subr.bf16.mxu0 %v5733_v25 }
 0x1c7   : > { %1325 = vmatpush1.bf16.msra.mxu0 %v5731_v26 }
 0x1c8   : > { %1326 = vmatprep.subr.bf16.mxu0 %v5736_v28 }
 0x1cb   : > { %1327 = vmatpush1.bf16.msra.mxu0 %v5734_v29 }
 0x1cc   : > { %1328 = vmatprep.subr.bf16.mxu0 %v5739_v30 }
 0x1cf   : > { %1329 = vmatpush1.bf16.msra.mxu0 %v5737_v31 }
 0x1d0   : > { %1330 = vmatprep.subr.bf16.mxu0 %v5742_v32 }
 0x1d3   : > { %1331 = vmatpush1.bf16.msra.mxu0 %v5740_v33 }
 0x1d4   : > { %5428 = vmatprep.subr.bf16.mxu0 %v6111_v34 }
 0x1d6   : > { %1333 = vmatmul.mubr.bf16.vlgmr.msra.gmra.mrb[8].mxu0 %v6355_v27  ;;  %v711_v27 = vrot.slane %v702_v35, %v6335_v63 }
 0x1d7   : > { %5430 = vmatprep.mubr.msk.bf16.mxu0 %vm6112_vm0, %v6111_v34 }
 0x229   : > { %v1248_v37 = vpop.f32.mrb[0].mxu0 }
 0x22a   : > { %v1250_v38 = vpop.f32.mrb[1].mxu0  ;;  %v1249_v40 = vadd.f32 %v1248_v37, %v707_v36 }
 0x22b   : > { %v1252_v39 = vpop.f32.mrb[2].mxu0  ;;  %v1251_v43 = vadd.f32 %v1250_v38, %v711_v27 }
 0x22c   : > { %v1253_v41 = vadd.f32 %v1252_v39, %v707_v36  ;;  %v1254_v42 = vpop.f32.mrb[3].mxu0 }
 0x22d   : > { %v1255_v44 = vadd.f32 %v1254_v42, %v711_v27 }
 0x22e   : > { %v6560_v45 = vpack.c.bf16 %v1253_v41, %v1249_v40 }
 0x22f   : > { %v6562_v46 = vpack.c.bf16 %v1255_v44, %v1251_v43 }
 0x269   : > { %v1291_v50 = vpop.f32.mrb[4].mxu0 }
 0x26a   : > { %v1293_v52 = vpop.f32.mrb[5].mxu0  ;;  %v1292_v54 = vadd.f32 %v1291_v50, %v715_v49 }
 0x26b   : > { %v1295_v53 = vpop.f32.mrb[6].mxu0  ;;  %v1294_v57 = vadd.f32 %v1293_v52, %v719_v51 }
 0x26c   : > { %v1296_v55 = vadd.f32 %v1295_v53, %v715_v49  ;;  %v1297_v56 = vpop.f32.mrb[7].mxu0 }
 0x26d   : > { %v1298_v58 = vadd.f32 %v1297_v56, %v719_v51 }
 0x26e   : > { %v6570_v59 = vpack.c.bf16 %v1296_v55, %v1292_v54 }
 0x26f   : > { %v6572_v60 = vpack.c.bf16 %v1298_v58, %v1294_v57  ;;  %v5390_v58 = vld [vmem:[%s7960_s5 + $0x10] sm:$0xff]  }
 0x270   : > { %v1386_v61 = vsel %vm1381_vm1, %v6570_v59, 0 }
 0x271   : > { %5429 = vmatpush3.bf16.xpose.msra.mxu0 %v1386_v61  ;;  %v5367_v61 = vunpack.c.l.bf16 %v5390_v58 }
 0x272   : > { %5434 = vmatprep.subr.bf16.mxu0 %v6111_v34 }
 0x278   : > { %5431 = vmatmul.mubr.msk.bf16.vlgmr.msra.gmra.mrb[12].mxu0 %vm1381_vm1, %v6560_v45 }
 0x279   : > { %5436 = vmatprep.mubr.msk.bf16.mxu0 %vm6112_vm0, %v6111_v34 }
 0x2a9   : > { %v1334_v8 = vpop.f32.mrb[8].mxu0 }
 0x2aa   : > { %v1336_v10 = vpop.f32.mrb[9].mxu0  ;;  %v1335_v12 = vadd.f32 %v1334_v8, %v723_v7 }
 0x2ab   : > { %v1338_v11 = vpop.f32.mrb[10].mxu0  ;;  %v1337_v15 = vadd.f32 %v1336_v10, %v727_v9 }
 0x2ac   : > { %v1339_v13 = vadd.f32 %v1338_v11, %v723_v7  ;;  %v1340_v14 = vpop.f32.mrb[11].mxu0  ;;  %v5368_v7 = vunpack.c.h.bf16 %v5390_v58 }
 0x2ad   : > { %v1341_v16 = vadd.f32 %v1340_v14, %v727_v9 }
 0x2ae   : > { %v6587_v17 = vpack.c.bf16 %v1339_v13, %v1335_v12 }
 0x2af   : > { %v6589_v18 = vpack.c.bf16 %v1341_v16, %v1337_v15 }
 0x2b0   : > { %5435 = vmatpush3.bf16.msra.mxu0 %v6587_v17 }
 0x2b1   : > { %5440 = vmatprep.subr.bf16.mxu0 %v6111_v34 }
 0x34b   : > { %v1422_v22 = vpop.f32.mrb[12].mxu0 }
 0x34c   : > { %v1423_v23 = vadd.f32 %v5359_v20, %v1422_v22  ;;  %v5432_v24 = vpop.f32.mrb[13].mxu0 }
 0x34d   : > { %v1425_v25 = vpop.f32.mrb[14].mxu0 }
 0x34e   : > { %v1426_v26 = vadd.f32 %v5360_v21, %v1425_v25  ;;  %v5433_v28 = vpop.f32.mrb[15].mxu0  ;;  %v1430_v29 = vsel %vm1429_vm2, %v1423_v23, -inf  ;;  %v5389_v21 = vld [vmem:[%s7960_s5 + $0x8] sm:$0xff]  }
 0x34f   : > { %1431 = vmax.xlane.f32.xlu0 %v1430_v29  ;;  %v5364_v24 = vunpack.c.h.bf16 %v5389_v21 }
 0x350   : > { %v1433_v30 = vsel %vm1429_vm2, %v1426_v26, -inf }
 0x351   : > { %1434 = vmax.xlane.f32.xlu1 %v1433_v30 }
 0x362   : > { %1501 = vrot.lane.b32.xlu1 %v6570_v59, %s6113_s23 }
 0x3dc   : > { %v1432_v31 = vpop.xlane.xlu0 %1431 }
 0x3dd   : > { %v1436_v32 = vsub.f32 %v1423_v23, %v1432_v31  ;;  %v5363_v23 = vunpack.c.l.bf16 %v5389_v21 }
 0x3de   : > { %v1435_v33 = vpop.xlane.xlu1 %1434 }
 0x3df   : > { %v1438_v35 = vmul.f32 1.442695, %v1436_v32  ;;  %v1437_v36 = vsub.f32 %v1426_v26, %v1435_v33 }
 0x3e1   : > { %5987 = vpow2.f32 %v1438_v35  ;;  %v1440_v37 = vmul.f32 1.442695, %v1437_v36 }
 0x3e2   : > { %v1502_v41 = vpop.permute.xlu1 %1501 }
 0x3e3   : > { %5989 = vpow2.f32 %v1440_v37  ;;  %v1507_v56 = vsel %vm1381_vm1, %v1502_v41, 0 }
 0x3eb   : > { %v5988_v27 = vpop.eup %5987 }
 0x3ec   : > { %v1442_v38 = vsel %vm1429_vm2, %v5988_v27, 0.0 }
 0x3ed   : > { %v5990_v39 = vpop.eup %5989  ;;  %1443 = vadd.xlane.f32.xlu0 %v1442_v38 }
 0x3ee   : > { %v1445_v40 = vsel %vm1429_vm2, %v5990_v39, 0.0 }
 0x3ef   : > { %1446 = vadd.xlane.f32.xlu1 %v1445_v40 }
 0x400   : > { %1621 = vrot.lane.b32.xlu1 %v6560_v45, %s7971_s24 }
 0x403   : > { %1623 = vrot.lane.b32.xlu0 %v6570_v59, %s7971_s24 }
 0x404   : > { %1498 = vrot.lane.b32.xlu1 %v6560_v45, %s6113_s23 }
 0x47a   : > { %v1444_v42 = vpop.xlane.xlu0 %1443 }
 0x47b   : > { %5991 = vrcp.f32 %v1444_v42 }
 0x47c   : > { %v1447_v43 = vpop.xlane.xlu1 %1446 }
 0x47d   : > { %5993 = vrcp.f32 %v1447_v43 }
 0x47e   : > { %v1624_v44 = vpop.permute.xlu0 %1623 }
 0x47f   : > { %v1629_v49 = vsel %vm1381_vm1, %v1624_v44, 0 }
 0x480   : > { %5453 = vmatpush3.bf16.xpose.msra.mxu1 %v1629_v49  ;;  %v1622_v51 = vpop.permute.xlu1 %1621 }
 0x481   : > { %5458 = vmatprep.subr.bf16.mxu1 %v6111_v34 }
 0x484   : > { %v1499_v57 = vpop.permute.xlu1 %1498 }
 0x485   : > { %v5992_v50 = vpop.eup %5991 }
 0x486   : > { %v1450_v53 = vmul.f32 %v5992_v50, %v5988_v27 }
 0x487   : > { %v5994_v52 = vpop.eup %5993  ;;  %5455 = vmatmul.mubr.msk.bf16.vlgmr.msra.gmra.mrb[0].mxu1 %vm1381_vm1, %v1622_v51 }
 0x488   : > { %v1451_v54 = vmul.f32 %v5994_v52, %v5990_v39  ;;  %5460 = vmatprep.mubr.msk.bf16.mxu1 %vm6112_vm0, %v6111_v34 }
 0x48a   : > { %v1452_v55 = vpack.c.bf16 %v1451_v54, %v1450_v53 }
 0x48c   : > { %5437 = vmatmul.mubr.msk.bf16.vlgmr.msra.gmra.mrb[16].mxu0 %vm1429_vm2, %v1452_v55 }
 0x48d   : > { %5441 = vmatpush3.bf16.xpose.msra.mxu0 %v1507_v56  ;;  %5442 = vmatprep.mubr.msk.bf16.mxu0 %vm6112_vm0, %v6111_v34 }
 0x48e   : > { %5446 = vmatprep.subr.bf16.mxu0 %v6111_v34 }
 0x494   : > { %5443 = vmatmul.mubr.msk.bf16.vlgmr.msra.gmra.mrb[20].mxu0 %vm1381_vm1, %v1499_v57 }
 0x495   : > { %5448 = vmatprep.mubr.msk.bf16.mxu0 %vm6112_vm0, %v6111_v34 }
 0x55a   : > { %v1665_v8 = vpop.f32.mrb[0].mxu1 }
 0x55b   : > { %v1666_v9 = vadd.f32 %v5367_v61, %v1665_v8  ;;  %v5456_v10 = vpop.f32.mrb[1].mxu1 }
 0x55c   : > { %v1668_v11 = vpop.f32.mrb[2].mxu1 }
 0x55d   : > { %v1669_v12 = vadd.f32 %v5368_v7, %v1668_v11  ;;  %v5457_v13 = vpop.f32.mrb[3].mxu1  ;;  %v1672_v14 = vsel %vm1429_vm2, %v1666_v9, -inf }
 0x55e   : > { %1673 = vmax.xlane.f32.xlu0 %v1672_v14 }
 0x55f   : > { %v6625_v15 = vpop.f32.mrb[16].mxu0  ;;  %v1675_v16 = vsel %vm1429_vm2, %v1669_v12, -inf }
 0x560   : > { %1676 = vmax.xlane.f32.xlu1 %v1675_v16  ;;  %v5438_v19 = vpop.f32.mrb[17].mxu0 }
 0x561   : > { %v6628_v20 = vpop.f32.mrb[18].mxu0 }
 0x562   : > { %v5439_v22 = vpop.f32.mrb[19].mxu0 }
 0x567   : > { %v1543_v25 = vpop.f32.mrb[20].mxu0 }
 0x568   : > { %v1544_v26 = vadd.f32 %v5363_v23, %v1543_v25  ;;  %v5444_v28 = vpop.f32.mrb[21].mxu0 }
 0x569   : > { %v1546_v29 = vpop.f32.mrb[22].mxu0 }
 0x56a   : > { %v1547_v30 = vadd.f32 %v5364_v24, %v1546_v29  ;;  %v5445_v31 = vpop.f32.mrb[23].mxu0  ;;  %v1550_v32 = vsel %vm1429_vm2, %v1544_v26, -inf }
 0x56b   : > { %1551 = vmax.xlane.f32.xlu0 %v1550_v32 }
 0x56c   : > { %v1553_v33 = vsel %vm1429_vm2, %v1547_v30, -inf }
 0x56f   : > { %1554 = vmax.xlane.f32.xlu0 %v1553_v33 }
 0x5eb   : > { %v1674_v35 = vpop.xlane.xlu0 %1673 }
 0x5ec   : > { %v1678_v36 = vsub.f32 %v1666_v9, %v1674_v35 }
 0x5ed   : > { %v1677_v37 = vpop.xlane.xlu1 %1676 }
 0x5ee   : > { %v1680_v27 = vmul.f32 1.442695, %v1678_v36  ;;  %v1679_v38 = vsub.f32 %v1669_v12, %v1677_v37 }
 0x5f0   : > { %5995 = vpow2.f32 %v1680_v27  ;;  %v1682_v39 = vmul.f32 1.442695, %v1679_v38 }
 0x5f2   : > { %5997 = vpow2.f32 %v1682_v39 }
 0x5f8   : > { %v1552_v40 = vpop.xlane.xlu0 %1551 }
 0x5f9   : > { %v1556_v41 = vsub.f32 %v1544_v26, %v1552_v40  ;;  %v1867_v26 = vsel %vm1381_vm1, %v6572_v60, 0  ;;  %v5391_v40 = vld [vmem:[%s7960_s5 + $0x18] sm:$0xff]  }
 0x5fa   : > { %v5996_v42 = vpop.eup %5995 }
 0x5fb   : > { %v1558_v43 = vmul.f32 1.442695, %v1556_v41  ;;  %v1684_v44 = vsel %vm1429_vm2, %v5996_v42, 0.0  ;;  %v5371_v41 = vunpack.c.l.bf16 %v5391_v40 }
 0x5fc   : > { %v5998_v49 = vpop.eup %5997  ;;  %1685 = vadd.xlane.f32.xlu0 %v1684_v44  ;;  %v1555_v53 = vpop.xlane.xlu0 %1554 }
 0x5fd   : > { %5999 = vpow2.f32 %v1558_v43  ;;  %v1687_v50 = vsel %vm1429_vm2, %v5998_v49, 0.0  ;;  %v1557_v54 = vsub.f32 %v1547_v30, %v1555_v53 }
 0x5fe   : > { %1688 = vadd.xlane.f32.xlu1 %v1687_v50 }
 0x5ff   : > { %v1560_v55 = vmul.f32 1.442695, %v1557_v54 }
 0x601   : > { %6001 = vpow2.f32 %v1560_v55 }
 0x607   : > { %v6000_v51 = vpop.eup %5999 }
 0x608   : > { %v1562_v52 = vsel %vm1429_vm2, %v6000_v51, 0.0 }
 0x609   : > { %1563 = vadd.xlane.f32.xlu0 %v1562_v52 }
 0x60b   : > { %v6002_v56 = vpop.eup %6001 }
 0x60c   : > { %v1565_v57 = vsel %vm1429_vm2, %v6002_v56, 0.0 }
 0x60f   : > { %1574 = vrot.lane.b32.xlu1 %v6587_v17, %s6113_s23 }
 0x613   : > { %1744 = vrot.lane.b32.xlu1 %v6570_v59, %s6115_s18 }
 0x61f   : > { %1695 = vrot.lane.b32.xlu0 %v6587_v17, %s7971_s24 }
 0x623   : > { %1981 = vrot.lane.b32.xlu0 %v6572_v60, %s6113_s23 }
 0x627   : > { %2103 = vrot.lane.b32.xlu0 %v6572_v60, %s7971_s24 }
 0x62b   : > { %2224 = vrot.lane.b32.xlu0 %v6572_v60, %s6115_s18 }
 0x637   : > { %1566 = vadd.xlane.f32.xlu1 %v1565_v57 }
 0x648   : > { %1742 = vrot.lane.b32.xlu1 %v6560_v45, %s6115_s18 }
 0x64c   : > { %1978 = vrot.lane.b32.xlu1 %v6562_v46, %s6113_s23 }
 0x650   : > { %2101 = vrot.lane.b32.xlu1 %v6562_v46, %s7971_s24 }
 0x654   : > { %2222 = vrot.lane.b32.xlu1 %v6562_v46, %s6115_s18 }
 0x689   : > { %v1686_v59 = vpop.xlane.xlu0 %1685 }
 0x68b   : > { %v1689_v58 = vpop.xlane.xlu1 %1688 }
 0x68c   : > { %6003 = vrcp.f32 %v1689_v58 }
 0x68d   : > { %6005 = vrcp.f32 %v1686_v59  ;;  %v5392_v59 = vld [vmem:[%s7960_s5 + $0x20] sm:$0xff]  }
 0x68f   : > { %v1575_v61 = vpop.permute.xlu1 %1574 }
 0x690   : > { %5447 = vmatpush3.bf16.msra.mxu0 %v1575_v61 }
 0x691   : > { %5476 = vmatprep.subr.bf16.mxu0 %v6111_v34 }
 0x693   : > { %v1745_v13 = vpop.permute.xlu1 %1744 }
 0x694   : > { %v1750_v14 = vsel %vm1381_vm1, %v1745_v13, 0 }
 0x696   : > { %v6004_v7 = vpop.eup %6003  ;;  %v1564_v8 = vpop.xlane.xlu0 %1563 }
 0x697   : > { %v6006_v45 = vpop.eup %6005  ;;  %v1693_v9 = vmul.f32 %v6004_v7, %v5998_v49  ;;  %6007 = vrcp.f32 %v1564_v8  ;;  %v5375_v7 = vunpack.c.l.bf16 %v5392_v59  ;;  %v5376_v8 = vunpack.c.h.bf16 %v5392_v59 }
 0x698   : > { %v1692_v10 = vmul.f32 %v6006_v45, %v5996_v42  ;;  %v5372_v42 = vunpack.c.h.bf16 %v5391_v40  ;;  %v5395_v40 = vld [vmem:[%s7960_s5 + $0x38] sm:$0xff]  }
 0x69a   : > { %v1696_v11 = vpop.permute.xlu0 %1695  ;;  %v1694_v12 = vpack.c.bf16 %v1693_v9, %v1692_v10 }
 0x69b   : > { %5459 = vmatpush3.bf16.msra.mxu1 %v1696_v11 }
 0x69c   : > { %5464 = vmatprep.subr.bf16.mxu1 %v6111_v34 }
 0x69e   : > { %5461 = vmatmul.mubr.msk.bf16.vlgmr.msra.gmra.mrb[4].mxu1 %vm1429_vm2, %v1694_v12  ;;  %v1982_v28 = vpop.permute.xlu0 %1981  ;;  %v5393_v12 = vld [vmem:[%s7960_s5 + $0x28] sm:$0xff]  }
 0x69f   : > { %5466 = vmatprep.mubr.msk.bf16.mxu1 %vm6112_vm0, %v6111_v34  ;;  %v1987_v29 = vsel %vm1381_vm1, %v1982_v28, 0  ;;  %v5394_v28 = vld [vmem:[%s7960_s5 + $0x30] sm:$0xff]  }
 0x6a1   : > { %v6008_v21 = vpop.eup %6007 }
 0x6a2   : > { %v1570_v23 = vmul.f32 %v6008_v21, %v6000_v51  ;;  %v2104_v30 = vpop.permute.xlu0 %2103 }
 0x6a3   : > { %v2109_v31 = vsel %vm1381_vm1, %v2104_v30, 0 }
 0x6a4   : > { %5465 = vmatpush3.bf16.xpose.msra.mxu1 %v1750_v14 }
 0x6a5   : > { %5470 = vmatprep.subr.bf16.mxu1 %v6111_v34 }
 0x6a6   : > { %v2225_v32 = vpop.permute.xlu0 %2224 }
 0x6a7   : > { %v2230_v33 = vsel %vm1381_vm1, %v2225_v32, 0  ;;  %v5383_v32 = vunpack.c.l.bf16 %v5394_v28 }
 0x6c4   : > { %v1567_v16 = vpop.xlane.xlu1 %1566 }
 0x6c5   : > { %6009 = vrcp.f32 %v1567_v16 }
 0x6c8   : > { %v1743_v19 = vpop.permute.xlu1 %1742 }
 0x6c9   : > { %5467 = vmatmul.mubr.msk.bf16.vlgmr.msra.gmra.mrb[8].mxu1 %vm1381_vm1, %v1743_v19  ;;  %v5379_v19 = vunpack.c.l.bf16 %v5393_v12 }
 0x6ca   : > { %5472 = vmatprep.mubr.msk.bf16.mxu1 %vm6112_vm0, %v6111_v34 }
 0x6cc   : > { %v1979_v60 = vpop.permute.xlu1 %1978 }
 0x6cf   : > { %v6010_v22 = vpop.eup %6009 }
 0x6d0   : > { %v1571_v24 = vmul.f32 %v6010_v22, %v6002_v56  ;;  %v5380_v22 = vunpack.c.h.bf16 %v5393_v12 }
 0x6d2   : > { %v1572_v25 = vpack.c.bf16 %v1571_v24, %v1570_v23 }
 0x6d4   : > { %5449 = vmatmul.mubr.msk.bf16.vlgmr.msra.gmra.mrb[24].mxu0 %vm1429_vm2, %v1572_v25 }
 0x6d5   : > { %5477 = vmatpush3.bf16.xpose.msra.mxu0 %v1867_v26  ;;  %5478 = vmatprep.mubr.msk.bf16.mxu0 %vm6112_vm0, %v6111_v34 }
 0x6d6   : > { %5488 = vmatprep.subr.bf16.mxu0 %v6111_v34 }
 0x6dc   : > { %5479 = vmatmul.mubr.msk.bf16.vlgmr.msra.gmra.mrb[28].mxu0 %vm1381_vm1, %v6562_v46  ;;  %v2102_v46 = vpop.permute.xlu1 %2101 }
 0x6dd   : > { %5489 = vmatpush3.bf16.xpose.msra.mxu0 %v1987_v29  ;;  %5490 = vmatprep.mubr.msk.bf16.mxu0 %vm6112_vm0, %v6111_v34 }
 0x6de   : > { %5500 = vmatprep.subr.bf16.mxu0 %v6111_v34 }
 0x6e0   : > { %v2223_v35 = vpop.permute.xlu1 %2222 }
 0x6e4   : > { %5491 = vmatmul.mubr.msk.bf16.vlgmr.msra.gmra.mrb[32].mxu0 %vm1381_vm1, %v1979_v60 }
 0x6e5   : > { %5501 = vmatpush3.bf16.xpose.msra.mxu0 %v2109_v31  ;;  %5502 = vmatprep.mubr.msk.bf16.mxu0 %vm6112_vm0, %v6111_v34 }
 0x6e6   : > { %5512 = vmatprep.subr.bf16.mxu0 %v6111_v34 }
 0x6ec   : > { %5503 = vmatmul.mubr.msk.bf16.vlgmr.msra.gmra.mrb[36].mxu0 %vm1381_vm1, %v2102_v46  ;;  %v5384_v46 = vunpack.c.h.bf16 %v5394_v28 }
 0x6ed   : > { %5513 = vmatpush3.bf16.xpose.msra.mxu0 %v2230_v33  ;;  %5514 = vmatprep.mubr.msk.bf16.mxu0 %vm6112_vm0, %v6111_v34 }
 0x6f4   : > { %5515 = vmatmul.mubr.msk.bf16.vlgmr.msra.gmra.mrb[40].mxu0 %vm1381_vm1, %v2223_v35 }
 0x771   : > { %v6691_v36 = vpop.f32.mrb[4].mxu1 }
 0x772   : > { %v5462_v37 = vpop.f32.mrb[5].mxu1 }
 0x773   : > { %v6693_v27 = vpop.f32.mrb[6].mxu1 }
 0x774   : > { %v5574_v38 = vpack.i.bf16 %v6693_v27, %v6691_v36  ;;  %v5463_v39 = vpop.f32.mrb[7].mxu1 }
 0x79c   : > { %v1786_v43 = vpop.f32.mrb[8].mxu1 }
 0x79d   : > { %v6700_v44 = vadd.f32 %v5371_v41, %v1786_v43  ;;  %v5468_v49 = vpop.f32.mrb[9].mxu1 }
 0x79e   : > { %v1789_v50 = vpop.f32.mrb[10].mxu1 }
 0x79f   : > { %v6702_v51 = vadd.f32 %v5372_v42, %v1789_v50  ;;  %v5469_v52 = vpop.f32.mrb[11].mxu1  ;;  %v1793_v53 = vsel %vm1429_vm2, %v6700_v44, -inf  ;;  %v5387_v50 = vunpack.c.l.bf16 %v5395_v40 }
 0x7a0   : > { %1794 = vmax.xlane.f32.xlu0 %v1793_v53  ;;  %v5388_v52 = vunpack.c.h.bf16 %v5395_v40 }
 0x7a1   : > { %v1796_v54 = vsel %vm1429_vm2, %v6702_v51, -inf }
 0x7a2   : > { %1797 = vmax.xlane.f32.xlu1 %v1796_v54 }
 0x7a7   : > { %v6708_v55 = vpop.f32.mrb[24].mxu0 }
 0x7a8   : > { %v5450_v56 = vpop.f32.mrb[25].mxu0 }
 0x7a9   : > { %v6710_v57 = vpop.f32.mrb[26].mxu0 }
 0x7aa   : > { %v5569_v58 = vpack.i.bf16 %v6710_v57, %v6708_v55  ;;  %v5451_v61 = vpop.f32.mrb[27].mxu0 }
 0x7af   : > { %v1903_v45 = vpop.f32.mrb[28].mxu0 }
 0x7b0   : > { %v6717_v9 = vadd.f32 %v5375_v7, %v1903_v45  ;;  %v5480_v10 = vpop.f32.mrb[29].mxu0 }
 0x7b1   : > { %v1906_v11 = vpop.f32.mrb[30].mxu0 }
 0x7b2   : > { %v6722_v13 = vadd.f32 %v5376_v8, %v1906_v11  ;;  %v5481_v14 = vpop.f32.mrb[31].mxu0  ;;  %v1910_v16 = vsel %vm1429_vm2, %v6717_v9, -inf }
 0x7b3   : > { %1911 = vmax.xlane.f32.xlu0 %v1910_v16 }
 0x7b4   : > { %v1913_v21 = vsel %vm1429_vm2, %v6722_v13, -inf }
 0x7b7   : > { %1914 = vmax.xlane.f32.xlu0 %v1913_v21  ;;  %v2023_v23 = vpop.f32.mrb[32].mxu0 }
 0x7b8   : > { %v6728_v24 = vadd.f32 %v5379_v19, %v2023_v23  ;;  %v5492_v25 = vpop.f32.mrb[33].mxu0 }
 0x7b9   : > { %v2026_v26 = vpop.f32.mrb[34].mxu0 }
 0x7ba   : > { %v2027_v29 = vadd.f32 %v5380_v22, %v2026_v26  ;;  %v5493_v30 = vpop.f32.mrb[35].mxu0  ;;  %v2030_v60 = vsel %vm1429_vm2, %v6728_v24, -inf }
 0x7bb   : > { %2031 = vmax.xlane.f32.xlu0 %v2030_v60 }
 0x7bc   : > { %v2033_v31 = vsel %vm1429_vm2, %v2027_v29, -inf }
 0x7bd   : > { %2034 = vmax.xlane.f32.xlu1 %v2033_v31 }
 0x7bf   : > { %v2145_v33 = vpop.f32.mrb[36].mxu0 }
 0x7c0   : > { %v6736_v35 = vadd.f32 %v5383_v32, %v2145_v33  ;;  %v5504_v37 = vpop.f32.mrb[37].mxu0 }
 0x7c1   : > { %v2148_v39 = vpop.f32.mrb[38].mxu0 }
 0x7c2   : > { %v2149_v41 = vadd.f32 %v5384_v46, %v2148_v39  ;;  %v5505_v42 = vpop.f32.mrb[39].mxu0  ;;  %v2152_v43 = vsel %vm1429_vm2, %v6736_v35, -inf }
 0x7c3   : > { %2153 = vmax.xlane.f32.xlu0 %v2152_v43 }
 0x7c4   : > { %v2155_v49 = vsel %vm1429_vm2, %v2149_v41, -inf }
 0x7c5   : > { %2156 = vmax.xlane.f32.xlu1 %v2155_v49 }
 0x7c7   : > { %v2266_v53 = vpop.f32.mrb[40].mxu0 }
 0x7c8   : > { %v2267_v54 = vadd.f32 %v5387_v50, %v2266_v53  ;;  %v5516_v56 = vpop.f32.mrb[41].mxu0 }
 0x7c9   : > { %v2269_v59 = vpop.f32.mrb[42].mxu0 }
 0x7ca   : > { %v2270_v61 = vadd.f32 %v5388_v52, %v2269_v59  ;;  %v5517_v7 = vpop.f32.mrb[43].mxu0  ;;  %v2273_v8 = vsel %vm1429_vm2, %v2267_v54, -inf }
 0x7cb   : > { %2274 = vmax.xlane.f32.xlu0 %v2273_v8 }
 0x7cc   : > { %v2276_v45 = vsel %vm1429_vm2, %v2270_v61, -inf }
 0x7cd   : > { %2277 = vmax.xlane.f32.xlu1 %v2276_v45 }
 0x82d   : > { %v1795_v10 = vpop.xlane.xlu0 %1794 }
 0x82e   : > { %v1799_v11 = vsub.f32 %v6700_v44, %v1795_v10 }
 0x82f   : > { %v1798_v12 = vpop.xlane.xlu1 %1797 }
 0x830   : > { %v1801_v14 = vmul.f32 1.442695, %v1799_v11  ;;  %v1800_v16 = vsub.f32 %v6702_v51, %v1798_v12 }
 0x832   : > { %6011 = vpow2.f32 %v1801_v14  ;;  %v1803_v19 = vmul.f32 1.442695, %v1800_v16 }
 0x834   : > { %6013 = vpow2.f32 %v1803_v19 }
 0x83c   : > { %v6748_v21 = vpop.eup %6011 }
 0x83d   : > { %v1805_v22 = vsel %vm1429_vm2, %v6748_v21, 0.0 }
 0x83e   : > { %v6752_v23 = vpop.eup %6013  ;;  %1806 = vadd.xlane.f32.xlu0 %v1805_v22 }
 0x83f   : > { %v1808_v25 = vsel %vm1429_vm2, %v6752_v23, 0.0 }
 0x840   : > { %v1912_v26 = vpop.xlane.xlu0 %1911  ;;  %1809 = vadd.xlane.f32.xlu1 %v1808_v25 }
 0x841   : > { %v1916_v44 = vsub.f32 %v6717_v9, %v1912_v26 }
 0x843   : > { %v1918_v28 = vmul.f32 1.442695, %v1916_v44 }
 0x844   : > { %v1915_v60 = vpop.xlane.xlu0 %1914 }
 0x845   : > { %6015 = vpow2.f32 %v1918_v28  ;;  %v1917_v31 = vsub.f32 %v6722_v13, %v1915_v60 }
 0x847   : > { %v1920_v33 = vmul.f32 1.442695, %v1917_v31 }
 0x848   : > { %v2032_v32 = vpop.xlane.xlu0 %2031 }
 0x849   : > { %6017 = vpow2.f32 %v1920_v33  ;;  %v2036_v56 = vsub.f32 %v6728_v24, %v2032_v32 }
 0x84a   : > { %v2035_v46 = vpop.xlane.xlu1 %2034 }
 0x84b   : > { %v2037_v37 = vsub.f32 %v2027_v29, %v2035_v46  ;;  %v2038_v7 = vmul.f32 1.442695, %v2036_v56 }
 0x84d   : > { %v2040_v40 = vmul.f32 1.442695, %v2037_v37 }
 0x84f   : > { %v6757_v51 = vpop.eup %6015  ;;  %6019 = vpow2.f32 %v2040_v40 }
 0x850   : > { %v1922_v30 = vsel %vm1429_vm2, %v6757_v51, 0.0  ;;  %v2154_v39 = vpop.xlane.xlu0 %2153 }
 0x851   : > { %1923 = vadd.xlane.f32.xlu0 %v1922_v30  ;;  %2054 = vrot.lane.b32.xlu1 %v6589_v18, %s6113_s23  ;;  %v2158_v8 = vsub.f32 %v6736_v35, %v2154_v39 }
 0x852   : > { %v2157_v9 = vpop.xlane.xlu1 %2156 }
 0x853   : > { %v2159_v42 = vsub.f32 %v2149_v41, %v2157_v9  ;;  %v6018_v59 = vpop.eup %6017 }
 0x854   : > { %v1925_v41 = vsel %vm1429_vm2, %v6018_v59, 0.0 }
 0x855   : > { %v2162_v49 = vmul.f32 1.442695, %v2159_v42 }
 0x857   : > { %6021 = vpow2.f32 %v2162_v49 }
 0x858   : > { %v2275_v43 = vpop.xlane.xlu0 %2274 }
 0x859   : > { %v2279_v50 = vsub.f32 %v2267_v54, %v2275_v43  ;;  %v6769_v45 = vpop.eup %6019 }
 0x85a   : > { %v2278_v52 = vpop.xlane.xlu1 %2277  ;;  %v2045_v54 = vsel %vm1429_vm2, %v6769_v45, 0.0 }
 0x85b   : > { %v2281_v53 = vmul.f32 1.442695, %v2279_v50  ;;  %v2280_v13 = vsub.f32 %v2270_v61, %v2278_v52 }
 0x85d   : > { %6023 = vpow2.f32 %v2281_v53  ;;  %v2283_v29 = vmul.f32 1.442695, %v2280_v13 }
 0x85f   : > { %6025 = vpow2.f32 %v2283_v29 }
 0x860   : > { %6027 = vpow2.f32 %v2038_v7 }
 0x861   : > { %v6773_v61 = vpop.eup %6021 }
 0x862   : > { %v2167_v24 = vsel %vm1429_vm2, %v6773_v61, 0.0 }
 0x867   : > { %1816 = vrot.lane.b32.xlu0 %v6587_v17, %s6115_s18  ;;  %v2160_v17 = vmul.f32 1.442695, %v2158_v8  ;;  %v6777_v10 = vpop.eup %6023 }
 0x868   : > { %v2285_v35 = vsel %vm1429_vm2, %v6777_v10, 0.0 }
 0x869   : > { %6029 = vpow2.f32 %v2160_v17  ;;  %v6781_v11 = vpop.eup %6025 }
 0x86a   : > { %v6028_v12 = vpop.eup %6027  ;;  %v2288_v14 = vsel %vm1429_vm2, %v6781_v11, 0.0 }
 0x86b   : > { %v2042_v16 = vsel %vm1429_vm2, %v6028_v12, 0.0 }
 0x873   : > { %v6030_v19 = vpop.eup %6029 }
 0x874   : > { %v2164_v22 = vsel %vm1429_vm2, %v6030_v19, 0.0 }
 0x875   : > { %1926 = vadd.xlane.f32.xlu1 %v1925_v41 }
 0x879   : > { %2046 = vadd.xlane.f32.xlu1 %v2045_v54  ;;  %v5743_v54 = vld [vmem:[%s7961_s6] ss:$8 sps:$4 sm:$0xff]  }
 0x87d   : > { %2168 = vadd.xlane.f32.xlu1 %v2167_v24  ;;  %v5748_v24 = vld [vmem:[%s7961_s6 + $0x14] ss:$8 sps:$4 sm:$0xff]  }
 0x881   : > { %2286 = vadd.xlane.f32.xlu1 %v2285_v35 }
 0x885   : > { %2289 = vadd.xlane.f32.xlu1 %v2288_v14  ;;  %v5749_v14 = vld [vmem:[%s7961_s6 + $0x20] ss:$8 sps:$4 sm:$0xff]  }
 0x886   : > { %2043 = vadd.xlane.f32.xlu0 %v2042_v16 }
 0x88a   : > { %2165 = vadd.xlane.f32.xlu0 %v2164_v22  ;;  %v5754_v22 = vld [vmem:[%s7961_s6 + $0x34] ss:$8 sps:$4 sm:$0xff]  }
 0x896   : > { %2296 = vrot.lane.b32.xlu1 %v6589_v18, %s6115_s18 }
 0x89a   : > { %5570 = vrot.lane.b32.xlu1 %v5569_v58, %s6115_s18 }
 0x89e   : > { %5575 = vrot.lane.b32.xlu1 %v5574_v38, %s7971_s24 }
 0x8a0   : > { %2175 = vrot.lane.b32.xlu0 %v6589_v18, %s7971_s24 }
 0x8cb   : > { %v1807_v26 = vpop.xlane.xlu0 %1806 }
 0x8cd   : > { %v1810_v25 = vpop.xlane.xlu1 %1809 }
 0x8ce   : > { %6031 = vrcp.f32 %v1810_v25  ;;  %v5752_v25 = vld [vmem:[%s7961_s6 + $0x30] ss:$8 sps:$4 sm:$0xff]  }
 0x8cf   : > { %6033 = vrcp.f32 %v1807_v26  ;;  %v5757_v26 = vld [vmem:[%s7961_s6 + $0x44] ss:$8 sps:$4 sm:$0xff]  }
 0x8d1   : > { %v2055_v36 = vpop.permute.xlu1 %2054 }
 0x8d8   : > { %v6032_v44 = vpop.eup %6031 }
 0x8d9   : > { %v6034_v30 = vpop.eup %6033  ;;  %v1814_v60 = vmul.f32 %v6032_v44, %v6752_v23  ;;  %v5755_v44 = vld [vmem:[%s7961_s6 + $0x40] ss:$8 sps:$4 sm:$0xff]  }
 0x8da   : > { %v1813_v55 = vmul.f32 %v6034_v30, %v6748_v21  ;;  %v5758_v30 = vld [vmem:[%s7961_s6 + $0x50] ss:$8 sps:$4 sm:$0xff]  }
 0x8dc   : > { %v1815_v58 = vpack.c.bf16 %v1814_v60, %v1813_v55  ;;  %v5763_v60 = vld [vmem:[%s7961_s6 + $0x64] ss:$8 sps:$4 sm:$0xff]   ;;  %v5761_v55 = vld [vmem:[%s7961_s6 + $0x60] ss:$8 sps:$4 sm:$0xff]  }
 0x8de   : > { %v1924_v28 = vpop.xlane.xlu0 %1923 }
 0x8df   : > { %6035 = vrcp.f32 %v1924_v28  ;;  %v5760_v28 = vld [vmem:[%s7961_s6 + $0x54] ss:$8 sps:$4 sm:$0xff]  }
 0x8e2   : > { %v1817_v57 = vpop.permute.xlu0 %1816 }
 0x8e3   : > { %5471 = vmatpush3.bf16.msra.mxu1 %v1817_v57  ;;  %v5766_v57 = vld [vmem:[%s7961_s6 + $0x74] ss:$8 sps:$4 sm:$0xff]  }
 0x8e4   : > { %5482 = vmatprep.subr.bf16.mxu1 %v6111_v34 }
 0x8e6   : > { %5473 = vmatmul.mubr.msk.bf16.vlgmr.msra.gmra.mrb[12].mxu1 %vm1429_vm2, %v1815_v58  ;;  %v5764_v58 = vld [vmem:[%s7961_s6 + $0x70] ss:$8 sps:$4 sm:$0xff]  }
 0x8e7   : > { %5483 = vmatpush3.bf16.msra.mxu1 %v6589_v18  ;;  %5484 = vmatprep.mubr.msk.bf16.mxu1 %vm6112_vm0, %v6111_v34 }
 0x8e8   : > { %5494 = vmatprep.subr.bf16.mxu1 %v6111_v34 }
 0x8e9   : > { %v6036_v38 = vpop.eup %6035 }
 0x8ea   : > { %v1930_v31 = vmul.f32 %v6036_v38, %v6757_v51  ;;  %v5772_v38 = vld [vmem:[%s7961_s6 + $0x94] ss:$8 sps:$4 sm:$0xff]  }
 0x902   : > { %v1927_v27 = vpop.xlane.xlu1 %1926 }
 0x903   : > { %6037 = vrcp.f32 %v1927_v27  ;;  %v5767_v27 = vld [vmem:[%s7961_s6 + $0x80] ss:$8 sps:$4 sm:$0xff]  }
 0x906   : > { %v2047_v21 = vpop.xlane.xlu1 %2046 }
 0x907   : > { %6039 = vrcp.f32 %v2047_v21  ;;  %v5770_v21 = vld [vmem:[%s7961_s6 + $0x90] ss:$8 sps:$4 sm:$0xff]  }
 0x90a   : > { %v2169_v33 = vpop.xlane.xlu1 %2168 }
 0x90d   : > { %v6038_v23 = vpop.eup %6037 }
 0x90e   : > { %v1931_v32 = vmul.f32 %v6038_v23, %v6018_v59  ;;  %v2287_v37 = vpop.xlane.xlu1 %2286  ;;  %v5775_v23 = vld [vmem:[%s7961_s6 + $0xa4] ss:$8 sps:$4 sm:$0xff]  }
 0x910   : > { %v1932_v46 = vpack.c.bf16 %v1931_v32, %v1930_v31  ;;  %v5773_v31 = vld [vmem:[%s7961_s6 + $0xa0] ss:$8 sps:$4 sm:$0xff]  }
 0x911   : > { %v6040_v9 = vpop.eup %6039 }
 0x912   : > { %5485 = vmatmul.mubr.msk.bf16.vlgmr.msra.gmra.mrb[16].mxu1 %vm1429_vm2, %v1932_v46  ;;  %v2290_v51 = vpop.xlane.xlu1 %2289  ;;  %v2051_v42 = vmul.f32 %v6040_v9, %v6769_v45  ;;  %v5781_v9 = vld [vmem:[%s7961_s6 + $0xc4] ss:$8 sps:$4 sm:$0xff]  }
 0x913   : > { %5495 = vmatpush3.bf16.msra.mxu1 %v2055_v36  ;;  %v2044_v18 = vpop.xlane.xlu0 %2043  ;;  %5496 = vmatprep.mubr.msk.bf16.mxu1 %vm6112_vm0, %v6111_v34  ;;  %v5769_v36 = vld [vmem:[%s7961_s6 + $0x84] ss:$8 sps:$4 sm:$0xff]  }
 0x914   : > { %6041 = vrcp.f32 %v2044_v18  ;;  %5506 = vmatprep.subr.bf16.mxu1 %v6111_v34 }
 0x916   : > { %v2297_v7 = vpop.permute.xlu1 %2296 }
 0x917   : > { %v2166_v39 = vpop.xlane.xlu0 %2165 }
 0x918   : > { %6043 = vrcp.f32 %v2166_v39  ;;  %v5776_v39 = vld [vmem:[%s7961_s6 + $0xb0] ss:$8 sps:$4 sm:$0xff]  }
 0x919   : > { %6045 = vrcp.f32 %v2169_v33 }
 0x91a   : > { %6047 = vrcp.f32 %v2290_v51  ;;  %v5779_v51 = vld [vmem:[%s7961_s6 + $0xc0] ss:$8 sps:$4 sm:$0xff]  }
 0x91b   : > { %6049 = vrcp.f32 %v2287_v37  ;;  %v2176_v52 = vpop.permute.xlu0 %2175  ;;  %v5778_v37 = vld [vmem:[%s7961_s6 + $0xb4] ss:$8 sps:$4 sm:$0xff]  }
 0x91e   : > { %v6042_v40 = vpop.eup %6041 }
 0x91f   : > { %v2050_v43 = vmul.f32 %v6042_v40, %v6028_v12 }
 0x921   : > { %v2052_v49 = vpack.c.bf16 %v2051_v42, %v2050_v43  ;;  %v5784_v43 = vld [vmem:[%s7961_s6 + $0xd4] ss:$8 sps:$4 sm:$0xff]  }
 0x922   : > { %v6044_v50 = vpop.eup %6043 }
 0x923   : > { %5497 = vmatmul.mubr.msk.bf16.vlgmr.msra.gmra.mrb[20].mxu1 %vm1429_vm2, %v2052_v49  ;;  %v6046_v53 = vpop.eup %6045  ;;  %v2172_v13 = vmul.f32 %v6044_v50, %v6030_v19  ;;  %v5782_v50 = vld [vmem:[%s7961_s6 + $0xd0] ss:$8 sps:$4 sm:$0xff]  }
 0x924   : > { %5507 = vmatpush3.bf16.msra.mxu1 %v2176_v52  ;;  %5508 = vmatprep.mubr.msk.bf16.mxu1 %vm6112_vm0, %v6111_v34  ;;  %v2173_v56 = vmul.f32 %v6046_v53, %v6773_v61  ;;  %v6048_v29 = vpop.eup %6047  ;;  %v5745_v61 = vld [vmem:[%s7961_s6 + $0x4] ss:$8 sps:$4 sm:$0xff]  }
 0x925   : > { %5518 = vmatprep.subr.bf16.mxu1 %v6111_v34  ;;  %v6050_v8 = vpop.eup %6049  ;;  %v2294_v41 = vmul.f32 %v6048_v29, %v6781_v11  ;;  %2611 = vmatprep.subr.bf16.mxu0 %v5745_v61  ;;  %v5788_v29 = vld [vmem:[%s7961_s6 + $0xf0] ss:$8 sps:$4 sm:$0xff]  }
 0x926   : > { %v2174_v59 = vpack.c.bf16 %v2173_v56, %v2172_v13  ;;  %v2293_v45 = vmul.f32 %v6050_v8, %v6777_v10  ;;  %2612 = vmatpush1.bf16.msra.mxu0 %v5743_v54  ;;  %v5751_v10 = vld [vmem:[%s7961_s6 + $0x24] ss:$8 sps:$4 sm:$0xff]   ;;  %v5785_v56 = vld [vmem:[%s7961_s6 + $0xe0] ss:$8 sps:$4 sm:$0xff]  }
 0x927   : > { %2613 = vmatprep.subr.bf16.mxu0 %v5748_v24  ;;  %v5787_v13 = vld [vmem:[%s7961_s6 + $0xe4] ss:$8 sps:$4 sm:$0xff]  }
 0x928   : > { %v2295_v17 = vpack.c.bf16 %v2294_v41, %v2293_v45 }
 0x92b   : > { %5509 = vmatmul.mubr.msk.bf16.vlgmr.msra.gmra.mrb[24].mxu1 %vm1429_vm2, %v2174_v59 }
 0x92c   : > { %5519 = vmatpush3.bf16.msra.mxu1 %v2297_v7  ;;  %5520 = vmatprep.mubr.msk.bf16.mxu1 %vm6112_vm0, %v6111_v34  ;;  %v5746_v34 = vld [vmem:[%s7961_s6 + $0x10] ss:$8 sps:$4 sm:$0xff]   ;;  %v5790_v7 = vld [vmem:[%s7961_s6 + $0xf4] ss:$8 sps:$4 sm:$0xff]  }
 0x92d   : > { %2614 = vmatpush1.bf16.msra.mxu0 %v5746_v34 }
 0x92e   : > { %2615 = vmatprep.subr.bf16.mxu0 %v5751_v10 }
 0x931   : > { %2616 = vmatpush1.bf16.msra.mxu0 %v5749_v14 }
 0x932   : > { %2617 = vmatprep.subr.bf16.mxu0 %v5754_v22 }
 0x933   : > { %5521 = vmatmul.mubr.msk.bf16.vlgmr.msra.gmra.mrb[28].mxu1 %vm1429_vm2, %v2295_v17 }
 0x935   : > { %2618 = vmatpush1.bf16.msra.mxu0 %v5752_v25 }
 0x936   : > { %2619 = vmatprep.subr.bf16.mxu0 %v5757_v26 }
 0x939   : > { %2620 = vmatpush1.bf16.msra.mxu0 %v5755_v44 }
 0x93a   : > { %2621 = vmatprep.subr.bf16.mxu0 %v5760_v28 }
 0x93d   : > { %2622 = vmatpush1.bf16.msra.mxu0 %v5758_v30 }
 0x93e   : > { %2623 = vmatprep.subr.bf16.mxu0 %v5763_v60 }
 0x941   : > { %2624 = vmatpush1.bf16.msra.mxu0 %v5761_v55 }
 0x942   : > { %2625 = vmatprep.subr.bf16.mxu0 %v5766_v57 }
 0x945   : > { %2626 = vmatpush1.bf16.msra.mxu0 %v5764_v58 }
 0x946   : > { %2627 = vmatprep.subr.bf16.mxu0 %v5769_v36 }
 0x949   : > { %2628 = vmatpush1.bf16.msra.mxu0 %v5767_v27 }
 0x94a   : > { %2629 = vmatprep.subr.bf16.mxu0 %v5772_v38 }
 0x94d   : > { %2630 = vmatpush1.bf16.msra.mxu0 %v5770_v21 }
 0x94e   : > { %2631 = vmatprep.subr.bf16.mxu0 %v5775_v23 }
 0x951   : > { %2632 = vmatpush1.bf16.msra.mxu0 %v5773_v31 }
 0x952   : > { %2633 = vmatprep.subr.bf16.mxu0 %v5778_v37 }
 0x955   : > { %2634 = vmatpush1.bf16.msra.mxu0 %v5776_v39 }
 0x956   : > { %2635 = vmatprep.subr.bf16.mxu0 %v5781_v9 }
 0x959   : > { %2636 = vmatpush1.bf16.msra.mxu0 %v5779_v51 }
 0x95a   : > { %2637 = vmatprep.subr.bf16.mxu0 %v5784_v43 }
 0x95d   : > { %2638 = vmatpush1.bf16.msra.mxu0 %v5782_v50 }
 0x95e   : > { %2639 = vmatprep.subr.bf16.mxu0 %v5787_v13 }
 0x961   : > { %2640 = vmatpush1.bf16.msra.mxu0 %v5785_v56 }
 0x962   : > { %2641 = vmatprep.subr.bf16.mxu0 %v5790_v7 }
 0x965   : > { %2642 = vmatpush1.bf16.msra.mxu0 %v5788_v29 }
 0x9b9   : > { %v1856_v35 = vpop.f32.mrb[12].mxu1 }
 0x9ba   : > { %v5474_v11 = vpop.f32.mrb[13].mxu1 }
 0x9bb   : > { %v1859_v12 = vpop.f32.mrb[14].mxu1 }
 0x9bc   : > { %v5594_v16 = vpack.i.bf16 %v1859_v12, %v1856_v35  ;;  %v5475_v19 = vpop.f32.mrb[15].mxu1  ;;  %v5571_v35 = vpop.permute.xlu1 %5570 }
 0x9bd   : > { %v5573_v12 = vunpack.i.h.bf16 %v5571_v35  ;;  %v5572_v14 = vunpack.i.l.bf16 %v5571_v35 }
 0x9be   : > { %5595 = vrot.lane.b32.xlu1 %v5594_v16, %s6113_s23 }
 0x9bf   : > { %v2392_v25 = vsel %vm1381_vm1, %v6628_v20, %v5573_v12  ;;  %v2391_v26 = vsel %vm1381_vm1, %v6625_v15, %v5572_v14  ;;  %v2733_v14 = vld [vmem:[%s7965_s10 + $0x48] sm:$0xff] }
 0x9c0   : > { %v5576_v11 = vpop.permute.xlu1 %5575 }
 0x9c1   : > { %v5578_v16 = vunpack.i.h.bf16 %v5576_v11  ;;  %v5577_v19 = vunpack.i.l.bf16 %v5576_v11 }
 0x9c3   : > { %v2394_v30 = vsel %vm2393_vm3, %v2391_v26, %v5577_v19  ;;  %v2395_v60 = vsel %vm2393_vm3, %v2392_v25, %v5578_v16  ;;  %v2737_v16 = vld [vmem:[%s7965_s10 + $0x68] sm:$0xff]  ;;  %v2740_v19 = vld [vmem:[%s7965_s10 + $0x80] sm:$0xff] }
 0x9c4   : > { %v2744_v25 = vld [vmem:[%s7965_s10 + $0xa0] sm:$0xff]  ;;  %v2741_v26 = vld [vmem:[%s7965_s10 + $0x88] sm:$0xff] }
 0x9e5   : > { %v6891_v32 = vpop.f32.mrb[16].mxu1 }
 0x9e6   : > { %v5486_v46 = vpop.f32.mrb[17].mxu1 }
 0x9e7   : > { %v6893_v33 = vpop.f32.mrb[18].mxu1 }
 0x9e8   : > { %v5487_v18 = vpop.f32.mrb[19].mxu1 }
 0x9f6   : > { %v2094_v40 = vpop.f32.mrb[20].mxu1 }
 0x9f7   : > { %v5498_v42 = vpop.f32.mrb[21].mxu1 }
 0x9f8   : > { %v2097_v49 = vpop.f32.mrb[22].mxu1 }
 0x9f9   : > { %v5579_v52 = vpack.i.bf16 %v2097_v49, %v2094_v40  ;;  %v5499_v53 = vpop.f32.mrb[23].mxu1 }
 0x9fb   : > { %5580 = vrot.lane.b32.xlu0 %v5579_v52, %s6115_s18 }
 0x9fe   : > { %v2215_v59 = vpop.f32.mrb[24].mxu1 }
 0x9ff   : > { %v5510_v8 = vpop.f32.mrb[25].mxu1 }
 0xa00   : > { %v2218_v41 = vpop.f32.mrb[26].mxu1 }
 0xa01   : > { %v5584_v45 = vpack.i.bf16 %v2218_v41, %v2215_v59  ;;  %v5511_v17 = vpop.f32.mrb[27].mxu1 }
 0xa03   : > { %5585 = vrot.lane.b32.xlu0 %v5584_v45, %s7972_s17 }
 0xa06   : > { %v2336_v54 = vpop.f32.mrb[28].mxu1 }
 0xa07   : > { %v5522_v61 = vpop.f32.mrb[29].mxu1 }
 0xa08   : > { %v2339_v24 = vpop.f32.mrb[30].mxu1 }
 0xa09   : > { %v5589_v34 = vpack.i.bf16 %v2339_v24, %v2336_v54  ;;  %v5523_v10 = vpop.f32.mrb[31].mxu1  ;;  %v2729_v24 = vld [vmem:[%s7965_s10 + $0x28] sm:$0xff] }
 0xa0a   : > { %v2736_v10 = vld [vmem:[%s7965_s10 + $0x60] sm:$0xff] }
 0xa0b   : > { %5590 = vrot.lane.b32.xlu0 %v5589_v34, %s6113_s23  ;;  %v2732_v34 = vld [vmem:[%s7965_s10 + $0x40] sm:$0xff] }
 0xa0c   : > { %v5102_v12 = vcombine.high %v2732_v34, %v2736_v10 }
 0xa30   : > { %v5596_v22 = vpop.permute.xlu1 %5595 }
 0xa31   : > { %v5598_v44 = vunpack.i.h.bf16 %v5596_v22  ;;  %v5597_v28 = vunpack.i.l.bf16 %v5596_v22  ;;  %v5104_v22 = vcombine.high %v2733_v14, %v2737_v16 }
 0xa33   : > { %v2397_v55 = vsel %vm2396_vm4, %v2394_v30, %v5597_v28  ;;  %v2398_v57 = vsel %vm2396_vm4, %v2395_v60, %v5598_v44  ;;  %v2745_v44 = vld [vmem:[%s7965_s10 + $0xa8] sm:$0xff]  ;;  %v5101_v28 = vcombine.low %v2732_v34, %v2736_v10  ;;  %v5103_v30 = vcombine.low %v2733_v14, %v2737_v16 }
 0xa34   : > { %v2405_v58 = vpack.c.bf16 %v2398_v57, %v2397_v55  ;;  %v5110_v60 = vcombine.high %v2740_v19, %v2744_v25  ;;  %v5112_v55 = vcombine.high %v2741_v26, %v2745_v44  ;;  %v2748_v57 = vld [vmem:[%s7965_s10 + $0xc0] sm:$0xff]  ;;  %v2789_v14 = vld [vmem:[%s7965_s10 + $0x208] sm:$0xff] }
 0xa35   : > { %v2793_v16 = vld [vmem:[%s7965_s10 + $0x228] sm:$0xff] }
 0xa6d   : > { %v5581_v36 = vpop.permute.xlu0 %5580 }
 0xa6e   : > { %v5583_v38 = vunpack.i.h.bf16 %v5581_v36  ;;  %v5582_v21 = vunpack.i.l.bf16 %v5581_v36  ;;  %v2749_v36 = vld [vmem:[%s7965_s10 + $0xc8] sm:$0xff] }
 0xa70   : > { %v2400_v15 = vsel %vm1381_vm1, %v6893_v33, %v5583_v38  ;;  %v2399_v46 = vsel %vm1381_vm1, %v6891_v32, %v5582_v21  ;;  %v2439_v33 = vld [vmem:[%s7962_s7] sm:$0x3]  ;;  %v5109_v38 = vcombine.low %v2740_v19, %v2744_v25  ;;  %v5111_v21 = vcombine.low %v2741_v26, %v2745_v44 }
 0xa71   : > { %v2444_v43 = vrot.slane %v2439_v33, %v6338_v0  ;;  %v2448_v32 = vrot.slane %v2439_v33, %v6335_v63  ;;  %v2765_v33 = vld [vmem:[%s7965_s10 + $0x148] sm:$0xff]  ;;  %v5160_v26 = vcombine.high %v2789_v14, %v2793_v16  ;;  %v2796_v44 = vld [vmem:[%s7965_s10 + $0x240] sm:$0xff] }
 0xa75   : > { %v5586_v27 = vpop.permute.xlu0 %5585 }
 0xa76   : > { %v5588_v23 = vunpack.i.h.bf16 %v5586_v27  ;;  %v5587_v20 = vunpack.i.l.bf16 %v5586_v27  ;;  %v2753_v27 = vld [vmem:[%s7965_s10 + $0xe8] sm:$0xff] }
 0xa78   : > { %v2402_v39 = vsel %vm2393_vm3, %v2400_v15, %v5588_v23  ;;  %v2401_v9 = vsel %vm2393_vm3, %v2399_v46, %v5587_v20  ;;  %v5120_v20 = vcombine.high %v2749_v36, %v2753_v27  ;;  %v2760_v15 = vld [vmem:[%s7965_s10 + $0x120] sm:$0xff]  ;;  %v2757_v46 = vld [vmem:[%s7965_s10 + $0x108] sm:$0xff] }
 0xa7d   : > { %v5591_v31 = vpop.permute.xlu0 %5590 }
 0xa7e   : > { %v5593_v18 = vunpack.i.h.bf16 %v5591_v31  ;;  %v5592_v37 = vunpack.i.l.bf16 %v5591_v31  ;;  %v2756_v31 = vld [vmem:[%s7965_s10 + $0x100] sm:$0xff] }
 0xa80   : > { %v2403_v51 = vsel %vm2396_vm4, %v2401_v9, %v5592_v37  ;;  %v2404_v40 = vsel %vm2396_vm4, %v2402_v39, %v5593_v18  ;;  %v2761_v18 = vld [vmem:[%s7965_s10 + $0x128] sm:$0xff]  ;;  %v5119_v39 = vcombine.low %v2749_v36, %v2753_v27  ;;  %v5126_v9 = vcombine.high %v2756_v31, %v2760_v15 }
 0xa81   : > { %v2406_v42 = vpack.c.bf16 %v2404_v40, %v2403_v51  ;;  %v5128_v51 = vcombine.high %v2757_v46, %v2761_v18  ;;  %v2764_v40 = vld [vmem:[%s7965_s10 + $0x140] sm:$0xff] }
 0xa83   : > { %2643 = vmatprep.mubr.bf16.mxu0 %v2406_v42  ;;  %v2768_v42 = vld [vmem:[%s7965_s10 + $0x160] sm:$0xff] }
 0xa84   : > { %2644 = vmatmul.mubr.bf16.vlgmr.msra.gmra.mrb[44].mxu0 %v2405_v58  ;;  %v2752_v58 = vld [vmem:[%s7965_s10 + $0xe0] sm:$0xff] }
 0xa85   : > { %v5118_v23 = vcombine.high %v2748_v57, %v2752_v58  ;;  %v5117_v37 = vcombine.low %v2748_v57, %v2752_v58  ;;  %v5159_v57 = vcombine.low %v2789_v14, %v2793_v16  ;;  %v2828_v16 = vld [vmem:[%s7965_s10 + $0x340] sm:$0xff] }
 0xb57   : > { %v2645_v49 = vpop.f32.mrb[44].mxu0 }
 0xb58   : > { %v2646_v50 = vadd.f32 %v2645_v49, %v2444_v43  ;;  %v2647_v52 = vpop.f32.mrb[45].mxu0  ;;  %v5127_v49 = vcombine.low %v2757_v46, %v2761_v18 }
 0xb59   : > { %v2648_v53 = vadd.f32 %v2647_v52, %v2448_v32  ;;  %v2649_v13 = vpop.f32.mrb[46].mxu0 }
 0xb5a   : > { %v6950_v56 = vadd.f32 %v2646_v50, %v6217_v2  ;;  %v2650_v59 = vadd.f32 %v2649_v13, %v2444_v43  ;;  %v2651_v29 = vpop.f32.mrb[47].mxu0  ;;  %v2769_v43 = vld [vmem:[%s7965_s10 + $0x168] sm:$0xff]  ;;  %v5134_v50 = vcombine.high %v2764_v40, %v2768_v42  ;;  %v2776_v13 = vld [vmem:[%s7965_s10 + $0x1a0] sm:$0xff] }
 0xb5b   : > { %v6953_v7 = vadd.f32 %v2648_v53, %v6219_v3  ;;  %v2652_v8 = vadd.f32 %v2651_v29, %v2448_v32  ;;  %v2724_v3 = vld [vmem:[%s7965_s10] sm:$0xff]  ;;  %v5125_v32 = vcombine.low %v2756_v31, %v2760_v15  ;;  %v5136_v52 = vcombine.high %v2765_v33, %v2769_v43  ;;  %v2777_v29 = vld [vmem:[%s7965_s10 + $0x1a8] sm:$0xff] }
 0xb5c   : > { %v6956_v41 = vadd.f32 %v2650_v59, %v6221_v4  ;;  %v2728_v4 = vld [vmem:[%s7965_s10 + $0x20] sm:$0xff]  ;;  %v2773_v59 = vld [vmem:[%s7965_s10 + $0x188] sm:$0xff] }
 0xb5d   : > { %v6959_v45 = vadd.f32 %v2652_v8, %v6223_v5  ;;  %v2660_v17 = vadd.f32 %v6953_v7, %v6950_v56  ;;  %v2725_v5 = vld [vmem:[%s7965_s10 + $0x8] sm:$0xff]  ;;  %v5093_v54 = vcombine.low %v2724_v3, %v2728_v4  ;;  %v5094_v61 = vcombine.high %v2724_v3, %v2728_v4  ;;  %v2772_v53 = vld [vmem:[%s7965_s10 + $0x180] sm:$0xff] }
 0xb5e   : > { %v5095_v35 = vcombine.low %v2725_v5, %v2729_v24  ;;  %v5096_v11 = vcombine.high %v2725_v5, %v2729_v24  ;;  %v5133_v8 = vcombine.low %v2764_v40, %v2768_v42  ;;  %v5144_v3 = vcombine.high %v2773_v59, %v2777_v29  ;;  %v2780_v4 = vld [vmem:[%s7965_s10 + $0x1c0] sm:$0xff] }
 0xb5f   : > { %2661 = vadd.xlane.f32.xlu0 %v2660_v17  ;;  %v2663_v2 = vadd.f32 %v6959_v45, %v6956_v41  ;;  %3534 = vmatprep.subr.bf16.mxu1 %v5094_v61  ;;  %v5135_v17 = vcombine.low %v2765_v33, %v2769_v43  ;;  %v2784_v5 = vld [vmem:[%s7965_s10 + $0x1e0] sm:$0xff]  ;;  %v2785_v61 = vld [vmem:[%s7965_s10 + $0x1e8] sm:$0xff]  ;;  %v5141_v24 = vcombine.low %v2772_v53, %v2776_v13 }
 0xb60   : > { %3577 = vmatprep.subr.bf16.mxu0 %v5096_v11  ;;  %3535 = vmatpush1.bf16.msra.mxu1 %v5093_v54  ;;  %v2781_v54 = vld [vmem:[%s7965_s10 + $0x1c8] sm:$0xff]  ;;  %v5143_v34 = vcombine.low %v2773_v59, %v2777_v29  ;;  %v5150_v10 = vcombine.high %v2780_v4, %v2784_v5  ;;  %v2788_v11 = vld [vmem:[%s7965_s10 + $0x200] sm:$0xff]  ;;  %v5149_v19 = vcombine.low %v2780_v4, %v2784_v5 }
 0xb61   : > { %2664 = vadd.xlane.f32.xlu1 %v2663_v2  ;;  %3578 = vmatpush1.bf16.msra.mxu0 %v5095_v35  ;;  %v5142_v2 = vcombine.high %v2772_v53, %v2776_v13  ;;  %v5152_v35 = vcombine.high %v2781_v54, %v2785_v61  ;;  %v2804_v43 = vld [vmem:[%s7965_s10 + $0x280] sm:$0xff] }
 0xb62   : > { %3536 = vmatprep.subr.bf16.mxu1 %v5102_v12  ;;  %3579 = vmatprep.subr.bf16.mxu0 %v5104_v22  ;;  %v2792_v12 = vld [vmem:[%s7965_s10 + $0x220] sm:$0xff]  ;;  %v5151_v22 = vcombine.low %v2781_v54, %v2785_v61 }
 0xb63   : > { %v5158_v25 = vcombine.high %v2788_v11, %v2792_v12  ;;  %v2812_v29 = vld [vmem:[%s7965_s10 + $0x2c0] sm:$0xff] }
 0xb64   : > { %3537 = vmatpush1.bf16.msra.mxu1 %v5101_v28  ;;  %v2800_v28 = vld [vmem:[%s7965_s10 + $0x260] sm:$0xff] }
 0xb65   : > { %3580 = vmatpush1.bf16.msra.mxu0 %v5103_v30  ;;  %3538 = vmatprep.subr.bf16.mxu1 %v5110_v60  ;;  %v2797_v30 = vld [vmem:[%s7965_s10 + $0x248] sm:$0xff]  ;;  %v5166_v58 = vcombine.high %v2796_v44, %v2800_v28  ;;  %v5165_v27 = vcombine.low %v2796_v44, %v2800_v28  ;;  %v2820_v61 = vld [vmem:[%s7965_s10 + $0x300] sm:$0xff] }
 0xb66   : > { %3581 = vmatprep.subr.bf16.mxu0 %v5112_v55  ;;  %v2801_v60 = vld [vmem:[%s7965_s10 + $0x268] sm:$0xff]  ;;  %v5157_v55 = vcombine.low %v2788_v11, %v2792_v12 }
 0xb67   : > { %v5168_v36 = vcombine.high %v2797_v30, %v2801_v60 }
 0xb68   : > { %3539 = vmatpush1.bf16.msra.mxu1 %v5109_v38  ;;  %v5167_v38 = vcombine.low %v2797_v30, %v2801_v60  ;;  %v2836_v60 = vld [vmem:[%s7965_s10 + $0x380] sm:$0xff] }
 0xb69   : > { %3582 = vmatpush1.bf16.msra.mxu0 %v5111_v21  ;;  %3540 = vmatprep.subr.bf16.mxu1 %v5118_v23 }
 0xb6a   : > { %3583 = vmatprep.subr.bf16.mxu0 %v5120_v20 }
 0xb6c   : > { %3541 = vmatpush1.bf16.msra.mxu1 %v5117_v37 }
 0xb6d   : > { %3584 = vmatpush1.bf16.msra.mxu0 %v5119_v39  ;;  %3542 = vmatprep.subr.bf16.mxu1 %v5126_v9 }
 0xb6e   : > { %3585 = vmatprep.subr.bf16.mxu0 %v5128_v51 }
 0xb70   : > { %3543 = vmatpush1.bf16.msra.mxu1 %v5125_v32  ;;  %v2808_v32 = vld [vmem:[%s7965_s10 + $0x2a0] sm:$0xff] }
 0xb71   : > { %3586 = vmatpush1.bf16.msra.mxu0 %v5127_v49  ;;  %3544 = vmatprep.subr.bf16.mxu1 %v5134_v50  ;;  %v2805_v49 = vld [vmem:[%s7965_s10 + $0x288] sm:$0xff]  ;;  %v5174_v50 = vcombine.high %v2804_v43, %v2808_v32  ;;  %v5173_v53 = vcombine.low %v2804_v43, %v2808_v32  ;;  %v2730_v43 = vld [vmem:[%s7965_s10 + $0x30] sm:$0xff]  ;;  %v2727_v32 = vld [vmem:[%s7965_s10 + $0x18] sm:$0xff] }
 0xb72   : > { %3587 = vmatprep.subr.bf16.mxu0 %v5136_v52  ;;  %v2809_v52 = vld [vmem:[%s7965_s10 + $0x2a8] sm:$0xff] }
 0xb73   : > { %v5175_v13 = vcombine.low %v2805_v49, %v2809_v52  ;;  %v5176_v59 = vcombine.high %v2805_v49, %v2809_v52 }
 0xb74   : > { %3545 = vmatpush1.bf16.msra.mxu1 %v5133_v8  ;;  %v2816_v8 = vld [vmem:[%s7965_s10 + $0x2e0] sm:$0xff] }
 0xb75   : > { %3588 = vmatpush1.bf16.msra.mxu0 %v5135_v17  ;;  %3546 = vmatprep.subr.bf16.mxu1 %v5142_v2  ;;  %v2813_v17 = vld [vmem:[%s7965_s10 + $0x2c8] sm:$0xff]  ;;  %v5182_v2 = vcombine.high %v2812_v29, %v2816_v8  ;;  %v5181_v4 = vcombine.low %v2812_v29, %v2816_v8 }
 0xb76   : > { %3589 = vmatprep.subr.bf16.mxu0 %v5144_v3  ;;  %v2817_v3 = vld [vmem:[%s7965_s10 + $0x2e8] sm:$0xff] }
 0xb77   : > { %v5183_v5 = vcombine.low %v2813_v17, %v2817_v3  ;;  %v5184_v54 = vcombine.high %v2813_v17, %v2817_v3 }
 0xb78   : > { %3547 = vmatpush1.bf16.msra.mxu1 %v5141_v24  ;;  %v2824_v24 = vld [vmem:[%s7965_s10 + $0x320] sm:$0xff] }
 0xb79   : > { %3590 = vmatpush1.bf16.msra.mxu0 %v5143_v34  ;;  %3548 = vmatprep.subr.bf16.mxu1 %v5150_v10  ;;  %v2821_v34 = vld [vmem:[%s7965_s10 + $0x308] sm:$0xff]  ;;  %v5190_v10 = vcombine.high %v2820_v61, %v2824_v24  ;;  %v5189_v11 = vcombine.low %v2820_v61, %v2824_v24  ;;  %v2659_v24 = vld [vmem:[%s7964_s9] sm:$0x3] }
 0xb7a   : > { %3591 = vmatprep.subr.bf16.mxu0 %v5152_v35  ;;  %v2825_v35 = vld [vmem:[%s7965_s10 + $0x328] sm:$0xff] }
 0xb7b   : > { %v5191_v12 = vcombine.low %v2821_v34, %v2825_v35  ;;  %v5192_v14 = vcombine.high %v2821_v34, %v2825_v35 }
 0xb7c   : > { %3549 = vmatpush1.bf16.msra.mxu1 %v5149_v19  ;;  %v2832_v19 = vld [vmem:[%s7965_s10 + $0x360] sm:$0xff] }
 0xb7d   : > { %3592 = vmatpush1.bf16.msra.mxu0 %v5151_v22  ;;  %3550 = vmatprep.subr.bf16.mxu1 %v5158_v25  ;;  %v2829_v22 = vld [vmem:[%s7965_s10 + $0x348] sm:$0xff]  ;;  %v5198_v25 = vcombine.high %v2828_v16, %v2832_v19  ;;  %v5197_v44 = vcombine.low %v2828_v16, %v2832_v19 }
 0xb7e   : > { %3593 = vmatprep.subr.bf16.mxu0 %v5160_v26  ;;  %v2833_v26 = vld [vmem:[%s7965_s10 + $0x368] sm:$0xff] }
 0xb7f   : > { %v5199_v28 = vcombine.low %v2829_v22, %v2833_v26  ;;  %v5200_v30 = vcombine.high %v2829_v22, %v2833_v26 }
 0xb80   : > { %3551 = vmatpush1.bf16.msra.mxu1 %v5157_v55  ;;  %v2840_v55 = vld [vmem:[%s7965_s10 + $0x3a0] sm:$0xff] }
 0xb81   : > { %3594 = vmatpush1.bf16.msra.mxu0 %v5159_v57  ;;  %3552 = vmatprep.subr.bf16.mxu1 %v5166_v58  ;;  %v2837_v57 = vld [vmem:[%s7965_s10 + $0x388] sm:$0xff]  ;;  %v5206_v58 = vcombine.high %v2836_v60, %v2840_v55 }
 0xb82   : > { %3595 = vmatprep.subr.bf16.mxu0 %v5168_v36  ;;  %v2841_v36 = vld [vmem:[%s7965_s10 + $0x3a8] sm:$0xff] }
 0xb84   : > { %3553 = vmatpush1.bf16.msra.mxu1 %v5165_v27  ;;  %v5205_v27 = vcombine.low %v2836_v60, %v2840_v55  ;;  %v2738_v60 = vld [vmem:[%s7965_s10 + $0x70] sm:$0xff] }
 0xb85   : > { %3596 = vmatpush1.bf16.msra.mxu0 %v5167_v38  ;;  %3554 = vmatprep.subr.bf16.mxu1 %v5174_v50  ;;  %v5207_v38 = vcombine.low %v2837_v57, %v2841_v36  ;;  %v2731_v50 = vld [vmem:[%s7965_s10 + $0x38] sm:$0xff] }
 0xb86   : > { %3597 = vmatprep.subr.bf16.mxu0 %v5176_v59 }
 0xb88   : > { %3555 = vmatpush1.bf16.msra.mxu1 %v5173_v53  ;;  %v5099_v53 = vcombine.low %v2727_v32, %v2731_v50 }
 0xb89   : > { %3598 = vmatpush1.bf16.msra.mxu0 %v5175_v13  ;;  %3556 = vmatprep.subr.bf16.mxu1 %v5182_v2  ;;  %v5100_v13 = vcombine.high %v2727_v32, %v2731_v50 }
 0xb8a   : > { %3599 = vmatprep.subr.bf16.mxu0 %v5184_v54 }
 0xb8c   : > { %3557 = vmatpush1.bf16.msra.mxu1 %v5181_v4  ;;  %v2658_v4 = vld [vmem:[%s7963_s8] sm:$0x3] }
 0xb8d   : > { %3600 = vmatpush1.bf16.msra.mxu0 %v5183_v5  ;;  %3558 = vmatprep.subr.bf16.mxu1 %v5190_v10  ;;  %v2700_v34 = vrot.slane %v2658_v4, %v6335_v63  ;;  %v2696_v10 = vrot.slane %v2658_v4, %v6338_v0  ;;  %v2770_v4 = vld [vmem:[%s7965_s10 + $0x170] sm:$0xff] }
 0xb8e   : > { %3601 = vmatprep.subr.bf16.mxu0 %v5192_v14 }
 0xb90   : > { %3559 = vmatpush1.bf16.msra.mxu1 %v5189_v11  ;;  %v2715_v11 = vrot.slane %v2659_v24, %v6335_v63 }
 0xb91   : > { %3602 = vmatpush1.bf16.msra.mxu0 %v5191_v12  ;;  %3560 = vmatprep.subr.bf16.mxu1 %v5198_v25  ;;  %v2711_v12 = vrot.slane %v2659_v24, %v6338_v0 }
 0xb92   : > { %3603 = vmatprep.subr.bf16.mxu0 %v5200_v30  ;;  %v2734_v30 = vld [vmem:[%s7965_s10 + $0x50] sm:$0xff] }
 0xb94   : > { %3561 = vmatpush1.bf16.msra.mxu1 %v5197_v44 }
 0xb95   : > { %3604 = vmatpush1.bf16.msra.mxu0 %v5199_v28  ;;  %3562 = vmatprep.subr.bf16.mxu1 %v5206_v58  ;;  %v2742_v58 = vld [vmem:[%s7965_s10 + $0x90] sm:$0xff] }
 0xb98   : > { %3563 = vmatpush1.bf16.msra.mxu1 %v5205_v27 }
 0xbec   : > { %v2662_v21 = vpop.xlane.xlu0 %2661 }
 0xbed   : > { %v2666_v23 = vmul.f32 0.00390625, %v2662_v21  ;;  %v5208_v21 = vcombine.high %v2837_v57, %v2841_v36  ;;  %v5106_v36 = vcombine.high %v2734_v30, %v2738_v60 }
 0xbee   : > { %v2665_v20 = vpop.xlane.xlu1 %2664 }
 0xbef   : > { %v7086_v31 = vsub.f32 %v6950_v56, %v2666_v23  ;;  %v7089_v15 = vsub.f32 %v6953_v7, %v2666_v23  ;;  %v2667_v46 = vmul.f32 0.00390625, %v2665_v20  ;;  %v2844_v23 = vld [vmem:[%s7965_s10 + $0x3c0] sm:$0xff]  ;;  %3605 = vmatprep.subr.bf16.mxu0 %v5208_v21  ;;  %v2743_v21 = vld [vmem:[%s7965_s10 + $0x98] sm:$0xff] }
 0xbf0   : > { %v2848_v20 = vld [vmem:[%s7965_s10 + $0x3e0] sm:$0xff]  ;;  %3606 = vmatpush1.bf16.msra.mxu0 %v5207_v38  ;;  %v2746_v38 = vld [vmem:[%s7965_s10 + $0xb0] sm:$0xff] }
 0xbf1   : > { %v7092_v18 = vsub.f32 %v6956_v41, %v2667_v46  ;;  %v7095_v37 = vsub.f32 %v6959_v45, %v2667_v46  ;;  %v2672_v39 = vmul.f32 %v7086_v31, %v7086_v31  ;;  %v2673_v9 = vmul.f32 %v7089_v15, %v7089_v15  ;;  %v2845_v46 = vld [vmem:[%s7965_s10 + $0x3c8] sm:$0xff] }
 0xbf3   : > { %v2676_v51 = vadd.f32 %v2673_v9, %v2672_v39  ;;  %v2674_v40 = vmul.f32 %v7092_v18, %v7092_v18  ;;  %v2675_v42 = vmul.f32 %v7095_v37, %v7095_v37  ;;  %v5214_v39 = vcombine.high %v2844_v23, %v2848_v20  ;;  %v2849_v9 = vld [vmem:[%s7965_s10 + $0x3e8] sm:$0xff] }
 0xbf5   : > { %2677 = vadd.xlane.f32.xlu0 %v2676_v51  ;;  %v2679_v33 = vadd.f32 %v2675_v42, %v2674_v40  ;;  %v5213_v51 = vcombine.low %v2844_v23, %v2848_v20  ;;  %v5216_v40 = vcombine.high %v2845_v46, %v2849_v9  ;;  %3564 = vmatprep.subr.bf16.mxu1 %v5214_v39  ;;  %v2747_v23 = vld [vmem:[%s7965_s10 + $0xb8] sm:$0xff] }
 0xbf6   : > { %v5215_v42 = vcombine.low %v2845_v46, %v2849_v9  ;;  %v5105_v20 = vcombine.low %v2734_v30, %v2738_v60  ;;  %v5114_v39 = vcombine.high %v2742_v58, %v2746_v38  ;;  %v5116_v9 = vcombine.high %v2743_v21, %v2747_v23 }
 0xbf7   : > { %3607 = vmatprep.subr.bf16.mxu0 %v5216_v40  ;;  %3565 = vmatpush1.bf16.msra.mxu1 %v5213_v51  ;;  %v2750_v51 = vld [vmem:[%s7965_s10 + $0xd0] sm:$0xff]  ;;  %v5115_v32 = vcombine.low %v2743_v21, %v2747_v23 }
 0xbf8   : > { %3608 = vmatpush1.bf16.msra.mxu0 %v5215_v42  ;;  %v2754_v40 = vld [vmem:[%s7965_s10 + $0xf0] sm:$0xff]  ;;  %v2751_v42 = vld [vmem:[%s7965_s10 + $0xd8] sm:$0xff] }
 0xbf9   : > { %2680 = vadd.xlane.f32.xlu0 %v2679_v33  ;;  %v2726_v33 = vld [vmem:[%s7965_s10 + $0x10] sm:$0xff]  ;;  %3663 = vmatprep.subr.bf16.mxu0 %v5100_v13  ;;  %v2759_v13 = vld [vmem:[%s7965_s10 + $0x118] sm:$0xff] }
 0xbfa   : > { %v5098_v49 = vcombine.high %v2726_v33, %v2730_v43  ;;  %v5097_v52 = vcombine.low %v2726_v33, %v2730_v43  ;;  %v2755_v33 = vld [vmem:[%s7965_s10 + $0xf8] sm:$0xff]  ;;  %v5113_v43 = vcombine.low %v2742_v58, %v2746_v38 }
 0xbfb   : > { %v5124_v50 = vcombine.high %v2751_v42, %v2755_v33  ;;  %v2791_v58 = vld [vmem:[%s7965_s10 + $0x218] sm:$0xff] }
 0xbfc   : > { %3620 = vmatprep.subr.bf16.mxu1 %v5098_v49  ;;  %v5122_v49 = vcombine.high %v2750_v51, %v2754_v40 }
 0xc82   : > { %v2678_v59 = vpop.xlane.xlu0 %2677 }
 0xc83   : > { %v2682_v29 = vmul.f32 0.00390625, %v2678_v59  ;;  %v2763_v59 = vld [vmem:[%s7965_s10 + $0x138] sm:$0xff] }
 0xc84   : > { %v5131_v24 = vcombine.low %v2759_v13, %v2763_v59 }
 0xc85   : > { %v2684_v8 = vadd.f32 1e-05, %v2682_v29  ;;  %v5121_v29 = vcombine.low %v2750_v51, %v2754_v40 }
 0xc86   : > { %v2681_v17 = vpop.xlane.xlu0 %2680 }
 0xc87   : > { %6051 = vrsqrt.f32 %v2684_v8  ;;  %v2683_v2 = vmul.f32 0.00390625, %v2681_v17  ;;  %v5123_v8 = vcombine.low %v2751_v42, %v2755_v33 }
 0xc89   : > { %v2685_v3 = vadd.f32 1e-05, %v2683_v2  ;;  %v5132_v2 = vcombine.high %v2759_v13, %v2763_v59 }
 0xc8b   : > { %6053 = vrsqrt.f32 %v2685_v3  ;;  %v2766_v3 = vld [vmem:[%s7965_s10 + $0x150] sm:$0xff] }
 0xc91   : > { %v6052_v5 = vpop.eup %6051 }
 0xc92   : > { %v2688_v54 = vmul.f32 %v6052_v5, %v7086_v31  ;;  %v2689_v61 = vmul.f32 %v6052_v5, %v7089_v15  ;;  %v2767_v5 = vld [vmem:[%s7965_s10 + $0x158] sm:$0xff] }
 0xc94   : > { %v2704_v31 = vmul.f32 %v2700_v34, %v2689_v61  ;;  %v2703_v19 = vmul.f32 %v2696_v10, %v2688_v54  ;;  %v2771_v54 = vld [vmem:[%s7965_s10 + $0x178] sm:$0xff] }
 0xc95   : > { %v6054_v35 = vpop.eup %6053 }
 0xc96   : > { %v2690_v14 = vmul.f32 %v6054_v35, %v7092_v18  ;;  %v2691_v16 = vmul.f32 %v6054_v35, %v7095_v37  ;;  %v2719_v25 = vadd.f32 %v2715_v11, %v2704_v31  ;;  %v2718_v44 = vadd.f32 %v2711_v12, %v2703_v19  ;;  %v2735_v18 = vld [vmem:[%s7965_s10 + $0x58] sm:$0xff]  ;;  %v2774_v35 = vld [vmem:[%s7965_s10 + $0x190] sm:$0xff] }
 0xc97   : > { %v2739_v37 = vld [vmem:[%s7965_s10 + $0x78] sm:$0xff]  ;;  %v5139_v31 = vcombine.low %v2767_v5, %v2771_v54 }
 0xc98   : > { %v2706_v15 = vmul.f32 %v2700_v34, %v2691_v16  ;;  %v2705_v22 = vmul.f32 %v2696_v10, %v2690_v14  ;;  %v5108_v27 = vcombine.high %v2735_v18, %v2739_v37  ;;  %v5107_v46 = vcombine.low %v2735_v18, %v2739_v37  ;;  %v2779_v14 = vld [vmem:[%s7965_s10 + $0x1b8] sm:$0xff]  ;;  %v2790_v37 = vld [vmem:[%s7965_s10 + $0x210] sm:$0xff] }
 0xc99   : > { %v5138_v34 = vcombine.high %v2766_v3, %v2770_v4  ;;  %v5140_v10 = vcombine.high %v2767_v5, %v2771_v54  ;;  %v5137_v16 = vcombine.low %v2766_v3, %v2770_v4 }
 0xc9a   : > { %v2721_v26 = vadd.f32 %v2715_v11, %v2706_v15  ;;  %v2720_v28 = vadd.f32 %v2711_v12, %v2705_v22  ;;  %v2778_v11 = vld [vmem:[%s7965_s10 + $0x1b0] sm:$0xff]  ;;  %v2775_v12 = vld [vmem:[%s7965_s10 + $0x198] sm:$0xff] }
 0xc9b   : > { %v5146_v19 = vcombine.high %v2774_v35, %v2778_v11  ;;  %v5148_v15 = vcombine.high %v2775_v12, %v2779_v14  ;;  %v2782_v22 = vld [vmem:[%s7965_s10 + $0x1d0] sm:$0xff]  ;;  %v5147_v30 = vcombine.low %v2775_v12, %v2779_v14 }
 0xc9c   : > { %v2723_v55 = vpack.c.bf16 %v2721_v26, %v2719_v25  ;;  %v7215_v57 = vpack.c.bf16 %v2720_v28, %v2718_v44  ;;  %v2786_v25 = vld [vmem:[%s7965_s10 + $0x1f0] sm:$0xff]  ;;  %v2783_v26 = vld [vmem:[%s7965_s10 + $0x1d8] sm:$0xff]  ;;  %v5145_v28 = vcombine.low %v2774_v35, %v2778_v11 }
 0xc9d   : > { %v2787_v44 = vld [vmem:[%s7965_s10 + $0x1f8] sm:$0xff]  ;;  %v5154_v60 = vcombine.high %v2782_v22, %v2786_v25 }
 0xc9e   : > { %3566 = vmatprep.mubr.bf16.mxu1 %v2723_v55  ;;  %3609 = vmatprep.mubr.bf16.mxu0 %v2723_v55  ;;  %v5156_v18 = vcombine.high %v2783_v26, %v2787_v44  ;;  %v5155_v38 = vcombine.low %v2783_v26, %v2787_v44 }
 0xc9f   : > { %3567 = vmatmul.mubr.bf16.vlgmr.msra.gmra.mrb[32].mxu1 %v7215_v57  ;;  %3610 = vmatmul.mubr.bf16.vlgmr.msra.gmra.mrb[48].mxu0 %v7215_v57 }
 0xca0   : > { %3621 = vmatpush1.bf16.msra.mxu1 %v5097_v52  ;;  %3664 = vmatpush1.bf16.msra.mxu0 %v5099_v53  ;;  %v2758_v52 = vld [vmem:[%s7965_s10 + $0x110] sm:$0xff] }
 0xca1   : > { %3652 = vmatprep.mubr.bf16.mxu1 %v2723_v55  ;;  %3695 = vmatprep.mubr.bf16.mxu0 %v2723_v55  ;;  %v2762_v53 = vld [vmem:[%s7965_s10 + $0x130] sm:$0xff] }
 0xca2   : > { %3622 = vmatprep.subr.bf16.mxu1 %v5106_v36  ;;  %3665 = vmatprep.subr.bf16.mxu0 %v5108_v27  ;;  %v5130_v17 = vcombine.high %v2758_v52, %v2762_v53  ;;  %v5129_v61 = vcombine.low %v2758_v52, %v2762_v53  ;;  %v2794_v55 = vld [vmem:[%s7965_s10 + $0x230] sm:$0xff]  ;;  %v2795_v36 = vld [vmem:[%s7965_s10 + $0x238] sm:$0xff]  ;;  %v5153_v27 = vcombine.low %v2782_v22, %v2786_v25 }
 0xca3   : > { %v5162_v21 = vcombine.high %v2790_v37, %v2794_v55  ;;  %v5164_v23 = vcombine.high %v2791_v58, %v2795_v36  ;;  %v5161_v51 = vcombine.low %v2790_v37, %v2794_v55  ;;  %v5163_v40 = vcombine.low %v2791_v58, %v2795_v36 }
 0xca4   : > { %3623 = vmatpush1.bf16.msra.mxu1 %v5105_v20  ;;  %3666 = vmatpush1.bf16.msra.mxu0 %v5107_v46  ;;  %v2798_v20 = vld [vmem:[%s7965_s10 + $0x250] sm:$0xff] }
 0xca5   : > { %3624 = vmatprep.subr.bf16.mxu1 %v5114_v39  ;;  %3667 = vmatprep.subr.bf16.mxu0 %v5116_v9  ;;  %v2802_v46 = vld [vmem:[%s7965_s10 + $0x270] sm:$0xff]  ;;  %v2799_v39 = vld [vmem:[%s7965_s10 + $0x258] sm:$0xff] }
 0xca6   : > { %v2803_v9 = vld [vmem:[%s7965_s10 + $0x278] sm:$0xff]  ;;  %v5170_v42 = vcombine.high %v2798_v20, %v2802_v46  ;;  %v5169_v52 = vcombine.low %v2798_v20, %v2802_v46 }
 0xca7   : > { %v5172_v33 = vcombine.high %v2799_v39, %v2803_v9  ;;  %v5171_v53 = vcombine.low %v2799_v39, %v2803_v9 }
 0xca8   : > { %3625 = vmatpush1.bf16.msra.mxu1 %v5113_v43  ;;  %3668 = vmatpush1.bf16.msra.mxu0 %v5115_v32  ;;  %v2806_v43 = vld [vmem:[%s7965_s10 + $0x290] sm:$0xff] }
 0xca9   : > { %3626 = vmatprep.subr.bf16.mxu1 %v5122_v49  ;;  %3669 = vmatprep.subr.bf16.mxu0 %v5124_v50  ;;  %v2810_v32 = vld [vmem:[%s7965_s10 + $0x2b0] sm:$0xff]  ;;  %v2807_v49 = vld [vmem:[%s7965_s10 + $0x298] sm:$0xff] }
 0xcaa   : > { %v2811_v50 = vld [vmem:[%s7965_s10 + $0x2b8] sm:$0xff]  ;;  %v5178_v13 = vcombine.high %v2806_v43, %v2810_v32  ;;  %v5177_v3 = vcombine.low %v2806_v43, %v2810_v32 }
 0xcab   : > { %v5180_v59 = vcombine.high %v2807_v49, %v2811_v50  ;;  %v5179_v4 = vcombine.low %v2807_v49, %v2811_v50  ;;  %v5796_v43 = vld [vmem:[%s7967_s12 + $0x14] ss:$8 sps:$4 sm:$0xff]   ;;  %v5794_v32 = vld [vmem:[%s7967_s12 + $0x10] ss:$8 sps:$4 sm:$0xff]   ;;  %v5799_v49 = vld [vmem:[%s7967_s12 + $0x24] ss:$8 sps:$4 sm:$0xff]  }
 0xcac   : > { %3627 = vmatpush1.bf16.msra.mxu1 %v5121_v29  ;;  %3670 = vmatpush1.bf16.msra.mxu0 %v5123_v8  ;;  %v2814_v29 = vld [vmem:[%s7965_s10 + $0x2d0] sm:$0xff]  ;;  %v5797_v50 = vld [vmem:[%s7967_s12 + $0x20] ss:$8 sps:$4 sm:$0xff]  }
 0xcad   : > { %3628 = vmatprep.subr.bf16.mxu1 %v5130_v17  ;;  %3671 = vmatprep.subr.bf16.mxu0 %v5132_v2  ;;  %v2818_v8 = vld [vmem:[%s7965_s10 + $0x2f0] sm:$0xff]  ;;  %v2815_v17 = vld [vmem:[%s7965_s10 + $0x2d8] sm:$0xff] }
 0xcae   : > { %v2819_v2 = vld [vmem:[%s7965_s10 + $0x2f8] sm:$0xff]  ;;  %v5186_v5 = vcombine.high %v2814_v29, %v2818_v8  ;;  %v5185_v35 = vcombine.low %v2814_v29, %v2818_v8  ;;  %v5811_v8 = vld [vmem:[%s7967_s12 + $0x64] ss:$8 sps:$4 sm:$0xff]  }
 0xcaf   : > { %v5188_v54 = vcombine.high %v2815_v17, %v2819_v2  ;;  %v5187_v11 = vcombine.low %v2815_v17, %v2819_v2  ;;  %v5806_v29 = vld [vmem:[%s7967_s12 + $0x50] ss:$8 sps:$4 sm:$0xff]   ;;  %v5809_v17 = vld [vmem:[%s7967_s12 + $0x60] ss:$8 sps:$4 sm:$0xff]   ;;  %v5814_v2 = vld [vmem:[%s7967_s12 + $0x74] ss:$8 sps:$4 sm:$0xff]  }
 0xcb0   : > { %3629 = vmatpush1.bf16.msra.mxu1 %v5129_v61  ;;  %3672 = vmatpush1.bf16.msra.mxu0 %v5131_v24  ;;  %v2822_v61 = vld [vmem:[%s7965_s10 + $0x310] sm:$0xff] }
 0xcb1   : > { %3630 = vmatprep.subr.bf16.mxu1 %v5138_v34  ;;  %3673 = vmatprep.subr.bf16.mxu0 %v5140_v10  ;;  %v2826_v24 = vld [vmem:[%s7965_s10 + $0x330] sm:$0xff]  ;;  %v2823_v34 = vld [vmem:[%s7965_s10 + $0x318] sm:$0xff] }
 0xcb2   : > { %v2827_v10 = vld [vmem:[%s7965_s10 + $0x338] sm:$0xff]  ;;  %v5194_v12 = vcombine.high %v2822_v61, %v2826_v24  ;;  %v5193_v22 = vcombine.low %v2822_v61, %v2826_v24  ;;  %v5823_v24 = vld [vmem:[%s7967_s12 + $0xa4] ss:$8 sps:$4 sm:$0xff]  }
 0xcb3   : > { %v5196_v14 = vcombine.high %v2823_v34, %v2827_v10  ;;  %v5195_v25 = vcombine.low %v2823_v34, %v2827_v10  ;;  %v5818_v61 = vld [vmem:[%s7967_s12 + $0x90] ss:$8 sps:$4 sm:$0xff]   ;;  %v5821_v34 = vld [vmem:[%s7967_s12 + $0xa0] ss:$8 sps:$4 sm:$0xff]   ;;  %v5826_v10 = vld [vmem:[%s7967_s12 + $0xb4] ss:$8 sps:$4 sm:$0xff]  }
 0xcb4   : > { %3631 = vmatpush1.bf16.msra.mxu1 %v5137_v16  ;;  %3674 = vmatpush1.bf16.msra.mxu0 %v5139_v31  ;;  %v2830_v16 = vld [vmem:[%s7965_s10 + $0x350] sm:$0xff] }
 0xcb5   : > { %3632 = vmatprep.subr.bf16.mxu1 %v5146_v19  ;;  %3675 = vmatprep.subr.bf16.mxu0 %v5148_v15  ;;  %v2834_v31 = vld [vmem:[%s7965_s10 + $0x370] sm:$0xff]  ;;  %v2831_v19 = vld [vmem:[%s7965_s10 + $0x358] sm:$0xff] }
 0xcb6   : > { %v2835_v15 = vld [vmem:[%s7965_s10 + $0x378] sm:$0xff]  ;;  %v5202_v26 = vcombine.high %v2830_v16, %v2834_v31  ;;  %v5201_v37 = vcombine.low %v2830_v16, %v2834_v31  ;;  %v5835_v31 = vld [vmem:[%s7967_s12 + $0xe4] ss:$8 sps:$4 sm:$0xff]  }
 0xcb7   : > { %v5204_v44 = vcombine.high %v2831_v19, %v2835_v15  ;;  %v5203_v55 = vcombine.low %v2831_v19, %v2835_v15  ;;  %v5830_v16 = vld [vmem:[%s7967_s12 + $0xd0] ss:$8 sps:$4 sm:$0xff]   ;;  %v5833_v19 = vld [vmem:[%s7967_s12 + $0xe0] ss:$8 sps:$4 sm:$0xff]   ;;  %v5838_v15 = vld [vmem:[%s7967_s12 + $0xf4] ss:$8 sps:$4 sm:$0xff]  }
 0xcb8   : > { %3633 = vmatpush1.bf16.msra.mxu1 %v5145_v28  ;;  %3676 = vmatpush1.bf16.msra.mxu0 %v5147_v30  ;;  %v2838_v28 = vld [vmem:[%s7965_s10 + $0x390] sm:$0xff] }
 0xcb9   : > { %3634 = vmatprep.subr.bf16.mxu1 %v5154_v60  ;;  %3677 = vmatprep.subr.bf16.mxu0 %v5156_v18  ;;  %v2842_v30 = vld [vmem:[%s7965_s10 + $0x3b0] sm:$0xff]  ;;  %v2839_v60 = vld [vmem:[%s7965_s10 + $0x398] sm:$0xff] }
 0xcba   : > { %v2843_v18 = vld [vmem:[%s7965_s10 + $0x3b8] sm:$0xff]  ;;  %v5210_v58 = vcombine.high %v2838_v28, %v2842_v30  ;;  %v5209_v20 = vcombine.low %v2838_v28, %v2842_v30 }
 0xcbb   : > { %v5212_v36 = vcombine.high %v2839_v60, %v2843_v18  ;;  %v5211_v46 = vcombine.low %v2839_v60, %v2843_v18 }
 0xcbc   : > { %3635 = vmatpush1.bf16.msra.mxu1 %v5153_v27  ;;  %3678 = vmatpush1.bf16.msra.mxu0 %v5155_v38  ;;  %v2846_v27 = vld [vmem:[%s7965_s10 + $0x3d0] sm:$0xff] }
 0xcbd   : > { %3636 = vmatprep.subr.bf16.mxu1 %v5162_v21  ;;  %3679 = vmatprep.subr.bf16.mxu0 %v5164_v23  ;;  %v2850_v38 = vld [vmem:[%s7965_s10 + $0x3f0] sm:$0xff]  ;;  %v2847_v21 = vld [vmem:[%s7965_s10 + $0x3d8] sm:$0xff] }
 0xcbe   : > { %v2851_v23 = vld [vmem:[%s7965_s10 + $0x3f8] sm:$0xff]  ;;  %v5218_v39 = vcombine.high %v2846_v27, %v2850_v38 }
 0xcbf   : > { %v5220_v9 = vcombine.high %v2847_v21, %v2851_v23 }
 0xcc0   : > { %3637 = vmatpush1.bf16.msra.mxu1 %v5161_v51  ;;  %3680 = vmatpush1.bf16.msra.mxu0 %v5163_v40  ;;  %v5217_v51 = vcombine.low %v2846_v27, %v2850_v38  ;;  %v5219_v40 = vcombine.low %v2847_v21, %v2851_v23 }
 0xcc1   : > { %3638 = vmatprep.subr.bf16.mxu1 %v5170_v42  ;;  %3681 = vmatprep.subr.bf16.mxu0 %v5172_v33  ;;  %v5793_v42 = vld [vmem:[%s7967_s12 + $0x4] ss:$8 sps:$4 sm:$0xff]   ;;  %v5791_v33 = vld [vmem:[%s7967_s12] ss:$8 sps:$4 sm:$0xff]  }
 0xcc4   : > { %3639 = vmatpush1.bf16.msra.mxu1 %v5169_v52  ;;  %3682 = vmatpush1.bf16.msra.mxu0 %v5171_v53  ;;  %v5800_v52 = vld [vmem:[%s7967_s12 + $0x30] ss:$8 sps:$4 sm:$0xff]   ;;  %v5805_v53 = vld [vmem:[%s7967_s12 + $0x44] ss:$8 sps:$4 sm:$0xff]  }
 0xcc5   : > { %3640 = vmatprep.subr.bf16.mxu1 %v5178_v13  ;;  %3683 = vmatprep.subr.bf16.mxu0 %v5180_v59  ;;  %v5803_v13 = vld [vmem:[%s7967_s12 + $0x40] ss:$8 sps:$4 sm:$0xff]   ;;  %v5808_v59 = vld [vmem:[%s7967_s12 + $0x54] ss:$8 sps:$4 sm:$0xff]  }
 0xcc8   : > { %3641 = vmatpush1.bf16.msra.mxu1 %v5177_v3  ;;  %3684 = vmatpush1.bf16.msra.mxu0 %v5179_v4  ;;  %v5812_v3 = vld [vmem:[%s7967_s12 + $0x70] ss:$8 sps:$4 sm:$0xff]   ;;  %v5817_v4 = vld [vmem:[%s7967_s12 + $0x84] ss:$8 sps:$4 sm:$0xff]  }
 0xcc9   : > { %3642 = vmatprep.subr.bf16.mxu1 %v5186_v5  ;;  %3685 = vmatprep.subr.bf16.mxu0 %v5188_v54  ;;  %v5815_v5 = vld [vmem:[%s7967_s12 + $0x80] ss:$8 sps:$4 sm:$0xff]   ;;  %v5820_v54 = vld [vmem:[%s7967_s12 + $0x94] ss:$8 sps:$4 sm:$0xff]  }
 0xccc   : > { %3643 = vmatpush1.bf16.msra.mxu1 %v5185_v35  ;;  %3686 = vmatpush1.bf16.msra.mxu0 %v5187_v11  ;;  %v5824_v35 = vld [vmem:[%s7967_s12 + $0xb0] ss:$8 sps:$4 sm:$0xff]   ;;  %v5829_v11 = vld [vmem:[%s7967_s12 + $0xc4] ss:$8 sps:$4 sm:$0xff]  }
 0xccd   : > { %3644 = vmatprep.subr.bf16.mxu1 %v5194_v12  ;;  %3687 = vmatprep.subr.bf16.mxu0 %v5196_v14  ;;  %v5827_v12 = vld [vmem:[%s7967_s12 + $0xc0] ss:$8 sps:$4 sm:$0xff]   ;;  %v5832_v14 = vld [vmem:[%s7967_s12 + $0xd4] ss:$8 sps:$4 sm:$0xff]  }
 0xcd0   : > { %3645 = vmatpush1.bf16.msra.mxu1 %v5193_v22  ;;  %3688 = vmatpush1.bf16.msra.mxu0 %v5195_v25  ;;  %v5836_v22 = vld [vmem:[%s7967_s12 + $0xf0] ss:$8 sps:$4 sm:$0xff]   ;;  %v5841_v25 = vld [vmem:[%s7967_s12 + $0x104] ss:$8 sps:$4 sm:$0xff]  }
 0xcd1   : > { %3646 = vmatprep.subr.bf16.mxu1 %v5202_v26  ;;  %3689 = vmatprep.subr.bf16.mxu0 %v5204_v44  ;;  %v7491_v26 = vld [vmem:[%s7966_s11] sm:$0xff] }
 0xcd2   : > { %v2857_v44 = vrot.slane %v7491_v26, %v6338_v0  ;;  %v2865_v28 = vrot.slane %v7491_v26, %v714_v47  ;;  %v2861_v30 = vrot.slane %v7491_v26, %v6335_v63  ;;  %v2869_v60 = vrot.slane %v7491_v26, %v718_v48 }
 0xcd4   : > { %3647 = vmatpush1.bf16.msra.mxu1 %v5201_v37  ;;  %3690 = vmatpush1.bf16.msra.mxu0 %v5203_v55 }
 0xcd5   : > { %3648 = vmatprep.subr.bf16.mxu1 %v5210_v58  ;;  %3691 = vmatprep.subr.bf16.mxu0 %v5212_v36 }
 0xcd8   : > { %3649 = vmatpush1.bf16.msra.mxu1 %v5209_v20  ;;  %3692 = vmatpush1.bf16.msra.mxu0 %v5211_v46 }
 0xcd9   : > { %3650 = vmatprep.subr.bf16.mxu1 %v5218_v39  ;;  %3693 = vmatprep.subr.bf16.mxu0 %v5220_v9 }
 0xcdc   : > { %3651 = vmatpush1.bf16.msra.mxu1 %v5217_v51  ;;  %3694 = vmatpush1.bf16.msra.mxu0 %v5219_v40 }
 0xcdd   : > { %4638 = vmatprep.subr.bf16.mxu1 %v5793_v42 }
 0xcdf   : > { %3653 = vmatmul.mubr.bf16.vlgmr.msra.gmra.mrb[36].mxu1 %v7215_v57  ;;  %3696 = vmatmul.mubr.bf16.vlgmr.msra.gmra.mrb[52].mxu0 %v7215_v57  ;;  %v5802_v57 = vld [vmem:[%s7967_s12 + $0x34] ss:$8 sps:$4 sm:$0xff]  }
 0xce0   : > { %4639 = vmatpush1.bf16.msra.mxu1 %v5791_v33 }
 0xce1   : > { %4640 = vmatprep.subr.bf16.mxu1 %v5796_v43 }
 0xce4   : > { %4641 = vmatpush1.bf16.msra.mxu1 %v5794_v32 }
 0xce5   : > { %4642 = vmatprep.subr.bf16.mxu1 %v5799_v49 }
 0xce8   : > { %4643 = vmatpush1.bf16.msra.mxu1 %v5797_v50 }
 0xce9   : > { %4644 = vmatprep.subr.bf16.mxu1 %v5802_v57 }
 0xcec   : > { %4645 = vmatpush1.bf16.msra.mxu1 %v5800_v52 }
 0xced   : > { %4646 = vmatprep.subr.bf16.mxu1 %v5805_v53 }
 0xcf0   : > { %4647 = vmatpush1.bf16.msra.mxu1 %v5803_v13 }
 0xcf1   : > { %4648 = vmatprep.subr.bf16.mxu1 %v5808_v59 }
 0xcf4   : > { %4649 = vmatpush1.bf16.msra.mxu1 %v5806_v29 }
 0xcf5   : > { %4650 = vmatprep.subr.bf16.mxu1 %v5811_v8 }
 0xcf8   : > { %4651 = vmatpush1.bf16.msra.mxu1 %v5809_v17 }
 0xcf9   : > { %4652 = vmatprep.subr.bf16.mxu1 %v5814_v2 }
 0xcfc   : > { %4653 = vmatpush1.bf16.msra.mxu1 %v5812_v3 }
 0xcfd   : > { %4654 = vmatprep.subr.bf16.mxu1 %v5817_v4 }
 0xd00   : > { %4655 = vmatpush1.bf16.msra.mxu1 %v5815_v5 }
 0xd01   : > { %4656 = vmatprep.subr.bf16.mxu1 %v5820_v54 }
 0xd04   : > { %4657 = vmatpush1.bf16.msra.mxu1 %v5818_v61 }
 0xd05   : > { %4658 = vmatprep.subr.bf16.mxu1 %v5823_v24 }
 0xd08   : > { %4659 = vmatpush1.bf16.msra.mxu1 %v5821_v34 }
 0xd09   : > { %4660 = vmatprep.subr.bf16.mxu1 %v5826_v10 }
 0xd0c   : > { %4661 = vmatpush1.bf16.msra.mxu1 %v5824_v35 }
 0xd0d   : > { %4662 = vmatprep.subr.bf16.mxu1 %v5829_v11 }
 0xd10   : > { %4663 = vmatpush1.bf16.msra.mxu1 %v5827_v12 }
 0xd11   : > { %4664 = vmatprep.subr.bf16.mxu1 %v5832_v14 }
 0xd14   : > { %4665 = vmatpush1.bf16.msra.mxu1 %v5830_v16 }
 0xd15   : > { %4666 = vmatprep.subr.bf16.mxu1 %v5835_v31 }
 0xd18   : > { %4667 = vmatpush1.bf16.msra.mxu1 %v5833_v19 }
 0xd19   : > { %4668 = vmatprep.subr.bf16.mxu1 %v5838_v15 }
 0xd1c   : > { %4669 = vmatpush1.bf16.msra.mxu1 %v5836_v22 }
 0xd1d   : > { %4681 = vmatprep.subr.bf16.mxu1 %v5841_v25 }
 0xd72   : > { %v3568_v18 = vpop.f32.mrb[32].mxu1  ;;  %v3611_v37 = vpop.f32.mrb[48].mxu0 }
 0xd73   : > { %v7503_v55 = vadd.f32 %v3568_v18, %v2857_v44  ;;  %v7505_v58 = vadd.f32 %v3611_v37, %v2865_v28  ;;  %v3570_v36 = vpop.f32.mrb[33].mxu1  ;;  %v3613_v27 = vpop.f32.mrb[49].mxu0 }
 0xd74   : > { %v7507_v38 = vadd.f32 %v3570_v36, %v2861_v30  ;;  %v7509_v21 = vadd.f32 %v3613_v27, %v2869_v60  ;;  %v3572_v47 = vpop.f32.mrb[34].mxu1  ;;  %v3615_v23 = vpop.f32.mrb[50].mxu0 }
 0xd75   : > { %v3722_v20 = vmul.f32 0.044715, %v7503_v55  ;;  %v3724_v46 = vmul.f32 0.044715, %v7505_v58  ;;  %v3573_v39 = vadd.f32 %v3572_v47, %v2857_v44  ;;  %v3616_v48 = vadd.f32 %v3615_v23, %v2865_v28  ;;  %v3574_v9 = vpop.f32.mrb[35].mxu1  ;;  %v3617_v51 = vpop.f32.mrb[51].mxu0 }
 0xd76   : > { %v3723_v40 = vmul.f32 0.044715, %v7507_v38  ;;  %v3725_v42 = vmul.f32 0.044715, %v7509_v21  ;;  %v7515_v33 = vadd.f32 %v3574_v9, %v2861_v30  ;;  %v7517_v43 = vadd.f32 %v3617_v51, %v2869_v60 }
 0xd77   : > { %v3738_v32 = vmul.f32 %v3722_v20, %v7503_v55  ;;  %v3740_v49 = vmul.f32 %v3724_v46, %v7505_v58  ;;  %v3730_v50 = vmul.f32 0.044715, %v3573_v39  ;;  %v3732_v57 = vmul.f32 0.044715, %v3616_v48 }
 0xd78   : > { %v3739_v52 = vmul.f32 %v3723_v40, %v7507_v38  ;;  %v3741_v53 = vmul.f32 %v3725_v42, %v7509_v21  ;;  %v3731_v13 = vmul.f32 0.044715, %v7515_v33  ;;  %v3733_v59 = vmul.f32 0.044715, %v7517_v43 }
 0xd79   : > { %v3754_v29 = vmul.f32 %v3738_v32, %v7503_v55  ;;  %v3756_v8 = vmul.f32 %v3740_v49, %v7505_v58  ;;  %v3746_v17 = vmul.f32 %v3730_v50, %v3573_v39  ;;  %v3748_v2 = vmul.f32 %v3732_v57, %v3616_v48 }
 0xd7a   : > { %v3755_v3 = vmul.f32 %v3739_v52, %v7507_v38  ;;  %v3747_v4 = vmul.f32 %v3731_v13, %v7515_v33  ;;  %v3749_v5 = vmul.f32 %v3733_v59, %v7517_v43  ;;  %v3757_v10 = vmul.f32 %v3741_v53, %v7509_v21 }
 0xd7b   : > { %v3770_v54 = vadd.f32 %v3754_v29, %v7503_v55  ;;  %v3772_v61 = vadd.f32 %v3756_v8, %v7505_v58  ;;  %v3762_v24 = vmul.f32 %v3746_v17, %v3573_v39  ;;  %v3764_v34 = vmul.f32 %v3748_v2, %v3616_v48 }
 0xd7c   : > { %v3763_v35 = vmul.f32 %v3747_v4, %v7515_v33  ;;  %v3765_v11 = vmul.f32 %v3749_v5, %v7517_v43  ;;  %v3771_v19 = vadd.f32 %v3755_v3, %v7507_v38  ;;  %v3773_v30 = vadd.f32 %v3757_v10, %v7509_v21 }
 0xd7d   : > { %v3786_v12 = vmul.f32 0.7978846, %v3770_v54  ;;  %v3788_v14 = vmul.f32 0.7978846, %v3772_v61  ;;  %v3778_v16 = vadd.f32 %v3762_v24, %v3573_v39  ;;  %v3780_v31 = vadd.f32 %v3764_v34, %v3616_v48 }
 0xd7e   : > { %v3779_v15 = vadd.f32 %v3763_v35, %v7515_v33  ;;  %v3787_v44 = vmul.f32 0.7978846, %v3771_v19  ;;  %v3781_v60 = vadd.f32 %v3765_v11, %v7517_v43  ;;  %v3789_v18 = vmul.f32 0.7978846, %v3773_v30  ;;  %v5842_v35 = vld [vmem:[%s7967_s12 + $0x110] ss:$8 sps:$4 sm:$0xff]  }
 0xd7f   : > { %6055 = vtanh.f32 %v3786_v12  ;;  %v3794_v22 = vmul.f32 0.7978846, %v3778_v16  ;;  %v3796_v25 = vmul.f32 0.7978846, %v3780_v31  ;;  %v3706_v9 = vmul.f32 0.5, %v7503_v55 }
 0xd80   : > { %6057 = vtanh.f32 %v3788_v14  ;;  %v3795_v28 = vmul.f32 0.7978846, %v3779_v15  ;;  %v3797_v37 = vmul.f32 0.7978846, %v3781_v60  ;;  %v3714_v51 = vmul.f32 0.5, %v3573_v39 }
 0xd81   : > { %6059 = vtanh.f32 %v3794_v22  ;;  %v3708_v32 = vmul.f32 0.5, %v7505_v58  ;;  %v3716_v49 = vmul.f32 0.5, %v3616_v48  ;;  %v3707_v52 = vmul.f32 0.5, %v7507_v38  ;;  %v5847_v11 = vld [vmem:[%s7967_s12 + $0x124] ss:$8 sps:$4 sm:$0xff]  }
 0xd82   : > { %6061 = vtanh.f32 %v3796_v25  ;;  %v3715_v8 = vmul.f32 0.5, %v7515_v33  ;;  %v3709_v58 = vmul.f32 0.5, %v7509_v21  ;;  %v3717_v48 = vmul.f32 0.5, %v7517_v43  ;;  %v5839_v33 = vld [vmem:[%s7967_s12 + $0x100] ss:$8 sps:$4 sm:$0xff]  }
 0xd83   : > { %6063 = vtanh.f32 %v3787_v44  ;;  %v5844_v21 = vld [vmem:[%s7967_s12 + $0x114] ss:$8 sps:$4 sm:$0xff]   ;;  %v5845_v12 = vld [vmem:[%s7967_s12 + $0x120] ss:$8 sps:$4 sm:$0xff]   ;;  %v5848_v16 = vld [vmem:[%s7967_s12 + $0x130] ss:$8 sps:$4 sm:$0xff]  }
 0xd84   : > { %6065 = vtanh.f32 %v3795_v28  ;;  %v5850_v14 = vld [vmem:[%s7967_s12 + $0x134] ss:$8 sps:$4 sm:$0xff]   ;;  %v5853_v31 = vld [vmem:[%s7967_s12 + $0x144] ss:$8 sps:$4 sm:$0xff]   ;;  %v5851_v19 = vld [vmem:[%s7967_s12 + $0x140] ss:$8 sps:$4 sm:$0xff]  }
 0xd85   : > { %6067 = vtanh.f32 %v3789_v18  ;;  %v5856_v15 = vld [vmem:[%s7967_s12 + $0x154] ss:$8 sps:$4 sm:$0xff]   ;;  %v5854_v22 = vld [vmem:[%s7967_s12 + $0x150] ss:$8 sps:$4 sm:$0xff]   ;;  %v5859_v25 = vld [vmem:[%s7967_s12 + $0x164] ss:$8 sps:$4 sm:$0xff]  }
 0xd86   : > { %6069 = vtanh.f32 %v3797_v37  ;;  %v5857_v44 = vld [vmem:[%s7967_s12 + $0x160] ss:$8 sps:$4 sm:$0xff]   ;;  %v2880_v28 = vsub.s32 6, %v6332_v62  ;;  %v5862_v30 = vld [vmem:[%s7967_s12 + $0x174] ss:$8 sps:$4 sm:$0xff]   ;;  %v2884_v60 = vsub.s32 7, %v6332_v62  ;;  %v2873_v37 = vrot.slane %v7491_v26, %v722_v1 }
 0xd87   : > { %v5860_v18 = vld [vmem:[%s7967_s12 + $0x170] ss:$8 sps:$4 sm:$0xff]   ;;  %v5863_v62 = vld [vmem:[%s7967_s12 + $0x180] ss:$8 sps:$4 sm:$0xff]  }
 0xd89   : > { %v6056_v36 = vpop.eup %6055 }
 0xd8a   : > { %v6058_v27 = vpop.eup %6057  ;;  %v3818_v47 = vadd.f32 1.0, %v6056_v36  ;;  %v2881_v36 = vrot.slane %v7491_v26, %v2880_v28 }
 0xd8b   : > { %v6060_v23 = vpop.eup %6059  ;;  %v3820_v20 = vadd.f32 1.0, %v6058_v27  ;;  %v2877_v27 = vrot.slane %v7491_v26, %v726_v6 }
 0xd8c   : > { %v6062_v46 = vpop.eup %6061  ;;  %v3826_v40 = vadd.f32 1.0, %v6060_v23  ;;  %v3834_v13 = vmul.f32 %v3818_v47, %v3706_v9  ;;  %v2885_v47 = vrot.slane %v7491_v26, %v2884_v60  ;;  %v5865_v23 = vld [vmem:[%s7967_s12 + $0x184] ss:$8 sps:$4 sm:$0xff]  }
 0xd8d   : > { %v6064_v42 = vpop.eup %6063  ;;  %v3828_v50 = vadd.f32 1.0, %v6062_v46  ;;  %v7543_v2 = vmul.f32 %v3820_v20, %v3708_v32 }
 0xd8e   : > { %v6066_v57 = vpop.eup %6065  ;;  %v3819_v53 = vadd.f32 1.0, %v6064_v42  ;;  %v3842_v59 = vmul.f32 %v3826_v40, %v3714_v51 }
 0xd8f   : > { %v6068_v29 = vpop.eup %6067  ;;  %v3827_v17 = vadd.f32 1.0, %v6066_v57  ;;  %v7545_v55 = vmul.f32 %v3828_v50, %v3716_v49  ;;  %v5868_v49 = vld [vmem:[%s7967_s12 + $0x194] ss:$8 sps:$4 sm:$0xff]  }
 0xd90   : > { %v6070_v39 = vpop.eup %6069  ;;  %v3850_v3 = vpack.c.bf16 %v3842_v59, %v3834_v13  ;;  %v3821_v4 = vadd.f32 1.0, %v6068_v29  ;;  %v3835_v5 = vmul.f32 %v3819_v53, %v3707_v52 }
 0xd91   : > { %v3843_v38 = vmul.f32 %v3827_v17, %v3715_v8  ;;  %v3829_v54 = vadd.f32 1.0, %v6070_v39  ;;  %v3852_v61 = vpack.c.bf16 %v7545_v55, %v7543_v2  ;;  %v5898_v2 = vld [vmem:[%s7967_s12 + $0x234] ss:$8 sps:$4 sm:$0xff]   ;;  %v5896_v55 = vld [vmem:[%s7967_s12 + $0x230] ss:$8 sps:$4 sm:$0xff]  }
 0xd92   : > { %v3837_v34 = vmul.f32 %v3821_v4, %v3709_v58 }
 0xd93   : > { %v3851_v24 = vpack.c.bf16 %v3843_v38, %v3835_v5  ;;  %v3845_v10 = vmul.f32 %v3829_v54, %v3717_v48  ;;  %v5866_v5 = vld [vmem:[%s7967_s12 + $0x190] ss:$8 sps:$4 sm:$0xff]  }
 0xd95   : > { %4670 = vmatprep.mubr.bf16.mxu1 %v3851_v24  ;;  %v3853_v43 = vpack.c.bf16 %v3845_v10, %v3837_v34  ;;  %v5871_v34 = vld [vmem:[%s7967_s12 + $0x1a4] ss:$8 sps:$4 sm:$0xff]  }
 0xd96   : > { %4671 = vmatmul.mubr.bf16.vlgmr.msra.gmra.mrb[40].mxu1 %v3850_v3 }
 0xd97   : > { %4682 = vmatpush1.bf16.msra.mxu1 %v5839_v33  ;;  %4713 = vmatprep.mubr.bf16.mxu1 %v3853_v43 }
 0xd98   : > { %4683 = vmatprep.subr.bf16.mxu1 %v5844_v21 }
 0xd9b   : > { %4684 = vmatpush1.bf16.msra.mxu1 %v5842_v35 }
 0xd9c   : > { %4685 = vmatprep.subr.bf16.mxu1 %v5847_v11 }
 0xd9f   : > { %4686 = vmatpush1.bf16.msra.mxu1 %v5845_v12 }
 0xda0   : > { %4687 = vmatprep.subr.bf16.mxu1 %v5850_v14 }
 0xda3   : > { %4688 = vmatpush1.bf16.msra.mxu1 %v5848_v16 }
 0xda4   : > { %4689 = vmatprep.subr.bf16.mxu1 %v5853_v31 }
 0xda7   : > { %4690 = vmatpush1.bf16.msra.mxu1 %v5851_v19 }
 0xda8   : > { %4691 = vmatprep.subr.bf16.mxu1 %v5856_v15 }
 0xdab   : > { %4692 = vmatpush1.bf16.msra.mxu1 %v5854_v22  ;;  %v5869_v22 = vld [vmem:[%s7967_s12 + $0x1a0] ss:$8 sps:$4 sm:$0xff]  }
 0xdac   : > { %4693 = vmatprep.subr.bf16.mxu1 %v5859_v25 }
 0xdaf   : > { %4694 = vmatpush1.bf16.msra.mxu1 %v5857_v44 }
 0xdb0   : > { %4695 = vmatprep.subr.bf16.mxu1 %v5862_v30  ;;  %v5874_v30 = vld [vmem:[%s7967_s12 + $0x1b4] ss:$8 sps:$4 sm:$0xff]  }
 0xdb2   : > { %v3654_v20 = vpop.f32.mrb[36].mxu1  ;;  %v3697_v46 = vpop.f32.mrb[52].mxu0 }
 0xdb3   : > { %4696 = vmatpush1.bf16.msra.mxu1 %v5860_v18  ;;  %v7609_v9 = vadd.f32 %v3654_v20, %v2873_v37  ;;  %v7611_v51 = vadd.f32 %v3697_v46, %v2881_v36  ;;  %v3656_v1 = vpop.f32.mrb[37].mxu1  ;;  %v3699_v40 = vpop.f32.mrb[53].mxu0  ;;  %v5872_v46 = vld [vmem:[%s7967_s12 + $0x1b0] ss:$8 sps:$4 sm:$0xff]  }
 0xdb4   : > { %v7616_v6 = vadd.f32 %v3656_v1, %v2877_v27  ;;  %v7618_v26 = vadd.f32 %v3699_v40, %v2885_v47  ;;  %v3658_v42 = vpop.f32.mrb[38].mxu1  ;;  %v3701_v32 = vpop.f32.mrb[54].mxu0  ;;  %4697 = vmatprep.subr.bf16.mxu1 %v5865_v23  ;;  %v5877_v1 = vld [vmem:[%s7967_s12 + $0x1c4] ss:$8 sps:$4 sm:$0xff]  }
 0xdb5   : > { %v3726_v50 = vmul.f32 0.044715, %v7609_v9  ;;  %v3728_v57 = vmul.f32 0.044715, %v7611_v51  ;;  %v7625_v52 = vadd.f32 %v3658_v42, %v2873_v37  ;;  %v7627_v53 = vadd.f32 %v3701_v32, %v2881_v36  ;;  %v3660_v13 = vpop.f32.mrb[39].mxu1  ;;  %v3703_v59 = vpop.f32.mrb[55].mxu0 }
 0xdb6   : > { %v3727_v29 = vmul.f32 0.044715, %v7616_v6  ;;  %v3729_v8 = vmul.f32 0.044715, %v7618_v26  ;;  %v7631_v17 = vadd.f32 %v3660_v13, %v2877_v27  ;;  %v7633_v39 = vadd.f32 %v3703_v59, %v2885_v47  ;;  %v5880_v13 = vld [vmem:[%s7967_s12 + $0x1d4] ss:$8 sps:$4 sm:$0xff]  }
 0xdb7   : > { %v3742_v3 = vmul.f32 %v3726_v50, %v7609_v9  ;;  %v3744_v58 = vmul.f32 %v3728_v57, %v7611_v51  ;;  %v3734_v48 = vmul.f32 0.044715, %v7625_v52  ;;  %v3736_v4 = vmul.f32 0.044715, %v7627_v53  ;;  %4698 = vmatpush1.bf16.msra.mxu1 %v5863_v62  ;;  %v5878_v59 = vld [vmem:[%s7967_s12 + $0x1d0] ss:$8 sps:$4 sm:$0xff]  }
 0xdb8   : > { %v3743_v38 = vmul.f32 %v3727_v29, %v7616_v6  ;;  %v3745_v54 = vmul.f32 %v3729_v8, %v7618_v26  ;;  %v3735_v24 = vmul.f32 0.044715, %v7631_v17  ;;  %v3737_v33 = vmul.f32 0.044715, %v7633_v39  ;;  %4699 = vmatprep.subr.bf16.mxu1 %v5868_v49  ;;  %v5875_v49 = vld [vmem:[%s7967_s12 + $0x1c0] ss:$8 sps:$4 sm:$0xff]  }
 0xdb9   : > { %v3758_v10 = vmul.f32 %v3742_v3, %v7609_v9  ;;  %v3760_v21 = vmul.f32 %v3744_v58, %v7611_v51  ;;  %v3750_v43 = vmul.f32 %v3734_v48, %v7625_v52  ;;  %v3752_v35 = vmul.f32 %v3736_v4, %v7627_v53  ;;  %v5883_v29 = vld [vmem:[%s7967_s12 + $0x1e4] ss:$8 sps:$4 sm:$0xff]   ;;  %v5881_v4 = vld [vmem:[%s7967_s12 + $0x1e0] ss:$8 sps:$4 sm:$0xff]  }
 0xdba   : > { %v3759_v11 = vmul.f32 %v3743_v38, %v7616_v6  ;;  %v3751_v12 = vmul.f32 %v3735_v24, %v7631_v17  ;;  %v3753_v14 = vmul.f32 %v3737_v33, %v7633_v39  ;;  %v3761_v25 = vmul.f32 %v3745_v54, %v7618_v26  ;;  %v5886_v54 = vld [vmem:[%s7967_s12 + $0x1f4] ss:$8 sps:$4 sm:$0xff]  }
 0xdbb   : > { %v3774_v16 = vadd.f32 %v3758_v10, %v7609_v9  ;;  %v3776_v31 = vadd.f32 %v3760_v21, %v7611_v51  ;;  %v3766_v19 = vmul.f32 %v3750_v43, %v7625_v52  ;;  %v3768_v15 = vmul.f32 %v3752_v35, %v7627_v53  ;;  %4700 = vmatpush1.bf16.msra.mxu1 %v5866_v5 }
 0xdbc   : > { %v3767_v44 = vmul.f32 %v3751_v12, %v7631_v17  ;;  %v3769_v28 = vmul.f32 %v3753_v14, %v7633_v39  ;;  %4701 = vmatprep.subr.bf16.mxu1 %v5871_v34  ;;  %v3775_v27 = vadd.f32 %v3759_v11, %v7616_v6  ;;  %v3777_v42 = vadd.f32 %v3761_v25, %v7618_v26 }
 0xdbd   : > { %v3790_v60 = vmul.f32 0.7978846, %v3774_v16  ;;  %v3792_v18 = vmul.f32 0.7978846, %v3776_v31  ;;  %v3782_v37 = vadd.f32 %v3766_v19, %v7625_v52  ;;  %v3784_v36 = vadd.f32 %v3768_v15, %v7627_v53 }
 0xdbe   : > { %v3783_v47 = vadd.f32 %v3767_v44, %v7631_v17  ;;  %v3791_v40 = vmul.f32 0.7978846, %v3775_v27  ;;  %v3785_v32 = vadd.f32 %v3769_v28, %v7633_v39  ;;  %v3793_v50 = vmul.f32 0.7978846, %v3777_v42  ;;  %v5902_v42 = vld [vmem:[%s7967_s12 + $0x250] ss:$8 sps:$4 sm:$0xff]  }
 0xdbf   : > { %6071 = vtanh.f32 %v3790_v60  ;;  %v3798_v23 = vmul.f32 0.7978846, %v3782_v37  ;;  %v3800_v20 = vmul.f32 0.7978846, %v3784_v36  ;;  %4702 = vmatpush1.bf16.msra.mxu1 %v5869_v22  ;;  %v3710_v24 = vmul.f32 0.5, %v7609_v9 }
 0xdc0   : > { %6073 = vtanh.f32 %v3792_v18  ;;  %4703 = vmatprep.subr.bf16.mxu1 %v5874_v30  ;;  %v3799_v62 = vmul.f32 0.7978846, %v3783_v47  ;;  %v3801_v57 = vmul.f32 0.7978846, %v3785_v32  ;;  %v3718_v33 = vmul.f32 0.5, %v7625_v52 }
 0xdc1   : > { %6075 = vtanh.f32 %v3798_v23  ;;  %v3712_v21 = vmul.f32 0.5, %v7611_v51  ;;  %v3720_v43 = vmul.f32 0.5, %v7627_v53  ;;  %v3711_v12 = vmul.f32 0.5, %v7616_v6  ;;  %v5884_v9 = vld [vmem:[%s7967_s12 + $0x1f0] ss:$8 sps:$4 sm:$0xff]  }
 0xdc2   : > { %6077 = vtanh.f32 %v3800_v20  ;;  %v3719_v52 = vmul.f32 0.5, %v7631_v17  ;;  %v5889_v6 = vld [vmem:[%s7967_s12 + $0x204] ss:$8 sps:$4 sm:$0xff]   ;;  %v3713_v44 = vmul.f32 0.5, %v7618_v26  ;;  %v3721_v28 = vmul.f32 0.5, %v7633_v39 }
 0xdc3   : > { %4704 = vmatpush1.bf16.msra.mxu1 %v5872_v46  ;;  %6079 = vtanh.f32 %v3791_v40  ;;  %v5887_v36 = vld [vmem:[%s7967_s12 + $0x200] ss:$8 sps:$4 sm:$0xff]   ;;  %v5892_v26 = vld [vmem:[%s7967_s12 + $0x214] ss:$8 sps:$4 sm:$0xff]   ;;  %v5890_v20 = vld [vmem:[%s7967_s12 + $0x210] ss:$8 sps:$4 sm:$0xff]  }
 0xdc4   : > { %4705 = vmatprep.subr.bf16.mxu1 %v5877_v1  ;;  %6081 = vtanh.f32 %v3799_v62  ;;  %v5895_v46 = vld [vmem:[%s7967_s12 + $0x224] ss:$8 sps:$4 sm:$0xff]   ;;  %v5893_v1 = vld [vmem:[%s7967_s12 + $0x220] ss:$8 sps:$4 sm:$0xff]   ;;  %v5904_v62 = vld [vmem:[%s7967_s12 + $0x254] ss:$8 sps:$4 sm:$0xff]  }
 0xdc5   : > { %6083 = vtanh.f32 %v3793_v50  ;;  %v5899_v40 = vld [vmem:[%s7967_s12 + $0x240] ss:$8 sps:$4 sm:$0xff]   ;;  %v5907_v32 = vld [vmem:[%s7967_s12 + $0x264] ss:$8 sps:$4 sm:$0xff]   ;;  %v5910_v50 = vld [vmem:[%s7967_s12 + $0x274] ss:$8 sps:$4 sm:$0xff]  }
 0xdc6   : > { %6085 = vtanh.f32 %v3801_v57  ;;  %v5908_v57 = vld [vmem:[%s7967_s12 + $0x270] ss:$8 sps:$4 sm:$0xff]  }
 0xdc7   : > { %4706 = vmatpush1.bf16.msra.mxu1 %v5875_v49  ;;  %v5905_v49 = vld [vmem:[%s7967_s12 + $0x260] ss:$8 sps:$4 sm:$0xff]  }
 0xdc8   : > { %4707 = vmatprep.subr.bf16.mxu1 %v5880_v13  ;;  %v5913_v13 = vld [vmem:[%s7967_s12 + $0x284] ss:$8 sps:$4 sm:$0xff]  }
 0xdc9   : > { %v6072_v8 = vpop.eup %6071 }
 0xdca   : > { %v6074_v3 = vpop.eup %6073  ;;  %v3822_v58 = vadd.f32 1.0, %v6072_v8  ;;  %v5914_v8 = vld [vmem:[%s7967_s12 + $0x290] ss:$8 sps:$4 sm:$0xff]  }
 0xdcb   : > { %v6076_v48 = vpop.eup %6075  ;;  %4708 = vmatpush1.bf16.msra.mxu1 %v5878_v59  ;;  %v3824_v5 = vadd.f32 1.0, %v6074_v3  ;;  %v5911_v59 = vld [vmem:[%s7967_s12 + $0x280] ss:$8 sps:$4 sm:$0xff]   ;;  %v5919_v3 = vld [vmem:[%s7967_s12 + $0x2a4] ss:$8 sps:$4 sm:$0xff]  }
 0xdcc   : > { %v6078_v38 = vpop.eup %6077  ;;  %4709 = vmatprep.subr.bf16.mxu1 %v5883_v29  ;;  %v3830_v34 = vadd.f32 1.0, %v6076_v48  ;;  %v7704_v16 = vmul.f32 %v3822_v58, %v3710_v24  ;;  %v5916_v29 = vld [vmem:[%s7967_s12 + $0x294] ss:$8 sps:$4 sm:$0xff]   ;;  %v5917_v58 = vld [vmem:[%s7967_s12 + $0x2a0] ss:$8 sps:$4 sm:$0xff]  }
 0xdcd   : > { %v6080_v10 = vpop.eup %6079  ;;  %v3832_v35 = vadd.f32 1.0, %v6078_v38  ;;  %v7712_v15 = vmul.f32 %v3824_v5, %v3712_v21  ;;  %v5922_v48 = vld [vmem:[%s7967_s12 + $0x2b4] ss:$8 sps:$4 sm:$0xff]   ;;  %v5925_v5 = vld [vmem:[%s7967_s12 + $0x2c4] ss:$8 sps:$4 sm:$0xff]  }
 0xdce   : > { %v6082_v11 = vpop.eup %6081  ;;  %v3823_v14 = vadd.f32 1.0, %v6080_v10  ;;  %v7706_v31 = vmul.f32 %v3830_v34, %v3718_v33  ;;  %v5923_v38 = vld [vmem:[%s7967_s12 + $0x2c0] ss:$8 sps:$4 sm:$0xff]   ;;  %v5926_v24 = vld [vmem:[%s7967_s12 + $0x2d0] ss:$8 sps:$4 sm:$0xff]  }
 0xdcf   : > { %v6084_v19 = vpop.eup %6083  ;;  %4710 = vmatpush1.bf16.msra.mxu1 %v5881_v4  ;;  %v3831_v51 = vadd.f32 1.0, %v6082_v11  ;;  %v7714_v53 = vmul.f32 %v3832_v35, %v3720_v43  ;;  %v5920_v4 = vld [vmem:[%s7967_s12 + $0x2b0] ss:$8 sps:$4 sm:$0xff]   ;;  %v5931_v33 = vld [vmem:[%s7967_s12 + $0x2e4] ss:$8 sps:$4 sm:$0xff]  }
 0xdd0   : > { %v6086_v22 = vpop.eup %6085  ;;  %4711 = vmatprep.subr.bf16.mxu1 %v5886_v54  ;;  %v3854_v25 = vpack.c.bf16 %v7706_v31, %v7704_v16  ;;  %v3825_v30 = vadd.f32 1.0, %v6084_v19  ;;  %v3839_v17 = vmul.f32 %v3823_v14, %v3711_v12  ;;  %v5928_v54 = vld [vmem:[%s7967_s12 + $0x2d4] ss:$8 sps:$4 sm:$0xff]   ;;  %v5929_v34 = vld [vmem:[%s7967_s12 + $0x2e0] ss:$8 sps:$4 sm:$0xff]  }
 0xdd1   : > { %v3847_v60 = vmul.f32 %v3831_v51, %v3719_v52  ;;  %v3833_v18 = vadd.f32 1.0, %v6086_v22  ;;  %v3856_v37 = vpack.c.bf16 %v7714_v53, %v7712_v15  ;;  %v5934_v10 = vld [vmem:[%s7967_s12 + $0x2f4] ss:$8 sps:$4 sm:$0xff]   ;;  %v5932_v21 = vld [vmem:[%s7967_s12 + $0x2f0] ss:$8 sps:$4 sm:$0xff]  }
 0xdd2   : > { %v7728_v47 = vmul.f32 %v3825_v30, %v3713_v44  ;;  %v5937_v43 = vld [vmem:[%s7967_s12 + $0x304] ss:$8 sps:$4 sm:$0xff]   ;;  %v5935_v35 = vld [vmem:[%s7967_s12 + $0x300] ss:$8 sps:$4 sm:$0xff]   ;;  %v5940_v11 = vld [vmem:[%s7967_s12 + $0x314] ss:$8 sps:$4 sm:$0xff]  }
 0xdd3   : > { %4712 = vmatpush1.bf16.msra.mxu1 %v5884_v9  ;;  %v3855_v27 = vpack.c.bf16 %v3847_v60, %v3839_v17  ;;  %v7730_v23 = vmul.f32 %v3833_v18, %v3721_v28  ;;  %v5938_v12 = vld [vmem:[%s7967_s12 + $0x310] ss:$8 sps:$4 sm:$0xff]   ;;  %v5943_v14 = vld [vmem:[%s7967_s12 + $0x324] ss:$8 sps:$4 sm:$0xff]   ;;  %v5941_v16 = vld [vmem:[%s7967_s12 + $0x320] ss:$8 sps:$4 sm:$0xff]  }
 0xdd4   : > { %4724 = vmatprep.subr.bf16.mxu1 %v5889_v6  ;;  %v5946_v31 = vld [vmem:[%s7967_s12 + $0x334] ss:$8 sps:$4 sm:$0xff]   ;;  %v5944_v19 = vld [vmem:[%s7967_s12 + $0x330] ss:$8 sps:$4 sm:$0xff]   ;;  %v5949_v9 = vld [vmem:[%s7967_s12 + $0x344] ss:$8 sps:$4 sm:$0xff]  }
 0xdd5   : > { %v3857_v39 = vpack.c.bf16 %v7730_v23, %v7728_v47  ;;  %v5947_v52 = vld [vmem:[%s7967_s12 + $0x340] ss:$8 sps:$4 sm:$0xff]   ;;  %v5952_v51 = vld [vmem:[%s7967_s12 + $0x354] ss:$8 sps:$4 sm:$0xff]   ;;  %v5950_v22 = vld [vmem:[%s7967_s12 + $0x350] ss:$8 sps:$4 sm:$0xff]  }
 0xdd6   : > { %4714 = vmatmul.mubr.bf16.vlgmr.msra.gmra.mrb[40].mxu1 %v3852_v61  ;;  %v5901_v61 = vld [vmem:[%s7967_s12 + $0x244] ss:$8 sps:$4 sm:$0xff]   ;;  %v5958_v44 = vld [vmem:[%s7967_s12 + $0x374] ss:$8 sps:$4 sm:$0xff]   ;;  %v5956_v28 = vld [vmem:[%s7967_s12 + $0x370] ss:$8 sps:$4 sm:$0xff]  }
 0xdd7   : > { %4725 = vmatpush1.bf16.msra.mxu1 %v5887_v36  ;;  %4756 = vmatprep.mubr.bf16.mxu1 %v3855_v27  ;;  %v5955_v6 = vld [vmem:[%s7967_s12 + $0x364] ss:$8 sps:$4 sm:$0xff]   ;;  %v5959_v17 = vld [vmem:[%s7967_s12 + $0x380] ss:$8 sps:$4 sm:$0xff]   ;;  %v5964_v60 = vld [vmem:[%s7967_s12 + $0x394] ss:$8 sps:$4 sm:$0xff]  }
 0xdd8   : > { %4726 = vmatprep.subr.bf16.mxu1 %v5892_v26  ;;  %v5961_v30 = vld [vmem:[%s7967_s12 + $0x384] ss:$8 sps:$4 sm:$0xff]   ;;  %v5962_v18 = vld [vmem:[%s7967_s12 + $0x390] ss:$8 sps:$4 sm:$0xff]   ;;  %v5965_v27 = vld [vmem:[%s7967_s12 + $0x3a0] ss:$8 sps:$4 sm:$0xff]  }
 0xdd9   : > { %v5967_v36 = vld [vmem:[%s7967_s12 + $0x3a4] ss:$8 sps:$4 sm:$0xff]   ;;  %v5970_v47 = vld [vmem:[%s7967_s12 + $0x3b4] ss:$8 sps:$4 sm:$0xff]   ;;  %v5968_v23 = vld [vmem:[%s7967_s12 + $0x3b0] ss:$8 sps:$4 sm:$0xff]  }
 0xdda   : > { %v5973_v26 = vld [vmem:[%s7967_s12 + $0x3c4] ss:$8 sps:$4 sm:$0xff]  }
 0xddb   : > { %4727 = vmatpush1.bf16.msra.mxu1 %v5890_v20  ;;  %v5976_v20 = vld [vmem:[%s7967_s12 + $0x3d4] ss:$8 sps:$4 sm:$0xff]  }
 0xddc   : > { %4728 = vmatprep.subr.bf16.mxu1 %v5895_v46  ;;  %v5974_v46 = vld [vmem:[%s7967_s12 + $0x3d0] ss:$8 sps:$4 sm:$0xff]  }
 0xddf   : > { %4729 = vmatpush1.bf16.msra.mxu1 %v5893_v1  ;;  %v5979_v1 = vld [vmem:[%s7967_s12 + $0x3e4] ss:$8 sps:$4 sm:$0xff]  }
 0xde0   : > { %4730 = vmatprep.subr.bf16.mxu1 %v5898_v2  ;;  %v5977_v2 = vld [vmem:[%s7967_s12 + $0x3e0] ss:$8 sps:$4 sm:$0xff]  }
 0xde3   : > { %4731 = vmatpush1.bf16.msra.mxu1 %v5896_v55  ;;  %v5982_v55 = vld [vmem:[%s7967_s12 + $0x3f4] ss:$8 sps:$4 sm:$0xff]  }
 0xde4   : > { %4732 = vmatprep.subr.bf16.mxu1 %v5901_v61  ;;  %v5980_v61 = vld [vmem:[%s7967_s12 + $0x3f0] ss:$8 sps:$4 sm:$0xff]  }
 0xde7   : > { %4733 = vmatpush1.bf16.msra.mxu1 %v5899_v40  ;;  %v3986_v40 = vld [vmem:[%s7968_s13] sm:$0x3] }
 0xde8   : > { %4734 = vmatprep.subr.bf16.mxu1 %v5904_v62  ;;  %v3991_v62 = vrot.slane %v3986_v40, %v6338_v0 }
 0xdeb   : > { %4735 = vmatpush1.bf16.msra.mxu1 %v5902_v42  ;;  %v3995_v42 = vrot.slane %v3986_v40, %v6335_v63 }
 0xdec   : > { %4736 = vmatprep.subr.bf16.mxu1 %v5907_v32 }
 0xdef   : > { %4737 = vmatpush1.bf16.msra.mxu1 %v5905_v49 }
 0xdf0   : > { %4738 = vmatprep.subr.bf16.mxu1 %v5910_v50 }
 0xdf3   : > { %4739 = vmatpush1.bf16.msra.mxu1 %v5908_v57 }
 0xdf4   : > { %4740 = vmatprep.subr.bf16.mxu1 %v5913_v13 }
 0xdf7   : > { %4741 = vmatpush1.bf16.msra.mxu1 %v5911_v59 }
 0xdf8   : > { %4742 = vmatprep.subr.bf16.mxu1 %v5916_v29 }
 0xdfb   : > { %4743 = vmatpush1.bf16.msra.mxu1 %v5914_v8 }
 0xdfc   : > { %4744 = vmatprep.subr.bf16.mxu1 %v5919_v3 }
 0xdff   : > { %4745 = vmatpush1.bf16.msra.mxu1 %v5917_v58 }
 0xe00   : > { %4746 = vmatprep.subr.bf16.mxu1 %v5922_v48 }
 0xe03   : > { %4747 = vmatpush1.bf16.msra.mxu1 %v5920_v4 }
 0xe04   : > { %4748 = vmatprep.subr.bf16.mxu1 %v5925_v5 }
 0xe07   : > { %4749 = vmatpush1.bf16.msra.mxu1 %v5923_v38 }
 0xe08   : > { %4750 = vmatprep.subr.bf16.mxu1 %v5928_v54 }
 0xe0b   : > { %4751 = vmatpush1.bf16.msra.mxu1 %v5926_v24 }
 0xe0c   : > { %4752 = vmatprep.subr.bf16.mxu1 %v5931_v33 }
 0xe0f   : > { %4753 = vmatpush1.bf16.msra.mxu1 %v5929_v34 }
 0xe10   : > { %4754 = vmatprep.subr.bf16.mxu1 %v5934_v10 }
 0xe13   : > { %4755 = vmatpush1.bf16.msra.mxu1 %v5932_v21 }
 0xe14   : > { %4767 = vmatprep.subr.bf16.mxu1 %v5937_v43 }
 0xe16   : > { %4757 = vmatmul.mubr.bf16.vlgmr.msra.gmra.mrb[40].mxu1 %v3854_v25  ;;  %v5953_v25 = vld [vmem:[%s7967_s12 + $0x360] ss:$8 sps:$4 sm:$0xff]  }
 0xe17   : > { %4768 = vmatpush1.bf16.msra.mxu1 %v5935_v35  ;;  %4799 = vmatprep.mubr.bf16.mxu1 %v3857_v39  ;;  %v5971_v39 = vld [vmem:[%s7967_s12 + $0x3c0] ss:$8 sps:$4 sm:$0xff]  }
 0xe18   : > { %4769 = vmatprep.subr.bf16.mxu1 %v5940_v11 }
 0xe1b   : > { %4770 = vmatpush1.bf16.msra.mxu1 %v5938_v12 }
 0xe1c   : > { %4771 = vmatprep.subr.bf16.mxu1 %v5943_v14 }
 0xe1f   : > { %4772 = vmatpush1.bf16.msra.mxu1 %v5941_v16 }
 0xe20   : > { %4773 = vmatprep.subr.bf16.mxu1 %v5946_v31 }
 0xe23   : > { %4774 = vmatpush1.bf16.msra.mxu1 %v5944_v19 }
 0xe24   : > { %4775 = vmatprep.subr.bf16.mxu1 %v5949_v9 }
 0xe27   : > { %4776 = vmatpush1.bf16.msra.mxu1 %v5947_v52 }
 0xe28   : > { %4777 = vmatprep.subr.bf16.mxu1 %v5952_v51 }
 0xe2b   : > { %4778 = vmatpush1.bf16.msra.mxu1 %v5950_v22 }
 0xe2c   : > { %4779 = vmatprep.subr.bf16.mxu1 %v5955_v6 }
 0xe2f   : > { %4780 = vmatpush1.bf16.msra.mxu1 %v5953_v25 }
 0xe30   : > { %4781 = vmatprep.subr.bf16.mxu1 %v5958_v44 }
 0xe33   : > { %4782 = vmatpush1.bf16.msra.mxu1 %v5956_v28 }
 0xe34   : > { %4783 = vmatprep.subr.bf16.mxu1 %v5961_v30 }
 0xe37   : > { %4784 = vmatpush1.bf16.msra.mxu1 %v5959_v17 }
 0xe38   : > { %4785 = vmatprep.subr.bf16.mxu1 %v5964_v60 }
 0xe3b   : > { %4786 = vmatpush1.bf16.msra.mxu1 %v5962_v18 }
 0xe3c   : > { %4787 = vmatprep.subr.bf16.mxu1 %v5967_v36 }
 0xe3f   : > { %4788 = vmatpush1.bf16.msra.mxu1 %v5965_v27 }
 0xe40   : > { %4789 = vmatprep.subr.bf16.mxu1 %v5970_v47 }
 0xe43   : > { %4790 = vmatpush1.bf16.msra.mxu1 %v5968_v23 }
 0xe44   : > { %4791 = vmatprep.subr.bf16.mxu1 %v5973_v26 }
 0xe47   : > { %4792 = vmatpush1.bf16.msra.mxu1 %v5971_v39 }
 0xe48   : > { %4793 = vmatprep.subr.bf16.mxu1 %v5976_v20 }
 0xe4b   : > { %4794 = vmatpush1.bf16.msra.mxu1 %v5974_v46 }
 0xe4c   : > { %4795 = vmatprep.subr.bf16.mxu1 %v5979_v1 }
 0xe4f   : > { %4796 = vmatpush1.bf16.msra.mxu1 %v5977_v2 }
 0xe50   : > { %4797 = vmatprep.subr.bf16.mxu1 %v5982_v55 }
 0xe53   : > { %4798 = vmatpush1.bf16.msra.mxu1 %v5980_v61 }
 0xe56   : > { %4800 = vmatmul.mubr.bf16.vlgmr.msra.gmra.mrb[40].mxu1 %v3856_v37 }
 0xf29   : > { %v4801_v32 = vpop.f32.mrb[40].mxu1 }
 0xf2a   : > { %v5524_v49 = vadd.f32 %v4801_v32, %v3991_v62  ;;  %v4803_v50 = vpop.f32.mrb[41].mxu1 }
 0xf2b   : > { %v5525_v57 = vadd.f32 %v4803_v50, %v3995_v42  ;;  %v4805_v13 = vpop.f32.mrb[42].mxu1 }
 0xf2c   : > { %v4810_v59 = vadd.f32 %v5524_v49, %v6950_v56  ;;  %v5526_v29 = vadd.f32 %v4805_v13, %v3991_v62  ;;  %v4807_v8 = vpop.f32.mrb[43].mxu1 }
 0xf2d   : > { %v4811_v15 = vadd.f32 %v5525_v57, %v6953_v7  ;;  %v5527_v53 = vadd.f32 %v4807_v8, %v3995_v42 }
 0xf2e   : > { %v4812_v0 = vadd.f32 %v5526_v29, %v6956_v41 }
 0xf2f   : > { %v5355_v63 = vpack.c.bf16 %v4811_v15, %v4810_v59  ;;  %v4813_v37 = vadd.f32 %v5527_v53, %v6959_v45 }
 0xf31   : > { %4826 = vst [vmem:[%s530_s25] sm:$0xff] %v5355_v63  ;;  %v5356_v3 = vpack.c.bf16 %v4813_v37, %v4812_v0 }
 0xf33   : > { %4827 = vst [vmem:[%s530_s25 + $0x8] sm:$0xff] %v5356_v3 }
 0xf34 PF: > { %s24_s15 = sadd.s32 1, %s6109_s15   ;;  %s7974_s29 = smov %s6105_s30 }
 0xf35   : > { %p21_p5 = scmp.ge.s32.totalorder %s24_s15, 4   ;;  %s7975_s30 = smov %s7977_s16 }
 0xf37   :  { %23 = sbr.rel (!%p21_p5) target bundleno = 2 (0x2), region = 109 }

</bundles_post_ra>
